<compile_context>
chip_gen: v6e
topology: v6e:2x2x1
jax: 0.10.0
libtpu: 0.0.40
codegen_flags: <defaults>
</compile_context>

<pallas_src>
import functools

import numpy as np
import jax
import jax.numpy as jnp
from jax import lax
from jax.experimental import pallas as pl
from jax.experimental.pallas import tpu as pltpu


N_GRID = 256            # wn_iso is 256 x 256
N_KNOTS = 128           # spline knot count (== MLP output size)
HIDDEN = 100            # MLP hidden width
PAD = 128               # padded feature width used inside the MLP kernel
ROWS_PER_TILE = 32      # wn_iso rows processed per grid step in the spline kernel
TILE_PTS = ROWS_PER_TILE * N_GRID       # 8192 points per grid step (lane-dense)
N_PTS = N_GRID * N_GRID                 # 65536
LOG_NORM = float(np.log(12661.0))       # exp(val)/12661 == exp(val - log(12661))


# ---------------------------------------------------------------------------
# Constant buffers (identical to the numpy code in CMBPS.__init__)
# ---------------------------------------------------------------------------
def _build_wn_iso_and_knots():
    wn = (256 * np.fft.fftfreq(256, d=1.0)).reshape((256,) + (1,) * (2 - 1))
    wn_iso = np.zeros((256, 256))
    for i in range(2):
        wn_iso += np.moveaxis(wn, 0, i) ** 2
    wn_iso = np.sqrt(wn_iso)
    indices = np.fft.fftshift(wn_iso).diagonal()[128:]
    return wn_iso.astype(np.float32), indices.astype(np.float32)


_WN_ISO_NP, _KNOTS_NP = _build_wn_iso_and_knots()


def _build_idx_frac():
    # torch.bucketize(t, knots, right=False) == searchsorted(knots, t, 'left');
    # minus 1, clamped to [0, N_KNOTS-2].  idx/frac depend only on constants.
    t = _WN_ISO_NP.reshape(-1)                                  # (65536,) f32
    knots = _KNOTS_NP                                           # (128,)   f32
    idx = np.searchsorted(knots, t, side="left") - 1
    idx = np.clip(idx, 0, N_KNOTS - 2).astype(np.int32)
    frac = (t - knots[idx]).astype(np.float32)
    return idx.reshape(1, N_PTS), frac.reshape(1, N_PTS)


_IDX_FLAT_NP, _FRAC_FLAT_NP = _build_idx_frac()


def _build_spline_operator():
    """Dense linear operator: values (B,128) @ op (128, 4*128) ->
    [a | b | 0.5*two_c | three_d/3], each padded from 127 to 128 knots
    (row 127 is never selected: idx <= 126).  Ports torchcubicspline's
    natural_cubic_spline_coeffs tridiagonal solve as a precomputed matrix."""
    k = _KNOTS_NP.astype(np.float64)
    L = k.shape[0]
    dt = k[1:] - k[:-1]
    dt_r = 1.0 / dt
    dt_r2 = dt_r ** 2
    r = np.arange(L - 1)

    # pds[i] = 3 * dt_r2[i] * (x[i+1] - x[i])
    P = np.zeros((L - 1, L))
    P[r, r] = -3.0 * dt_r2
    P[r, r + 1] = 3.0 * dt_r2

    # rhs[:-1] = pds ; rhs[-1] = 0 ; rhs[1:] += pds
    R = np.zeros((L, L - 1))
    R[r, r] += 1.0
    R[r + 1, r] += 1.0
    RHS = R @ P                                             # (L, L)

    # symmetric tridiagonal system
    diag = np.zeros(L)
    diag[:-1] = dt_r
    diag[1:] += dt_r
    diag *= 2.0
    T = np.diag(diag)
    T[r, r + 1] = dt_r
    T[r + 1, r] = dt_r
    KD = np.linalg.solve(T, RHS)                            # kd = KD @ x

    Dx = np.zeros((L - 1, L))                               # x[i+1] - x[i]
    Dx[r, r] = -1.0
    Dx[r, r + 1] = 1.0

    A = np.zeros((L - 1, L))
    A[r, r] = 1.0                                           # a = x[:-1]
    Bm = KD[:-1, :]                                         # b = kd[:-1]
    six_dxr = 6.0 * (dt_r[:, None] * Dx)
    C2 = dt_r[:, None] * (six_dxr - 4.0 * KD[:-1, :] - 2.0 * KD[1:, :])
    D3 = dt_r2[:, None] * (-six_dxr + 3.0 * (KD[:-1, :] + KD[1:, :]))

    C2 *= 0.5                                               # fold Horner constants
    D3 /= 3.0

    def pad_t(M):                                           # (127,128)->(128,128)->T
        return np.concatenate([M, np.zeros((1, L))], axis=0).T

    op = np.concatenate([pad_t(A), pad_t(Bm), pad_t(C2), pad_t(D3)], axis=1)
    return op.astype(np.float32)                            # (128, 512)


_SPLINE_OP_NP = _build_spline_operator()


# ---------------------------------------------------------------------------
# Kernel 1: emulator MLP + spline-coefficient operator (all MXU matmuls)
# ---------------------------------------------------------------------------
def _mlp_coef_kernel(phi_ref, const_ref, w1_ref, b1_ref, w2_ref, b2_ref,
                     w3_ref, b3_ref, w4_ref, b4_ref, sop_ref, out_ref):
    nb = phi_ref.shape[0]                    # padded batch
    c = const_ref[...]                       # (4, PAD): rows = dphi, min_phi, mu, sd
    x = phi_ref[...]                         # (Bp, PAD) (cols >= 2 are zero)
    x = x * c[0:1, :] + c[1:2, :]            # undo phi normalisation (norm_phi)
    x = (x - c[2:3, :]) / c[3:4, :]          # standardise for the emulator MLP
    h = jnp.dot(x, w1_ref[...], preferred_element_type=jnp.float32) + b1_ref[...]
    h = jnp.maximum(h, 0.0)
    h = jnp.dot(h, w2_ref[...], preferred_element_type=jnp.float32) + b2_ref[...]
    h = jnp.maximum(h, 0.0)
    h = jnp.dot(h, w3_ref[...], preferred_element_type=jnp.float32) + b3_ref[...]
    h = jnp.maximum(h, 0.0)
    h = jnp.dot(h, w4_ref[...], preferred_element_type=jnp.float32) + b4_ref[...]

    # One dense matmul replaces the 127-step tridiagonal spline solve:
    g = jnp.dot(h, sop_ref[...], preferred_element_type=jnp.float32)   # (Bp, 512)
    out_ref[0 * nb:1 * nb, :] = g[:, 0 * N_KNOTS:1 * N_KNOTS] - jnp.float32(LOG_NORM)
    out_ref[1 * nb:2 * nb, :] = g[:, 1 * N_KNOTS:2 * N_KNOTS]
    out_ref[2 * nb:3 * nb, :] = g[:, 2 * N_KNOTS:3 * N_KNOTS]
    out_ref[3 * nb:4 * nb, :] = g[:, 3 * N_KNOTS:4 * N_KNOTS]


def _mlp_coef_pallas(phi_pad, consts_pad, padded_params, sop, nbp):
    operands = [phi_pad, consts_pad] + list(padded_params) + [sop]

    def full_spec(arr):
        nd = arr.ndim
        return pl.BlockSpec(arr.shape, lambda i, _nd=nd: (0,) * _nd)

    return pl.pallas_call(
        _mlp_coef_kernel,
        out_shape=jax.ShapeDtypeStruct((4 * nbp, N_KNOTS), jnp.float32),
        grid=(1,),
        in_specs=[full_spec(a) for a in operands],
        out_specs=pl.BlockSpec((4 * nbp, N_KNOTS), lambda i: (0, 0)),
        compiler_params=pltpu.CompilerParams(dimension_semantics=("arbitrary",)),
    )(*operands)


# ---------------------------------------------------------------------------
# Kernel 2: natural-cubic-spline evaluation on the (flattened) wn_iso map.
# One fused one-hot gather matmul + Horner polynomial + exp, all lane-dense.
# ---------------------------------------------------------------------------
def _spline_eval_kernel(idx_ref, frac_ref, coef_ref, o_ref):
    nb = o_ref.shape[0]                                   # padded batch
    idx = idx_ref[...]                                    # (1, P) int32
    frac = frac_ref[...]                                  # (1, P) f32
    p = idx.shape[1]

    # One-hot selection matrix: knots on the sublane axis, points lane-dense.
    iota = lax.broadcasted_iota(jnp.int32, (N_KNOTS, p), 0)
    onehot = (iota == idx).astype(jnp.float32)            # (128, P)

    # Single fused gather of the 4 stacked coefficient rows per batch element:
    # coef = [a; b; half_c; third_d] each (nb, 128) -> (4*nb, 128).
    g = jnp.dot(coef_ref[...], onehot, preferred_element_type=jnp.float32)

    a = g[0 * nb:1 * nb, :]
    b = g[1 * nb:2 * nb, :]
    c = g[2 * nb:3 * nb, :]
    d = g[3 * nb:4 * nb, :]

    # a already has -log(12661) folded in; c = two_c/2; d = three_d/3.
    o_ref[...] = jnp.exp(a + frac * (b + frac * (c + frac * d)))


def _spline_eval_pallas(idx_flat, frac_flat, coef, nbp):
    grid_n = N_PTS // TILE_PTS
    return pl.pallas_call(
        _spline_eval_kernel,
        out_shape=jax.ShapeDtypeStruct((nbp, N_PTS), jnp.float32),
        grid=(grid_n,),
        in_specs=[
            pl.BlockSpec((1, TILE_PTS), lambda i: (0, i)),        # idx
            pl.BlockSpec((1, TILE_PTS), lambda i: (0, i)),        # frac
            pl.BlockSpec((4 * nbp, N_KNOTS), lambda i: (0, 0)),   # stacked coeffs
        ],
        out_specs=pl.BlockSpec((nbp, TILE_PTS), lambda i: (0, i)),
        compiler_params=pltpu.CompilerParams(
            dimension_semantics=("parallel",),
            vmem_limit_bytes=32 * 1024 * 1024,
        ),
    )(idx_flat, frac_flat, coef)


# ---------------------------------------------------------------------------
# Reference-only: natural cubic spline coefficients (port of torchcubicspline)
# Used to cross-check the precomputed dense spline operator.
# ---------------------------------------------------------------------------
def _natural_cubic_spline_coeffs(knots, values):
    """knots: (L,) f32, values: (L, B) f32 -> a, b, two_c, three_d, each (L-1, B)."""
    length = knots.shape[0]
    x = values.T                                    # (B, L), channels first
    dt = knots[1:] - knots[:-1]
    dt_r = 1.0 / dt
    dt_r2 = dt_r * dt_r
    three_pd = 3.0 * (x[:, 1:] - x[:, :-1])
    six_pd = 2.0 * three_pd
    pds = three_pd * dt_r2

    diag = jnp.zeros((length,), jnp.float32)
    diag = (diag.at[:-1].set(dt_r).at[1:].add(dt_r)) * 2.0
    rhs = jnp.zeros_like(x)
    rhs = rhs.at[:, :-1].set(pds).at[:, 1:].add(pds)

    def fwd(carry, inp):
        nb_prev, nd_prev = carry
        low_prev, up_prev, diag_i, b_i = inp
        w = low_prev / nd_prev
        nd_i = diag_i - w * up_prev
        nb_i = b_i - w * nb_prev
        return (nb_i, nd_i), (nb_i, nd_i)

    (_, _), (nb_rest, nd_rest) = lax.scan(
        fwd, (rhs[:, 0], diag[0]), (dt_r, dt_r, diag[1:], rhs[:, 1:].T))
    new_b = jnp.concatenate([rhs[:, 0:1].T, nb_rest], axis=0)    # (L, B)
    new_d = jnp.concatenate([diag[0:1], nd_rest], axis=0)        # (L,)

    def bwd(carry, inp):
        out_next = carry
        nb_i, nd_i, up_i = inp
        out_i = (nb_i - up_i * out_next) / nd_i
        return out_i, out_i

    out_last = new_b[-1] / new_d[-1]                              # (B,)
    _, outs = lax.scan(bwd, out_last, (new_b[:-1], new_d[:-1], dt_r),
                       reverse=True)
    kd = jnp.concatenate([outs, out_last[None, :]], axis=0)       # (L, B)

    dt_r_c = dt_r[:, None]
    dt_r2_c = dt_r2[:, None]
    six_pd_t = six_pd.T                                           # (L-1, B)
    a_c = values[:-1, :]
    b_c = kd[:-1, :]
    two_c = (six_pd_t * dt_r_c - 4.0 * kd[:-1, :] - 2.0 * kd[1:, :]) * dt_r_c
    three_d = (-six_pd_t * dt_r_c + 3.0 * (kd[:-1, :] + kd[1:, :])) * dt_r2_c
    return a_c, b_c, two_c, three_d


# ---------------------------------------------------------------------------
# Parameters (deterministic stand-in for the 'Emulator_H0_ombh2_1' checkpoint)
# TODO(synk): real checkpoint weights are not loadable here; random init instead.
# ---------------------------------------------------------------------------
def init_mlp_params(key):
    shapes = [(2, HIDDEN), (HIDDEN, HIDDEN), (HIDDEN, HIDDEN), (HIDDEN, N_KNOTS)]
    params = []
    for fan_in, fan_out in shapes:
        key, kw, kb = jax.random.split(key, 3)
        bound = 1.0 / np.sqrt(fan_in)
        w = jax.random.uniform(kw, (fan_in, fan_out), jnp.float32, -bound, bound)
        b = jax.random.uniform(kb, (fan_out,), jnp.float32, -bound, bound)
        params.append((w, b))
    return params


def _pad_params(params):
    padded = []
    for w, b in params:
        fan_in, fan_out = w.shape
        wp = jnp.zeros((PAD, PAD), jnp.float32).at[:fan_in, :fan_out].set(w)
        bp = jnp.zeros((1, PAD), jnp.float32).at[0, :fan_out].set(b)
        padded += [wp, bp]
    return padded


def _make_consts(norm_phi):
    if norm_phi:
        row0, row1 = [40.0, 0.0492], [50.0, 0.0075]     # dphi, min_phi
    else:
        row0, row1 = [1.0, 1.0], [0.0, 0.0]
    real = np.array([row0, row1, [70.0, 0.032], [20.0, 0.025]], np.float32)
    pad_col = np.array([0.0, 0.0, 0.0, 1.0], np.float32)[:, None]
    consts = np.tile(pad_col, (1, PAD))
    consts[:, :2] = real
    return jnp.asarray(consts)


# ---------------------------------------------------------------------------
# Full CMBPS forward
# ---------------------------------------------------------------------------
@functools.partial(jax.jit, static_argnames=("norm_phi",))
def cmbps_forward(phi, params, norm_phi=True):
    if phi.ndim == 1:
        phi = phi[None, :]
    phi = phi.astype(jnp.float32)
    b = phi.shape[0]
    nbp = ((b + 7) // 8) * 8                    # pad batch to a sublane multiple
    if nbp > b:
        phi_ext = jnp.concatenate(
            [phi, jnp.broadcast_to(phi[:1], (nbp - b, phi.shape[1]))], axis=0)
    else:
        phi_ext = phi

    phi_pad = jnp.zeros((nbp, PAD), jnp.float32).at[:, :2].set(phi_ext)
    consts = _make_consts(norm_phi)
    padded = _pad_params(params)
    sop = jnp.asarray(_SPLINE_OP_NP)                              # (128, 512)

    # Kernel 1: MLP + dense spline-coefficient operator -> (4*Bp, 128)
    coef = _mlp_coef_pallas(phi_pad, consts, padded, sop, nbp)

    # Kernel 2: spline evaluation over the flattened wn_iso map.
    idx_flat = jnp.asarray(_IDX_FLAT_NP)                          # (1, 65536) i32
    frac_flat = jnp.asarray(_FRAC_FLAT_NP)                        # (1, 65536) f32
    ps_flat = _spline_eval_pallas(idx_flat, frac_flat, coef, nbp)  # (Bp, 65536)
    return ps_flat.reshape(nbp, N_GRID, N_GRID)[:b]               # (B, 256, 256)


# Pure-JAX reference (same semantics as the PyTorch module, fp32)
def cmbps_reference(phi, params, norm_phi=True):
    if phi.ndim == 1:
        phi = phi[None, :]
    x = phi.astype(jnp.float32)
    if norm_phi:
        x = x * jnp.array([40.0, 0.0492], jnp.float32) + jnp.array([50.0, 0.0075], jnp.float32)
    x = (x - jnp.array([70.0, 0.032], jnp.float32)) / jnp.array([20.0, 0.025], jnp.float32)
    h = x
    for i, (w, b) in enumerate(params):
        h = h @ w + b
        if i < len(params) - 1:
            h = jnp.maximum(h, 0.0)
    values = jnp.moveaxis(h, -1, 0)                               # (128, B)
    knots = jnp.asarray(_KNOTS_NP)
    a_c, b_c, c_c, d_c = _natural_cubic_spline_coeffs(knots, values)
    t = jnp.asarray(_WN_ISO_NP).reshape(-1)
    idx = jnp.clip(jnp.searchsorted(knots, t, side="left") - 1, 0, N_KNOTS - 2)
    frac = (t - knots[idx])[:, None]
    inner = 0.5 * c_c[idx] + d_c[idx] * frac / 3.0
    inner = b_c[idx] + inner * frac
    val = a_c[idx] + inner * frac
    ps = (jnp.exp(val) / 12661.0).reshape(N_GRID, N_GRID, -1)
    return jnp.moveaxis(ps, -1, 0)


if __name__ == "__main__":
    key = jax.random.PRNGKey(0)
    k_params, k_phi = jax.random.split(key)
    params = init_mlp_params(k_params)

    B = 4
    # phi in "normalised" units (norm_phi=True), roughly in [0, 1]
    phi = jax.random.uniform(k_phi, (B, 2), jnp.float32)

    out = cmbps_forward(phi, params, norm_phi=True)
    out = jax.block_until_ready(out)
    assert out.shape == (B, N_GRID, N_GRID), out.shape
    assert out.dtype == jnp.float32

    ref = cmbps_reference(phi, params, norm_phi=True)
    np.testing.assert_allclose(np.asarray(out), np.asarray(ref), rtol=5e-3, atol=1e-9)

    print("KERNEL_OK")
</pallas_src>

<mosaic_0001>
module attributes {stable_mosaic.version = 11 : i64} {
  func.func @_mlp_coef_kernel(%arg0: i32, %arg1: memref<8x128xf32, #tpu.memory_space<vmem>>, %arg2: memref<4x128xf32, #tpu.memory_space<vmem>>, %arg3: memref<128x128xf32, #tpu.memory_space<vmem>>, %arg4: memref<1x128xf32, #tpu.memory_space<vmem>>, %arg5: memref<128x128xf32, #tpu.memory_space<vmem>>, %arg6: memref<1x128xf32, #tpu.memory_space<vmem>>, %arg7: memref<128x128xf32, #tpu.memory_space<vmem>>, %arg8: memref<1x128xf32, #tpu.memory_space<vmem>>, %arg9: memref<128x128xf32, #tpu.memory_space<vmem>>, %arg10: memref<1x128xf32, #tpu.memory_space<vmem>>, %arg11: memref<128x512xf32, #tpu.memory_space<vmem>>, %arg12: memref<32x128xf32, #tpu.memory_space<vmem>>) attributes {dimension_semantics = [#tpu.dimension_semantics<arbitrary>], iteration_bounds = array<i64: 1>, scalar_prefetch = 0 : i64, scratch_operands = 0 : i64, tpu.core_type = #tpu.core_type<tc>, window_params = [{pipeline_mode = #tpu.pipeline_mode<synchronous>, transform_indices = @transform_0, window_bounds = array<i64: 8, 128>}, {pipeline_mode = #tpu.pipeline_mode<synchronous>, transform_indices = @transform_1, window_bounds = array<i64: 4, 128>}, {pipeline_mode = #tpu.pipeline_mode<synchronous>, transform_indices = @transform_2, window_bounds = array<i64: 128, 128>}, {pipeline_mode = #tpu.pipeline_mode<synchronous>, transform_indices = @transform_3, window_bounds = array<i64: 1, 128>}, {pipeline_mode = #tpu.pipeline_mode<synchronous>, transform_indices = @transform_4, window_bounds = array<i64: 128, 128>}, {pipeline_mode = #tpu.pipeline_mode<synchronous>, transform_indices = @transform_5, window_bounds = array<i64: 1, 128>}, {pipeline_mode = #tpu.pipeline_mode<synchronous>, transform_indices = @transform_6, window_bounds = array<i64: 128, 128>}, {pipeline_mode = #tpu.pipeline_mode<synchronous>, transform_indices = @transform_7, window_bounds = array<i64: 1, 128>}, {pipeline_mode = #tpu.pipeline_mode<synchronous>, transform_indices = @transform_8, window_bounds = array<i64: 128, 128>}, {pipeline_mode = #tpu.pipeline_mode<synchronous>, transform_indices = @transform_9, window_bounds = array<i64: 1, 128>}, {pipeline_mode = #tpu.pipeline_mode<synchronous>, transform_indices = @transform_10, window_bounds = array<i64: 128, 512>}, {pipeline_mode = #tpu.pipeline_mode<synchronous>, transform_indices = @transform_11, window_bounds = array<i64: 32, 128>}]} {
    %c0 = arith.constant 0 : index
    %c0_0 = arith.constant 0 : index
    %0 = vector.load %arg2[%c0, %c0_0] : memref<4x128xf32, #tpu.memory_space<vmem>>, vector<4x128xf32>
    %c0_1 = arith.constant 0 : index
    %c0_2 = arith.constant 0 : index
    %1 = vector.load %arg1[%c0_1, %c0_2] : memref<8x128xf32, #tpu.memory_space<vmem>>, vector<8x128xf32>
    %2 = vector.extract_strided_slice %0 {offsets = [0, 0], sizes = [1, 128], strides = [1, 1]} : vector<4x128xf32> to vector<1x128xf32>
    %3 = vector.broadcast %2 : vector<1x128xf32> to vector<8x128xf32>
    %4 = arith.mulf %1, %3 : vector<8x128xf32>
    %5 = vector.extract_strided_slice %0 {offsets = [1, 0], sizes = [1, 128], strides = [1, 1]} : vector<4x128xf32> to vector<1x128xf32>
    %6 = vector.broadcast %5 : vector<1x128xf32> to vector<8x128xf32>
    %7 = arith.addf %4, %6 : vector<8x128xf32>
    %8 = vector.extract_strided_slice %0 {offsets = [2, 0], sizes = [1, 128], strides = [1, 1]} : vector<4x128xf32> to vector<1x128xf32>
    %9 = vector.broadcast %8 : vector<1x128xf32> to vector<8x128xf32>
    %10 = arith.subf %7, %9 : vector<8x128xf32>
    %11 = vector.extract_strided_slice %0 {offsets = [3, 0], sizes = [1, 128], strides = [1, 1]} : vector<4x128xf32> to vector<1x128xf32>
    %12 = vector.broadcast %11 : vector<1x128xf32> to vector<8x128xf32>
    %13 = arith.divf %10, %12 : vector<8x128xf32>
    %c0_3 = arith.constant 0 : index
    %c0_4 = arith.constant 0 : index
    %14 = vector.load %arg3[%c0_3, %c0_4] : memref<128x128xf32, #tpu.memory_space<vmem>>, vector<128x128xf32>
    %cst = arith.constant dense<0.000000e+00> : vector<8x128xf32>
    %15 = tpu.matmul %13, %14, %cst {dimension_numbers = #tpu.dot_dimension_numbers<[1], [0], [0], [1], [0, 0, 1, 1], [], []>} : vector<8x128xf32>, vector<128x128xf32>, vector<8x128xf32> -> vector<8x128xf32>
    %c0_5 = arith.constant 0 : index
    %c0_6 = arith.constant 0 : index
    %16 = vector.load %arg4[%c0_5, %c0_6] : memref<1x128xf32, #tpu.memory_space<vmem>>, vector<1x128xf32>
    %17 = vector.broadcast %16 : vector<1x128xf32> to vector<8x128xf32>
    %18 = arith.addf %15, %17 : vector<8x128xf32>
    %cst_7 = arith.constant 0.000000e+00 : f32
    %19 = vector.broadcast %cst_7 : f32 to vector<8x128xf32>
    %20 = arith.maximumf %18, %19 : vector<8x128xf32>
    %c0_8 = arith.constant 0 : index
    %c0_9 = arith.constant 0 : index
    %21 = vector.load %arg5[%c0_8, %c0_9] : memref<128x128xf32, #tpu.memory_space<vmem>>, vector<128x128xf32>
    %cst_10 = arith.constant dense<0.000000e+00> : vector<8x128xf32>
    %22 = tpu.matmul %20, %21, %cst_10 {dimension_numbers = #tpu.dot_dimension_numbers<[1], [0], [0], [1], [0, 0, 1, 1], [], []>} : vector<8x128xf32>, vector<128x128xf32>, vector<8x128xf32> -> vector<8x128xf32>
    %c0_11 = arith.constant 0 : index
    %c0_12 = arith.constant 0 : index
    %23 = vector.load %arg6[%c0_11, %c0_12] : memref<1x128xf32, #tpu.memory_space<vmem>>, vector<1x128xf32>
    %24 = vector.broadcast %23 : vector<1x128xf32> to vector<8x128xf32>
    %25 = arith.addf %22, %24 : vector<8x128xf32>
    %cst_13 = arith.constant 0.000000e+00 : f32
    %26 = vector.broadcast %cst_13 : f32 to vector<8x128xf32>
    %27 = arith.maximumf %25, %26 : vector<8x128xf32>
    %c0_14 = arith.constant 0 : index
    %c0_15 = arith.constant 0 : index
    %28 = vector.load %arg7[%c0_14, %c0_15] : memref<128x128xf32, #tpu.memory_space<vmem>>, vector<128x128xf32>
    %cst_16 = arith.constant dense<0.000000e+00> : vector<8x128xf32>
    %29 = tpu.matmul %27, %28, %cst_16 {dimension_numbers = #tpu.dot_dimension_numbers<[1], [0], [0], [1], [0, 0, 1, 1], [], []>} : vector<8x128xf32>, vector<128x128xf32>, vector<8x128xf32> -> vector<8x128xf32>
    %c0_17 = arith.constant 0 : index
    %c0_18 = arith.constant 0 : index
    %30 = vector.load %arg8[%c0_17, %c0_18] : memref<1x128xf32, #tpu.memory_space<vmem>>, vector<1x128xf32>
    %31 = vector.broadcast %30 : vector<1x128xf32> to vector<8x128xf32>
    %32 = arith.addf %29, %31 : vector<8x128xf32>
    %cst_19 = arith.constant 0.000000e+00 : f32
    %33 = vector.broadcast %cst_19 : f32 to vector<8x128xf32>
    %34 = arith.maximumf %32, %33 : vector<8x128xf32>
    %c0_20 = arith.constant 0 : index
    %c0_21 = arith.constant 0 : index
    %35 = vector.load %arg9[%c0_20, %c0_21] : memref<128x128xf32, #tpu.memory_space<vmem>>, vector<128x128xf32>
    %cst_22 = arith.constant dense<0.000000e+00> : vector<8x128xf32>
    %36 = tpu.matmul %34, %35, %cst_22 {dimension_numbers = #tpu.dot_dimension_numbers<[1], [0], [0], [1], [0, 0, 1, 1], [], []>} : vector<8x128xf32>, vector<128x128xf32>, vector<8x128xf32> -> vector<8x128xf32>
    %c0_23 = arith.constant 0 : index
    %c0_24 = arith.constant 0 : index
    %37 = vector.load %arg10[%c0_23, %c0_24] : memref<1x128xf32, #tpu.memory_space<vmem>>, vector<1x128xf32>
    %38 = vector.broadcast %37 : vector<1x128xf32> to vector<8x128xf32>
    %39 = arith.addf %36, %38 : vector<8x128xf32>
    %c0_25 = arith.constant 0 : index
    %c0_26 = arith.constant 0 : index
    %40 = vector.load %arg11[%c0_25, %c0_26] : memref<128x512xf32, #tpu.memory_space<vmem>>, vector<128x512xf32>
    %cst_27 = arith.constant dense<0.000000e+00> : vector<8x512xf32>
    %41 = tpu.matmul %39, %40, %cst_27 {dimension_numbers = #tpu.dot_dimension_numbers<[1], [0], [0], [1], [0, 0, 1, 1], [], []>} : vector<8x128xf32>, vector<128x512xf32>, vector<8x512xf32> -> vector<8x512xf32>
    %42 = vector.extract_strided_slice %41 {offsets = [0, 0], sizes = [8, 128], strides = [1, 1]} : vector<8x512xf32> to vector<8x128xf32>
    %cst_28 = arith.constant 9.44628143 : f32
    %43 = vector.broadcast %cst_28 : f32 to vector<8x128xf32>
    %44 = arith.subf %42, %43 : vector<8x128xf32>
    %c0_29 = arith.constant 0 : index
    %c0_30 = arith.constant 0 : index
    %45 = vector.load %arg12[%c0_29, %c0_30] : memref<32x128xf32, #tpu.memory_space<vmem>>, vector<8x128xf32>
    tpu.vector_store %arg12[%c0_29, %c0_30], %44 {strides = array<i32>} : memref<32x128xf32, #tpu.memory_space<vmem>>, vector<8x128xf32>,
    %46 = vector.extract_strided_slice %41 {offsets = [0, 128], sizes = [8, 128], strides = [1, 1]} : vector<8x512xf32> to vector<8x128xf32>
    %c8 = arith.constant 8 : index
    %c0_31 = arith.constant 0 : index
    %47 = vector.load %arg12[%c8, %c0_31] : memref<32x128xf32, #tpu.memory_space<vmem>>, vector<8x128xf32>
    tpu.vector_store %arg12[%c8, %c0_31], %46 {strides = array<i32>} : memref<32x128xf32, #tpu.memory_space<vmem>>, vector<8x128xf32>,
    %48 = vector.extract_strided_slice %41 {offsets = [0, 256], sizes = [8, 128], strides = [1, 1]} : vector<8x512xf32> to vector<8x128xf32>
    %c16 = arith.constant 16 : index
    %c0_32 = arith.constant 0 : index
    %49 = vector.load %arg12[%c16, %c0_32] : memref<32x128xf32, #tpu.memory_space<vmem>>, vector<8x128xf32>
    tpu.vector_store %arg12[%c16, %c0_32], %48 {strides = array<i32>} : memref<32x128xf32, #tpu.memory_space<vmem>>, vector<8x128xf32>,
    %50 = vector.extract_strided_slice %41 {offsets = [0, 384], sizes = [8, 128], strides = [1, 1]} : vector<8x512xf32> to vector<8x128xf32>
    %c24 = arith.constant 24 : index
    %c0_33 = arith.constant 0 : index
    %51 = vector.load %arg12[%c24, %c0_33] : memref<32x128xf32, #tpu.memory_space<vmem>>, vector<8x128xf32>
    tpu.vector_store %arg12[%c24, %c0_33], %50 {strides = array<i32>} : memref<32x128xf32, #tpu.memory_space<vmem>>, vector<8x128xf32>,
    return
  }
  func.func @transform_0(%arg0: i32) -> (i32, i32) {
    %c0_i32 = arith.constant 0 : i32
    %c0_i32_0 = arith.constant 0 : i32
    %c0_i32_1 = arith.constant 0 : i32
    return %c0_i32, %c0_i32_0 : i32, i32
  }
  func.func @transform_1(%arg0: i32) -> (i32, i32) {
    %c0_i32 = arith.constant 0 : i32
    %c0_i32_0 = arith.constant 0 : i32
    %c0_i32_1 = arith.constant 0 : i32
    return %c0_i32, %c0_i32_0 : i32, i32
  }
  func.func @transform_2(%arg0: i32) -> (i32, i32) {
    %c0_i32 = arith.constant 0 : i32
    %c0_i32_0 = arith.constant 0 : i32
    %c0_i32_1 = arith.constant 0 : i32
    return %c0_i32, %c0_i32_0 : i32, i32
  }
  func.func @transform_3(%arg0: i32) -> (i32, i32) {
    %c0_i32 = arith.constant 0 : i32
    %c0_i32_0 = arith.constant 0 : i32
    %c0_i32_1 = arith.constant 0 : i32
    return %c0_i32, %c0_i32_0 : i32, i32
  }
  func.func @transform_4(%arg0: i32) -> (i32, i32) {
    %c0_i32 = arith.constant 0 : i32
    %c0_i32_0 = arith.constant 0 : i32
    %c0_i32_1 = arith.constant 0 : i32
    return %c0_i32, %c0_i32_0 : i32, i32
  }
  func.func @transform_5(%arg0: i32) -> (i32, i32) {
    %c0_i32 = arith.constant 0 : i32
    %c0_i32_0 = arith.constant 0 : i32
    %c0_i32_1 = arith.constant 0 : i32
    return %c0_i32, %c0_i32_0 : i32, i32
  }
  func.func @transform_6(%arg0: i32) -> (i32, i32) {
    %c0_i32 = arith.constant 0 : i32
    %c0_i32_0 = arith.constant 0 : i32
    %c0_i32_1 = arith.constant 0 : i32
    return %c0_i32, %c0_i32_0 : i32, i32
  }
  func.func @transform_7(%arg0: i32) -> (i32, i32) {
    %c0_i32 = arith.constant 0 : i32
    %c0_i32_0 = arith.constant 0 : i32
    %c0_i32_1 = arith.constant 0 : i32
    return %c0_i32, %c0_i32_0 : i32, i32
  }
  func.func @transform_8(%arg0: i32) -> (i32, i32) {
    %c0_i32 = arith.constant 0 : i32
    %c0_i32_0 = arith.constant 0 : i32
    %c0_i32_1 = arith.constant 0 : i32
    return %c0_i32, %c0_i32_0 : i32, i32
  }
  func.func @transform_9(%arg0: i32) -> (i32, i32) {
    %c0_i32 = arith.constant 0 : i32
    %c0_i32_0 = arith.constant 0 : i32
    %c0_i32_1 = arith.constant 0 : i32
    return %c0_i32, %c0_i32_0 : i32, i32
  }
  func.func @transform_10(%arg0: i32) -> (i32, i32) {
    %c0_i32 = arith.constant 0 : i32
    %c0_i32_0 = arith.constant 0 : i32
    %c0_i32_1 = arith.constant 0 : i32
    return %c0_i32, %c0_i32_0 : i32, i32
  }
  func.func @transform_11(%arg0: i32) -> (i32, i32) {
    %c0_i32 = arith.constant 0 : i32
    %c0_i32_0 = arith.constant 0 : i32
    %c0_i32_1 = arith.constant 0 : i32
    return %c0_i32, %c0_i32_0 : i32, i32
  }
}

module attributes {stable_mosaic.version = 11 : i64} {
  func.func @_spline_eval_kernel(%arg0: i32, %arg1: memref<1x8192xi32, #tpu.memory_space<vmem>>, %arg2: memref<1x8192xf32, #tpu.memory_space<vmem>>, %arg3: memref<32x128xf32, #tpu.memory_space<vmem>>, %arg4: memref<8x8192xf32, #tpu.memory_space<vmem>>) attributes {dimension_semantics = [#tpu.dimension_semantics<parallel>], iteration_bounds = array<i64: 8>, scalar_prefetch = 0 : i64, scratch_operands = 0 : i64, tpu.core_type = #tpu.core_type<tc>, window_params = [{transform_indices = @transform_0, window_bounds = array<i64: 1, 8192>}, {transform_indices = @transform_1, window_bounds = array<i64: 1, 8192>}, {pipeline_mode = #tpu.pipeline_mode<synchronous>, transform_indices = @transform_2, window_bounds = array<i64: 32, 128>}, {transform_indices = @transform_3, window_bounds = array<i64: 8, 8192>}]} {
    %c0 = arith.constant 0 : index
    %c0_0 = arith.constant 0 : index
    %0 = vector.load %arg1[%c0, %c0_0] : memref<1x8192xi32, #tpu.memory_space<vmem>>, vector<1x8192xi32>
    %c0_1 = arith.constant 0 : index
    %c0_2 = arith.constant 0 : index
    %1 = vector.load %arg2[%c0_1, %c0_2] : memref<1x8192xf32, #tpu.memory_space<vmem>>, vector<1x8192xf32>
    %2 = tpu.iota {dimensions = array<i32: 0>} : vector<128x8192xi32>
    %3 = vector.broadcast %0 : vector<1x8192xi32> to vector<128x8192xi32>
    %4 = arith.cmpi eq, %2, %3 : vector<128x8192xi32>
    %5 = arith.extui %4 : vector<128x8192xi1> to vector<128x8192xi32>
    %6 = arith.sitofp %5 : vector<128x8192xi32> to vector<128x8192xf32>
    %c0_3 = arith.constant 0 : index
    %c0_4 = arith.constant 0 : index
    %7 = vector.load %arg3[%c0_3, %c0_4] : memref<32x128xf32, #tpu.memory_space<vmem>>, vector<32x128xf32>
    %cst = arith.constant dense<0.000000e+00> : vector<32x8192xf32>
    %8 = tpu.matmul %7, %6, %cst {dimension_numbers = #tpu.dot_dimension_numbers<[1], [0], [0], [1], [0, 0, 1, 1], [], []>} : vector<32x128xf32>, vector<128x8192xf32>, vector<32x8192xf32> -> vector<32x8192xf32>
    %9 = vector.extract_strided_slice %8 {offsets = [0, 0], sizes = [8, 8192], strides = [1, 1]} : vector<32x8192xf32> to vector<8x8192xf32>
    %10 = vector.extract_strided_slice %8 {offsets = [8, 0], sizes = [8, 8192], strides = [1, 1]} : vector<32x8192xf32> to vector<8x8192xf32>
    %11 = vector.extract_strided_slice %8 {offsets = [16, 0], sizes = [8, 8192], strides = [1, 1]} : vector<32x8192xf32> to vector<8x8192xf32>
    %12 = vector.extract_strided_slice %8 {offsets = [24, 0], sizes = [8, 8192], strides = [1, 1]} : vector<32x8192xf32> to vector<8x8192xf32>
    %13 = vector.broadcast %1 : vector<1x8192xf32> to vector<8x8192xf32>
    %14 = arith.mulf %13, %12 : vector<8x8192xf32>
    %15 = arith.addf %11, %14 : vector<8x8192xf32>
    %16 = vector.broadcast %1 : vector<1x8192xf32> to vector<8x8192xf32>
    %17 = arith.mulf %16, %15 : vector<8x8192xf32>
    %18 = arith.addf %10, %17 : vector<8x8192xf32>
    %19 = vector.broadcast %1 : vector<1x8192xf32> to vector<8x8192xf32>
    %20 = arith.mulf %19, %18 : vector<8x8192xf32>
    %21 = arith.addf %9, %20 : vector<8x8192xf32>
    %22 = math.exp %21 : vector<8x8192xf32>
    %c0_5 = arith.constant 0 : index
    %c0_6 = arith.constant 0 : index
    %23 = vector.load %arg4[%c0_5, %c0_6] : memref<8x8192xf32, #tpu.memory_space<vmem>>, vector<8x8192xf32>
    tpu.vector_store %arg4[%c0_5, %c0_6], %22 {strides = array<i32>} : memref<8x8192xf32, #tpu.memory_space<vmem>>, vector<8x8192xf32>,
    return
  }
  func.func @transform_0(%arg0: i32) -> (i32, i32) {
    %c0_i32 = arith.constant 0 : i32
    %c0_i32_0 = arith.constant 0 : i32
    return %c0_i32, %arg0 : i32, i32
  }
  func.func @transform_1(%arg0: i32) -> (i32, i32) {
    %c0_i32 = arith.constant 0 : i32
    %c0_i32_0 = arith.constant 0 : i32
    return %c0_i32, %arg0 : i32, i32
  }
  func.func @transform_2(%arg0: i32) -> (i32, i32) {
    %c0_i32 = arith.constant 0 : i32
    %c0_i32_0 = arith.constant 0 : i32
    %c0_i32_1 = arith.constant 0 : i32
    return %c0_i32, %c0_i32_0 : i32, i32
  }
  func.func @transform_3(%arg0: i32) -> (i32, i32) {
    %c0_i32 = arith.constant 0 : i32
    %c0_i32_0 = arith.constant 0 : i32
    return %c0_i32, %arg0 : i32, i32
  }
}

</mosaic_0001>

<bundles_post_ra>
// kernel: cmbps_forward.2
= control target key start
LH: loop header
LB: loop body
LE: loop exit
PB: predicated region body
PF: predicated region fallthrough
CT: control target
= control target key end

     0   :  { %16 = vsyncpa [#allocation3], 0  ;;  %s1348_s0 = inlined_call_operand.vmem [shape: f32[8,128], index: 0, kind: input, shape index: {}]   ;;  %s1349_s1 = inlined_call_operand.hbm [shape: f32[4,128], index: 1, kind: input, shape index: {}]   ;;  %s1350_s2 = inlined_call_operand.vmem [shape: f32[128,128], index: 2, kind: input, shape index: {}]   ;;  %s1351_s3 = inlined_call_operand.vmem [shape: f32[1,128], index: 3, kind: input, shape index: {}]   ;;  %s1352_s4 = inlined_call_operand.vmem [shape: f32[128,128], index: 4, kind: input, shape index: {}]   ;;  %s1353_s5 = inlined_call_operand.vmem [shape: f32[1,128], index: 5, kind: input, shape index: {}]   ;;  %s1354_s6 = inlined_call_operand.vmem [shape: f32[128,128], index: 6, kind: input, shape index: {}]   ;;  %s1355_s7 = inlined_call_operand.vmem [shape: f32[1,128], index: 7, kind: input, shape index: {}]   ;;  %s1356_s8 = inlined_call_operand.vmem [shape: f32[128,128], index: 8, kind: input, shape index: {}]   ;;  %s1357_s9 = inlined_call_operand.hbm [shape: f32[1,128], index: 9, kind: input, shape index: {}]   ;;  %s1358_s10 = inlined_call_operand.hbm [shape: f32[128,512], index: 10, kind: input, shape index: {}]   ;;  %s1359_s11 = inlined_call_operand.vmem [shape: f32[32,128], index: 11, kind: output, shape index: {}]  }
   0x1   :  { %17 = vsyncpa [#allocation5], 0  ;;  %s976_s17 = smov [#allocation4]   ;;  %s977_s19 = smov [#allocation2]  }
   0x2   :  { %s50_s18 = sshll.u32 %s976_s17, 4  ;;  %s26_s20 = sshll.u32 %s977_s19, 4  ;;  %s51_s18 = int_to_ptr.vmem [resolvable:$true] %s50_s18  ;;  %s27_s20 = int_to_ptr.vmem [resolvable:$true] %s26_s20 }
   0x3   :  { %s920_s21 = scalar_lea.vmem %s51_s18, 16  ;;  %s924_s22 = scalar_lea.vmem %s51_s18, 32 }
   0x4   :  { %p921_p0 = scmp.ne.s32.totalorder %s51_s18, %s920_s21  ;;  %p925_p1 = scmp.lt.s32.totalorder %s51_s18, %s51_s18 }
   0x5   :  { %p926_p2 = scmp.lt.s32.totalorder %s924_s22, %s920_s21 }
   0x7   :  { %p927_p3 = por %p926_p2, %p925_p1 }
   0x9   :  { %p928_p4 = pnand %p927_p3, %p921_p0 }
   0xb   :  { %931 = shalt.err (!%p928_p4)
}
   0xc   :  { %53 = dma.hbm_to_vmem [thread:$0]  %s1357_s9, 16, %s51_s18, [#allocation5]  }
   0xd   :  { %s940_s25 = scalar_lea.vmem %s27_s20, 64  ;;  %p945_p6 = scmp.lt.s32.totalorder %s27_s20, %s27_s20 }
   0xe   :  { %p941_p5 = scmp.ne.s32.totalorder %s27_s20, %s940_s25  ;;  %p946_p7 = scmp.lt.s32.totalorder %s940_s25, %s940_s25 }
  0x10   :  { %p947_p8 = por %p946_p7, %p945_p6 }
  0x12   :  { %p948_p9 = pnand %p947_p8, %p941_p5 }
  0x14   :  { %951 = shalt.err (!%p948_p9)
}
  0x15   :  { %29 = dma.hbm_to_vmem [thread:$0]  %s1349_s1, 64, %s27_s20, [#allocation3]  }
  0x16   :  { %s978_s28 = smov [#allocation6]  }
  0x17   :  { %s59_s29 = sshll.u32 %s978_s28, 4  ;;  %s60_s29 = int_to_ptr.vmem [resolvable:$true] %s59_s29 }
  0x18   :  { %s960_s30 = scalar_lea.vmem %s60_s29, 8192  ;;  %p965_p11 = scmp.lt.s32.totalorder %s60_s29, %s60_s29 }
  0x19   :  { %p961_p10 = scmp.ne.s32.totalorder %s60_s29, %s960_s30  ;;  %p966_p12 = scmp.lt.s32.totalorder %s960_s30, %s960_s30 }
  0x1b   :  { %p967_p13 = por %p966_p12, %p965_p11 }
  0x1d   :  { %p968_p0 = pnand %p967_p13, %p961_p10 }
  0x1f   :  { %971 = shalt.err (!%p968_p0)
}
  0x20   :  { %s979_s9 = smov 512   ;;  %s980_s12 = smov 32  }
  0x21   :  { %65 = dma.hbm_to_vmem [thread:$0]  %s1358_s10, 8192, %s60_s29, [#allocation5], %s979_s9, %s979_s9, %s980_s12  }
  0x22   :  { %972 = dma.done.wait [#allocation3], 64  }
  0x23   :  { %973 = vsyncadd [#allocation3], 4294967232 }
  0x24   :  { %974 = dma.done.wait [#allocation5], 8208  }
  0x25   :  { %975 = vsyncadd [#allocation5], 4294959088  ;;  %v981_v0 = vmov 0.0   ;;  %vm982_vm0 = vmmov 0   ;;  %v77_v1 = vlaneseq  ;;  %v113_v2 = vld [vmem:[%s1350_s2 + $0x78] sm:$0xff]  ;;  %v112_v3 = vld [vmem:[%s1350_s2 + $0x70] sm:$0xff] }
  0x26   :  { %763 = vmatprep.subr.mxu0 %v981_v0  ;;  %795 = vmatprep.mubr.msk.f32.mxu0 %vm982_vm0, %v981_v0  ;;  %v111_v5 = vld [vmem:[%s1350_s2 + $0x68] sm:$0xff]  ;;  %v110_v6 = vld [vmem:[%s1350_s2 + $0x60] sm:$0xff]  ;;  %v109_v9 = vld [vmem:[%s1350_s2 + $0x58] sm:$0xff] }
  0x27   :  { %798 = vmatprep.subr.mxu1 %v981_v0  ;;  %830 = vmatprep.mubr.msk.f32.mxu1 %vm982_vm0, %v981_v0  ;;  %v1064_v4 = vshrl.u32 %v77_v1, 7  ;;  %v75_v8 = vld [vmem:[#allocation2] sm:$0xf]  ;;  %v207_v10 = vld [vmem:[%s1352_s4 + $0x78] sm:$0xff]  ;;  %v206_v11 = vld [vmem:[%s1352_s4 + $0x70] sm:$0xff] }
  0x28   :  { %764 = vmatpush3.msra.mxu0 %v113_v2  ;;  %799 = vmatpush3.msra.mxu1 %v207_v10  ;;  %v108_v12 = vld [vmem:[%s1350_s2 + $0x50] sm:$0xff]  ;;  %v205_v15 = vld [vmem:[%s1352_s4 + $0x68] sm:$0xff]  ;;  %v204_v17 = vld [vmem:[%s1352_s4 + $0x60] sm:$0xff] }
  0x29   :  { %765 = vmatprep.subr.mxu0 %v981_v0  ;;  %v94_v7 = vsub.s32 3, %v1064_v4  ;;  %v79_v13 = vsub.s32 0, %v1064_v4  ;;  %800 = vmatprep.subr.mxu1 %v981_v0  ;;  %v107_v16 = vld [vmem:[%s1350_s2 + $0x48] sm:$0xff]  ;;  %v106_v18 = vld [vmem:[%s1350_s2 + $0x40] sm:$0xff]  ;;  %v84_v20 = vsub.s32 1, %v1064_v4  ;;  %v203_v21 = vld [vmem:[%s1352_s4 + $0x58] sm:$0xff] }
  0x2a   :  { %766 = vmatpush3.msra.mxu0 %v112_v3  ;;  %801 = vmatpush3.msra.mxu1 %v206_v11  ;;  %v76_v22 = vld [vmem:[%s1348_s0] sm:$0xff]  ;;  %v105_v23 = vld [vmem:[%s1350_s2 + $0x38] sm:$0xff]  ;;  %v202_v24 = vld [vmem:[%s1352_s4 + $0x50] sm:$0xff]  ;;  %v89_v28 = vsub.s32 2, %v1064_v4 }
  0x2b   :  { %767 = vmatprep.subr.mxu0 %v981_v0  ;;  %v95_v14 = vrot.slane %v75_v8, %v94_v7  ;;  %802 = vmatprep.subr.mxu1 %v981_v0  ;;  %v80_v19 = vrot.slane %v75_v8, %v79_v13  ;;  %v104_v25 = vld [vmem:[%s1350_s2 + $0x30] sm:$0xff]  ;;  %v85_v27 = vrot.slane %v75_v8, %v84_v20  ;;  %v201_v29 = vld [vmem:[%s1352_s4 + $0x48] sm:$0xff]  ;;  %v200_v31 = vld [vmem:[%s1352_s4 + $0x40] sm:$0xff] }
  0x2c   :  { %768 = vmatpush3.msra.mxu0 %v111_v5  ;;  %803 = vmatpush3.msra.mxu1 %v205_v15  ;;  %v103_v30 = vld [vmem:[%s1350_s2 + $0x28] sm:$0xff]  ;;  %v102_v32 = vld [vmem:[%s1350_s2 + $0x20] sm:$0xff]  ;;  %v90_v34 = vrot.slane %v75_v8, %v89_v28  ;;  %v199_v35 = vld [vmem:[%s1352_s4 + $0x38] sm:$0xff] }
  0x2d   :  { %769 = vmatprep.subr.mxu0 %v981_v0  ;;  %910 = vrcp.f32 %v95_v14  ;;  %804 = vmatprep.subr.mxu1 %v981_v0  ;;  %v81_v26 = vmul.f32 %v80_v19, %v76_v22  ;;  %v101_v36 = vld [vmem:[%s1350_s2 + $0x18] sm:$0xff]  ;;  %v198_v37 = vld [vmem:[%s1352_s4 + $0x30] sm:$0xff]  ;;  %v197_v40 = vld [vmem:[%s1352_s4 + $0x28] sm:$0xff] }
  0x2e   :  { %770 = vmatpush3.msra.mxu0 %v110_v6  ;;  %805 = vmatpush3.msra.mxu1 %v204_v17  ;;  %v100_v38 = vld [vmem:[%s1350_s2 + $0x10] sm:$0xff]  ;;  %v99_v42 = vld [vmem:[%s1350_s2 + $0x8] sm:$0xff]  ;;  %v196_v43 = vld [vmem:[%s1352_s4 + $0x20] sm:$0xff] }
  0x2f   :  { %771 = vmatprep.subr.mxu0 %v981_v0  ;;  %806 = vmatprep.subr.mxu1 %v981_v0  ;;  %v86_v33 = vadd.f32 %v85_v27, %v81_v26  ;;  %v98_v44 = vld [vmem:[%s1350_s2] sm:$0xff]  ;;  %v195_v46 = vld [vmem:[%s1352_s4 + $0x18] sm:$0xff]  ;;  %v194_v47 = vld [vmem:[%s1352_s4 + $0x10] sm:$0xff] }
  0x30   :  { %772 = vmatpush3.msra.mxu0 %v109_v9  ;;  %807 = vmatpush3.msra.mxu1 %v203_v21  ;;  %v193_v48 = vld [vmem:[%s1352_s4 + $0x8] sm:$0xff]  ;;  %v192_v49 = vld [vmem:[%s1352_s4] sm:$0xff]  ;;  %v301_v50 = vld [vmem:[%s1354_s6 + $0x78] sm:$0xff] }
  0x31   :  { %773 = vmatprep.subr.mxu0 %v981_v0  ;;  %808 = vmatprep.subr.mxu1 %v981_v0  ;;  %v91_v39 = vsub.f32 %v86_v33, %v90_v34  ;;  %v300_v51 = vld [vmem:[%s1354_s6 + $0x70] sm:$0xff]  ;;  %v299_v52 = vld [vmem:[%s1354_s6 + $0x68] sm:$0xff]  ;;  %v298_v53 = vld [vmem:[%s1354_s6 + $0x60] sm:$0xff] }
  0x32   :  { %774 = vmatpush3.msra.mxu0 %v108_v12  ;;  %809 = vmatpush3.msra.mxu1 %v202_v24  ;;  %v297_v54 = vld [vmem:[%s1354_s6 + $0x58] sm:$0xff]  ;;  %v296_v55 = vld [vmem:[%s1354_s6 + $0x50] sm:$0xff]  ;;  %v295_v56 = vld [vmem:[%s1354_s6 + $0x48] sm:$0xff] }
  0x33   :  { %775 = vmatprep.subr.mxu0 %v981_v0  ;;  %810 = vmatprep.subr.mxu1 %v981_v0  ;;  %v294_v57 = vld [vmem:[%s1354_s6 + $0x40] sm:$0xff]  ;;  %v293_v58 = vld [vmem:[%s1354_s6 + $0x38] sm:$0xff]  ;;  %v292_v59 = vld [vmem:[%s1354_s6 + $0x30] sm:$0xff] }
  0x34   :  { %776 = vmatpush3.msra.mxu0 %v107_v16  ;;  %811 = vmatpush3.msra.mxu1 %v201_v29  ;;  %v291_v60 = vld [vmem:[%s1354_s6 + $0x28] sm:$0xff]  ;;  %v290_v61 = vld [vmem:[%s1354_s6 + $0x20] sm:$0xff]  ;;  %v289_v62 = vld [vmem:[%s1354_s6 + $0x18] sm:$0xff] }
  0x35   :  { %777 = vmatprep.subr.mxu0 %v981_v0  ;;  %812 = vmatprep.subr.mxu1 %v981_v0  ;;  %v690_v63 = vld [vmem:[%s1351_s3] ss:$0 sm:$0xff]  ;;  %v288_v5 = vld [vmem:[%s1354_s6 + $0x10] sm:$0xff]  ;;  %v287_v6 = vld [vmem:[%s1354_s6 + $0x8] sm:$0xff] }
  0x36   :  { %778 = vmatpush3.msra.mxu0 %v106_v18  ;;  %813 = vmatpush3.msra.mxu1 %v200_v31  ;;  %v286_v7 = vld [vmem:[%s1354_s6] sm:$0xff]  ;;  %v395_v8 = vld [vmem:[%s1356_s8 + $0x78] sm:$0xff]  ;;  %v394_v9 = vld [vmem:[%s1356_s8 + $0x70] sm:$0xff] }
  0x37   :  { %779 = vmatprep.subr.mxu0 %v981_v0  ;;  %814 = vmatprep.subr.mxu1 %v981_v0  ;;  %v393_v10 = vld [vmem:[%s1356_s8 + $0x68] sm:$0xff]  ;;  %v392_v11 = vld [vmem:[%s1356_s8 + $0x60] sm:$0xff]  ;;  %v391_v12 = vld [vmem:[%s1356_s8 + $0x58] sm:$0xff] }
  0x38   :  { %780 = vmatpush3.msra.mxu0 %v105_v23  ;;  %815 = vmatpush3.msra.mxu1 %v199_v35  ;;  %v390_v13 = vld [vmem:[%s1356_s8 + $0x50] sm:$0xff]  ;;  %v389_v14 = vld [vmem:[%s1356_s8 + $0x48] sm:$0xff]  ;;  %v388_v15 = vld [vmem:[%s1356_s8 + $0x40] sm:$0xff] }
  0x39   :  { %781 = vmatprep.subr.mxu0 %v981_v0  ;;  %816 = vmatprep.subr.mxu1 %v981_v0  ;;  %v387_v16 = vld [vmem:[%s1356_s8 + $0x38] sm:$0xff]  ;;  %v386_v17 = vld [vmem:[%s1356_s8 + $0x30] sm:$0xff]  ;;  %v385_v18 = vld [vmem:[%s1356_s8 + $0x28] sm:$0xff] }
  0x3a   :  { %782 = vmatpush3.msra.mxu0 %v104_v25  ;;  %v911_v41 = vpop.eup %910  ;;  %817 = vmatpush3.msra.mxu1 %v198_v37  ;;  %v384_v19 = vld [vmem:[%s1356_s8 + $0x20] sm:$0xff]  ;;  %v383_v20 = vld [vmem:[%s1356_s8 + $0x18] sm:$0xff]  ;;  %v382_v26 = vld [vmem:[%s1356_s8 + $0x10] sm:$0xff] }
  0x3b   :  { %783 = vmatprep.subr.mxu0 %v981_v0  ;;  %818 = vmatprep.subr.mxu1 %v981_v0  ;;  %v97_v45 = vmul.f32 %v911_v41, %v91_v39  ;;  %v691_v21 = vld [vmem:[%s1353_s5] ss:$0 sm:$0xff]  ;;  %v381_v27 = vld [vmem:[%s1356_s8 + $0x8] sm:$0xff] }
  0x3c   :  { %784 = vmatpush3.msra.mxu0 %v103_v30  ;;  %819 = vmatpush3.msra.mxu1 %v197_v40  ;;  %v380_v28 = vld [vmem:[%s1356_s8] sm:$0xff]  ;;  %v534_v29 = vld [vmem:[#allocation6 + $0x1e8] sm:$0xff] }
  0x3d   :  { %785 = vmatprep.subr.mxu0 %v981_v0  ;;  %820 = vmatprep.subr.mxu1 %v981_v0  ;;  %v536_v30 = vld [vmem:[#allocation6 + $0x1f8] sm:$0xff]  ;;  %v533_v31 = vld [vmem:[#allocation6 + $0x1e0] sm:$0xff]  ;;  %v526_v34 = vld [vmem:[#allocation6 + $0x1a8] sm:$0xff] }
  0x3e   :  { %786 = vmatpush3.msra.mxu0 %v102_v32  ;;  %821 = vmatpush3.msra.mxu1 %v196_v43  ;;  %v530_v32 = vld [vmem:[#allocation6 + $0x1c8] sm:$0xff]  ;;  %v529_v33 = vld [vmem:[#allocation6 + $0x1c0] sm:$0xff] }
  0x3f   :  { %787 = vmatprep.subr.mxu0 %v981_v0  ;;  %822 = vmatprep.subr.mxu1 %v981_v0  ;;  %v525_v35 = vld [vmem:[#allocation6 + $0x1a0] sm:$0xff]  ;;  %v514_v40 = vld [vmem:[#allocation6 + $0x148] sm:$0xff] }
  0x40   :  { %788 = vmatpush3.msra.mxu0 %v101_v36  ;;  %823 = vmatpush3.msra.mxu1 %v195_v46  ;;  %v522_v36 = vld [vmem:[#allocation6 + $0x188] sm:$0xff]  ;;  %v521_v37 = vld [vmem:[#allocation6 + $0x180] sm:$0xff] }
  0x41   :  { %789 = vmatprep.subr.mxu0 %v981_v0  ;;  %824 = vmatprep.subr.mxu1 %v981_v0  ;;  %v517_v39 = vld [vmem:[#allocation6 + $0x160] sm:$0xff]  ;;  %v502_v46 = vld [vmem:[#allocation6 + $0xe8] sm:$0xff] }
  0x42   :  { %790 = vmatpush3.msra.mxu0 %v100_v38  ;;  %825 = vmatpush3.msra.mxu1 %v194_v47  ;;  %v518_v38 = vld [vmem:[#allocation6 + $0x168] sm:$0xff]  ;;  %v513_v41 = vld [vmem:[#allocation6 + $0x140] sm:$0xff] }
  0x43   :  { %791 = vmatprep.subr.mxu0 %v981_v0  ;;  %826 = vmatprep.subr.mxu1 %v981_v0  ;;  %v509_v43 = vld [vmem:[#allocation6 + $0x120] sm:$0xff] }
  0x44   :  { %792 = vmatpush3.msra.mxu0 %v99_v42  ;;  %827 = vmatpush3.msra.mxu1 %v193_v48  ;;  %v510_v42 = vld [vmem:[#allocation6 + $0x128] sm:$0xff]  ;;  %v501_v47 = vld [vmem:[#allocation6 + $0xe0] sm:$0xff] }
  0x45   :  { %793 = vmatprep.subr.mxu0 %v981_v0  ;;  %828 = vmatprep.subr.mxu1 %v981_v0  ;;  %v498_v48 = vld [vmem:[#allocation6 + $0xc8] sm:$0xff] }
  0x46   :  { %794 = vmatpush3.msra.mxu0 %v98_v44  ;;  %829 = vmatpush3.msra.mxu1 %v192_v49  ;;  %v506_v44 = vld [vmem:[#allocation6 + $0x108] sm:$0xff]  ;;  %v497_v49 = vld [vmem:[#allocation6 + $0xc0] sm:$0xff] }
  0x47   :  { %796 = vmatmul.mubr.f32.vlgmr.msra.gmra.mxu0 %v97_v45  ;;  %833 = vmatprep.subr.mxu0 %v981_v0  ;;  %v505_v45 = vld [vmem:[#allocation6 + $0x100] sm:$0xff] }
  0x48   :  { %865 = vmatprep.mubr.msk.f32.mxu0 %vm982_vm0, %v981_v0  ;;  %868 = vmatprep.subr.mxu1 %v981_v0 }
  0x49   :  { %834 = vmatpush3.msra.mxu0 %v301_v50  ;;  %v494_v50 = vld [vmem:[#allocation6 + $0xa8] sm:$0xff] }
  0x4a   :  { %835 = vmatprep.subr.mxu0 %v981_v0 }
  0x4b   :  { %836 = vmatpush3.msra.mxu0 %v300_v51  ;;  %v493_v51 = vld [vmem:[#allocation6 + $0xa0] sm:$0xff] }
  0x4c   :  { %837 = vmatprep.subr.mxu0 %v981_v0 }
  0x4d   :  { %838 = vmatpush3.msra.mxu0 %v299_v52  ;;  %v490_v52 = vld [vmem:[#allocation6 + $0x88] sm:$0xff] }
  0x4e   :  { %839 = vmatprep.subr.mxu0 %v981_v0 }
  0x4f   :  { %840 = vmatpush3.msra.mxu0 %v298_v53  ;;  %v489_v53 = vld [vmem:[#allocation6 + $0x80] sm:$0xff] }
  0x50   :  { %841 = vmatprep.subr.mxu0 %v981_v0 }
  0x51   :  { %842 = vmatpush3.msra.mxu0 %v297_v54  ;;  %v486_v54 = vld [vmem:[#allocation6 + $0x68] sm:$0xff] }
  0x52   :  { %843 = vmatprep.subr.mxu0 %v981_v0 }
  0x53   :  { %844 = vmatpush3.msra.mxu0 %v296_v55  ;;  %v485_v55 = vld [vmem:[#allocation6 + $0x60] sm:$0xff] }
  0x54   :  { %845 = vmatprep.subr.mxu0 %v981_v0 }
  0x55   :  { %846 = vmatpush3.msra.mxu0 %v295_v56  ;;  %v482_v56 = vld [vmem:[#allocation6 + $0x48] sm:$0xff] }
  0x56   :  { %847 = vmatprep.subr.mxu0 %v981_v0 }
  0x57   :  { %848 = vmatpush3.msra.mxu0 %v294_v57  ;;  %v481_v57 = vld [vmem:[#allocation6 + $0x40] sm:$0xff] }
  0x58   :  { %849 = vmatprep.subr.mxu0 %v981_v0 }
  0x59   :  { %850 = vmatpush3.msra.mxu0 %v293_v58  ;;  %v478_v58 = vld [vmem:[#allocation6 + $0x28] sm:$0xff] }
  0x5a   :  { %851 = vmatprep.subr.mxu0 %v981_v0 }
  0x5b   :  { %852 = vmatpush3.msra.mxu0 %v292_v59  ;;  %v692_v59 = vld [vmem:[%s1355_s7] ss:$0 sm:$0xff] }
  0x5c   :  { %853 = vmatprep.subr.mxu0 %v981_v0 }
  0x5d   :  { %854 = vmatpush3.msra.mxu0 %v291_v60 }
  0x5e   :  { %855 = vmatprep.subr.mxu0 %v981_v0 }
  0x5f   :  { %856 = vmatpush3.msra.mxu0 %v290_v61 }
  0x60   :  { %857 = vmatprep.subr.mxu0 %v981_v0 }
  0x61   :  { %858 = vmatpush3.msra.mxu0 %v289_v62 }
  0x62   :  { %859 = vmatprep.subr.mxu0 %v981_v0 }
  0x63   :  { %860 = vmatpush3.msra.mxu0 %v288_v5  ;;  %v527_v5 = vld [vmem:[#allocation6 + $0x1b0] sm:$0xff] }
  0x64   :  { %861 = vmatprep.subr.mxu0 %v981_v0 }
  0x65   :  { %862 = vmatpush3.msra.mxu0 %v287_v6  ;;  %v524_v6 = vld [vmem:[#allocation6 + $0x198] sm:$0xff] }
  0x66   :  { %863 = vmatprep.subr.mxu0 %v981_v0 }
  0x67   :  { %864 = vmatpush3.msra.mxu0 %v286_v7  ;;  %v523_v7 = vld [vmem:[#allocation6 + $0x190] sm:$0xff] }
  0x68   :  { %537 = vmatprep.subr.mxu0 %v534_v29  ;;  %v479_v29 = vld [vmem:[#allocation6 + $0x30] sm:$0xff] }
 0x107   :  { %v187_v1 = vpop.f32.mrf.mxu0 }
 0x108   :  { %v188_v2 = vadd.f32 %v690_v63, %v187_v1  ;;  %v535_v1 = vld [vmem:[#allocation6 + $0x1f0] sm:$0xff] }
 0x109   :  { %v797_v3 = vpop.f32.mrf.mxu0 }
 0x10a   :  { %v191_v4 = vmax.f32 %v188_v2, 0.0  ;;  %v532_v2 = vld [vmem:[#allocation6 + $0x1d8] sm:$0xff]  ;;  %v531_v3 = vld [vmem:[#allocation6 + $0x1d0] sm:$0xff] }
 0x10c   :  { %831 = vmatmul.mubr.f32.vlgmr.msra.gmra.mxu1 %v191_v4  ;;  %v528_v4 = vld [vmem:[#allocation6 + $0x1b8] sm:$0xff] }
 0x10d   :  { %900 = vmatprep.mubr.msk.f32.mxu1 %vm982_vm0, %v981_v0  ;;  %869 = vmatpush3.msra.mxu1 %v395_v8  ;;  %v520_v8 = vld [vmem:[#allocation6 + $0x178] sm:$0xff] }
 0x10e   :  { %870 = vmatprep.subr.mxu1 %v981_v0 }
 0x10f   :  { %871 = vmatpush3.msra.mxu1 %v394_v9  ;;  %v519_v9 = vld [vmem:[#allocation6 + $0x170] sm:$0xff] }
 0x110   :  { %872 = vmatprep.subr.mxu1 %v981_v0 }
 0x111   :  { %873 = vmatpush3.msra.mxu1 %v393_v10  ;;  %v516_v10 = vld [vmem:[#allocation6 + $0x158] sm:$0xff] }
 0x112   :  { %874 = vmatprep.subr.mxu1 %v981_v0 }
 0x113   :  { %875 = vmatpush3.msra.mxu1 %v392_v11  ;;  %v515_v11 = vld [vmem:[#allocation6 + $0x150] sm:$0xff] }
 0x114   :  { %876 = vmatprep.subr.mxu1 %v981_v0 }
 0x115   :  { %877 = vmatpush3.msra.mxu1 %v391_v12  ;;  %v512_v12 = vld [vmem:[#allocation6 + $0x138] sm:$0xff] }
 0x116   :  { %878 = vmatprep.subr.mxu1 %v981_v0 }
 0x117   :  { %879 = vmatpush3.msra.mxu1 %v390_v13  ;;  %v511_v13 = vld [vmem:[#allocation6 + $0x130] sm:$0xff] }
 0x118   :  { %880 = vmatprep.subr.mxu1 %v981_v0 }
 0x119   :  { %881 = vmatpush3.msra.mxu1 %v389_v14  ;;  %v507_v14 = vld [vmem:[#allocation6 + $0x110] sm:$0xff] }
 0x11a   :  { %882 = vmatprep.subr.mxu1 %v981_v0 }
 0x11b   :  { %883 = vmatpush3.msra.mxu1 %v388_v15  ;;  %v504_v15 = vld [vmem:[#allocation6 + $0xf8] sm:$0xff] }
 0x11c   :  { %884 = vmatprep.subr.mxu1 %v981_v0 }
 0x11d   :  { %885 = vmatpush3.msra.mxu1 %v387_v16  ;;  %v503_v16 = vld [vmem:[#allocation6 + $0xf0] sm:$0xff] }
 0x11e   :  { %886 = vmatprep.subr.mxu1 %v981_v0 }
 0x11f   :  { %887 = vmatpush3.msra.mxu1 %v386_v17  ;;  %v500_v17 = vld [vmem:[#allocation6 + $0xd8] sm:$0xff] }
 0x120   :  { %888 = vmatprep.subr.mxu1 %v981_v0 }
 0x121   :  { %889 = vmatpush3.msra.mxu1 %v385_v18  ;;  %v499_v18 = vld [vmem:[#allocation6 + $0xd0] sm:$0xff] }
 0x122   :  { %890 = vmatprep.subr.mxu1 %v981_v0 }
 0x123   :  { %891 = vmatpush3.msra.mxu1 %v384_v19  ;;  %v496_v19 = vld [vmem:[#allocation6 + $0xb8] sm:$0xff] }
 0x124   :  { %892 = vmatprep.subr.mxu1 %v981_v0 }
 0x125   :  { %893 = vmatpush3.msra.mxu1 %v383_v20  ;;  %v495_v20 = vld [vmem:[#allocation6 + $0xb0] sm:$0xff] }
 0x126   :  { %894 = vmatprep.subr.mxu1 %v981_v0 }
 0x127   :  { %895 = vmatpush3.msra.mxu1 %v382_v26  ;;  %v483_v26 = vld [vmem:[#allocation6 + $0x50] sm:$0xff] }
 0x128   :  { %896 = vmatprep.subr.mxu1 %v981_v0 }
 0x129   :  { %897 = vmatpush3.msra.mxu1 %v381_v27  ;;  %v480_v27 = vld [vmem:[#allocation6 + $0x38] sm:$0xff] }
 0x12a   :  { %898 = vmatprep.subr.mxu1 %v981_v0 }
 0x12b   :  { %899 = vmatpush3.msra.mxu1 %v380_v28  ;;  %v477_v28 = vld [vmem:[#allocation6 + $0x20] sm:$0xff] }
 0x12c   :  { %608 = vmatprep.subr.mxu1 %v536_v30  ;;  %v474_v30 = vld [vmem:[#allocation6 + $0x8] sm:$0xff] }
 0x1cc   :  { %v281_v22 = vpop.f32.mrf.mxu1 }
 0x1cd   :  { %v282_v23 = vadd.f32 %v691_v21, %v281_v22  ;;  %v492_v21 = vld [vmem:[#allocation6 + $0x98] sm:$0xff]  ;;  %v491_v22 = vld [vmem:[#allocation6 + $0x90] sm:$0xff] }
 0x1ce   :  { %v832_v24 = vpop.f32.mrf.mxu1 }
 0x1cf   :  { %v285_v25 = vmax.f32 %v282_v23, 0.0  ;;  %v488_v23 = vld [vmem:[#allocation6 + $0x78] sm:$0xff]  ;;  %v487_v24 = vld [vmem:[#allocation6 + $0x70] sm:$0xff] }
 0x1d1   :  { %866 = vmatmul.mubr.f32.vlgmr.msra.gmra.mxu0 %v285_v25  ;;  %v484_v25 = vld [vmem:[#allocation6 + $0x58] sm:$0xff] }
 0x1d2   :  { %601 = vmatprep.mubr.f32.mxu0 %v981_v0  ;;  %538 = vmatpush1.msra.mxu0 %v533_v31  ;;  %v476_v31 = vld [vmem:[#allocation6 + $0x18] sm:$0xff] }
 0x1d3   :  { %539 = vmatprep.subr.mxu0 %v530_v32  ;;  %v473_v32 = vld [vmem:[#allocation6] sm:$0xff] }
 0x1d4   :  { %540 = vmatpush1.msra.mxu0 %v529_v33  ;;  %v475_v33 = vld [vmem:[#allocation6 + $0x10] sm:$0xff] }
 0x1d5   :  { %541 = vmatprep.subr.mxu0 %v526_v34  ;;  %v693_v34 = vld [vmem:[#allocation4] ss:$0 sm:$0xff] }
 0x1d6   :  { %542 = vmatpush1.msra.mxu0 %v525_v35 }
 0x1d7   :  { %543 = vmatprep.subr.mxu0 %v522_v36 }
 0x1d8   :  { %544 = vmatpush1.msra.mxu0 %v521_v37 }
 0x1d9   :  { %545 = vmatprep.subr.mxu0 %v518_v38 }
 0x1da   :  { %546 = vmatpush1.msra.mxu0 %v517_v39 }
 0x1db   :  { %547 = vmatprep.subr.mxu0 %v514_v40 }
 0x1dc   :  { %548 = vmatpush1.msra.mxu0 %v513_v41 }
 0x1dd   :  { %549 = vmatprep.subr.mxu0 %v510_v42 }
 0x1de   :  { %550 = vmatpush1.msra.mxu0 %v509_v43 }
 0x1df   :  { %551 = vmatprep.subr.mxu0 %v506_v44 }
 0x1e0   :  { %552 = vmatpush1.msra.mxu0 %v505_v45 }
 0x1e1   :  { %553 = vmatprep.subr.mxu0 %v502_v46 }
 0x1e2   :  { %554 = vmatpush1.msra.mxu0 %v501_v47 }
 0x1e3   :  { %555 = vmatprep.subr.mxu0 %v498_v48 }
 0x1e4   :  { %556 = vmatpush1.msra.mxu0 %v497_v49 }
 0x1e5   :  { %557 = vmatprep.subr.mxu0 %v494_v50 }
 0x1e6   :  { %558 = vmatpush1.msra.mxu0 %v493_v51 }
 0x1e7   :  { %559 = vmatprep.subr.mxu0 %v490_v52 }
 0x1e8   :  { %560 = vmatpush1.msra.mxu0 %v489_v53 }
 0x1e9   :  { %561 = vmatprep.subr.mxu0 %v486_v54 }
 0x1ea   :  { %562 = vmatpush1.msra.mxu0 %v485_v55 }
 0x1eb   :  { %563 = vmatprep.subr.mxu0 %v482_v56 }
 0x1ec   :  { %564 = vmatpush1.msra.mxu0 %v481_v57 }
 0x1ed   :  { %565 = vmatprep.subr.mxu0 %v478_v58 }
 0x1ee   :  { %566 = vmatpush1.msra.mxu0 %v477_v28 }
 0x1ef   :  { %567 = vmatprep.subr.mxu0 %v474_v30 }
 0x1f0   :  { %568 = vmatpush1.msra.mxu0 %v473_v32 }
 0x291   :  { %v375_v60 = vpop.f32.mrf.mxu0 }
 0x292   :  { %v376_v61 = vadd.f32 %v692_v59, %v375_v60 }
 0x293   :  { %v867_v62 = vpop.f32.mrf.mxu0 }
 0x294   :  { %v379_v63 = vmax.f32 %v376_v61, 0.0 }
 0x296   :  { %901 = vmatmul.mubr.f32.vlgmr.msra.gmra.mxu1 %v379_v63 }
 0x297   :  { %609 = vmatpush1.msra.mxu1 %v535_v1  ;;  %672 = vmatprep.mubr.f32.mxu1 %v981_v0  ;;  %v508_v0 = vld [vmem:[#allocation6 + $0x118] sm:$0xff] }
 0x298   :  { %610 = vmatprep.subr.mxu1 %v532_v2 }
 0x299   :  { %611 = vmatpush1.msra.mxu1 %v531_v3 }
 0x29a   :  { %612 = vmatprep.subr.mxu1 %v528_v4 }
 0x29b   :  { %613 = vmatpush1.msra.mxu1 %v527_v5 }
 0x29c   :  { %614 = vmatprep.subr.mxu1 %v524_v6 }
 0x29d   :  { %615 = vmatpush1.msra.mxu1 %v523_v7 }
 0x29e   :  { %616 = vmatprep.subr.mxu1 %v520_v8 }
 0x29f   :  { %617 = vmatpush1.msra.mxu1 %v519_v9 }
 0x2a0   :  { %618 = vmatprep.subr.mxu1 %v516_v10 }
 0x2a1   :  { %619 = vmatpush1.msra.mxu1 %v515_v11 }
 0x2a2   :  { %620 = vmatprep.subr.mxu1 %v512_v12 }
 0x2a3   :  { %621 = vmatpush1.msra.mxu1 %v511_v13 }
 0x2a4   :  { %622 = vmatprep.subr.mxu1 %v508_v0 }
 0x2a5   :  { %623 = vmatpush1.msra.mxu1 %v507_v14 }
 0x2a6   :  { %624 = vmatprep.subr.mxu1 %v504_v15 }
 0x2a7   :  { %625 = vmatpush1.msra.mxu1 %v503_v16 }
 0x2a8   :  { %626 = vmatprep.subr.mxu1 %v500_v17 }
 0x2a9   :  { %627 = vmatpush1.msra.mxu1 %v499_v18 }
 0x2aa   :  { %628 = vmatprep.subr.mxu1 %v496_v19 }
 0x2ab   :  { %629 = vmatpush1.msra.mxu1 %v495_v20 }
 0x2ac   :  { %630 = vmatprep.subr.mxu1 %v492_v21 }
 0x2ad   :  { %631 = vmatpush1.msra.mxu1 %v491_v22 }
 0x2ae   :  { %632 = vmatprep.subr.mxu1 %v488_v23 }
 0x2af   :  { %633 = vmatpush1.msra.mxu1 %v487_v24 }
 0x2b0   :  { %634 = vmatprep.subr.mxu1 %v484_v25 }
 0x2b1   :  { %635 = vmatpush1.msra.mxu1 %v483_v26 }
 0x2b2   :  { %636 = vmatprep.subr.mxu1 %v480_v27 }
 0x2b3   :  { %637 = vmatpush1.msra.mxu1 %v479_v29 }
 0x2b4   :  { %638 = vmatprep.subr.mxu1 %v476_v31 }
 0x2b5   :  { %639 = vmatpush1.msra.mxu1 %v475_v33 }
 0x356   :  { %v469_v35 = vpop.f32.mrf.mxu1 }
 0x357   :  { %v470_v36 = vadd.f32 %v693_v34, %v469_v35 }
 0x358   :  { %v902_v37 = vpop.f32.mrf.mxu1 }
 0x359   :  { %602 = vmatmul.mubr.f32.vlgmr.msra.gmra.mxu0 %v470_v36  ;;  %673 = vmatmul.mubr.f32.vlgmr.msra.gmra.mxu1 %v470_v36 }
 0x419   :  { %v603_v38 = vpop.f32.mrf.mxu0  ;;  %v674_v39 = vpop.f32.mrf.mxu1 }
 0x41a   :  { %v694_v40 = vadd.f32 -9.446281, %v603_v38  ;;  %682 = vst [vmem:[%s1359_s11 + $0x10] sm:$0xff] %v674_v39 }
 0x41b   :  { %v605_v41 = vpop.f32.mrf.mxu0  ;;  %v676_v42 = vpop.f32.mrf.mxu1 }
 0x41c   :  { %680 = vst [vmem:[%s1359_s11] sm:$0xff] %v694_v40  ;;  %681 = vst [vmem:[%s1359_s11 + $0x8] sm:$0xff] %v605_v41 }
 0x41d   :  { %683 = vst [vmem:[%s1359_s11 + $0x18] sm:$0xff] %v676_v42 }
 0x41e   :  { %688 = vsyncpa [#allocation3], 1 }
 0x41f   :  { %689 = vsyncpa [#allocation5], 1 }

// kernel: cmbps_forward.3
= control target key start
LH: loop header
LB: loop body
LE: loop exit
PB: predicated region body
PF: predicated region fallthrough
CT: control target
= control target key end

     0   :  { %8 = vsyncpa [#allocation3], 0  ;;  %s15519_s0 = inlined_call_operand.hbm [shape: s32[1,65536], index: 0, kind: input, shape index: {}]   ;;  %s15520_s1 = inlined_call_operand.hbm [shape: f32[1,65536], index: 1, kind: input, shape index: {}]   ;;  %s15521_s2 = inlined_call_operand.vmem [shape: f32[32,128], index: 2, kind: input, shape index: {}]   ;;  %s15522_s3 = inlined_call_operand.vmem [shape: f32[8,65536], index: 3, kind: output, shape index: {}]  }
   0x1   :  { %10 = vsyncpa [#allocation3 + $0x1], 0 }
   0x2   :  { %11 = vsyncpa [#allocation5], 0 }
   0x3   :  { %13 = vsyncpa [#allocation5 + $0x1], 0  ;;  %s9814_s12 = smov 0   ;;  %s9816_s13 = smov 0  }
   0x4   :  { %s9818_s14 = smov 0   ;;  %s9820_s15 = smov 0  }
   0x5 LB: > { %s7437_s16 = sadd.s32 4294967295, %s9788_s15   ;;  %s9834_s17 = sadd.s32 1, %s9788_s15   ;;  %s9788_s15 = sphi %s9820_s15, %s15534_s15   ;;  %s9784_s14 = sphi %s9818_s14, %s15533_s14   ;;  %s9780_s13 = sphi %s9816_s13, %s15532_s13   ;;  %s9776_s12 = sphi %s9814_s12, %s15531_s12  }
   0x6   : > { %s23_s18 = ssub.s32 %s9788_s15, %s9834_s17  ;;  %s26_s19 = sadd.s32 1, %s9784_s14 }
   0x7   : > { %p24_p0 = scmp.eq.s32.totalorder %s23_s18, 0  ;;  %p33_p1 = scmp.ne.s32.totalorder %s9784_s14, %s9780_s13 }
   0x8   : > { %p34_p2 = scmp.eq.s32.totalorder %s9788_s15, 0  ;;  %p39_p3 = scmp.ne.s32.totalorder %s9780_s13, %s9776_s12 }
   0x9   : > { %s9844_s20 = scalar_select %p24_p0, %s9784_s14, %s26_s19  }
   0xa   : > { %p35_p4 = por %p34_p2, %p33_p1  ;;  %p40_p5 = scmp.eq.s32.totalorder %s7437_s16, 0 }
   0xb   : > { %p9515_p6 = scmp.lt.s32.totalorder %s9788_s15, 8  ;;  %s9854_s22 = sand.u32 1, %s9784_s14  }
   0xc   : > { %p9849_p7 = por %p40_p5, %p39_p3  ;;  %s7441_s23 = sshll.u32 %s9854_s22, 6 }
   0xd   : > { %s9502_s24 = sshll.u32 %s9788_s15, 10  ;;  %s143_s28 = scalar_lea.vmem [#allocation2], %s7441_s23 }
   0xe   : > { %s15524_s21 = scalar_select %p9849_p7, 1, 0 }
   0xf   : > { %s9863_s27 = scalar_lea.hbm %s15519_s0, %s9502_s24  ;;  %s151_s29 = sshll.u32 %s143_s28, 4  ;;  %s9867_s29 = int_to_ptr.vmem [resolvable:$true] %s151_s29 }
  0x10   : > { %p9869_p8 = pnand %p9515_p6, %p35_p4  ;;  %s140_s4 = scalar_lea.sflag [#allocation3], %s9854_s22 }
  0x11   : > { %s9694_s5 = scalar_lea.hbm %s9863_s27, 1024  ;;  %s9699_s8 = scalar_lea.hbm %s15519_s0, 8192 }
  0x12   : > { %p9695_p11 = scmp.ne.s32.totalorder %s9863_s27, %s9694_s5  ;;  %p9696_p12 = pneg %p9869_p8 }
  0x13   : > { %p9700_p1 = scmp.lt.s32.totalorder %s9863_s27, %s15519_s0  ;;  %p9701_p2 = scmp.lt.s32.totalorder %s9699_s8, %s9694_s5 }
  0x14   : > { %p9697_p13 = pnand %p9696_p12, %p9695_p11 }
  0x15   : > { %p9702_p3 = por %p9701_p2, %p9700_p1 }
  0x16   : > { %p9698_p0 = pneg %p9697_p13 }
  0x18   : > { %p9703_p4 = pnand %p9702_p3, %p9698_p0 }
  0x1a   : > { %9706 = shalt.err (!%p9703_p4)
}
  0x1b   : > { %s9707_s11 = scalar_lea.vmem %s9867_s29, 1024  ;;  %s9790_s12 = smov [#allocation2]  }
  0x1c   : > { %p9708_p5 = scmp.ne.s32.totalorder %s9867_s29, %s9707_s11  ;;  %s9712_s18 = sshll.u32 %s9790_s12, 4  ;;  %s9713_s18 = int_to_ptr.vmem [resolvable:$false] %s9712_s18 }
  0x1d   : > { %s9714_s19 = scalar_lea.vmem %s9713_s18, 2048  ;;  %p9715_p13 = scmp.lt.s32.totalorder %s9867_s29, %s9713_s18 }
  0x1e   : > { %p9710_p6 = pnand %p9708_p5, %p9696_p12  ;;  %p9716_p9 = scmp.lt.s32.totalorder %s9714_s19, %s9707_s11 }
  0x20   : > { %p9711_p11 = pneg %p9710_p6  ;;  %p9717_p10 = por %p9716_p9, %p9715_p13 }
  0x22   : > { %p9718_p1 = pnand %p9717_p10, %p9711_p11 }
  0x24   : > { %9721 = shalt.err (!%p9718_p1)
}
  0x25   : > { %9511 = dma.hbm_to_vmem [thread:$0]  (!%p9869_p8), %s9863_s27, 1024, %s9867_s29, %s140_s4  }
  0x26   : > { %p15526_p0 = scmp.lt.s32.totalorder %s9788_s15, 9  ;;  %p15527_p2 = scmp.ge.s32.totalorder %s9788_s15, 1 }
  0x27   : > { %s9913_s5 = scalar_lea.hbm %s15520_s1, %s9502_s24  ;;  %s162_s6 = scalar_lea.vmem [#allocation4], %s7441_s23 }
  0x28   : > { %p9904_p3 = pnand %p15527_p2, %p15526_p0  ;;  %s170_s7 = sshll.u32 %s162_s6, 4  ;;  %s171_s7 = int_to_ptr.vmem [resolvable:$true] %s170_s7 }
  0x29   : > { %s159_s27 = scalar_lea.sflag [#allocation5], %s9854_s22  ;;  %s9722_s29 = scalar_lea.hbm %s9913_s5, 1024 }
  0x2a   : > { %s15528_s25 = scalar_select %p9904_p3, 1, 0 }
  0x2b   : > { %p9723_p9 = scmp.ne.s32.totalorder %s9913_s5, %s9722_s29  ;;  %s9727_s9 = scalar_lea.hbm %s15520_s1, 8192 }
  0x2c   : > { %p9728_p5 = scmp.lt.s32.totalorder %s9913_s5, %s15520_s1  ;;  %p9729_p6 = scmp.lt.s32.totalorder %s9727_s9, %s9722_s29 }
  0x2d   : > { %p9725_p10 = pnand %p9723_p9, %p9696_p12 }
  0x2e   : > { %p9730_p11 = por %p9729_p6, %p9728_p5 }
  0x2f   : > { %p9726_p4 = pneg %p9725_p10 }
  0x31   : > { %p9731_p13 = pnand %p9730_p11, %p9726_p4 }
  0x33   : > { %9734 = shalt.err (!%p9731_p13)
}
  0x34   : > { %s9735_s23 = scalar_lea.vmem %s171_s7, 1024  ;;  %s9791_s22 = smov [#allocation4]  }
  0x35   : > { %p9736_p1 = scmp.ne.s32.totalorder %s171_s7, %s9735_s23  ;;  %s9740_s11 = sshll.u32 %s9791_s22, 4  ;;  %s9741_s11 = int_to_ptr.vmem [resolvable:$false] %s9740_s11 }
  0x36   : > { %s9742_s12 = scalar_lea.vmem %s9741_s11, 2048  ;;  %p9743_p9 = scmp.lt.s32.totalorder %s171_s7, %s9741_s11 }
  0x37   : > { %p9738_p0 = pnand %p9736_p1, %p9696_p12  ;;  %p9744_p10 = scmp.lt.s32.totalorder %s9742_s12, %s9735_s23 }
  0x39   : > { %p9739_p2 = pneg %p9738_p0  ;;  %p9745_p7 = por %p9744_p10, %p9743_p9 }
  0x3b   : > { %p9746_p3 = pnand %p9745_p7, %p9739_p2 }
  0x3d   : > { %9749 = shalt.err (!%p9746_p3)
}
  0x3e   : > { %9514 = dma.hbm_to_vmem [thread:$0]  (!%p9869_p8), %s9913_s5, 1024, %s171_s7, %s159_s27  }
  0x3f   : > { %p15529_p4 = scmp.ne.s32.totalorder %s15528_s25, 0 }
  0x40   : > { %s181_s18 = sand.u32 (!%p15529_p4), 1, %s9780_s13   ;;  %p15530_p12 = scmp.ne.s32.totalorder (!%p15529_p4), %s15524_s21, 0 }
  0x41   : > { %179 = sbr.rel (%p15529_p4) target bundleno = 951 (0x3b7), region = 32  ;;  %s7448_s19 = sshll.u32 (!%p15529_p4), %s181_s18, 6 }
  0x42   : > { %s182_s26 = scalar_lea.sflag (!%p15529_p4), [#allocation3], %s181_s18  ;;  %s9939_s28 = scalar_lea.vmem (!%p15529_p4), [#allocation2], %s7448_s19 }
  0x46   : > { %9767 = dma.done.wait (%p15530_p12), %s182_s26, 1024  }
  0x47   : > { %9769 = vsyncadd (%p15530_p12), %s182_s26, 4294966272  ;;  %s191_s6 = scalar_lea.sflag [#allocation5], %s181_s18  ;;  %s9945_s30 = scalar_lea.vmem [#allocation4], %s7448_s19 }
  0x48   : > { %9771 = dma.done.wait (%p15530_p12), %s191_s6, 1024  }
  0x49   : > { %9773 = vsyncadd (%p15530_p12), %s191_s6, 4294966272  ;;  %v246_v0 = vlaneseq  ;;  %v9792_v1 = vmov 0.0   ;;  %v9971_v8 = vld [vmem:[%s9939_s28] sm:$0xff]  ;;  %v9793_v16 = vmov 1.0   ;;  %v10292_v37 = vld [vmem:[%s15521_s2 + $0x8] sm:$0xff]  ;;  %s11688_s19 = sshll.u32 %s7437_s16, 6 }
  0x4a   : > { %3659 = vmatprep.mubr.f32.mxu0 %v9792_v1  ;;  %3748 = vmatprep.mubr.f32.mxu1 %v9792_v1  ;;  %v10259_v36 = vld [vmem:[%s15521_s2] sm:$0xff]  ;;  %v10325_v38 = vld [vmem:[%s15521_s2 + $0x10] sm:$0xff]  ;;  %v10358_v39 = vld [vmem:[%s15521_s2 + $0x18] sm:$0xff]  ;;  %p225_p7 = scmp.lt.s32.totalorder %s11688_s19, 511 }
  0x4b   : > { %v9953_v2 = vshrl.u32 %v246_v0, 7  ;;  %v10451_v40 = vld [vmem:[%s9939_s28 + $0x8] sm:$0xff]  ;;  %v10902_v49 = vld [vmem:[%s9939_s28 + $0x10] sm:$0xff]  ;;  %v11193_v58 = vld [vmem:[%s15521_s2] sm:$0xff] }
  0x4c   : > { %v11226_v59 = vld [vmem:[%s15521_s2 + $0x8] sm:$0xff]  ;;  %v11259_v60 = vld [vmem:[%s15521_s2 + $0x10] sm:$0xff]  ;;  %v11292_v61 = vld [vmem:[%s15521_s2 + $0x18] sm:$0xff]  ;;  %s15536_s19 = smov (!%p225_p7, %s11688_s19), 511 }
  0x4d   : > { %v9956_v3 = vsub.s32 1, %v9953_v2  ;;  %v9959_v4 = vsub.s32 3, %v9953_v2  ;;  %v9962_v5 = vsub.s32 0, %v9953_v2  ;;  %v9965_v6 = vsub.s32 2, %v9953_v2  ;;  %v11379_v62 = vld [vmem:[%s9939_s28 + $0x18] sm:$0xff]  ;;  %s7451_s15 = sshll.u32 %s15536_s19, 3 }
  0x4e   : > { %v9968_v7 = vadd.s32 120, %v9953_v2  ;;  %v9974_v9 = vadd.s32 112, %v9953_v2  ;;  %v9977_v10 = vadd.s32 104, %v9953_v2  ;;  %v9996_v15 = vadd.s32 96, %v9953_v2  ;;  %s11853_s6 = scalar_lea.vmem %s15522_s3, %s7451_s15 }
  0x4f   : > { %v9981_v11 = vrot.slane %v9971_v8, %v9956_v3  ;;  %v9985_v12 = vrot.slane %v9971_v8, %v9959_v4  ;;  %v9989_v13 = vrot.slane %v9971_v8, %v9962_v5  ;;  %v9993_v14 = vrot.slane %v9971_v8, %v9965_v6 }
  0x50   : > { %v10023_v17 = vadd.s32 88, %v9953_v2  ;;  %v10038_v18 = vadd.s32 80, %v9953_v2  ;;  %v10053_v19 = vadd.s32 72, %v9953_v2  ;;  %v10068_v20 = vadd.s32 64, %v9953_v2 }
  0x51   : > { %vm1480_vm0 = vcmp.eq.s32.totalorder %v9968_v7, %v9981_v11  ;;  %vm1482_vm1 = vcmp.eq.s32.totalorder %v9968_v7, %v9985_v12  ;;  %vm1479_vm2 = vcmp.eq.s32.totalorder %v9968_v7, %v9989_v13  ;;  %vm1481_vm3 = vcmp.eq.s32.totalorder %v9968_v7, %v9993_v14 }
  0x52   : > { %8476 = vmatprep.subr.msk.mxu0 %vm1480_vm0, %v9793_v16  ;;  %8508 = vmatprep.subr.msk.mxu1 %vm1482_vm1, %v9793_v16  ;;  %vm1416_vm4 = vcmp.eq.s32.totalorder %v9974_v9, %v9981_v11  ;;  %vm1418_vm5 = vcmp.eq.s32.totalorder %v9974_v9, %v9985_v12  ;;  %vm1415_vm6 = vcmp.eq.s32.totalorder %v9974_v9, %v9989_v13  ;;  %v10083_v21 = vadd.s32 56, %v9953_v2 }
  0x53   : > { %8477 = vmatpush1.msk.msra.mxu0 %vm1479_vm2, %v9793_v16  ;;  %8509 = vmatpush1.msk.msra.mxu1 %vm1481_vm3, %v9793_v16  ;;  %vm1417_vm7 = vcmp.eq.s32.totalorder %v9974_v9, %v9993_v14  ;;  %vm1352_vm8 = vcmp.eq.s32.totalorder %v9977_v10, %v9981_v11  ;;  %vm1354_vm9 = vcmp.eq.s32.totalorder %v9977_v10, %v9985_v12  ;;  %v10098_v22 = vadd.s32 48, %v9953_v2 }
  0x54   : > { %8478 = vmatprep.subr.msk.mxu0 %vm1416_vm4, %v9793_v16  ;;  %8510 = vmatprep.subr.msk.mxu1 %vm1418_vm5, %v9793_v16  ;;  %vm1351_vm10 = vcmp.eq.s32.totalorder %v9977_v10, %v9989_v13  ;;  %vm1353_vm11 = vcmp.eq.s32.totalorder %v9977_v10, %v9993_v14  ;;  %vm1288_vm12 = vcmp.eq.s32.totalorder %v9996_v15, %v9981_v11  ;;  %v10113_v23 = vadd.s32 40, %v9953_v2 }
  0x55   : > { %8479 = vmatpush1.msk.msra.mxu0 %vm1415_vm6, %v9793_v16  ;;  %8511 = vmatpush1.msk.msra.mxu1 %vm1417_vm7, %v9793_v16  ;;  %vm1290_vm13 = vcmp.eq.s32.totalorder %v9996_v15, %v9985_v12  ;;  %vm1287_vm14 = vcmp.eq.s32.totalorder %v9996_v15, %v9989_v13  ;;  %vm1289_vm15 = vcmp.eq.s32.totalorder %v9996_v15, %v9993_v14  ;;  %v10128_v24 = vadd.s32 32, %v9953_v2 }
  0x56   : > { %8480 = vmatprep.subr.msk.mxu0 %vm1352_vm8, %v9793_v16  ;;  %8512 = vmatprep.subr.msk.mxu1 %vm1354_vm9, %v9793_v16  ;;  %vm1224_vm0 = vcmp.eq.s32.totalorder %v10023_v17, %v9981_v11  ;;  %vm1226_vm1 = vcmp.eq.s32.totalorder %v10023_v17, %v9985_v12  ;;  %vm1223_vm2 = vcmp.eq.s32.totalorder %v10023_v17, %v9989_v13  ;;  %v10143_v25 = vadd.s32 24, %v9953_v2 }
  0x57   : > { %8481 = vmatpush1.msk.msra.mxu0 %vm1351_vm10, %v9793_v16  ;;  %8513 = vmatpush1.msk.msra.mxu1 %vm1353_vm11, %v9793_v16  ;;  %vm1225_vm3 = vcmp.eq.s32.totalorder %v10023_v17, %v9993_v14  ;;  %vm1160_vm4 = vcmp.eq.s32.totalorder %v10038_v18, %v9981_v11  ;;  %vm1162_vm5 = vcmp.eq.s32.totalorder %v10038_v18, %v9985_v12  ;;  %v10158_v26 = vadd.s32 16, %v9953_v2 }
  0x58   : > { %8482 = vmatprep.subr.msk.mxu0 %vm1288_vm12, %v9793_v16  ;;  %8514 = vmatprep.subr.msk.mxu1 %vm1290_vm13, %v9793_v16  ;;  %vm1159_vm6 = vcmp.eq.s32.totalorder %v10038_v18, %v9989_v13  ;;  %vm1161_vm7 = vcmp.eq.s32.totalorder %v10038_v18, %v9993_v14  ;;  %vm1096_vm8 = vcmp.eq.s32.totalorder %v10053_v19, %v9981_v11  ;;  %v10167_v27 = vadd.s32 8, %v9953_v2 }
  0x59   : > { %8483 = vmatpush1.msk.msra.mxu0 %vm1287_vm14, %v9793_v16  ;;  %8515 = vmatpush1.msk.msra.mxu1 %vm1289_vm15, %v9793_v16  ;;  %vm1098_vm9 = vcmp.eq.s32.totalorder %v10053_v19, %v9985_v12  ;;  %vm1095_vm10 = vcmp.eq.s32.totalorder %v10053_v19, %v9989_v13  ;;  %vm1097_vm11 = vcmp.eq.s32.totalorder %v10053_v19, %v9993_v14  ;;  %v10182_v28 = vsub.s32 5, %v9953_v2 }
  0x5a   : > { %8484 = vmatprep.subr.msk.mxu0 %vm1224_vm0, %v9793_v16  ;;  %8516 = vmatprep.subr.msk.mxu1 %vm1226_vm1, %v9793_v16  ;;  %vm1032_vm12 = vcmp.eq.s32.totalorder %v10068_v20, %v9981_v11  ;;  %vm1034_vm13 = vcmp.eq.s32.totalorder %v10068_v20, %v9985_v12  ;;  %vm1031_vm14 = vcmp.eq.s32.totalorder %v10068_v20, %v9989_v13  ;;  %v10185_v29 = vsub.s32 7, %v9953_v2 }
  0x5b   : > { %8485 = vmatpush1.msk.msra.mxu0 %vm1223_vm2, %v9793_v16  ;;  %8517 = vmatpush1.msk.msra.mxu1 %vm1225_vm3, %v9793_v16  ;;  %vm1033_vm15 = vcmp.eq.s32.totalorder %v10068_v20, %v9993_v14  ;;  %vm968_vm0 = vcmp.eq.s32.totalorder %v10083_v21, %v9981_v11  ;;  %vm970_vm1 = vcmp.eq.s32.totalorder %v10083_v21, %v9985_v12  ;;  %v10194_v30 = vsub.s32 4, %v9953_v2 }
  0x5c   : > { %8486 = vmatprep.subr.msk.mxu0 %vm1160_vm4, %v9793_v16  ;;  %8518 = vmatprep.subr.msk.mxu1 %vm1162_vm5, %v9793_v16  ;;  %vm967_vm2 = vcmp.eq.s32.totalorder %v10083_v21, %v9989_v13  ;;  %vm969_vm3 = vcmp.eq.s32.totalorder %v10083_v21, %v9993_v14  ;;  %vm904_vm4 = vcmp.eq.s32.totalorder %v10098_v22, %v9981_v11  ;;  %v10197_v31 = vsub.s32 6, %v9953_v2 }
  0x5d   : > { %8487 = vmatpush1.msk.msra.mxu0 %vm1159_vm6, %v9793_v16  ;;  %8519 = vmatpush1.msk.msra.mxu1 %vm1161_vm7, %v9793_v16  ;;  %vm906_vm5 = vcmp.eq.s32.totalorder %v10098_v22, %v9985_v12  ;;  %vm903_vm6 = vcmp.eq.s32.totalorder %v10098_v22, %v9989_v13  ;;  %vm905_vm7 = vcmp.eq.s32.totalorder %v10098_v22, %v9993_v14 }
  0x5e   : > { %8488 = vmatprep.subr.msk.mxu0 %vm1096_vm8, %v9793_v16  ;;  %8520 = vmatprep.subr.msk.mxu1 %vm1098_vm9, %v9793_v16  ;;  %vm840_vm8 = vcmp.eq.s32.totalorder %v10113_v23, %v9981_v11  ;;  %vm842_vm9 = vcmp.eq.s32.totalorder %v10113_v23, %v9985_v12  ;;  %v10221_v32 = vrot.slane %v9971_v8, %v10182_v28 }
  0x5f   : > { %8489 = vmatpush1.msk.msra.mxu0 %vm1095_vm10, %v9793_v16  ;;  %8521 = vmatpush1.msk.msra.mxu1 %vm1097_vm11, %v9793_v16  ;;  %vm839_vm10 = vcmp.eq.s32.totalorder %v10113_v23, %v9989_v13  ;;  %vm841_vm11 = vcmp.eq.s32.totalorder %v10113_v23, %v9993_v14  ;;  %v10225_v33 = vrot.slane %v9971_v8, %v10185_v29 }
  0x60   : > { %8490 = vmatprep.subr.msk.mxu0 %vm1032_vm12, %v9793_v16  ;;  %8522 = vmatprep.subr.msk.mxu1 %vm1034_vm13, %v9793_v16  ;;  %vm776_vm12 = vcmp.eq.s32.totalorder %v10128_v24, %v9981_v11  ;;  %vm778_vm13 = vcmp.eq.s32.totalorder %v10128_v24, %v9985_v12  ;;  %v10233_v34 = vrot.slane %v9971_v8, %v10194_v30 }
  0x61   : > { %8491 = vmatpush1.msk.msra.mxu0 %vm1031_vm14, %v9793_v16  ;;  %8523 = vmatpush1.msk.msra.mxu1 %vm1033_vm15, %v9793_v16  ;;  %vm775_vm14 = vcmp.eq.s32.totalorder %v10128_v24, %v9989_v13  ;;  %vm777_vm15 = vcmp.eq.s32.totalorder %v10128_v24, %v9993_v14  ;;  %v10237_v35 = vrot.slane %v9971_v8, %v10197_v31 }
  0x62   : > { %8492 = vmatprep.subr.msk.mxu0 %vm968_vm0, %v9793_v16  ;;  %8524 = vmatprep.subr.msk.mxu1 %vm970_vm1, %v9793_v16  ;;  %vm712_vm0 = vcmp.eq.s32.totalorder %v10143_v25, %v9981_v11  ;;  %vm714_vm1 = vcmp.eq.s32.totalorder %v10143_v25, %v9985_v12  ;;  %v10473_v41 = vrot.slane %v10451_v40, %v9956_v3 }
  0x63   : > { %8493 = vmatpush1.msk.msra.mxu0 %vm967_vm2, %v9793_v16  ;;  %8525 = vmatpush1.msk.msra.mxu1 %vm969_vm3, %v9793_v16  ;;  %vm711_vm2 = vcmp.eq.s32.totalorder %v10143_v25, %v9989_v13  ;;  %vm713_vm3 = vcmp.eq.s32.totalorder %v10143_v25, %v9993_v14  ;;  %v10483_v42 = vrot.slane %v10451_v40, %v9959_v4 }
  0x64   : > { %8494 = vmatprep.subr.msk.mxu0 %vm904_vm4, %v9793_v16  ;;  %8526 = vmatprep.subr.msk.mxu1 %vm906_vm5, %v9793_v16  ;;  %vm648_vm4 = vcmp.eq.s32.totalorder %v10158_v26, %v9981_v11  ;;  %vm650_vm5 = vcmp.eq.s32.totalorder %v10158_v26, %v9985_v12  ;;  %v10491_v43 = vrot.slane %v10451_v40, %v9962_v5 }
  0x65   : > { %8495 = vmatpush1.msk.msra.mxu0 %vm903_vm6, %v9793_v16  ;;  %8527 = vmatpush1.msk.msra.mxu1 %vm905_vm7, %v9793_v16  ;;  %vm647_vm6 = vcmp.eq.s32.totalorder %v10158_v26, %v9989_v13  ;;  %vm649_vm7 = vcmp.eq.s32.totalorder %v10158_v26, %v9993_v14  ;;  %v10495_v44 = vrot.slane %v10451_v40, %v9965_v6 }
  0x66   : > { %8496 = vmatprep.subr.msk.mxu0 %vm840_vm8, %v9793_v16  ;;  %8528 = vmatprep.subr.msk.mxu1 %vm842_vm9, %v9793_v16  ;;  %vm584_vm8 = vcmp.eq.s32.totalorder %v10167_v27, %v9981_v11  ;;  %vm586_vm9 = vcmp.eq.s32.totalorder %v10167_v27, %v9985_v12  ;;  %v10703_v45 = vrot.slane %v10451_v40, %v10182_v28 }
  0x67   : > { %8497 = vmatpush1.msk.msra.mxu0 %vm839_vm10, %v9793_v16  ;;  %8529 = vmatpush1.msk.msra.mxu1 %vm841_vm11, %v9793_v16  ;;  %vm583_vm10 = vcmp.eq.s32.totalorder %v10167_v27, %v9989_v13  ;;  %vm585_vm11 = vcmp.eq.s32.totalorder %v10167_v27, %v9993_v14  ;;  %v10707_v46 = vrot.slane %v10451_v40, %v10185_v29 }
  0x68   : > { %8498 = vmatprep.subr.msk.mxu0 %vm776_vm12, %v9793_v16  ;;  %8530 = vmatprep.subr.msk.mxu1 %vm778_vm13, %v9793_v16  ;;  %vm520_vm12 = vcmp.eq.s32.totalorder %v9953_v2, %v9981_v11  ;;  %vm522_vm13 = vcmp.eq.s32.totalorder %v9953_v2, %v9985_v12  ;;  %v10715_v47 = vrot.slane %v10451_v40, %v10194_v30 }
  0x69   : > { %8499 = vmatpush1.msk.msra.mxu0 %vm775_vm14, %v9793_v16  ;;  %8531 = vmatpush1.msk.msra.mxu1 %vm777_vm15, %v9793_v16  ;;  %vm519_vm14 = vcmp.eq.s32.totalorder %v9953_v2, %v9989_v13  ;;  %vm521_vm15 = vcmp.eq.s32.totalorder %v9953_v2, %v9993_v14  ;;  %v10719_v48 = vrot.slane %v10451_v40, %v10197_v31 }
  0x6a   : > { %8500 = vmatprep.subr.msk.mxu0 %vm712_vm0, %v9793_v16  ;;  %8532 = vmatprep.subr.msk.mxu1 %vm714_vm1, %v9793_v16  ;;  %vm1484_vm0 = vcmp.eq.s32.totalorder %v9968_v7, %v10221_v32  ;;  %vm1486_vm1 = vcmp.eq.s32.totalorder %v9968_v7, %v10225_v33  ;;  %v10924_v50 = vrot.slane %v10902_v49, %v9956_v3 }
  0x6b   : > { %8501 = vmatpush1.msk.msra.mxu0 %vm711_vm2, %v9793_v16  ;;  %8533 = vmatpush1.msk.msra.mxu1 %vm713_vm3, %v9793_v16  ;;  %vm1483_vm2 = vcmp.eq.s32.totalorder %v9968_v7, %v10233_v34  ;;  %vm1485_vm3 = vcmp.eq.s32.totalorder %v9968_v7, %v10237_v35  ;;  %v10934_v51 = vrot.slane %v10902_v49, %v9959_v4 }
  0x6c   : > { %8502 = vmatprep.subr.msk.mxu0 %vm648_vm4, %v9793_v16  ;;  %8534 = vmatprep.subr.msk.mxu1 %vm650_vm5, %v9793_v16  ;;  %vm1420_vm4 = vcmp.eq.s32.totalorder %v9974_v9, %v10221_v32  ;;  %vm1422_vm5 = vcmp.eq.s32.totalorder %v9974_v9, %v10225_v33  ;;  %v10942_v52 = vrot.slane %v10902_v49, %v9962_v5 }
  0x6d   : > { %8503 = vmatpush1.msk.msra.mxu0 %vm647_vm6, %v9793_v16  ;;  %8535 = vmatpush1.msk.msra.mxu1 %vm649_vm7, %v9793_v16  ;;  %vm1419_vm6 = vcmp.eq.s32.totalorder %v9974_v9, %v10233_v34  ;;  %vm1421_vm7 = vcmp.eq.s32.totalorder %v9974_v9, %v10237_v35  ;;  %v10946_v53 = vrot.slane %v10902_v49, %v9965_v6 }
  0x6e   : > { %8504 = vmatprep.subr.msk.mxu0 %vm584_vm8, %v9793_v16  ;;  %8536 = vmatprep.subr.msk.mxu1 %vm586_vm9, %v9793_v16  ;;  %vm1356_vm8 = vcmp.eq.s32.totalorder %v9977_v10, %v10221_v32  ;;  %vm1358_vm9 = vcmp.eq.s32.totalorder %v9977_v10, %v10225_v33  ;;  %v11154_v54 = vrot.slane %v10902_v49, %v10182_v28 }
  0x6f   : > { %8505 = vmatpush1.msk.msra.mxu0 %vm583_vm10, %v9793_v16  ;;  %8537 = vmatpush1.msk.msra.mxu1 %vm585_vm11, %v9793_v16  ;;  %vm1355_vm10 = vcmp.eq.s32.totalorder %v9977_v10, %v10233_v34  ;;  %vm1357_vm11 = vcmp.eq.s32.totalorder %v9977_v10, %v10237_v35  ;;  %v11158_v55 = vrot.slane %v10902_v49, %v10185_v29 }
  0x70   : > { %8506 = vmatprep.subr.msk.mxu0 %vm520_vm12, %v9793_v16  ;;  %8538 = vmatprep.subr.msk.mxu1 %vm522_vm13, %v9793_v16  ;;  %vm1292_vm12 = vcmp.eq.s32.totalorder %v9996_v15, %v10221_v32  ;;  %vm1294_vm13 = vcmp.eq.s32.totalorder %v9996_v15, %v10225_v33  ;;  %v11166_v56 = vrot.slane %v10902_v49, %v10194_v30 }
  0x71   : > { %8507 = vmatpush1.msk.msra.mxu0 %vm519_vm14, %v9793_v16  ;;  %8539 = vmatpush1.msk.msra.mxu1 %vm521_vm15, %v9793_v16  ;;  %vm1291_vm14 = vcmp.eq.s32.totalorder %v9996_v15, %v10233_v34  ;;  %vm1293_vm15 = vcmp.eq.s32.totalorder %v9996_v15, %v10237_v35  ;;  %v11170_v57 = vrot.slane %v10902_v49, %v10197_v31 }
  0x72   : > { %3660 = vmatmul.mubr.f32.vlgmr.msra.gmra.mxu0 %v10259_v36  ;;  %3749 = vmatmul.mubr.f32.vlgmr.msra.gmra.mxu1 %v10259_v36  ;;  %v11405_v8 = vrot.slane %v11379_v62, %v9956_v3  ;;  %v11409_v11 = vrot.slane %v11379_v62, %v9959_v4  ;;  %v11427_v14 = vrot.slane %v11379_v62, %v9962_v5 }
  0x73   : > { %8540 = vmatprep.subr.msk.mxu0 %vm1484_vm0, %v9793_v16  ;;  %8572 = vmatprep.subr.msk.mxu1 %vm1486_vm1, %v9793_v16  ;;  %vm1228_vm0 = vcmp.eq.s32.totalorder %v10023_v17, %v10221_v32  ;;  %vm1230_vm1 = vcmp.eq.s32.totalorder %v10023_v17, %v10225_v33 }
  0x74   : > { %8541 = vmatpush1.msk.msra.mxu0 %vm1483_vm2, %v9793_v16  ;;  %8573 = vmatpush1.msk.msra.mxu1 %vm1485_vm3, %v9793_v16  ;;  %vm1227_vm2 = vcmp.eq.s32.totalorder %v10023_v17, %v10233_v34  ;;  %vm1229_vm3 = vcmp.eq.s32.totalorder %v10023_v17, %v10237_v35 }
  0x75   : > { %8542 = vmatprep.subr.msk.mxu0 %vm1420_vm4, %v9793_v16  ;;  %8574 = vmatprep.subr.msk.mxu1 %vm1422_vm5, %v9793_v16  ;;  %vm1164_vm4 = vcmp.eq.s32.totalorder %v10038_v18, %v10221_v32  ;;  %vm1166_vm5 = vcmp.eq.s32.totalorder %v10038_v18, %v10225_v33 }
  0x76   : > { %3665 = vmatprep.mubr.f32.mxu0 %v9792_v1  ;;  %3754 = vmatprep.mubr.f32.mxu1 %v9792_v1 }
  0x77   : > { %8543 = vmatpush1.msk.msra.mxu0 %vm1419_vm6, %v9793_v16  ;;  %8575 = vmatpush1.msk.msra.mxu1 %vm1421_vm7, %v9793_v16  ;;  %vm1163_vm6 = vcmp.eq.s32.totalorder %v10038_v18, %v10233_v34  ;;  %vm1165_vm7 = vcmp.eq.s32.totalorder %v10038_v18, %v10237_v35 }
  0x78   : > { %3666 = vmatmul.mubr.f32.gmra.mxu0 %v10292_v37  ;;  %3755 = vmatmul.mubr.f32.gmra.mxu1 %v10292_v37 }
  0x79   : > { %8544 = vmatprep.subr.msk.mxu0 %vm1356_vm8, %v9793_v16  ;;  %8576 = vmatprep.subr.msk.mxu1 %vm1358_vm9, %v9793_v16  ;;  %vm1100_vm8 = vcmp.eq.s32.totalorder %v10053_v19, %v10221_v32  ;;  %vm1102_vm9 = vcmp.eq.s32.totalorder %v10053_v19, %v10225_v33 }
  0x7a   : > { %8545 = vmatpush1.msk.msra.mxu0 %vm1355_vm10, %v9793_v16  ;;  %8577 = vmatpush1.msk.msra.mxu1 %vm1357_vm11, %v9793_v16  ;;  %vm1099_vm10 = vcmp.eq.s32.totalorder %v10053_v19, %v10233_v34  ;;  %vm1101_vm11 = vcmp.eq.s32.totalorder %v10053_v19, %v10237_v35 }
  0x7b   : > { %8546 = vmatprep.subr.msk.mxu0 %vm1292_vm12, %v9793_v16  ;;  %8578 = vmatprep.subr.msk.mxu1 %vm1294_vm13, %v9793_v16  ;;  %vm1036_vm12 = vcmp.eq.s32.totalorder %v10068_v20, %v10221_v32  ;;  %vm1038_vm13 = vcmp.eq.s32.totalorder %v10068_v20, %v10225_v33 }
  0x7c   : > { %3671 = vmatprep.mubr.f32.mxu0 %v9792_v1  ;;  %3760 = vmatprep.mubr.f32.mxu1 %v9792_v1 }
  0x7d   : > { %8547 = vmatpush1.msk.msra.mxu0 %vm1291_vm14, %v9793_v16  ;;  %8579 = vmatpush1.msk.msra.mxu1 %vm1293_vm15, %v9793_v16  ;;  %vm1035_vm14 = vcmp.eq.s32.totalorder %v10068_v20, %v10233_v34  ;;  %vm1037_vm15 = vcmp.eq.s32.totalorder %v10068_v20, %v10237_v35 }
  0x7e   : > { %3672 = vmatmul.mubr.f32.gmra.mxu0 %v10325_v38  ;;  %3761 = vmatmul.mubr.f32.gmra.mxu1 %v10325_v38 }
  0x7f   : > { %8548 = vmatprep.subr.msk.mxu0 %vm1228_vm0, %v9793_v16  ;;  %8580 = vmatprep.subr.msk.mxu1 %vm1230_vm1, %v9793_v16  ;;  %vm972_vm0 = vcmp.eq.s32.totalorder %v10083_v21, %v10221_v32  ;;  %vm974_vm1 = vcmp.eq.s32.totalorder %v10083_v21, %v10225_v33 }
  0x80   : > { %8549 = vmatpush1.msk.msra.mxu0 %vm1227_vm2, %v9793_v16  ;;  %8581 = vmatpush1.msk.msra.mxu1 %vm1229_vm3, %v9793_v16  ;;  %vm971_vm2 = vcmp.eq.s32.totalorder %v10083_v21, %v10233_v34  ;;  %vm973_vm3 = vcmp.eq.s32.totalorder %v10083_v21, %v10237_v35 }
  0x81   : > { %8550 = vmatprep.subr.msk.mxu0 %vm1164_vm4, %v9793_v16  ;;  %8582 = vmatprep.subr.msk.mxu1 %vm1166_vm5, %v9793_v16  ;;  %vm908_vm4 = vcmp.eq.s32.totalorder %v10098_v22, %v10221_v32  ;;  %vm910_vm5 = vcmp.eq.s32.totalorder %v10098_v22, %v10225_v33 }
  0x82   : > { %3677 = vmatprep.mubr.f32.mxu0 %v9792_v1  ;;  %3766 = vmatprep.mubr.f32.mxu1 %v9792_v1 }
  0x83   : > { %8551 = vmatpush1.msk.msra.mxu0 %vm1163_vm6, %v9793_v16  ;;  %8583 = vmatpush1.msk.msra.mxu1 %vm1165_vm7, %v9793_v16  ;;  %vm907_vm6 = vcmp.eq.s32.totalorder %v10098_v22, %v10233_v34  ;;  %vm909_vm7 = vcmp.eq.s32.totalorder %v10098_v22, %v10237_v35 }
  0x84   : > { %3678 = vmatmul.mubr.f32.gmra.mxu0 %v10358_v39  ;;  %3767 = vmatmul.mubr.f32.gmra.mxu1 %v10358_v39 }
  0x85   : > { %8552 = vmatprep.subr.msk.mxu0 %vm1100_vm8, %v9793_v16  ;;  %8584 = vmatprep.subr.msk.mxu1 %vm1102_vm9, %v9793_v16  ;;  %vm844_vm8 = vcmp.eq.s32.totalorder %v10113_v23, %v10221_v32  ;;  %vm846_vm9 = vcmp.eq.s32.totalorder %v10113_v23, %v10225_v33 }
  0x86   : > { %8553 = vmatpush1.msk.msra.mxu0 %vm1099_vm10, %v9793_v16  ;;  %8585 = vmatpush1.msk.msra.mxu1 %vm1101_vm11, %v9793_v16  ;;  %vm843_vm10 = vcmp.eq.s32.totalorder %v10113_v23, %v10233_v34  ;;  %vm845_vm11 = vcmp.eq.s32.totalorder %v10113_v23, %v10237_v35 }
  0x87   : > { %8554 = vmatprep.subr.msk.mxu0 %vm1036_vm12, %v9793_v16  ;;  %8586 = vmatprep.subr.msk.mxu1 %vm1038_vm13, %v9793_v16  ;;  %vm780_vm12 = vcmp.eq.s32.totalorder %v10128_v24, %v10221_v32  ;;  %vm782_vm13 = vcmp.eq.s32.totalorder %v10128_v24, %v10225_v33 }
  0x88   : > { %8555 = vmatpush1.msk.msra.mxu0 %vm1035_vm14, %v9793_v16  ;;  %8587 = vmatpush1.msk.msra.mxu1 %vm1037_vm15, %v9793_v16  ;;  %vm779_vm14 = vcmp.eq.s32.totalorder %v10128_v24, %v10233_v34  ;;  %vm781_vm15 = vcmp.eq.s32.totalorder %v10128_v24, %v10237_v35 }
  0x89   : > { %8556 = vmatprep.subr.msk.mxu0 %vm972_vm0, %v9793_v16  ;;  %8588 = vmatprep.subr.msk.mxu1 %vm974_vm1, %v9793_v16  ;;  %vm716_vm0 = vcmp.eq.s32.totalorder %v10143_v25, %v10221_v32  ;;  %vm718_vm1 = vcmp.eq.s32.totalorder %v10143_v25, %v10225_v33 }
  0x8a   : > { %8557 = vmatpush1.msk.msra.mxu0 %vm971_vm2, %v9793_v16  ;;  %8589 = vmatpush1.msk.msra.mxu1 %vm973_vm3, %v9793_v16  ;;  %vm715_vm2 = vcmp.eq.s32.totalorder %v10143_v25, %v10233_v34  ;;  %vm717_vm3 = vcmp.eq.s32.totalorder %v10143_v25, %v10237_v35 }
  0x8b   : > { %8558 = vmatprep.subr.msk.mxu0 %vm908_vm4, %v9793_v16  ;;  %8590 = vmatprep.subr.msk.mxu1 %vm910_vm5, %v9793_v16  ;;  %vm652_vm4 = vcmp.eq.s32.totalorder %v10158_v26, %v10221_v32  ;;  %vm654_vm5 = vcmp.eq.s32.totalorder %v10158_v26, %v10225_v33 }
  0x8c   : > { %8559 = vmatpush1.msk.msra.mxu0 %vm907_vm6, %v9793_v16  ;;  %8591 = vmatpush1.msk.msra.mxu1 %vm909_vm7, %v9793_v16  ;;  %vm651_vm6 = vcmp.eq.s32.totalorder %v10158_v26, %v10233_v34  ;;  %vm653_vm7 = vcmp.eq.s32.totalorder %v10158_v26, %v10237_v35 }
  0x8d   : > { %8560 = vmatprep.subr.msk.mxu0 %vm844_vm8, %v9793_v16  ;;  %8592 = vmatprep.subr.msk.mxu1 %vm846_vm9, %v9793_v16  ;;  %vm588_vm8 = vcmp.eq.s32.totalorder %v10167_v27, %v10221_v32  ;;  %vm590_vm9 = vcmp.eq.s32.totalorder %v10167_v27, %v10225_v33 }
  0x8e   : > { %8561 = vmatpush1.msk.msra.mxu0 %vm843_vm10, %v9793_v16  ;;  %8593 = vmatpush1.msk.msra.mxu1 %vm845_vm11, %v9793_v16  ;;  %vm587_vm10 = vcmp.eq.s32.totalorder %v10167_v27, %v10233_v34  ;;  %vm589_vm11 = vcmp.eq.s32.totalorder %v10167_v27, %v10237_v35 }
  0x8f   : > { %8562 = vmatprep.subr.msk.mxu0 %vm780_vm12, %v9793_v16  ;;  %8594 = vmatprep.subr.msk.mxu1 %vm782_vm13, %v9793_v16  ;;  %vm524_vm12 = vcmp.eq.s32.totalorder %v9953_v2, %v10221_v32  ;;  %vm526_vm13 = vcmp.eq.s32.totalorder %v9953_v2, %v10225_v33  ;;  %v11431_v32 = vrot.slane %v11379_v62, %v9965_v6 }
  0x90   : > { %8563 = vmatpush1.msk.msra.mxu0 %vm779_vm14, %v9793_v16  ;;  %8595 = vmatpush1.msk.msra.mxu1 %vm781_vm15, %v9793_v16  ;;  %vm523_vm14 = vcmp.eq.s32.totalorder %v9953_v2, %v10233_v34  ;;  %vm525_vm15 = vcmp.eq.s32.totalorder %v9953_v2, %v10237_v35 }
  0x91   : > { %8564 = vmatprep.subr.msk.mxu0 %vm716_vm0, %v9793_v16  ;;  %8596 = vmatprep.subr.msk.mxu1 %vm718_vm1, %v9793_v16  ;;  %vm1488_vm0 = vcmp.eq.s32.totalorder %v9968_v7, %v10473_v41  ;;  %vm1490_vm1 = vcmp.eq.s32.totalorder %v9968_v7, %v10483_v42 }
  0x92   : > { %8565 = vmatpush1.msk.msra.mxu0 %vm715_vm2, %v9793_v16  ;;  %8597 = vmatpush1.msk.msra.mxu1 %vm717_vm3, %v9793_v16  ;;  %vm1487_vm2 = vcmp.eq.s32.totalorder %v9968_v7, %v10491_v43  ;;  %vm1489_vm3 = vcmp.eq.s32.totalorder %v9968_v7, %v10495_v44 }
  0x93   : > { %8566 = vmatprep.subr.msk.mxu0 %vm652_vm4, %v9793_v16  ;;  %8598 = vmatprep.subr.msk.mxu1 %vm654_vm5, %v9793_v16  ;;  %vm1424_vm4 = vcmp.eq.s32.totalorder %v9974_v9, %v10473_v41  ;;  %vm1426_vm5 = vcmp.eq.s32.totalorder %v9974_v9, %v10483_v42 }
  0x94   : > { %8567 = vmatpush1.msk.msra.mxu0 %vm651_vm6, %v9793_v16  ;;  %8599 = vmatpush1.msk.msra.mxu1 %vm653_vm7, %v9793_v16  ;;  %vm1423_vm6 = vcmp.eq.s32.totalorder %v9974_v9, %v10491_v43  ;;  %vm1425_vm7 = vcmp.eq.s32.totalorder %v9974_v9, %v10495_v44 }
  0x95   : > { %8568 = vmatprep.subr.msk.mxu0 %vm588_vm8, %v9793_v16  ;;  %8600 = vmatprep.subr.msk.mxu1 %vm590_vm9, %v9793_v16  ;;  %vm1360_vm8 = vcmp.eq.s32.totalorder %v9977_v10, %v10473_v41  ;;  %vm1362_vm9 = vcmp.eq.s32.totalorder %v9977_v10, %v10483_v42 }
  0x96   : > { %8569 = vmatpush1.msk.msra.mxu0 %vm587_vm10, %v9793_v16  ;;  %8601 = vmatpush1.msk.msra.mxu1 %vm589_vm11, %v9793_v16  ;;  %vm1359_vm10 = vcmp.eq.s32.totalorder %v9977_v10, %v10491_v43  ;;  %vm1361_vm11 = vcmp.eq.s32.totalorder %v9977_v10, %v10495_v44 }
  0x97   : > { %8570 = vmatprep.subr.msk.mxu0 %vm524_vm12, %v9793_v16  ;;  %8602 = vmatprep.subr.msk.mxu1 %vm526_vm13, %v9793_v16  ;;  %vm1296_vm12 = vcmp.eq.s32.totalorder %v9996_v15, %v10473_v41  ;;  %vm1298_vm13 = vcmp.eq.s32.totalorder %v9996_v15, %v10483_v42 }
  0x98   : > { %8571 = vmatpush1.msk.msra.mxu0 %vm523_vm14, %v9793_v16  ;;  %3837 = vmatprep.mubr.f32.mxu0 %v9792_v1  ;;  %vm1295_vm14 = vcmp.eq.s32.totalorder %v9996_v15, %v10491_v43 }
  0x99   : > { %8603 = vmatpush1.msk.msra.mxu1 %vm525_vm15, %v9793_v16  ;;  %3926 = vmatprep.mubr.f32.mxu1 %v9792_v1  ;;  %vm1297_vm15 = vcmp.eq.s32.totalorder %v9996_v15, %v10495_v44 }
  0x9a   : > { %3838 = vmatmul.mubr.f32.vlgmr.msra.gmra.mxu0 %v10259_v36  ;;  %3927 = vmatmul.mubr.f32.vlgmr.msra.gmra.mxu1 %v10259_v36 }
  0x9b   : > { %8604 = vmatprep.subr.msk.mxu0 %vm1488_vm0, %v9793_v16  ;;  %8636 = vmatprep.subr.msk.mxu1 %vm1490_vm1, %v9793_v16  ;;  %vm1232_vm0 = vcmp.eq.s32.totalorder %v10023_v17, %v10473_v41  ;;  %vm1234_vm1 = vcmp.eq.s32.totalorder %v10023_v17, %v10483_v42 }
  0x9c   : > { %8605 = vmatpush1.msk.msra.mxu0 %vm1487_vm2, %v9793_v16  ;;  %8637 = vmatpush1.msk.msra.mxu1 %vm1489_vm3, %v9793_v16  ;;  %vm1231_vm2 = vcmp.eq.s32.totalorder %v10023_v17, %v10491_v43  ;;  %vm1233_vm3 = vcmp.eq.s32.totalorder %v10023_v17, %v10495_v44 }
  0x9d   : > { %8606 = vmatprep.subr.msk.mxu0 %vm1424_vm4, %v9793_v16  ;;  %8638 = vmatprep.subr.msk.mxu1 %vm1426_vm5, %v9793_v16  ;;  %vm1168_vm4 = vcmp.eq.s32.totalorder %v10038_v18, %v10473_v41  ;;  %vm1170_vm5 = vcmp.eq.s32.totalorder %v10038_v18, %v10483_v42 }
  0x9e   : > { %3843 = vmatprep.mubr.f32.mxu0 %v9792_v1  ;;  %3932 = vmatprep.mubr.f32.mxu1 %v9792_v1 }
  0x9f   : > { %8607 = vmatpush1.msk.msra.mxu0 %vm1423_vm6, %v9793_v16  ;;  %8639 = vmatpush1.msk.msra.mxu1 %vm1425_vm7, %v9793_v16  ;;  %vm1167_vm6 = vcmp.eq.s32.totalorder %v10038_v18, %v10491_v43  ;;  %vm1169_vm7 = vcmp.eq.s32.totalorder %v10038_v18, %v10495_v44 }
  0xa0   : > { %3844 = vmatmul.mubr.f32.gmra.mxu0 %v10292_v37  ;;  %3933 = vmatmul.mubr.f32.gmra.mxu1 %v10292_v37 }
  0xa1   : > { %8608 = vmatprep.subr.msk.mxu0 %vm1360_vm8, %v9793_v16  ;;  %8640 = vmatprep.subr.msk.mxu1 %vm1362_vm9, %v9793_v16  ;;  %vm1104_vm8 = vcmp.eq.s32.totalorder %v10053_v19, %v10473_v41  ;;  %vm1106_vm9 = vcmp.eq.s32.totalorder %v10053_v19, %v10483_v42 }
  0xa2   : > { %8609 = vmatpush1.msk.msra.mxu0 %vm1359_vm10, %v9793_v16  ;;  %8641 = vmatpush1.msk.msra.mxu1 %vm1361_vm11, %v9793_v16  ;;  %vm1103_vm10 = vcmp.eq.s32.totalorder %v10053_v19, %v10491_v43  ;;  %vm1105_vm11 = vcmp.eq.s32.totalorder %v10053_v19, %v10495_v44 }
  0xa3   : > { %8610 = vmatprep.subr.msk.mxu0 %vm1296_vm12, %v9793_v16  ;;  %8642 = vmatprep.subr.msk.mxu1 %vm1298_vm13, %v9793_v16  ;;  %vm1040_vm12 = vcmp.eq.s32.totalorder %v10068_v20, %v10473_v41  ;;  %vm1042_vm13 = vcmp.eq.s32.totalorder %v10068_v20, %v10483_v42 }
  0xa4   : > { %3849 = vmatprep.mubr.f32.mxu0 %v9792_v1  ;;  %3938 = vmatprep.mubr.f32.mxu1 %v9792_v1 }
  0xa5   : > { %8611 = vmatpush1.msk.msra.mxu0 %vm1295_vm14, %v9793_v16  ;;  %8643 = vmatpush1.msk.msra.mxu1 %vm1297_vm15, %v9793_v16  ;;  %vm1039_vm14 = vcmp.eq.s32.totalorder %v10068_v20, %v10491_v43  ;;  %vm1041_vm15 = vcmp.eq.s32.totalorder %v10068_v20, %v10495_v44 }
  0xa6   : > { %3850 = vmatmul.mubr.f32.gmra.mxu0 %v10325_v38  ;;  %3939 = vmatmul.mubr.f32.gmra.mxu1 %v10325_v38 }
  0xa7   : > { %8612 = vmatprep.subr.msk.mxu0 %vm1232_vm0, %v9793_v16  ;;  %8644 = vmatprep.subr.msk.mxu1 %vm1234_vm1, %v9793_v16  ;;  %vm976_vm0 = vcmp.eq.s32.totalorder %v10083_v21, %v10473_v41  ;;  %vm978_vm1 = vcmp.eq.s32.totalorder %v10083_v21, %v10483_v42 }
  0xa8   : > { %8613 = vmatpush1.msk.msra.mxu0 %vm1231_vm2, %v9793_v16  ;;  %8645 = vmatpush1.msk.msra.mxu1 %vm1233_vm3, %v9793_v16  ;;  %vm975_vm2 = vcmp.eq.s32.totalorder %v10083_v21, %v10491_v43  ;;  %vm977_vm3 = vcmp.eq.s32.totalorder %v10083_v21, %v10495_v44 }
  0xa9   : > { %8614 = vmatprep.subr.msk.mxu0 %vm1168_vm4, %v9793_v16  ;;  %8646 = vmatprep.subr.msk.mxu1 %vm1170_vm5, %v9793_v16  ;;  %vm912_vm4 = vcmp.eq.s32.totalorder %v10098_v22, %v10473_v41  ;;  %vm914_vm5 = vcmp.eq.s32.totalorder %v10098_v22, %v10483_v42 }
  0xaa   : > { %3855 = vmatprep.mubr.f32.mxu0 %v9792_v1  ;;  %3944 = vmatprep.mubr.f32.mxu1 %v9792_v1 }
  0xab   : > { %8615 = vmatpush1.msk.msra.mxu0 %vm1167_vm6, %v9793_v16  ;;  %8647 = vmatpush1.msk.msra.mxu1 %vm1169_vm7, %v9793_v16  ;;  %vm911_vm6 = vcmp.eq.s32.totalorder %v10098_v22, %v10491_v43  ;;  %vm913_vm7 = vcmp.eq.s32.totalorder %v10098_v22, %v10495_v44 }
  0xac   : > { %3856 = vmatmul.mubr.f32.gmra.mxu0 %v10358_v39  ;;  %3945 = vmatmul.mubr.f32.gmra.mxu1 %v10358_v39 }
  0xad   : > { %8616 = vmatprep.subr.msk.mxu0 %vm1104_vm8, %v9793_v16  ;;  %8648 = vmatprep.subr.msk.mxu1 %vm1106_vm9, %v9793_v16  ;;  %vm848_vm8 = vcmp.eq.s32.totalorder %v10113_v23, %v10473_v41  ;;  %vm850_vm9 = vcmp.eq.s32.totalorder %v10113_v23, %v10483_v42 }
  0xae   : > { %8617 = vmatpush1.msk.msra.mxu0 %vm1103_vm10, %v9793_v16  ;;  %8649 = vmatpush1.msk.msra.mxu1 %vm1105_vm11, %v9793_v16  ;;  %vm847_vm10 = vcmp.eq.s32.totalorder %v10113_v23, %v10491_v43  ;;  %vm849_vm11 = vcmp.eq.s32.totalorder %v10113_v23, %v10495_v44 }
  0xaf   : > { %8618 = vmatprep.subr.msk.mxu0 %vm1040_vm12, %v9793_v16  ;;  %8650 = vmatprep.subr.msk.mxu1 %vm1042_vm13, %v9793_v16  ;;  %vm784_vm12 = vcmp.eq.s32.totalorder %v10128_v24, %v10473_v41  ;;  %vm786_vm13 = vcmp.eq.s32.totalorder %v10128_v24, %v10483_v42 }
  0xb0   : > { %8619 = vmatpush1.msk.msra.mxu0 %vm1039_vm14, %v9793_v16  ;;  %8651 = vmatpush1.msk.msra.mxu1 %vm1041_vm15, %v9793_v16  ;;  %vm783_vm14 = vcmp.eq.s32.totalorder %v10128_v24, %v10491_v43  ;;  %vm785_vm15 = vcmp.eq.s32.totalorder %v10128_v24, %v10495_v44 }
  0xb1   : > { %8620 = vmatprep.subr.msk.mxu0 %vm976_vm0, %v9793_v16  ;;  %8652 = vmatprep.subr.msk.mxu1 %vm978_vm1, %v9793_v16  ;;  %vm720_vm0 = vcmp.eq.s32.totalorder %v10143_v25, %v10473_v41  ;;  %vm722_vm1 = vcmp.eq.s32.totalorder %v10143_v25, %v10483_v42 }
  0xb2   : > { %8621 = vmatpush1.msk.msra.mxu0 %vm975_vm2, %v9793_v16  ;;  %8653 = vmatpush1.msk.msra.mxu1 %vm977_vm3, %v9793_v16  ;;  %vm719_vm2 = vcmp.eq.s32.totalorder %v10143_v25, %v10491_v43  ;;  %vm721_vm3 = vcmp.eq.s32.totalorder %v10143_v25, %v10495_v44 }
  0xb3   : > { %8622 = vmatprep.subr.msk.mxu0 %vm912_vm4, %v9793_v16  ;;  %8654 = vmatprep.subr.msk.mxu1 %vm914_vm5, %v9793_v16  ;;  %vm656_vm4 = vcmp.eq.s32.totalorder %v10158_v26, %v10473_v41  ;;  %vm658_vm5 = vcmp.eq.s32.totalorder %v10158_v26, %v10483_v42 }
  0xb4   : > { %8623 = vmatpush1.msk.msra.mxu0 %vm911_vm6, %v9793_v16  ;;  %8655 = vmatpush1.msk.msra.mxu1 %vm913_vm7, %v9793_v16  ;;  %vm655_vm6 = vcmp.eq.s32.totalorder %v10158_v26, %v10491_v43  ;;  %vm657_vm7 = vcmp.eq.s32.totalorder %v10158_v26, %v10495_v44 }
  0xb5   : > { %8624 = vmatprep.subr.msk.mxu0 %vm848_vm8, %v9793_v16  ;;  %8656 = vmatprep.subr.msk.mxu1 %vm850_vm9, %v9793_v16  ;;  %vm592_vm8 = vcmp.eq.s32.totalorder %v10167_v27, %v10473_v41  ;;  %vm594_vm9 = vcmp.eq.s32.totalorder %v10167_v27, %v10483_v42 }
  0xb6   : > { %8625 = vmatpush1.msk.msra.mxu0 %vm847_vm10, %v9793_v16  ;;  %8657 = vmatpush1.msk.msra.mxu1 %vm849_vm11, %v9793_v16  ;;  %vm591_vm10 = vcmp.eq.s32.totalorder %v10167_v27, %v10491_v43  ;;  %vm593_vm11 = vcmp.eq.s32.totalorder %v10167_v27, %v10495_v44 }
  0xb7   : > { %8626 = vmatprep.subr.msk.mxu0 %vm784_vm12, %v9793_v16  ;;  %8658 = vmatprep.subr.msk.mxu1 %vm786_vm13, %v9793_v16  ;;  %vm528_vm12 = vcmp.eq.s32.totalorder %v9953_v2, %v10473_v41  ;;  %vm530_vm13 = vcmp.eq.s32.totalorder %v9953_v2, %v10483_v42 }
  0xb8   : > { %8627 = vmatpush1.msk.msra.mxu0 %vm783_vm14, %v9793_v16  ;;  %8659 = vmatpush1.msk.msra.mxu1 %vm785_vm15, %v9793_v16  ;;  %vm527_vm14 = vcmp.eq.s32.totalorder %v9953_v2, %v10491_v43  ;;  %vm529_vm15 = vcmp.eq.s32.totalorder %v9953_v2, %v10495_v44 }
  0xb9   : > { %8628 = vmatprep.subr.msk.mxu0 %vm720_vm0, %v9793_v16  ;;  %8660 = vmatprep.subr.msk.mxu1 %vm722_vm1, %v9793_v16  ;;  %vm1492_vm0 = vcmp.eq.s32.totalorder %v9968_v7, %v10703_v45  ;;  %vm1494_vm1 = vcmp.eq.s32.totalorder %v9968_v7, %v10707_v46 }
  0xba   : > { %8629 = vmatpush1.msk.msra.mxu0 %vm719_vm2, %v9793_v16  ;;  %8661 = vmatpush1.msk.msra.mxu1 %vm721_vm3, %v9793_v16  ;;  %vm1491_vm2 = vcmp.eq.s32.totalorder %v9968_v7, %v10715_v47  ;;  %vm1493_vm3 = vcmp.eq.s32.totalorder %v9968_v7, %v10719_v48 }
  0xbb   : > { %8630 = vmatprep.subr.msk.mxu0 %vm656_vm4, %v9793_v16  ;;  %8662 = vmatprep.subr.msk.mxu1 %vm658_vm5, %v9793_v16  ;;  %vm1428_vm4 = vcmp.eq.s32.totalorder %v9974_v9, %v10703_v45  ;;  %vm1430_vm5 = vcmp.eq.s32.totalorder %v9974_v9, %v10707_v46 }
  0xbc   : > { %8631 = vmatpush1.msk.msra.mxu0 %vm655_vm6, %v9793_v16  ;;  %8663 = vmatpush1.msk.msra.mxu1 %vm657_vm7, %v9793_v16  ;;  %vm1427_vm6 = vcmp.eq.s32.totalorder %v9974_v9, %v10715_v47  ;;  %vm1429_vm7 = vcmp.eq.s32.totalorder %v9974_v9, %v10719_v48 }
  0xbd   : > { %8632 = vmatprep.subr.msk.mxu0 %vm592_vm8, %v9793_v16  ;;  %8664 = vmatprep.subr.msk.mxu1 %vm594_vm9, %v9793_v16  ;;  %vm1364_vm8 = vcmp.eq.s32.totalorder %v9977_v10, %v10703_v45  ;;  %vm1366_vm9 = vcmp.eq.s32.totalorder %v9977_v10, %v10707_v46 }
  0xbe   : > { %8633 = vmatpush1.msk.msra.mxu0 %vm591_vm10, %v9793_v16  ;;  %8665 = vmatpush1.msk.msra.mxu1 %vm593_vm11, %v9793_v16  ;;  %vm1363_vm10 = vcmp.eq.s32.totalorder %v9977_v10, %v10715_v47  ;;  %vm1365_vm11 = vcmp.eq.s32.totalorder %v9977_v10, %v10719_v48 }
  0xbf   : > { %8634 = vmatprep.subr.msk.mxu0 %vm528_vm12, %v9793_v16  ;;  %8666 = vmatprep.subr.msk.mxu1 %vm530_vm13, %v9793_v16  ;;  %vm1300_vm12 = vcmp.eq.s32.totalorder %v9996_v15, %v10703_v45  ;;  %vm1302_vm13 = vcmp.eq.s32.totalorder %v9996_v15, %v10707_v46 }
  0xc0   : > { %8635 = vmatpush1.msk.msra.mxu0 %vm527_vm14, %v9793_v16  ;;  %4015 = vmatprep.mubr.f32.mxu0 %v9792_v1  ;;  %vm1299_vm14 = vcmp.eq.s32.totalorder %v9996_v15, %v10715_v47 }
  0xc1   : > { %8667 = vmatpush1.msk.msra.mxu1 %vm529_vm15, %v9793_v16  ;;  %4104 = vmatprep.mubr.f32.mxu1 %v9792_v1  ;;  %vm1301_vm15 = vcmp.eq.s32.totalorder %v9996_v15, %v10719_v48 }
  0xc2   : > { %4016 = vmatmul.mubr.f32.vlgmr.msra.gmra.mxu0 %v10259_v36  ;;  %4105 = vmatmul.mubr.f32.vlgmr.msra.gmra.mxu1 %v10259_v36 }
  0xc3   : > { %8668 = vmatprep.subr.msk.mxu0 %vm1492_vm0, %v9793_v16  ;;  %8700 = vmatprep.subr.msk.mxu1 %vm1494_vm1, %v9793_v16  ;;  %vm1236_vm0 = vcmp.eq.s32.totalorder %v10023_v17, %v10703_v45  ;;  %vm1238_vm1 = vcmp.eq.s32.totalorder %v10023_v17, %v10707_v46 }
  0xc4   : > { %8669 = vmatpush1.msk.msra.mxu0 %vm1491_vm2, %v9793_v16  ;;  %8701 = vmatpush1.msk.msra.mxu1 %vm1493_vm3, %v9793_v16  ;;  %vm1235_vm2 = vcmp.eq.s32.totalorder %v10023_v17, %v10715_v47  ;;  %vm1237_vm3 = vcmp.eq.s32.totalorder %v10023_v17, %v10719_v48 }
  0xc5   : > { %8670 = vmatprep.subr.msk.mxu0 %vm1428_vm4, %v9793_v16  ;;  %8702 = vmatprep.subr.msk.mxu1 %vm1430_vm5, %v9793_v16  ;;  %vm1172_vm4 = vcmp.eq.s32.totalorder %v10038_v18, %v10703_v45  ;;  %vm1174_vm5 = vcmp.eq.s32.totalorder %v10038_v18, %v10707_v46 }
  0xc6   : > { %4021 = vmatprep.mubr.f32.mxu0 %v9792_v1  ;;  %4110 = vmatprep.mubr.f32.mxu1 %v9792_v1 }
  0xc7   : > { %8671 = vmatpush1.msk.msra.mxu0 %vm1427_vm6, %v9793_v16  ;;  %8703 = vmatpush1.msk.msra.mxu1 %vm1429_vm7, %v9793_v16  ;;  %vm1171_vm6 = vcmp.eq.s32.totalorder %v10038_v18, %v10715_v47  ;;  %vm1173_vm7 = vcmp.eq.s32.totalorder %v10038_v18, %v10719_v48 }
  0xc8   : > { %4022 = vmatmul.mubr.f32.gmra.mxu0 %v10292_v37  ;;  %4111 = vmatmul.mubr.f32.gmra.mxu1 %v10292_v37 }
  0xc9   : > { %8672 = vmatprep.subr.msk.mxu0 %vm1364_vm8, %v9793_v16  ;;  %8704 = vmatprep.subr.msk.mxu1 %vm1366_vm9, %v9793_v16  ;;  %vm1108_vm8 = vcmp.eq.s32.totalorder %v10053_v19, %v10703_v45  ;;  %vm1110_vm9 = vcmp.eq.s32.totalorder %v10053_v19, %v10707_v46 }
  0xca   : > { %8673 = vmatpush1.msk.msra.mxu0 %vm1363_vm10, %v9793_v16  ;;  %8705 = vmatpush1.msk.msra.mxu1 %vm1365_vm11, %v9793_v16  ;;  %vm1107_vm10 = vcmp.eq.s32.totalorder %v10053_v19, %v10715_v47  ;;  %vm1109_vm11 = vcmp.eq.s32.totalorder %v10053_v19, %v10719_v48 }
  0xcb   : > { %8674 = vmatprep.subr.msk.mxu0 %vm1300_vm12, %v9793_v16  ;;  %8706 = vmatprep.subr.msk.mxu1 %vm1302_vm13, %v9793_v16  ;;  %vm1044_vm12 = vcmp.eq.s32.totalorder %v10068_v20, %v10703_v45  ;;  %vm1046_vm13 = vcmp.eq.s32.totalorder %v10068_v20, %v10707_v46 }
  0xcc   : > { %4027 = vmatprep.mubr.f32.mxu0 %v9792_v1  ;;  %4116 = vmatprep.mubr.f32.mxu1 %v9792_v1 }
  0xcd   : > { %8675 = vmatpush1.msk.msra.mxu0 %vm1299_vm14, %v9793_v16  ;;  %8707 = vmatpush1.msk.msra.mxu1 %vm1301_vm15, %v9793_v16  ;;  %vm1043_vm14 = vcmp.eq.s32.totalorder %v10068_v20, %v10715_v47  ;;  %vm1045_vm15 = vcmp.eq.s32.totalorder %v10068_v20, %v10719_v48 }
  0xce   : > { %4028 = vmatmul.mubr.f32.gmra.mxu0 %v10325_v38  ;;  %4117 = vmatmul.mubr.f32.gmra.mxu1 %v10325_v38 }
  0xcf   : > { %8676 = vmatprep.subr.msk.mxu0 %vm1236_vm0, %v9793_v16  ;;  %8708 = vmatprep.subr.msk.mxu1 %vm1238_vm1, %v9793_v16  ;;  %vm980_vm0 = vcmp.eq.s32.totalorder %v10083_v21, %v10703_v45  ;;  %vm982_vm1 = vcmp.eq.s32.totalorder %v10083_v21, %v10707_v46 }
  0xd0   : > { %8677 = vmatpush1.msk.msra.mxu0 %vm1235_vm2, %v9793_v16  ;;  %8709 = vmatpush1.msk.msra.mxu1 %vm1237_vm3, %v9793_v16  ;;  %vm979_vm2 = vcmp.eq.s32.totalorder %v10083_v21, %v10715_v47  ;;  %vm981_vm3 = vcmp.eq.s32.totalorder %v10083_v21, %v10719_v48 }
  0xd1   : > { %8678 = vmatprep.subr.msk.mxu0 %vm1172_vm4, %v9793_v16  ;;  %8710 = vmatprep.subr.msk.mxu1 %vm1174_vm5, %v9793_v16  ;;  %vm916_vm4 = vcmp.eq.s32.totalorder %v10098_v22, %v10703_v45  ;;  %vm918_vm5 = vcmp.eq.s32.totalorder %v10098_v22, %v10707_v46 }
  0xd2   : > { %4033 = vmatprep.mubr.f32.mxu0 %v9792_v1  ;;  %4122 = vmatprep.mubr.f32.mxu1 %v9792_v1 }
  0xd3   : > { %8679 = vmatpush1.msk.msra.mxu0 %vm1171_vm6, %v9793_v16  ;;  %8711 = vmatpush1.msk.msra.mxu1 %vm1173_vm7, %v9793_v16  ;;  %vm915_vm6 = vcmp.eq.s32.totalorder %v10098_v22, %v10715_v47  ;;  %vm917_vm7 = vcmp.eq.s32.totalorder %v10098_v22, %v10719_v48 }
  0xd4   : > { %4034 = vmatmul.mubr.f32.gmra.mxu0 %v10358_v39  ;;  %4123 = vmatmul.mubr.f32.gmra.mxu1 %v10358_v39 }
  0xd5   : > { %8680 = vmatprep.subr.msk.mxu0 %vm1108_vm8, %v9793_v16  ;;  %8712 = vmatprep.subr.msk.mxu1 %vm1110_vm9, %v9793_v16  ;;  %vm852_vm8 = vcmp.eq.s32.totalorder %v10113_v23, %v10703_v45  ;;  %vm854_vm9 = vcmp.eq.s32.totalorder %v10113_v23, %v10707_v46 }
  0xd6   : > { %8681 = vmatpush1.msk.msra.mxu0 %vm1107_vm10, %v9793_v16  ;;  %8713 = vmatpush1.msk.msra.mxu1 %vm1109_vm11, %v9793_v16  ;;  %vm851_vm10 = vcmp.eq.s32.totalorder %v10113_v23, %v10715_v47  ;;  %vm853_vm11 = vcmp.eq.s32.totalorder %v10113_v23, %v10719_v48 }
  0xd7   : > { %8682 = vmatprep.subr.msk.mxu0 %vm1044_vm12, %v9793_v16  ;;  %8714 = vmatprep.subr.msk.mxu1 %vm1046_vm13, %v9793_v16  ;;  %vm788_vm12 = vcmp.eq.s32.totalorder %v10128_v24, %v10703_v45  ;;  %vm790_vm13 = vcmp.eq.s32.totalorder %v10128_v24, %v10707_v46 }
  0xd8   : > { %8683 = vmatpush1.msk.msra.mxu0 %vm1043_vm14, %v9793_v16  ;;  %8715 = vmatpush1.msk.msra.mxu1 %vm1045_vm15, %v9793_v16  ;;  %vm787_vm14 = vcmp.eq.s32.totalorder %v10128_v24, %v10715_v47  ;;  %vm789_vm15 = vcmp.eq.s32.totalorder %v10128_v24, %v10719_v48 }
  0xd9   : > { %8684 = vmatprep.subr.msk.mxu0 %vm980_vm0, %v9793_v16  ;;  %8716 = vmatprep.subr.msk.mxu1 %vm982_vm1, %v9793_v16  ;;  %vm724_vm0 = vcmp.eq.s32.totalorder %v10143_v25, %v10703_v45  ;;  %vm726_vm1 = vcmp.eq.s32.totalorder %v10143_v25, %v10707_v46 }
  0xda   : > { %8685 = vmatpush1.msk.msra.mxu0 %vm979_vm2, %v9793_v16  ;;  %8717 = vmatpush1.msk.msra.mxu1 %vm981_vm3, %v9793_v16  ;;  %vm723_vm2 = vcmp.eq.s32.totalorder %v10143_v25, %v10715_v47  ;;  %vm725_vm3 = vcmp.eq.s32.totalorder %v10143_v25, %v10719_v48 }
  0xdb   : > { %8686 = vmatprep.subr.msk.mxu0 %vm916_vm4, %v9793_v16  ;;  %8718 = vmatprep.subr.msk.mxu1 %vm918_vm5, %v9793_v16  ;;  %vm660_vm4 = vcmp.eq.s32.totalorder %v10158_v26, %v10703_v45  ;;  %vm662_vm5 = vcmp.eq.s32.totalorder %v10158_v26, %v10707_v46 }
  0xdc   : > { %8687 = vmatpush1.msk.msra.mxu0 %vm915_vm6, %v9793_v16  ;;  %8719 = vmatpush1.msk.msra.mxu1 %vm917_vm7, %v9793_v16  ;;  %vm659_vm6 = vcmp.eq.s32.totalorder %v10158_v26, %v10715_v47  ;;  %vm661_vm7 = vcmp.eq.s32.totalorder %v10158_v26, %v10719_v48 }
  0xdd   : > { %8688 = vmatprep.subr.msk.mxu0 %vm852_vm8, %v9793_v16  ;;  %8720 = vmatprep.subr.msk.mxu1 %vm854_vm9, %v9793_v16  ;;  %vm596_vm8 = vcmp.eq.s32.totalorder %v10167_v27, %v10703_v45  ;;  %vm598_vm9 = vcmp.eq.s32.totalorder %v10167_v27, %v10707_v46 }
  0xde   : > { %8689 = vmatpush1.msk.msra.mxu0 %vm851_vm10, %v9793_v16  ;;  %8721 = vmatpush1.msk.msra.mxu1 %vm853_vm11, %v9793_v16  ;;  %vm595_vm10 = vcmp.eq.s32.totalorder %v10167_v27, %v10715_v47  ;;  %vm597_vm11 = vcmp.eq.s32.totalorder %v10167_v27, %v10719_v48 }
  0xdf   : > { %8690 = vmatprep.subr.msk.mxu0 %vm788_vm12, %v9793_v16  ;;  %8722 = vmatprep.subr.msk.mxu1 %vm790_vm13, %v9793_v16  ;;  %vm532_vm12 = vcmp.eq.s32.totalorder %v9953_v2, %v10703_v45  ;;  %vm534_vm13 = vcmp.eq.s32.totalorder %v9953_v2, %v10707_v46 }
  0xe0   : > { %8691 = vmatpush1.msk.msra.mxu0 %vm787_vm14, %v9793_v16  ;;  %8723 = vmatpush1.msk.msra.mxu1 %vm789_vm15, %v9793_v16  ;;  %vm531_vm14 = vcmp.eq.s32.totalorder %v9953_v2, %v10715_v47  ;;  %vm533_vm15 = vcmp.eq.s32.totalorder %v9953_v2, %v10719_v48 }
  0xe1   : > { %8692 = vmatprep.subr.msk.mxu0 %vm724_vm0, %v9793_v16  ;;  %8724 = vmatprep.subr.msk.mxu1 %vm726_vm1, %v9793_v16  ;;  %vm1496_vm0 = vcmp.eq.s32.totalorder %v9968_v7, %v10924_v50  ;;  %vm1498_vm1 = vcmp.eq.s32.totalorder %v9968_v7, %v10934_v51 }
  0xe2   : > { %8693 = vmatpush1.msk.msra.mxu0 %vm723_vm2, %v9793_v16  ;;  %8725 = vmatpush1.msk.msra.mxu1 %vm725_vm3, %v9793_v16  ;;  %vm1495_vm2 = vcmp.eq.s32.totalorder %v9968_v7, %v10942_v52  ;;  %vm1497_vm3 = vcmp.eq.s32.totalorder %v9968_v7, %v10946_v53 }
  0xe3   : > { %8694 = vmatprep.subr.msk.mxu0 %vm660_vm4, %v9793_v16  ;;  %8726 = vmatprep.subr.msk.mxu1 %vm662_vm5, %v9793_v16  ;;  %vm1432_vm4 = vcmp.eq.s32.totalorder %v9974_v9, %v10924_v50  ;;  %vm1434_vm5 = vcmp.eq.s32.totalorder %v9974_v9, %v10934_v51 }
  0xe4   : > { %8695 = vmatpush1.msk.msra.mxu0 %vm659_vm6, %v9793_v16  ;;  %8727 = vmatpush1.msk.msra.mxu1 %vm661_vm7, %v9793_v16  ;;  %vm1431_vm6 = vcmp.eq.s32.totalorder %v9974_v9, %v10942_v52  ;;  %vm1433_vm7 = vcmp.eq.s32.totalorder %v9974_v9, %v10946_v53 }
  0xe5   : > { %8696 = vmatprep.subr.msk.mxu0 %vm596_vm8, %v9793_v16  ;;  %8728 = vmatprep.subr.msk.mxu1 %vm598_vm9, %v9793_v16  ;;  %vm1368_vm8 = vcmp.eq.s32.totalorder %v9977_v10, %v10924_v50  ;;  %vm1370_vm9 = vcmp.eq.s32.totalorder %v9977_v10, %v10934_v51 }
  0xe6   : > { %8697 = vmatpush1.msk.msra.mxu0 %vm595_vm10, %v9793_v16  ;;  %8729 = vmatpush1.msk.msra.mxu1 %vm597_vm11, %v9793_v16  ;;  %vm1367_vm10 = vcmp.eq.s32.totalorder %v9977_v10, %v10942_v52  ;;  %vm1369_vm11 = vcmp.eq.s32.totalorder %v9977_v10, %v10946_v53 }
  0xe7   : > { %8698 = vmatprep.subr.msk.mxu0 %vm532_vm12, %v9793_v16  ;;  %8730 = vmatprep.subr.msk.mxu1 %vm534_vm13, %v9793_v16  ;;  %vm1304_vm12 = vcmp.eq.s32.totalorder %v9996_v15, %v10924_v50  ;;  %vm1306_vm13 = vcmp.eq.s32.totalorder %v9996_v15, %v10934_v51 }
  0xe8   : > { %8699 = vmatpush1.msk.msra.mxu0 %vm531_vm14, %v9793_v16  ;;  %4193 = vmatprep.mubr.f32.mxu0 %v9792_v1  ;;  %vm1303_vm14 = vcmp.eq.s32.totalorder %v9996_v15, %v10942_v52 }
  0xe9   : > { %8731 = vmatpush1.msk.msra.mxu1 %vm533_vm15, %v9793_v16  ;;  %4282 = vmatprep.mubr.f32.mxu1 %v9792_v1  ;;  %vm1305_vm15 = vcmp.eq.s32.totalorder %v9996_v15, %v10946_v53 }
  0xea   : > { %4194 = vmatmul.mubr.f32.vlgmr.msra.gmra.mxu0 %v10259_v36  ;;  %4283 = vmatmul.mubr.f32.vlgmr.msra.gmra.mxu1 %v10259_v36 }
  0xeb   : > { %8732 = vmatprep.subr.msk.mxu0 %vm1496_vm0, %v9793_v16  ;;  %8764 = vmatprep.subr.msk.mxu1 %vm1498_vm1, %v9793_v16  ;;  %vm1240_vm0 = vcmp.eq.s32.totalorder %v10023_v17, %v10924_v50  ;;  %vm1242_vm1 = vcmp.eq.s32.totalorder %v10023_v17, %v10934_v51 }
  0xec   : > { %8733 = vmatpush1.msk.msra.mxu0 %vm1495_vm2, %v9793_v16  ;;  %8765 = vmatpush1.msk.msra.mxu1 %vm1497_vm3, %v9793_v16  ;;  %vm1239_vm2 = vcmp.eq.s32.totalorder %v10023_v17, %v10942_v52  ;;  %vm1241_vm3 = vcmp.eq.s32.totalorder %v10023_v17, %v10946_v53 }
  0xed   : > { %8734 = vmatprep.subr.msk.mxu0 %vm1432_vm4, %v9793_v16  ;;  %8766 = vmatprep.subr.msk.mxu1 %vm1434_vm5, %v9793_v16  ;;  %vm1176_vm4 = vcmp.eq.s32.totalorder %v10038_v18, %v10924_v50  ;;  %vm1178_vm5 = vcmp.eq.s32.totalorder %v10038_v18, %v10934_v51 }
  0xee   : > { %4199 = vmatprep.mubr.f32.mxu0 %v9792_v1  ;;  %4288 = vmatprep.mubr.f32.mxu1 %v9792_v1 }
  0xef   : > { %8735 = vmatpush1.msk.msra.mxu0 %vm1431_vm6, %v9793_v16  ;;  %8767 = vmatpush1.msk.msra.mxu1 %vm1433_vm7, %v9793_v16  ;;  %vm1175_vm6 = vcmp.eq.s32.totalorder %v10038_v18, %v10942_v52  ;;  %vm1177_vm7 = vcmp.eq.s32.totalorder %v10038_v18, %v10946_v53 }
  0xf0   : > { %4200 = vmatmul.mubr.f32.gmra.mxu0 %v10292_v37  ;;  %4289 = vmatmul.mubr.f32.gmra.mxu1 %v10292_v37 }
  0xf1   : > { %8736 = vmatprep.subr.msk.mxu0 %vm1368_vm8, %v9793_v16  ;;  %8768 = vmatprep.subr.msk.mxu1 %vm1370_vm9, %v9793_v16  ;;  %vm1112_vm8 = vcmp.eq.s32.totalorder %v10053_v19, %v10924_v50  ;;  %vm1114_vm9 = vcmp.eq.s32.totalorder %v10053_v19, %v10934_v51 }
  0xf2   : > { %8737 = vmatpush1.msk.msra.mxu0 %vm1367_vm10, %v9793_v16  ;;  %8769 = vmatpush1.msk.msra.mxu1 %vm1369_vm11, %v9793_v16  ;;  %vm1111_vm10 = vcmp.eq.s32.totalorder %v10053_v19, %v10942_v52  ;;  %vm1113_vm11 = vcmp.eq.s32.totalorder %v10053_v19, %v10946_v53 }
  0xf3   : > { %8738 = vmatprep.subr.msk.mxu0 %vm1304_vm12, %v9793_v16  ;;  %8770 = vmatprep.subr.msk.mxu1 %vm1306_vm13, %v9793_v16  ;;  %vm1048_vm12 = vcmp.eq.s32.totalorder %v10068_v20, %v10924_v50  ;;  %vm1050_vm13 = vcmp.eq.s32.totalorder %v10068_v20, %v10934_v51 }
  0xf4   : > { %4205 = vmatprep.mubr.f32.mxu0 %v9792_v1  ;;  %4294 = vmatprep.mubr.f32.mxu1 %v9792_v1 }
  0xf5   : > { %8739 = vmatpush1.msk.msra.mxu0 %vm1303_vm14, %v9793_v16  ;;  %8771 = vmatpush1.msk.msra.mxu1 %vm1305_vm15, %v9793_v16  ;;  %vm1047_vm14 = vcmp.eq.s32.totalorder %v10068_v20, %v10942_v52  ;;  %vm1049_vm15 = vcmp.eq.s32.totalorder %v10068_v20, %v10946_v53 }
  0xf6   : > { %4206 = vmatmul.mubr.f32.gmra.mxu0 %v10325_v38  ;;  %4295 = vmatmul.mubr.f32.gmra.mxu1 %v10325_v38 }
  0xf7   : > { %8740 = vmatprep.subr.msk.mxu0 %vm1240_vm0, %v9793_v16  ;;  %8772 = vmatprep.subr.msk.mxu1 %vm1242_vm1, %v9793_v16  ;;  %vm984_vm0 = vcmp.eq.s32.totalorder %v10083_v21, %v10924_v50  ;;  %vm986_vm1 = vcmp.eq.s32.totalorder %v10083_v21, %v10934_v51 }
  0xf8   : > { %8741 = vmatpush1.msk.msra.mxu0 %vm1239_vm2, %v9793_v16  ;;  %8773 = vmatpush1.msk.msra.mxu1 %vm1241_vm3, %v9793_v16  ;;  %vm983_vm2 = vcmp.eq.s32.totalorder %v10083_v21, %v10942_v52  ;;  %vm985_vm3 = vcmp.eq.s32.totalorder %v10083_v21, %v10946_v53 }
  0xf9   : > { %8742 = vmatprep.subr.msk.mxu0 %vm1176_vm4, %v9793_v16  ;;  %8774 = vmatprep.subr.msk.mxu1 %vm1178_vm5, %v9793_v16  ;;  %vm920_vm4 = vcmp.eq.s32.totalorder %v10098_v22, %v10924_v50  ;;  %vm922_vm5 = vcmp.eq.s32.totalorder %v10098_v22, %v10934_v51 }
  0xfa   : > { %4211 = vmatprep.mubr.f32.mxu0 %v9792_v1  ;;  %4300 = vmatprep.mubr.f32.mxu1 %v9792_v1 }
  0xfb   : > { %8743 = vmatpush1.msk.msra.mxu0 %vm1175_vm6, %v9793_v16  ;;  %8775 = vmatpush1.msk.msra.mxu1 %vm1177_vm7, %v9793_v16  ;;  %vm919_vm6 = vcmp.eq.s32.totalorder %v10098_v22, %v10942_v52  ;;  %vm921_vm7 = vcmp.eq.s32.totalorder %v10098_v22, %v10946_v53 }
  0xfc   : > { %4212 = vmatmul.mubr.f32.gmra.mxu0 %v10358_v39  ;;  %4301 = vmatmul.mubr.f32.gmra.mxu1 %v10358_v39  ;;  %v11487_v39 = vld [vmem:[%s9945_s30] sm:$0xff] }
  0xfd   : > { %8744 = vmatprep.subr.msk.mxu0 %vm1112_vm8, %v9793_v16  ;;  %8776 = vmatprep.subr.msk.mxu1 %vm1114_vm9, %v9793_v16  ;;  %vm856_vm8 = vcmp.eq.s32.totalorder %v10113_v23, %v10924_v50  ;;  %vm858_vm9 = vcmp.eq.s32.totalorder %v10113_v23, %v10934_v51  ;;  %v11517_v42 = vrot.slane %v11487_v39, %v9962_v5 }
  0xfe   : > { %8745 = vmatpush1.msk.msra.mxu0 %vm1111_vm10, %v9793_v16  ;;  %8777 = vmatpush1.msk.msra.mxu1 %vm1113_vm11, %v9793_v16  ;;  %vm855_vm10 = vcmp.eq.s32.totalorder %v10113_v23, %v10942_v52  ;;  %vm857_vm11 = vcmp.eq.s32.totalorder %v10113_v23, %v10946_v53  ;;  %v11521_v43 = vrot.slane %v11487_v39, %v9965_v6 }
  0xff   : > { %8746 = vmatprep.subr.msk.mxu0 %vm1048_vm12, %v9793_v16  ;;  %8778 = vmatprep.subr.msk.mxu1 %vm1050_vm13, %v9793_v16  ;;  %vm792_vm12 = vcmp.eq.s32.totalorder %v10128_v24, %v10924_v50  ;;  %vm794_vm13 = vcmp.eq.s32.totalorder %v10128_v24, %v10934_v51  ;;  %v11551_v44 = vrot.slane %v11487_v39, %v9956_v3 }
 0x100   : > { %8747 = vmatpush1.msk.msra.mxu0 %vm1047_vm14, %v9793_v16  ;;  %8779 = vmatpush1.msk.msra.mxu1 %vm1049_vm15, %v9793_v16  ;;  %vm791_vm14 = vcmp.eq.s32.totalorder %v10128_v24, %v10942_v52  ;;  %vm793_vm15 = vcmp.eq.s32.totalorder %v10128_v24, %v10946_v53  ;;  %v11561_v47 = vrot.slane %v11487_v39, %v9959_v4 }
 0x101   : > { %8748 = vmatprep.subr.msk.mxu0 %vm984_vm0, %v9793_v16  ;;  %8780 = vmatprep.subr.msk.mxu1 %vm986_vm1, %v9793_v16  ;;  %vm728_vm0 = vcmp.eq.s32.totalorder %v10143_v25, %v10924_v50  ;;  %vm730_vm1 = vcmp.eq.s32.totalorder %v10143_v25, %v10934_v51 }
 0x102   : > { %8749 = vmatpush1.msk.msra.mxu0 %vm983_vm2, %v9793_v16  ;;  %8781 = vmatpush1.msk.msra.mxu1 %vm985_vm3, %v9793_v16  ;;  %vm727_vm2 = vcmp.eq.s32.totalorder %v10143_v25, %v10942_v52  ;;  %vm729_vm3 = vcmp.eq.s32.totalorder %v10143_v25, %v10946_v53 }
 0x103   : > { %8750 = vmatprep.subr.msk.mxu0 %vm920_vm4, %v9793_v16  ;;  %8782 = vmatprep.subr.msk.mxu1 %vm922_vm5, %v9793_v16  ;;  %vm664_vm4 = vcmp.eq.s32.totalorder %v10158_v26, %v10924_v50  ;;  %vm666_vm5 = vcmp.eq.s32.totalorder %v10158_v26, %v10934_v51 }
 0x104   : > { %8751 = vmatpush1.msk.msra.mxu0 %vm919_vm6, %v9793_v16  ;;  %8783 = vmatpush1.msk.msra.mxu1 %vm921_vm7, %v9793_v16  ;;  %vm663_vm6 = vcmp.eq.s32.totalorder %v10158_v26, %v10942_v52  ;;  %vm665_vm7 = vcmp.eq.s32.totalorder %v10158_v26, %v10946_v53 }
 0x105   : > { %8752 = vmatprep.subr.msk.mxu0 %vm856_vm8, %v9793_v16  ;;  %8784 = vmatprep.subr.msk.mxu1 %vm858_vm9, %v9793_v16  ;;  %vm600_vm8 = vcmp.eq.s32.totalorder %v10167_v27, %v10924_v50  ;;  %vm602_vm9 = vcmp.eq.s32.totalorder %v10167_v27, %v10934_v51 }
 0x106   : > { %8753 = vmatpush1.msk.msra.mxu0 %vm855_vm10, %v9793_v16  ;;  %8785 = vmatpush1.msk.msra.mxu1 %vm857_vm11, %v9793_v16  ;;  %vm599_vm10 = vcmp.eq.s32.totalorder %v10167_v27, %v10942_v52  ;;  %vm601_vm11 = vcmp.eq.s32.totalorder %v10167_v27, %v10946_v53 }
 0x107   : > { %8754 = vmatprep.subr.msk.mxu0 %vm792_vm12, %v9793_v16  ;;  %8786 = vmatprep.subr.msk.mxu1 %vm794_vm13, %v9793_v16  ;;  %vm536_vm12 = vcmp.eq.s32.totalorder %v9953_v2, %v10924_v50  ;;  %vm538_vm13 = vcmp.eq.s32.totalorder %v9953_v2, %v10934_v51 }
 0x108   : > { %8755 = vmatpush1.msk.msra.mxu0 %vm791_vm14, %v9793_v16  ;;  %8787 = vmatpush1.msk.msra.mxu1 %vm793_vm15, %v9793_v16  ;;  %vm535_vm14 = vcmp.eq.s32.totalorder %v9953_v2, %v10942_v52  ;;  %vm537_vm15 = vcmp.eq.s32.totalorder %v9953_v2, %v10946_v53 }
 0x109   : > { %8756 = vmatprep.subr.msk.mxu0 %vm728_vm0, %v9793_v16  ;;  %8788 = vmatprep.subr.msk.mxu1 %vm730_vm1, %v9793_v16  ;;  %vm1500_vm0 = vcmp.eq.s32.totalorder %v9968_v7, %v11154_v54  ;;  %vm1502_vm1 = vcmp.eq.s32.totalorder %v9968_v7, %v11158_v55 }
 0x10a   : > { %8757 = vmatpush1.msk.msra.mxu0 %vm727_vm2, %v9793_v16  ;;  %8789 = vmatpush1.msk.msra.mxu1 %vm729_vm3, %v9793_v16  ;;  %vm1499_vm2 = vcmp.eq.s32.totalorder %v9968_v7, %v11166_v56  ;;  %vm1501_vm3 = vcmp.eq.s32.totalorder %v9968_v7, %v11170_v57 }
 0x10b   : > { %8758 = vmatprep.subr.msk.mxu0 %vm664_vm4, %v9793_v16  ;;  %8790 = vmatprep.subr.msk.mxu1 %vm666_vm5, %v9793_v16  ;;  %vm1436_vm4 = vcmp.eq.s32.totalorder %v9974_v9, %v11154_v54  ;;  %vm1438_vm5 = vcmp.eq.s32.totalorder %v9974_v9, %v11158_v55 }
 0x10c   : > { %8759 = vmatpush1.msk.msra.mxu0 %vm663_vm6, %v9793_v16  ;;  %8791 = vmatpush1.msk.msra.mxu1 %vm665_vm7, %v9793_v16  ;;  %vm1435_vm6 = vcmp.eq.s32.totalorder %v9974_v9, %v11166_v56  ;;  %vm1437_vm7 = vcmp.eq.s32.totalorder %v9974_v9, %v11170_v57 }
 0x10d   : > { %8760 = vmatprep.subr.msk.mxu0 %vm600_vm8, %v9793_v16  ;;  %8792 = vmatprep.subr.msk.mxu1 %vm602_vm9, %v9793_v16  ;;  %vm1372_vm8 = vcmp.eq.s32.totalorder %v9977_v10, %v11154_v54  ;;  %vm1374_vm9 = vcmp.eq.s32.totalorder %v9977_v10, %v11158_v55 }
 0x10e   : > { %8761 = vmatpush1.msk.msra.mxu0 %vm599_vm10, %v9793_v16  ;;  %8793 = vmatpush1.msk.msra.mxu1 %vm601_vm11, %v9793_v16  ;;  %vm1371_vm10 = vcmp.eq.s32.totalorder %v9977_v10, %v11166_v56  ;;  %vm1373_vm11 = vcmp.eq.s32.totalorder %v9977_v10, %v11170_v57 }
 0x10f   : > { %8762 = vmatprep.subr.msk.mxu0 %vm536_vm12, %v9793_v16  ;;  %8794 = vmatprep.subr.msk.mxu1 %vm538_vm13, %v9793_v16  ;;  %vm1308_vm12 = vcmp.eq.s32.totalorder %v9996_v15, %v11154_v54  ;;  %vm1310_vm13 = vcmp.eq.s32.totalorder %v9996_v15, %v11158_v55 }
 0x110   : > { %8763 = vmatpush1.msk.msra.mxu0 %vm535_vm14, %v9793_v16  ;;  %4371 = vmatprep.mubr.f32.mxu0 %v9792_v1  ;;  %vm1307_vm14 = vcmp.eq.s32.totalorder %v9996_v15, %v11166_v56 }
 0x111   : > { %8795 = vmatpush1.msk.msra.mxu1 %vm537_vm15, %v9793_v16  ;;  %4460 = vmatprep.mubr.f32.mxu1 %v9792_v1  ;;  %vm1309_vm15 = vcmp.eq.s32.totalorder %v9996_v15, %v11170_v57 }
 0x112   : > { %4372 = vmatmul.mubr.f32.vlgmr.msra.gmra.mxu0 %v11193_v58  ;;  %4461 = vmatmul.mubr.f32.vlgmr.msra.gmra.mxu1 %v11193_v58 }
 0x113   : > { %8796 = vmatprep.subr.msk.mxu0 %vm1500_vm0, %v9793_v16  ;;  %8828 = vmatprep.subr.msk.mxu1 %vm1502_vm1, %v9793_v16  ;;  %vm1244_vm0 = vcmp.eq.s32.totalorder %v10023_v17, %v11154_v54  ;;  %vm1246_vm1 = vcmp.eq.s32.totalorder %v10023_v17, %v11158_v55 }
 0x114   : > { %8797 = vmatpush1.msk.msra.mxu0 %vm1499_vm2, %v9793_v16  ;;  %8829 = vmatpush1.msk.msra.mxu1 %vm1501_vm3, %v9793_v16  ;;  %vm1243_vm2 = vcmp.eq.s32.totalorder %v10023_v17, %v11166_v56  ;;  %vm1245_vm3 = vcmp.eq.s32.totalorder %v10023_v17, %v11170_v57 }
 0x115   : > { %8798 = vmatprep.subr.msk.mxu0 %vm1436_vm4, %v9793_v16  ;;  %8830 = vmatprep.subr.msk.mxu1 %vm1438_vm5, %v9793_v16  ;;  %vm1180_vm4 = vcmp.eq.s32.totalorder %v10038_v18, %v11154_v54  ;;  %vm1182_vm5 = vcmp.eq.s32.totalorder %v10038_v18, %v11158_v55 }
 0x116   : > { %4377 = vmatprep.mubr.f32.mxu0 %v9792_v1  ;;  %4466 = vmatprep.mubr.f32.mxu1 %v9792_v1 }
 0x117   : > { %8799 = vmatpush1.msk.msra.mxu0 %vm1435_vm6, %v9793_v16  ;;  %8831 = vmatpush1.msk.msra.mxu1 %vm1437_vm7, %v9793_v16  ;;  %vm1179_vm6 = vcmp.eq.s32.totalorder %v10038_v18, %v11166_v56  ;;  %vm1181_vm7 = vcmp.eq.s32.totalorder %v10038_v18, %v11170_v57 }
 0x118   : > { %4378 = vmatmul.mubr.f32.gmra.mxu0 %v11226_v59  ;;  %4467 = vmatmul.mubr.f32.gmra.mxu1 %v11226_v59 }
 0x119   : > { %8800 = vmatprep.subr.msk.mxu0 %vm1372_vm8, %v9793_v16  ;;  %8832 = vmatprep.subr.msk.mxu1 %vm1374_vm9, %v9793_v16  ;;  %vm1116_vm8 = vcmp.eq.s32.totalorder %v10053_v19, %v11154_v54  ;;  %vm1118_vm9 = vcmp.eq.s32.totalorder %v10053_v19, %v11158_v55 }
 0x11a   : > { %8801 = vmatpush1.msk.msra.mxu0 %vm1371_vm10, %v9793_v16  ;;  %8833 = vmatpush1.msk.msra.mxu1 %vm1373_vm11, %v9793_v16  ;;  %vm1115_vm10 = vcmp.eq.s32.totalorder %v10053_v19, %v11166_v56  ;;  %vm1117_vm11 = vcmp.eq.s32.totalorder %v10053_v19, %v11170_v57 }
 0x11b   : > { %8802 = vmatprep.subr.msk.mxu0 %vm1308_vm12, %v9793_v16  ;;  %8834 = vmatprep.subr.msk.mxu1 %vm1310_vm13, %v9793_v16  ;;  %vm1052_vm12 = vcmp.eq.s32.totalorder %v10068_v20, %v11154_v54  ;;  %vm1054_vm13 = vcmp.eq.s32.totalorder %v10068_v20, %v11158_v55 }
 0x11c   : > { %4383 = vmatprep.mubr.f32.mxu0 %v9792_v1  ;;  %4472 = vmatprep.mubr.f32.mxu1 %v9792_v1 }
 0x11d   : > { %8803 = vmatpush1.msk.msra.mxu0 %vm1307_vm14, %v9793_v16  ;;  %8835 = vmatpush1.msk.msra.mxu1 %vm1309_vm15, %v9793_v16  ;;  %vm1051_vm14 = vcmp.eq.s32.totalorder %v10068_v20, %v11166_v56  ;;  %vm1053_vm15 = vcmp.eq.s32.totalorder %v10068_v20, %v11170_v57 }
 0x11e   : > { %4384 = vmatmul.mubr.f32.gmra.mxu0 %v11259_v60  ;;  %4473 = vmatmul.mubr.f32.gmra.mxu1 %v11259_v60 }
 0x11f   : > { %8804 = vmatprep.subr.msk.mxu0 %vm1244_vm0, %v9793_v16  ;;  %8836 = vmatprep.subr.msk.mxu1 %vm1246_vm1, %v9793_v16  ;;  %vm988_vm0 = vcmp.eq.s32.totalorder %v10083_v21, %v11154_v54  ;;  %vm990_vm1 = vcmp.eq.s32.totalorder %v10083_v21, %v11158_v55 }
 0x120   : > { %8805 = vmatpush1.msk.msra.mxu0 %vm1243_vm2, %v9793_v16  ;;  %8837 = vmatpush1.msk.msra.mxu1 %vm1245_vm3, %v9793_v16  ;;  %vm987_vm2 = vcmp.eq.s32.totalorder %v10083_v21, %v11166_v56  ;;  %vm989_vm3 = vcmp.eq.s32.totalorder %v10083_v21, %v11170_v57 }
 0x121   : > { %8806 = vmatprep.subr.msk.mxu0 %vm1180_vm4, %v9793_v16  ;;  %8838 = vmatprep.subr.msk.mxu1 %vm1182_vm5, %v9793_v16  ;;  %vm924_vm4 = vcmp.eq.s32.totalorder %v10098_v22, %v11154_v54  ;;  %vm926_vm5 = vcmp.eq.s32.totalorder %v10098_v22, %v11158_v55 }
 0x122   : > { %4389 = vmatprep.mubr.f32.mxu0 %v9792_v1  ;;  %4478 = vmatprep.mubr.f32.mxu1 %v9792_v1 }
 0x123   : > { %8807 = vmatpush1.msk.msra.mxu0 %vm1179_vm6, %v9793_v16  ;;  %8839 = vmatpush1.msk.msra.mxu1 %vm1181_vm7, %v9793_v16  ;;  %vm923_vm6 = vcmp.eq.s32.totalorder %v10098_v22, %v11166_v56  ;;  %vm925_vm7 = vcmp.eq.s32.totalorder %v10098_v22, %v11170_v57 }
 0x124   : > { %4390 = vmatmul.mubr.f32.gmra.mxu0 %v11292_v61  ;;  %4479 = vmatmul.mubr.f32.gmra.mxu1 %v11292_v61 }
 0x125   : > { %8808 = vmatprep.subr.msk.mxu0 %vm1116_vm8, %v9793_v16  ;;  %8840 = vmatprep.subr.msk.mxu1 %vm1118_vm9, %v9793_v16  ;;  %vm860_vm8 = vcmp.eq.s32.totalorder %v10113_v23, %v11154_v54  ;;  %vm862_vm9 = vcmp.eq.s32.totalorder %v10113_v23, %v11158_v55 }
 0x126   : > { %8809 = vmatpush1.msk.msra.mxu0 %vm1115_vm10, %v9793_v16  ;;  %8841 = vmatpush1.msk.msra.mxu1 %vm1117_vm11, %v9793_v16  ;;  %vm859_vm10 = vcmp.eq.s32.totalorder %v10113_v23, %v11166_v56  ;;  %vm861_vm11 = vcmp.eq.s32.totalorder %v10113_v23, %v11170_v57 }
 0x127   : > { %8810 = vmatprep.subr.msk.mxu0 %vm1052_vm12, %v9793_v16  ;;  %8842 = vmatprep.subr.msk.mxu1 %vm1054_vm13, %v9793_v16  ;;  %vm796_vm12 = vcmp.eq.s32.totalorder %v10128_v24, %v11154_v54  ;;  %vm798_vm13 = vcmp.eq.s32.totalorder %v10128_v24, %v11158_v55 }
 0x128   : > { %8811 = vmatpush1.msk.msra.mxu0 %vm1051_vm14, %v9793_v16  ;;  %8843 = vmatpush1.msk.msra.mxu1 %vm1053_vm15, %v9793_v16  ;;  %vm795_vm14 = vcmp.eq.s32.totalorder %v10128_v24, %v11166_v56  ;;  %vm797_vm15 = vcmp.eq.s32.totalorder %v10128_v24, %v11170_v57 }
 0x129   : > { %8812 = vmatprep.subr.msk.mxu0 %vm988_vm0, %v9793_v16  ;;  %8844 = vmatprep.subr.msk.mxu1 %vm990_vm1, %v9793_v16  ;;  %vm732_vm0 = vcmp.eq.s32.totalorder %v10143_v25, %v11154_v54  ;;  %vm734_vm1 = vcmp.eq.s32.totalorder %v10143_v25, %v11158_v55 }
 0x12a   : > { %8813 = vmatpush1.msk.msra.mxu0 %vm987_vm2, %v9793_v16  ;;  %8845 = vmatpush1.msk.msra.mxu1 %vm989_vm3, %v9793_v16  ;;  %vm731_vm2 = vcmp.eq.s32.totalorder %v10143_v25, %v11166_v56  ;;  %vm733_vm3 = vcmp.eq.s32.totalorder %v10143_v25, %v11170_v57 }
 0x12b   : > { %8814 = vmatprep.subr.msk.mxu0 %vm924_vm4, %v9793_v16  ;;  %8846 = vmatprep.subr.msk.mxu1 %vm926_vm5, %v9793_v16  ;;  %vm668_vm4 = vcmp.eq.s32.totalorder %v10158_v26, %v11154_v54  ;;  %vm670_vm5 = vcmp.eq.s32.totalorder %v10158_v26, %v11158_v55 }
 0x12c   : > { %8815 = vmatpush1.msk.msra.mxu0 %vm923_vm6, %v9793_v16  ;;  %8847 = vmatpush1.msk.msra.mxu1 %vm925_vm7, %v9793_v16  ;;  %vm667_vm6 = vcmp.eq.s32.totalorder %v10158_v26, %v11166_v56  ;;  %vm669_vm7 = vcmp.eq.s32.totalorder %v10158_v26, %v11170_v57 }
 0x12d   : > { %8816 = vmatprep.subr.msk.mxu0 %vm860_vm8, %v9793_v16  ;;  %8848 = vmatprep.subr.msk.mxu1 %vm862_vm9, %v9793_v16  ;;  %vm604_vm8 = vcmp.eq.s32.totalorder %v10167_v27, %v11154_v54  ;;  %vm606_vm9 = vcmp.eq.s32.totalorder %v10167_v27, %v11158_v55 }
 0x12e   : > { %8817 = vmatpush1.msk.msra.mxu0 %vm859_vm10, %v9793_v16  ;;  %8849 = vmatpush1.msk.msra.mxu1 %vm861_vm11, %v9793_v16  ;;  %vm603_vm10 = vcmp.eq.s32.totalorder %v10167_v27, %v11166_v56  ;;  %vm605_vm11 = vcmp.eq.s32.totalorder %v10167_v27, %v11170_v57 }
 0x12f   : > { %8818 = vmatprep.subr.msk.mxu0 %vm796_vm12, %v9793_v16  ;;  %8850 = vmatprep.subr.msk.mxu1 %vm798_vm13, %v9793_v16  ;;  %vm540_vm12 = vcmp.eq.s32.totalorder %v9953_v2, %v11154_v54  ;;  %vm542_vm13 = vcmp.eq.s32.totalorder %v9953_v2, %v11158_v55 }
 0x130   : > { %8819 = vmatpush1.msk.msra.mxu0 %vm795_vm14, %v9793_v16  ;;  %8851 = vmatpush1.msk.msra.mxu1 %vm797_vm15, %v9793_v16  ;;  %vm539_vm14 = vcmp.eq.s32.totalorder %v9953_v2, %v11166_v56  ;;  %vm541_vm15 = vcmp.eq.s32.totalorder %v9953_v2, %v11170_v57 }
 0x131   : > { %8820 = vmatprep.subr.msk.mxu0 %vm732_vm0, %v9793_v16  ;;  %8852 = vmatprep.subr.msk.mxu1 %vm734_vm1, %v9793_v16  ;;  %vm1504_vm0 = vcmp.eq.s32.totalorder %v9968_v7, %v11405_v8  ;;  %vm1506_vm1 = vcmp.eq.s32.totalorder %v9968_v7, %v11409_v11 }
 0x132   : > { %8821 = vmatpush1.msk.msra.mxu0 %vm731_vm2, %v9793_v16  ;;  %8853 = vmatpush1.msk.msra.mxu1 %vm733_vm3, %v9793_v16  ;;  %v11387_v63 = vpop.f32.mrf.mxu0  ;;  %v11389_v0 = vpop.f32.mrf.mxu1  ;;  %vm1503_vm2 = vcmp.eq.s32.totalorder %v9968_v7, %v11427_v14  ;;  %vm1505_vm3 = vcmp.eq.s32.totalorder %v9968_v7, %v11431_v32 }
 0x133   : > { %8822 = vmatprep.subr.msk.mxu0 %vm668_vm4, %v9793_v16  ;;  %8854 = vmatprep.subr.msk.mxu1 %vm670_vm5, %v9793_v16  ;;  %vm1440_vm4 = vcmp.eq.s32.totalorder %v9974_v9, %v11405_v8  ;;  %vm1442_vm5 = vcmp.eq.s32.totalorder %v9974_v9, %v11409_v11 }
 0x134   : > { %8823 = vmatpush1.msk.msra.mxu0 %vm667_vm6, %v9793_v16  ;;  %8855 = vmatpush1.msk.msra.mxu1 %vm669_vm7, %v9793_v16  ;;  %v11411_v12 = vpop.f32.mrf.mxu0  ;;  %v11413_v13 = vpop.f32.mrf.mxu1  ;;  %vm1439_vm6 = vcmp.eq.s32.totalorder %v9974_v9, %v11427_v14  ;;  %vm1441_vm7 = vcmp.eq.s32.totalorder %v9974_v9, %v11431_v32 }
 0x135   : > { %8824 = vmatprep.subr.msk.mxu0 %vm604_vm8, %v9793_v16  ;;  %8856 = vmatprep.subr.msk.mxu1 %vm606_vm9, %v9793_v16  ;;  %vm1376_vm8 = vcmp.eq.s32.totalorder %v9977_v10, %v11405_v8  ;;  %vm1378_vm9 = vcmp.eq.s32.totalorder %v9977_v10, %v11409_v11 }
 0x136   : > { %8825 = vmatpush1.msk.msra.mxu0 %vm603_vm10, %v9793_v16  ;;  %8857 = vmatpush1.msk.msra.mxu1 %vm605_vm11, %v9793_v16  ;;  %vm1375_vm10 = vcmp.eq.s32.totalorder %v9977_v10, %v11427_v14  ;;  %vm1377_vm11 = vcmp.eq.s32.totalorder %v9977_v10, %v11431_v32 }
 0x137   : > { %8826 = vmatprep.subr.msk.mxu0 %vm540_vm12, %v9793_v16  ;;  %8858 = vmatprep.subr.msk.mxu1 %vm542_vm13, %v9793_v16  ;;  %vm1312_vm12 = vcmp.eq.s32.totalorder %v9996_v15, %v11405_v8  ;;  %vm1314_vm13 = vcmp.eq.s32.totalorder %v9996_v15, %v11409_v11 }
 0x138   : > { %8827 = vmatpush1.msk.msra.mxu0 %vm539_vm14, %v9793_v16  ;;  %4549 = vmatprep.mubr.f32.mxu0 %v9792_v1  ;;  %v11448_v33 = vpop.f32.mrf.mxu0  ;;  %v11450_v34 = vpop.f32.mrf.mxu1  ;;  %vm1311_vm14 = vcmp.eq.s32.totalorder %v9996_v15, %v11427_v14 }
 0x139   : > { %8859 = vmatpush1.msk.msra.mxu1 %vm541_vm15, %v9793_v16  ;;  %4638 = vmatprep.mubr.f32.mxu1 %v9792_v1  ;;  %vm1313_vm15 = vcmp.eq.s32.totalorder %v9996_v15, %v11431_v32 }
 0x13a   : > { %4550 = vmatmul.mubr.f32.vlgmr.msra.gmra.mxu0 %v11193_v58  ;;  %4639 = vmatmul.mubr.f32.vlgmr.msra.gmra.mxu1 %v11193_v58  ;;  %v11464_v35 = vpop.f32.mrf.mxu0  ;;  %v11466_v36 = vpop.f32.mrf.mxu1 }
 0x13b   : > { %8860 = vmatprep.subr.msk.mxu0 %vm1504_vm0, %v9793_v16  ;;  %8892 = vmatprep.subr.msk.mxu1 %vm1506_vm1, %v9793_v16  ;;  %vm1248_vm0 = vcmp.eq.s32.totalorder %v10023_v17, %v11405_v8  ;;  %vm1250_vm1 = vcmp.eq.s32.totalorder %v10023_v17, %v11409_v11 }
 0x13c   : > { %8861 = vmatpush1.msk.msra.mxu0 %vm1503_vm2, %v9793_v16  ;;  %8893 = vmatpush1.msk.msra.mxu1 %vm1505_vm3, %v9793_v16  ;;  %vm1247_vm2 = vcmp.eq.s32.totalorder %v10023_v17, %v11427_v14  ;;  %vm1249_vm3 = vcmp.eq.s32.totalorder %v10023_v17, %v11431_v32 }
 0x13d   : > { %8862 = vmatprep.subr.msk.mxu0 %vm1440_vm4, %v9793_v16  ;;  %8894 = vmatprep.subr.msk.mxu1 %vm1442_vm5, %v9793_v16  ;;  %vm1184_vm4 = vcmp.eq.s32.totalorder %v10038_v18, %v11405_v8  ;;  %vm1186_vm5 = vcmp.eq.s32.totalorder %v10038_v18, %v11409_v11 }
 0x13e   : > { %4555 = vmatprep.mubr.f32.mxu0 %v9792_v1  ;;  %4644 = vmatprep.mubr.f32.mxu1 %v9792_v1  ;;  %v3673_v37 = vpop.f32.mrf.mxu0  ;;  %v3762_v38 = vpop.f32.mrf.mxu1 }
 0x13f   : > { %8863 = vmatpush1.msk.msra.mxu0 %vm1439_vm6, %v9793_v16  ;;  %8895 = vmatpush1.msk.msra.mxu1 %vm1441_vm7, %v9793_v16  ;;  %vm1183_vm6 = vcmp.eq.s32.totalorder %v10038_v18, %v11427_v14  ;;  %vm1185_vm7 = vcmp.eq.s32.totalorder %v10038_v18, %v11431_v32 }
 0x140   : > { %4556 = vmatmul.mubr.f32.gmra.mxu0 %v11226_v59  ;;  %4645 = vmatmul.mubr.f32.gmra.mxu1 %v11226_v59  ;;  %v3675_v40 = vpop.f32.mrf.mxu0  ;;  %v3764_v41 = vpop.f32.mrf.mxu1 }
 0x141   : > { %8864 = vmatprep.subr.msk.mxu0 %vm1376_vm8, %v9793_v16  ;;  %8896 = vmatprep.subr.msk.mxu1 %vm1378_vm9, %v9793_v16  ;;  %vm1120_vm8 = vcmp.eq.s32.totalorder %v10053_v19, %v11405_v8  ;;  %vm1122_vm9 = vcmp.eq.s32.totalorder %v10053_v19, %v11409_v11 }
 0x142   : > { %8865 = vmatpush1.msk.msra.mxu0 %vm1375_vm10, %v9793_v16  ;;  %8897 = vmatpush1.msk.msra.mxu1 %vm1377_vm11, %v9793_v16  ;;  %vm1119_vm10 = vcmp.eq.s32.totalorder %v10053_v19, %v11427_v14  ;;  %vm1121_vm11 = vcmp.eq.s32.totalorder %v10053_v19, %v11431_v32 }
 0x143   : > { %8866 = vmatprep.subr.msk.mxu0 %vm1312_vm12, %v9793_v16  ;;  %8898 = vmatprep.subr.msk.mxu1 %vm1314_vm13, %v9793_v16  ;;  %vm1056_vm12 = vcmp.eq.s32.totalorder %v10068_v20, %v11405_v8  ;;  %vm1058_vm13 = vcmp.eq.s32.totalorder %v10068_v20, %v11409_v11 }
 0x144   : > { %4561 = vmatprep.mubr.f32.mxu0 %v9792_v1  ;;  %4650 = vmatprep.mubr.f32.mxu1 %v9792_v1  ;;  %v3679_v45 = vpop.f32.mrf.mxu0  ;;  %v3768_v46 = vpop.f32.mrf.mxu1 }
 0x145   : > { %8867 = vmatpush1.msk.msra.mxu0 %vm1311_vm14, %v9793_v16  ;;  %8899 = vmatpush1.msk.msra.mxu1 %vm1313_vm15, %v9793_v16  ;;  %v6771_v48 = vmul.f32 %v11517_v42, %v3679_v45  ;;  %v6773_v49 = vmul.f32 %v11521_v43, %v3768_v46  ;;  %vm1055_vm14 = vcmp.eq.s32.totalorder %v10068_v20, %v11427_v14 }
 0x146   : > { %4562 = vmatmul.mubr.f32.gmra.mxu0 %v11259_v60  ;;  %4651 = vmatmul.mubr.f32.gmra.mxu1 %v11259_v60  ;;  %v3681_v50 = vpop.f32.mrf.mxu0  ;;  %v3770_v51 = vpop.f32.mrf.mxu1  ;;  %vm1057_vm15 = vcmp.eq.s32.totalorder %v10068_v20, %v11431_v32 }
 0x147   : > { %8868 = vmatprep.subr.msk.mxu0 %vm1248_vm0, %v9793_v16  ;;  %8900 = vmatprep.subr.msk.mxu1 %vm1250_vm1, %v9793_v16  ;;  %v6835_v52 = vadd.f32 %v6771_v48, %v3673_v37  ;;  %v6837_v53 = vadd.f32 %v6773_v49, %v3762_v38  ;;  %v6772_v54 = vmul.f32 %v11551_v44, %v3681_v50 }
 0x148   : > { %8869 = vmatpush1.msk.msra.mxu0 %vm1247_vm2, %v9793_v16  ;;  %8901 = vmatpush1.msk.msra.mxu1 %vm1249_vm3, %v9793_v16  ;;  %v6774_v55 = vmul.f32 %v11561_v47, %v3770_v51  ;;  %vm992_vm0 = vcmp.eq.s32.totalorder %v10083_v21, %v11405_v8  ;;  %vm994_vm1 = vcmp.eq.s32.totalorder %v10083_v21, %v11409_v11 }
 0x149   : > { %8870 = vmatprep.subr.msk.mxu0 %vm1184_vm4, %v9793_v16  ;;  %8902 = vmatprep.subr.msk.mxu1 %vm1186_vm5, %v9793_v16  ;;  %v6899_v56 = vmul.f32 %v6835_v52, %v11517_v42  ;;  %v6901_v57 = vmul.f32 %v6837_v53, %v11521_v43  ;;  %v6836_v37 = vadd.f32 %v6772_v54, %v3675_v40 }
 0x14a   : > { %4567 = vmatprep.mubr.f32.mxu0 %v9792_v1  ;;  %4656 = vmatprep.mubr.f32.mxu1 %v9792_v1  ;;  %v6838_v38 = vadd.f32 %v6774_v55, %v3764_v41  ;;  %vm991_vm2 = vcmp.eq.s32.totalorder %v10083_v21, %v11427_v14  ;;  %vm993_vm3 = vcmp.eq.s32.totalorder %v10083_v21, %v11431_v32 }
 0x14b   : > { %8871 = vmatpush1.msk.msra.mxu0 %vm1183_vm6, %v9793_v16  ;;  %8903 = vmatpush1.msk.msra.mxu1 %vm1185_vm7, %v9793_v16  ;;  %v6963_v40 = vadd.f32 %v6899_v56, %v11448_v33  ;;  %v6965_v45 = vadd.f32 %v6901_v57, %v11450_v34  ;;  %v6900_v46 = vmul.f32 %v6836_v37, %v11551_v44 }
 0x14c   : > { %4568 = vmatmul.mubr.f32.gmra.mxu0 %v11292_v61  ;;  %4657 = vmatmul.mubr.f32.gmra.mxu1 %v11292_v61  ;;  %v6902_v41 = vmul.f32 %v6838_v38, %v11561_v47  ;;  %vm928_vm4 = vcmp.eq.s32.totalorder %v10098_v22, %v11405_v8  ;;  %vm930_vm5 = vcmp.eq.s32.totalorder %v10098_v22, %v11409_v11 }
 0x14d   : > { %8872 = vmatprep.subr.msk.mxu0 %vm1120_vm8, %v9793_v16  ;;  %8904 = vmatprep.subr.msk.mxu1 %vm1122_vm9, %v9793_v16  ;;  %v7027_v33 = vmul.f32 %v6963_v40, %v11517_v42  ;;  %v7029_v34 = vmul.f32 %v6965_v45, %v11521_v43  ;;  %v6964_v48 = vadd.f32 %v6900_v46, %v11464_v35 }
 0x14e   : > { %8873 = vmatpush1.msk.msra.mxu0 %vm1119_vm10, %v9793_v16  ;;  %8905 = vmatpush1.msk.msra.mxu1 %vm1121_vm11, %v9793_v16  ;;  %v6966_v42 = vadd.f32 %v6902_v41, %v11466_v36  ;;  %vm927_vm6 = vcmp.eq.s32.totalorder %v10098_v22, %v11427_v14  ;;  %vm929_vm7 = vcmp.eq.s32.totalorder %v10098_v22, %v11431_v32 }
 0x14f   : > { %8874 = vmatprep.subr.msk.mxu0 %vm1056_vm12, %v9793_v16  ;;  %8906 = vmatprep.subr.msk.mxu1 %vm1058_vm13, %v9793_v16  ;;  %v7091_v35 = vadd.f32 %v7027_v33, %v11387_v63  ;;  %v7093_v43 = vadd.f32 %v7029_v34, %v11389_v0  ;;  %v7028_v49 = vmul.f32 %v6964_v48, %v11551_v44 }
 0x150   : > { %8875 = vmatpush1.msk.msra.mxu0 %vm1055_vm14, %v9793_v16  ;;  %8907 = vmatpush1.msk.msra.mxu1 %vm1057_vm15, %v9793_v16  ;;  %v7030_v63 = vmul.f32 %v6966_v42, %v11561_v47  ;;  %vm864_vm8 = vcmp.eq.s32.totalorder %v10113_v23, %v11405_v8  ;;  %vm866_vm9 = vcmp.eq.s32.totalorder %v10113_v23, %v11409_v11 }
 0x151   : > { %8876 = vmatprep.subr.msk.mxu0 %vm992_vm0, %v9793_v16  ;;  %8908 = vmatprep.subr.msk.mxu1 %vm994_vm1, %v9793_v16  ;;  %v7155_v0 = vmul.f32 1.442695, %v7091_v35  ;;  %v7159_v36 = vmul.f32 1.442695, %v7093_v43  ;;  %v7092_v44 = vadd.f32 %v7028_v49, %v11411_v12  ;;  %vm863_vm10 = vcmp.eq.s32.totalorder %v10113_v23, %v11427_v14 }
 0x152   : > { %8877 = vmatpush1.msk.msra.mxu0 %vm991_vm2, %v9793_v16  ;;  %8909 = vmatpush1.msk.msra.mxu1 %vm993_vm3, %v9793_v16  ;;  %v7094_v47 = vadd.f32 %v7030_v63, %v11413_v13  ;;  %vm865_vm11 = vcmp.eq.s32.totalorder %v10113_v23, %v11431_v32  ;;  %vm800_vm12 = vcmp.eq.s32.totalorder %v10128_v24, %v11405_v8 }
 0x153   : > { %8878 = vmatprep.subr.msk.mxu0 %vm928_vm4, %v9793_v16  ;;  %8910 = vmatprep.subr.msk.mxu1 %vm930_vm5, %v9793_v16  ;;  %9550 = vpow2.f32 %v7155_v0  ;;  %v7157_v12 = vmul.f32 1.442695, %v7092_v44  ;;  %vm802_vm13 = vcmp.eq.s32.totalorder %v10128_v24, %v11409_v11  ;;  %vm799_vm14 = vcmp.eq.s32.totalorder %v10128_v24, %v11427_v14 }
 0x154   : > { %8879 = vmatpush1.msk.msra.mxu0 %vm927_vm6, %v9793_v16  ;;  %8911 = vmatpush1.msk.msra.mxu1 %vm929_vm7, %v9793_v16  ;;  %9552 = vpow2.f32 %v7159_v36  ;;  %v7161_v13 = vmul.f32 1.442695, %v7094_v47  ;;  %vm801_vm15 = vcmp.eq.s32.totalorder %v10128_v24, %v11431_v32  ;;  %vm736_vm0 = vcmp.eq.s32.totalorder %v10143_v25, %v11405_v8 }
 0x155   : > { %8880 = vmatprep.subr.msk.mxu0 %vm864_vm8, %v9793_v16  ;;  %8912 = vmatprep.subr.msk.mxu1 %vm866_vm9, %v9793_v16  ;;  %9554 = vpow2.f32 %v7157_v12  ;;  %vm738_vm1 = vcmp.eq.s32.totalorder %v10143_v25, %v11409_v11  ;;  %vm735_vm2 = vcmp.eq.s32.totalorder %v10143_v25, %v11427_v14  ;;  %vm737_vm3 = vcmp.eq.s32.totalorder %v10143_v25, %v11431_v32 }
 0x156   : > { %8881 = vmatpush1.msk.msra.mxu0 %vm863_vm10, %v9793_v16  ;;  %8913 = vmatpush1.msk.msra.mxu1 %vm865_vm11, %v9793_v16  ;;  %9556 = vpow2.f32 %v7161_v13  ;;  %vm672_vm4 = vcmp.eq.s32.totalorder %v10158_v26, %v11405_v8  ;;  %vm674_vm5 = vcmp.eq.s32.totalorder %v10158_v26, %v11409_v11  ;;  %vm671_vm6 = vcmp.eq.s32.totalorder %v10158_v26, %v11427_v14 }
 0x157   : > { %8882 = vmatprep.subr.msk.mxu0 %vm800_vm12, %v9793_v16  ;;  %8914 = vmatprep.subr.msk.mxu1 %vm802_vm13, %v9793_v16  ;;  %vm673_vm7 = vcmp.eq.s32.totalorder %v10158_v26, %v11431_v32  ;;  %vm608_vm8 = vcmp.eq.s32.totalorder %v10167_v27, %v11405_v8  ;;  %vm610_vm9 = vcmp.eq.s32.totalorder %v10167_v27, %v11409_v11 }
 0x158   : > { %8883 = vmatpush1.msk.msra.mxu0 %vm799_vm14, %v9793_v16  ;;  %8915 = vmatpush1.msk.msra.mxu1 %vm801_vm15, %v9793_v16  ;;  %vm607_vm10 = vcmp.eq.s32.totalorder %v10167_v27, %v11427_v14  ;;  %vm609_vm11 = vcmp.eq.s32.totalorder %v10167_v27, %v11431_v32  ;;  %vm544_vm12 = vcmp.eq.s32.totalorder %v9953_v2, %v11405_v8 }
 0x159   : > { %8884 = vmatprep.subr.msk.mxu0 %vm736_vm0, %v9793_v16  ;;  %8916 = vmatprep.subr.msk.mxu1 %vm738_vm1, %v9793_v16  ;;  %vm546_vm13 = vcmp.eq.s32.totalorder %v9953_v2, %v11409_v11  ;;  %v11812_v52 = vrot.slane %v11379_v62, %v10182_v28  ;;  %v11816_v53 = vrot.slane %v11379_v62, %v10185_v29 }
 0x15a   : > { %8885 = vmatpush1.msk.msra.mxu0 %vm735_vm2, %v9793_v16  ;;  %8917 = vmatpush1.msk.msra.mxu1 %vm737_vm3, %v9793_v16  ;;  %v11793_v50 = vpop.f32.mrf.mxu0  ;;  %v11795_v51 = vpop.f32.mrf.mxu1  ;;  %vm543_vm14 = vcmp.eq.s32.totalorder %v9953_v2, %v11427_v14  ;;  %v11834_v56 = vrot.slane %v11379_v62, %v10194_v30  ;;  %v11838_v57 = vrot.slane %v11379_v62, %v10197_v31 }
 0x15b   : > { %8886 = vmatprep.subr.msk.mxu0 %vm672_vm4, %v9793_v16  ;;  %8918 = vmatprep.subr.msk.mxu1 %vm674_vm5, %v9793_v16  ;;  %vm545_vm15 = vcmp.eq.s32.totalorder %v9953_v2, %v11431_v32  ;;  %vm1508_vm0 = vcmp.eq.s32.totalorder %v9968_v7, %v11812_v52  ;;  %vm1510_vm1 = vcmp.eq.s32.totalorder %v9968_v7, %v11816_v53 }
 0x15c   : > { %8887 = vmatpush1.msk.msra.mxu0 %vm671_vm6, %v9793_v16  ;;  %8919 = vmatpush1.msk.msra.mxu1 %vm673_vm7, %v9793_v16  ;;  %v11818_v54 = vpop.f32.mrf.mxu0  ;;  %v11820_v55 = vpop.f32.mrf.mxu1  ;;  %vm1507_vm2 = vcmp.eq.s32.totalorder %v9968_v7, %v11834_v56  ;;  %vm1509_vm3 = vcmp.eq.s32.totalorder %v9968_v7, %v11838_v57  ;;  %vm1444_vm4 = vcmp.eq.s32.totalorder %v9974_v9, %v11812_v52 }
 0x15d   : > { %8888 = vmatprep.subr.msk.mxu0 %vm608_vm8, %v9793_v16  ;;  %8920 = vmatprep.subr.msk.mxu1 %vm610_vm9, %v9793_v16  ;;  %vm1446_vm5 = vcmp.eq.s32.totalorder %v9974_v9, %v11816_v53  ;;  %vm1443_vm6 = vcmp.eq.s32.totalorder %v9974_v9, %v11834_v56  ;;  %vm1445_vm7 = vcmp.eq.s32.totalorder %v9974_v9, %v11838_v57 }
 0x15e   : > { %8889 = vmatpush1.msk.msra.mxu0 %vm607_vm10, %v9793_v16  ;;  %8921 = vmatpush1.msk.msra.mxu1 %vm609_vm11, %v9793_v16  ;;  %vm1380_vm8 = vcmp.eq.s32.totalorder %v9977_v10, %v11812_v52  ;;  %vm1382_vm9 = vcmp.eq.s32.totalorder %v9977_v10, %v11816_v53  ;;  %vm1379_vm10 = vcmp.eq.s32.totalorder %v9977_v10, %v11834_v56 }
 0x15f   : > { %8890 = vmatprep.subr.msk.mxu0 %vm544_vm12, %v9793_v16  ;;  %8922 = vmatprep.subr.msk.mxu1 %vm546_vm13, %v9793_v16  ;;  %vm1381_vm11 = vcmp.eq.s32.totalorder %v9977_v10, %v11838_v57  ;;  %vm1316_vm12 = vcmp.eq.s32.totalorder %v9996_v15, %v11812_v52  ;;  %vm1318_vm13 = vcmp.eq.s32.totalorder %v9996_v15, %v11816_v53 }
 0x160   : > { %v9551_v62 = vpop.eup %9550  ;;  %8891 = vmatpush1.msk.msra.mxu0 %vm543_vm14, %v9793_v16  ;;  %4727 = vmatprep.mubr.f32.mxu0 %v9792_v1  ;;  %v11866_v11 = vpop.f32.mrf.mxu0  ;;  %vm1315_vm14 = vcmp.eq.s32.totalorder %v9996_v15, %v11834_v56  ;;  %v11946_v33 = vrot.slane %v11487_v39, %v10197_v31  ;;  %v11976_v34 = vrot.slane %v11487_v39, %v10182_v28 }
 0x161   : > { %v11868_v14 = vpop.f32.mrf.mxu1  ;;  %v9553_v8 = vpop.eup %9552  ;;  %8923 = vmatpush1.msk.msra.mxu1 %vm545_vm15, %v9793_v16  ;;  %4816 = vmatprep.mubr.f32.mxu1 %v9792_v1  ;;  %7283 = vst [vmem:[%s11853_s6] sm:$0xff] %v9551_v62  ;;  %vm1317_vm15 = vcmp.eq.s32.totalorder %v9996_v15, %v11838_v57  ;;  %v6482_v35 = vrot.slane %v11487_v39, %v10185_v29 }
 0x162   : > { %v9555_v32 = vpop.eup %9554  ;;  %4728 = vmatmul.mubr.f32.vlgmr.msra.gmra.mxu0 %v11193_v58  ;;  %4817 = vmatmul.mubr.f32.vlgmr.msra.gmra.mxu1 %v11193_v58  ;;  %7285 = vst [vmem:[%s11853_s6 + $0x10] sm:$0xff] %v9553_v8  ;;  %v11884_v37 = vpop.f32.mrf.mxu0 }
 0x163   : > { %v11886_v38 = vpop.f32.mrf.mxu1  ;;  %v9557_v40 = vpop.eup %9556  ;;  %8924 = vmatprep.subr.msk.mxu0 %vm1508_vm0, %v9793_v16  ;;  %8956 = vmatprep.subr.msk.mxu1 %vm1510_vm1, %v9793_v16  ;;  %7284 = vst [vmem:[%s11853_s6 + $0x8] sm:$0xff] %v9555_v32  ;;  %vm1252_vm0 = vcmp.eq.s32.totalorder %v10023_v17, %v11812_v52  ;;  %vm1254_vm1 = vcmp.eq.s32.totalorder %v10023_v17, %v11816_v53 }
 0x164   : > { %8925 = vmatpush1.msk.msra.mxu0 %vm1507_vm2, %v9793_v16  ;;  %8957 = vmatpush1.msk.msra.mxu1 %vm1509_vm3, %v9793_v16  ;;  %7286 = vst [vmem:[%s11853_s6 + $0x18] sm:$0xff] %v9557_v40  ;;  %vm1251_vm2 = vcmp.eq.s32.totalorder %v10023_v17, %v11834_v56  ;;  %vm1253_vm3 = vcmp.eq.s32.totalorder %v10023_v17, %v11838_v57 }
 0x165   : > { %8926 = vmatprep.subr.msk.mxu0 %vm1444_vm4, %v9793_v16  ;;  %8958 = vmatprep.subr.msk.mxu1 %vm1446_vm5, %v9793_v16  ;;  %vm1188_vm4 = vcmp.eq.s32.totalorder %v10038_v18, %v11812_v52  ;;  %vm1190_vm5 = vcmp.eq.s32.totalorder %v10038_v18, %v11816_v53 }
 0x166   : > { %4733 = vmatprep.mubr.f32.mxu0 %v9792_v1  ;;  %4822 = vmatprep.mubr.f32.mxu1 %v9792_v1  ;;  %v3851_v58 = vpop.f32.mrf.mxu0  ;;  %v3940_v45 = vpop.f32.mrf.mxu1 }
 0x167   : > { %8927 = vmatpush1.msk.msra.mxu0 %vm1443_vm6, %v9793_v16  ;;  %8959 = vmatpush1.msk.msra.mxu1 %vm1445_vm7, %v9793_v16  ;;  %vm1187_vm6 = vcmp.eq.s32.totalorder %v10038_v18, %v11834_v56  ;;  %vm1189_vm7 = vcmp.eq.s32.totalorder %v10038_v18, %v11838_v57 }
 0x168   : > { %4734 = vmatmul.mubr.f32.gmra.mxu0 %v11226_v59  ;;  %4823 = vmatmul.mubr.f32.gmra.mxu1 %v11226_v59  ;;  %v3853_v46 = vpop.f32.mrf.mxu0  ;;  %v3942_v41 = vpop.f32.mrf.mxu1  ;;  %v11942_v59 = vrot.slane %v11487_v39, %v10194_v30 }
 0x169   : > { %8928 = vmatprep.subr.msk.mxu0 %vm1380_vm8, %v9793_v16  ;;  %8960 = vmatprep.subr.msk.mxu1 %vm1382_vm9, %v9793_v16  ;;  %vm1124_vm8 = vcmp.eq.s32.totalorder %v10053_v19, %v11812_v52  ;;  %vm1126_vm9 = vcmp.eq.s32.totalorder %v10053_v19, %v11816_v53 }
 0x16a   : > { %8929 = vmatpush1.msk.msra.mxu0 %vm1379_vm10, %v9793_v16  ;;  %8961 = vmatpush1.msk.msra.mxu1 %vm1381_vm11, %v9793_v16  ;;  %vm1123_vm10 = vcmp.eq.s32.totalorder %v10053_v19, %v11834_v56  ;;  %vm1125_vm11 = vcmp.eq.s32.totalorder %v10053_v19, %v11838_v57 }
 0x16b   : > { %8930 = vmatprep.subr.msk.mxu0 %vm1316_vm12, %v9793_v16  ;;  %8962 = vmatprep.subr.msk.mxu1 %vm1318_vm13, %v9793_v16  ;;  %vm1060_vm12 = vcmp.eq.s32.totalorder %v10068_v20, %v11812_v52  ;;  %vm1062_vm13 = vcmp.eq.s32.totalorder %v10068_v20, %v11816_v53 }
 0x16c   : > { %4739 = vmatprep.mubr.f32.mxu0 %v9792_v1  ;;  %4828 = vmatprep.mubr.f32.mxu1 %v9792_v1  ;;  %v3857_v48 = vpop.f32.mrf.mxu0  ;;  %v3946_v42 = vpop.f32.mrf.mxu1 }
 0x16d   : > { %8931 = vmatpush1.msk.msra.mxu0 %vm1315_vm14, %v9793_v16  ;;  %8963 = vmatpush1.msk.msra.mxu1 %vm1317_vm15, %v9793_v16  ;;  %v6775_v43 = vmul.f32 %v11942_v59, %v3857_v48  ;;  %v6777_v49 = vmul.f32 %v11946_v33, %v3946_v42  ;;  %vm1059_vm14 = vcmp.eq.s32.totalorder %v10068_v20, %v11834_v56 }
 0x16e   : > { %4740 = vmatmul.mubr.f32.gmra.mxu0 %v11259_v60  ;;  %4829 = vmatmul.mubr.f32.gmra.mxu1 %v11259_v60  ;;  %v3859_v39 = vpop.f32.mrf.mxu0  ;;  %v3948_v63 = vpop.f32.mrf.mxu1  ;;  %vm1061_vm15 = vcmp.eq.s32.totalorder %v10068_v20, %v11838_v57 }
 0x16f   : > { %8932 = vmatprep.subr.msk.mxu0 %vm1252_vm0, %v9793_v16  ;;  %8964 = vmatprep.subr.msk.mxu1 %vm1254_vm1, %v9793_v16  ;;  %v6839_v60 = vadd.f32 %v6775_v43, %v3851_v58  ;;  %v6841_v0 = vadd.f32 %v6777_v49, %v3940_v45  ;;  %v6776_v36 = vmul.f32 %v11976_v34, %v3859_v39 }
 0x170   : > { %8933 = vmatpush1.msk.msra.mxu0 %vm1251_vm2, %v9793_v16  ;;  %8965 = vmatpush1.msk.msra.mxu1 %vm1253_vm3, %v9793_v16  ;;  %v6778_v44 = vmul.f32 %v6482_v35, %v3948_v63  ;;  %vm996_vm0 = vcmp.eq.s32.totalorder %v10083_v21, %v11812_v52  ;;  %vm998_vm1 = vcmp.eq.s32.totalorder %v10083_v21, %v11816_v53 }
 0x171   : > { %8934 = vmatprep.subr.msk.mxu0 %vm1188_vm4, %v9793_v16  ;;  %8966 = vmatprep.subr.msk.mxu1 %vm1190_vm5, %v9793_v16  ;;  %v6903_v47 = vmul.f32 %v6839_v60, %v11942_v59  ;;  %v6905_v12 = vmul.f32 %v6841_v0, %v11946_v33  ;;  %v6840_v13 = vadd.f32 %v6776_v36, %v3853_v46  ;;  %v12266_v36 = vld [vmem:[%s15521_s2] sm:$0xff] }
 0x172   : > { %4745 = vmatprep.mubr.f32.mxu0 %v9792_v1  ;;  %4834 = vmatprep.mubr.f32.mxu1 %v9792_v1  ;;  %v6842_v62 = vadd.f32 %v6778_v44, %v3942_v41  ;;  %vm995_vm2 = vcmp.eq.s32.totalorder %v10083_v21, %v11834_v56  ;;  %vm997_vm3 = vcmp.eq.s32.totalorder %v10083_v21, %v11838_v57 }
 0x173   : > { %8935 = vmatpush1.msk.msra.mxu0 %vm1187_vm6, %v9793_v16  ;;  %8967 = vmatpush1.msk.msra.mxu1 %vm1189_vm7, %v9793_v16  ;;  %v6967_v8 = vadd.f32 %v6903_v47, %v11866_v11  ;;  %v6969_v32 = vadd.f32 %v6905_v12, %v11868_v14  ;;  %v6904_v40 = vmul.f32 %v6840_v13, %v11976_v34 }
 0x174   : > { %4746 = vmatmul.mubr.f32.gmra.mxu0 %v11292_v61  ;;  %4835 = vmatmul.mubr.f32.gmra.mxu1 %v11292_v61  ;;  %v6906_v58 = vmul.f32 %v6842_v62, %v6482_v35  ;;  %vm932_vm4 = vcmp.eq.s32.totalorder %v10098_v22, %v11812_v52  ;;  %vm934_vm5 = vcmp.eq.s32.totalorder %v10098_v22, %v11816_v53 }
 0x175   : > { %8936 = vmatprep.subr.msk.mxu0 %vm1124_vm8, %v9793_v16  ;;  %8968 = vmatprep.subr.msk.mxu1 %vm1126_vm9, %v9793_v16  ;;  %v7031_v11 = vmul.f32 %v6967_v8, %v11942_v59  ;;  %v7033_v61 = vmul.f32 %v6969_v32, %v11946_v33  ;;  %v6968_v14 = vadd.f32 %v6904_v40, %v11884_v37  ;;  %v12312_v8 = vld [vmem:[%s9945_s30 + $0x8] sm:$0xff] }
 0x176   : > { %8937 = vmatpush1.msk.msra.mxu0 %vm1123_vm10, %v9793_v16  ;;  %8969 = vmatpush1.msk.msra.mxu1 %vm1125_vm11, %v9793_v16  ;;  %v6970_v45 = vadd.f32 %v6906_v58, %v11886_v38  ;;  %vm931_vm6 = vcmp.eq.s32.totalorder %v10098_v22, %v11834_v56  ;;  %vm933_vm7 = vcmp.eq.s32.totalorder %v10098_v22, %v11838_v57  ;;  %v12325_v32 = vld [vmem:[%s15521_s2 + $0x8] sm:$0xff] }
 0x177   : > { %8938 = vmatprep.subr.msk.mxu0 %vm1060_vm12, %v9793_v16  ;;  %8970 = vmatprep.subr.msk.mxu1 %vm1062_vm13, %v9793_v16  ;;  %v7095_v37 = vadd.f32 %v7031_v11, %v11793_v50  ;;  %v7097_v46 = vadd.f32 %v7033_v61, %v11795_v51  ;;  %v7032_v41 = vmul.f32 %v6968_v14, %v11976_v34  ;;  %v12183_v34 = vld [vmem:[%s9939_s28 + $0x20] sm:$0xff] }
 0x178   : > { %8939 = vmatpush1.msk.msra.mxu0 %vm1059_vm14, %v9793_v16  ;;  %8971 = vmatpush1.msk.msra.mxu1 %vm1061_vm15, %v9793_v16  ;;  %v7034_v50 = vmul.f32 %v6970_v45, %v6482_v35  ;;  %vm868_vm8 = vcmp.eq.s32.totalorder %v10113_v23, %v11812_v52  ;;  %vm870_vm9 = vcmp.eq.s32.totalorder %v10113_v23, %v11816_v53 }
 0x179   : > { %8940 = vmatprep.subr.msk.mxu0 %vm996_vm0, %v9793_v16  ;;  %8972 = vmatprep.subr.msk.mxu1 %vm998_vm1, %v9793_v16  ;;  %v7163_v51 = vmul.f32 1.442695, %v7095_v37  ;;  %v7167_v38 = vmul.f32 1.442695, %v7097_v46  ;;  %v7096_v59 = vadd.f32 %v7032_v41, %v11818_v54  ;;  %vm867_vm10 = vcmp.eq.s32.totalorder %v10113_v23, %v11834_v56 }
 0x17a   : > { %8941 = vmatpush1.msk.msra.mxu0 %vm995_vm2, %v9793_v16  ;;  %8973 = vmatpush1.msk.msra.mxu1 %vm997_vm3, %v9793_v16  ;;  %v7098_v33 = vadd.f32 %v7034_v50, %v11820_v55  ;;  %vm869_vm11 = vcmp.eq.s32.totalorder %v10113_v23, %v11838_v57  ;;  %vm804_vm12 = vcmp.eq.s32.totalorder %v10128_v24, %v11812_v52 }
 0x17b   : > { %8942 = vmatprep.subr.msk.mxu0 %vm932_vm4, %v9793_v16  ;;  %8974 = vmatprep.subr.msk.mxu1 %vm934_vm5, %v9793_v16  ;;  %9558 = vpow2.f32 %v7163_v51  ;;  %v7165_v54 = vmul.f32 1.442695, %v7096_v59  ;;  %vm806_vm13 = vcmp.eq.s32.totalorder %v10128_v24, %v11816_v53  ;;  %vm803_vm14 = vcmp.eq.s32.totalorder %v10128_v24, %v11834_v56  ;;  %v12408_v51 = vld [vmem:[%s15521_s2 + $0x10] sm:$0xff] }
 0x17c   : > { %8943 = vmatpush1.msk.msra.mxu0 %vm931_vm6, %v9793_v16  ;;  %8975 = vmatpush1.msk.msra.mxu1 %vm933_vm7, %v9793_v16  ;;  %9560 = vpow2.f32 %v7167_v38  ;;  %v7169_v55 = vmul.f32 1.442695, %v7098_v33  ;;  %vm805_vm15 = vcmp.eq.s32.totalorder %v10128_v24, %v11838_v57  ;;  %vm740_vm0 = vcmp.eq.s32.totalorder %v10143_v25, %v11812_v52 }
 0x17d   : > { %8944 = vmatprep.subr.msk.mxu0 %vm868_vm8, %v9793_v16  ;;  %8976 = vmatprep.subr.msk.mxu1 %vm870_vm9, %v9793_v16  ;;  %9562 = vpow2.f32 %v7165_v54  ;;  %vm742_vm1 = vcmp.eq.s32.totalorder %v10143_v25, %v11816_v53  ;;  %vm739_vm2 = vcmp.eq.s32.totalorder %v10143_v25, %v11834_v56  ;;  %vm741_vm3 = vcmp.eq.s32.totalorder %v10143_v25, %v11838_v57 }
 0x17e   : > { %8945 = vmatpush1.msk.msra.mxu0 %vm867_vm10, %v9793_v16  ;;  %8977 = vmatpush1.msk.msra.mxu1 %vm869_vm11, %v9793_v16  ;;  %9564 = vpow2.f32 %v7169_v55  ;;  %vm676_vm4 = vcmp.eq.s32.totalorder %v10158_v26, %v11812_v52  ;;  %vm678_vm5 = vcmp.eq.s32.totalorder %v10158_v26, %v11816_v53  ;;  %vm675_vm6 = vcmp.eq.s32.totalorder %v10158_v26, %v11834_v56 }
 0x17f   : > { %8946 = vmatprep.subr.msk.mxu0 %vm804_vm12, %v9793_v16  ;;  %8978 = vmatprep.subr.msk.mxu1 %vm806_vm13, %v9793_v16  ;;  %vm677_vm7 = vcmp.eq.s32.totalorder %v10158_v26, %v11838_v57  ;;  %vm612_vm8 = vcmp.eq.s32.totalorder %v10167_v27, %v11812_v52  ;;  %vm614_vm9 = vcmp.eq.s32.totalorder %v10167_v27, %v11816_v53 }
 0x180   : > { %8947 = vmatpush1.msk.msra.mxu0 %vm803_vm14, %v9793_v16  ;;  %8979 = vmatpush1.msk.msra.mxu1 %vm805_vm15, %v9793_v16  ;;  %vm611_vm10 = vcmp.eq.s32.totalorder %v10167_v27, %v11834_v56  ;;  %vm613_vm11 = vcmp.eq.s32.totalorder %v10167_v27, %v11838_v57  ;;  %vm548_vm12 = vcmp.eq.s32.totalorder %v9953_v2, %v11812_v52 }
 0x181   : > { %8948 = vmatprep.subr.msk.mxu0 %vm740_vm0, %v9793_v16  ;;  %8980 = vmatprep.subr.msk.mxu1 %vm742_vm1, %v9793_v16  ;;  %vm550_vm13 = vcmp.eq.s32.totalorder %v9953_v2, %v11816_v53  ;;  %v12209_v35 = vrot.slane %v12183_v34, %v9956_v3  ;;  %v12213_v43 = vrot.slane %v12183_v34, %v9959_v4 }
 0x182   : > { %8949 = vmatpush1.msk.msra.mxu0 %vm739_vm2, %v9793_v16  ;;  %8981 = vmatpush1.msk.msra.mxu1 %vm741_vm3, %v9793_v16  ;;  %v12191_v48 = vpop.f32.mrf.mxu0  ;;  %v12193_v42 = vpop.f32.mrf.mxu1  ;;  %vm547_vm14 = vcmp.eq.s32.totalorder %v9953_v2, %v11834_v56  ;;  %v12231_v63 = vrot.slane %v12183_v34, %v9962_v5  ;;  %v12235_v60 = vrot.slane %v12183_v34, %v9965_v6 }
 0x183   : > { %8950 = vmatprep.subr.msk.mxu0 %vm676_vm4, %v9793_v16  ;;  %8982 = vmatprep.subr.msk.mxu1 %vm678_vm5, %v9793_v16  ;;  %vm549_vm15 = vcmp.eq.s32.totalorder %v9953_v2, %v11838_v57  ;;  %vm1512_vm0 = vcmp.eq.s32.totalorder %v9968_v7, %v12209_v35  ;;  %vm1514_vm1 = vcmp.eq.s32.totalorder %v9968_v7, %v12213_v43 }
 0x184   : > { %8951 = vmatpush1.msk.msra.mxu0 %vm675_vm6, %v9793_v16  ;;  %8983 = vmatpush1.msk.msra.mxu1 %vm677_vm7, %v9793_v16  ;;  %v12215_v49 = vpop.f32.mrf.mxu0  ;;  %v12217_v39 = vpop.f32.mrf.mxu1  ;;  %vm1511_vm2 = vcmp.eq.s32.totalorder %v9968_v7, %v12231_v63  ;;  %vm1513_vm3 = vcmp.eq.s32.totalorder %v9968_v7, %v12235_v60  ;;  %vm1448_vm4 = vcmp.eq.s32.totalorder %v9974_v9, %v12209_v35 }
 0x185   : > { %8952 = vmatprep.subr.msk.mxu0 %vm612_vm8, %v9793_v16  ;;  %8984 = vmatprep.subr.msk.mxu1 %vm614_vm9, %v9793_v16  ;;  %vm1450_vm5 = vcmp.eq.s32.totalorder %v9974_v9, %v12213_v43  ;;  %vm1447_vm6 = vcmp.eq.s32.totalorder %v9974_v9, %v12231_v63  ;;  %vm1449_vm7 = vcmp.eq.s32.totalorder %v9974_v9, %v12235_v60 }
 0x186   : > { %8953 = vmatpush1.msk.msra.mxu0 %vm611_vm10, %v9793_v16  ;;  %8985 = vmatpush1.msk.msra.mxu1 %vm613_vm11, %v9793_v16  ;;  %vm1384_vm8 = vcmp.eq.s32.totalorder %v9977_v10, %v12209_v35  ;;  %vm1386_vm9 = vcmp.eq.s32.totalorder %v9977_v10, %v12213_v43  ;;  %vm1383_vm10 = vcmp.eq.s32.totalorder %v9977_v10, %v12231_v63 }
 0x187   : > { %8954 = vmatprep.subr.msk.mxu0 %vm548_vm12, %v9793_v16  ;;  %8986 = vmatprep.subr.msk.mxu1 %vm550_vm13, %v9793_v16  ;;  %vm1385_vm11 = vcmp.eq.s32.totalorder %v9977_v10, %v12235_v60  ;;  %vm1320_vm12 = vcmp.eq.s32.totalorder %v9996_v15, %v12209_v35  ;;  %vm1322_vm13 = vcmp.eq.s32.totalorder %v9996_v15, %v12213_v43 }
 0x188   : > { %v9559_v53 = vpop.eup %9558  ;;  %8955 = vmatpush1.msk.msra.mxu0 %vm547_vm14, %v9793_v16  ;;  %4905 = vmatprep.mubr.f32.mxu0 %v9792_v1  ;;  %v12252_v56 = vpop.f32.mrf.mxu0  ;;  %vm1319_vm14 = vcmp.eq.s32.totalorder %v9996_v15, %v12231_v63  ;;  %v12347_v11 = vrot.slane %v12312_v8, %v9962_v5  ;;  %v12351_v61 = vrot.slane %v12312_v8, %v9965_v6 }
 0x189   : > { %v12254_v57 = vpop.f32.mrf.mxu1  ;;  %v9561_v52 = vpop.eup %9560  ;;  %8987 = vmatpush1.msk.msra.mxu1 %vm549_vm15, %v9793_v16  ;;  %4994 = vmatprep.mubr.f32.mxu1 %v9792_v1  ;;  %7287 = vst [vmem:[%s11853_s6 + $0x20] sm:$0xff] %v9559_v53  ;;  %vm1321_vm15 = vcmp.eq.s32.totalorder %v9996_v15, %v12235_v60  ;;  %v12381_v14 = vrot.slane %v12312_v8, %v9956_v3 }
 0x18a   : > { %v9563_v0 = vpop.eup %9562  ;;  %4906 = vmatmul.mubr.f32.vlgmr.msra.gmra.mxu0 %v12266_v36  ;;  %4995 = vmatmul.mubr.f32.vlgmr.msra.gmra.mxu1 %v12266_v36  ;;  %7289 = vst [vmem:[%s11853_s6 + $0x30] sm:$0xff] %v9561_v52  ;;  %v12275_v44 = vpop.f32.mrf.mxu0  ;;  %v12391_v46 = vrot.slane %v12312_v8, %v9959_v4 }
 0x18b   : > { %v12277_v47 = vpop.f32.mrf.mxu1  ;;  %v9565_v12 = vpop.eup %9564  ;;  %8988 = vmatprep.subr.msk.mxu0 %vm1512_vm0, %v9793_v16  ;;  %9020 = vmatprep.subr.msk.mxu1 %vm1514_vm1, %v9793_v16  ;;  %7288 = vst [vmem:[%s11853_s6 + $0x28] sm:$0xff] %v9563_v0  ;;  %vm1256_vm0 = vcmp.eq.s32.totalorder %v10023_v17, %v12209_v35  ;;  %vm1258_vm1 = vcmp.eq.s32.totalorder %v10023_v17, %v12213_v43 }
 0x18c   : > { %8989 = vmatpush1.msk.msra.mxu0 %vm1511_vm2, %v9793_v16  ;;  %9021 = vmatpush1.msk.msra.mxu1 %vm1513_vm3, %v9793_v16  ;;  %7290 = vst [vmem:[%s11853_s6 + $0x38] sm:$0xff] %v9565_v12  ;;  %vm1255_vm2 = vcmp.eq.s32.totalorder %v10023_v17, %v12231_v63  ;;  %vm1257_vm3 = vcmp.eq.s32.totalorder %v10023_v17, %v12235_v60 }
 0x18d   : > { %8990 = vmatprep.subr.msk.mxu0 %vm1448_vm4, %v9793_v16  ;;  %9022 = vmatprep.subr.msk.mxu1 %vm1450_vm5, %v9793_v16  ;;  %vm1192_vm4 = vcmp.eq.s32.totalorder %v10038_v18, %v12209_v35  ;;  %vm1194_vm5 = vcmp.eq.s32.totalorder %v10038_v18, %v12213_v43 }
 0x18e   : > { %4911 = vmatprep.mubr.f32.mxu0 %v9792_v1  ;;  %5000 = vmatprep.mubr.f32.mxu1 %v9792_v1  ;;  %v4029_v13 = vpop.f32.mrf.mxu0  ;;  %v4118_v62 = vpop.f32.mrf.mxu1 }
 0x18f   : > { %8991 = vmatpush1.msk.msra.mxu0 %vm1447_vm6, %v9793_v16  ;;  %9023 = vmatpush1.msk.msra.mxu1 %vm1449_vm7, %v9793_v16  ;;  %vm1191_vm6 = vcmp.eq.s32.totalorder %v10038_v18, %v12231_v63  ;;  %vm1193_vm7 = vcmp.eq.s32.totalorder %v10038_v18, %v12235_v60 }
 0x190   : > { %4912 = vmatmul.mubr.f32.gmra.mxu0 %v12325_v32  ;;  %5001 = vmatmul.mubr.f32.gmra.mxu1 %v12325_v32  ;;  %v4031_v40 = vpop.f32.mrf.mxu0  ;;  %v4120_v58 = vpop.f32.mrf.mxu1 }
 0x191   : > { %8992 = vmatprep.subr.msk.mxu0 %vm1384_vm8, %v9793_v16  ;;  %9024 = vmatprep.subr.msk.mxu1 %vm1386_vm9, %v9793_v16  ;;  %vm1128_vm8 = vcmp.eq.s32.totalorder %v10053_v19, %v12209_v35  ;;  %vm1130_vm9 = vcmp.eq.s32.totalorder %v10053_v19, %v12213_v43 }
 0x192   : > { %8993 = vmatpush1.msk.msra.mxu0 %vm1383_vm10, %v9793_v16  ;;  %9025 = vmatpush1.msk.msra.mxu1 %vm1385_vm11, %v9793_v16  ;;  %vm1127_vm10 = vcmp.eq.s32.totalorder %v10053_v19, %v12231_v63  ;;  %vm1129_vm11 = vcmp.eq.s32.totalorder %v10053_v19, %v12235_v60 }
 0x193   : > { %8994 = vmatprep.subr.msk.mxu0 %vm1320_vm12, %v9793_v16  ;;  %9026 = vmatprep.subr.msk.mxu1 %vm1322_vm13, %v9793_v16  ;;  %vm1064_vm12 = vcmp.eq.s32.totalorder %v10068_v20, %v12209_v35  ;;  %vm1066_vm13 = vcmp.eq.s32.totalorder %v10068_v20, %v12213_v43 }
 0x194   : > { %4917 = vmatprep.mubr.f32.mxu0 %v9792_v1  ;;  %5006 = vmatprep.mubr.f32.mxu1 %v9792_v1  ;;  %v4035_v45 = vpop.f32.mrf.mxu0  ;;  %v4124_v37 = vpop.f32.mrf.mxu1 }
 0x195   : > { %8995 = vmatpush1.msk.msra.mxu0 %vm1319_vm14, %v9793_v16  ;;  %9027 = vmatpush1.msk.msra.mxu1 %vm1321_vm15, %v9793_v16  ;;  %v6779_v41 = vmul.f32 %v12347_v11, %v4035_v45  ;;  %v6781_v50 = vmul.f32 %v12351_v61, %v4124_v37  ;;  %vm1063_vm14 = vcmp.eq.s32.totalorder %v10068_v20, %v12231_v63 }
 0x196   : > { %4918 = vmatmul.mubr.f32.gmra.mxu0 %v12408_v51  ;;  %5007 = vmatmul.mubr.f32.gmra.mxu1 %v12408_v51  ;;  %v4037_v38 = vpop.f32.mrf.mxu0  ;;  %v4126_v59 = vpop.f32.mrf.mxu1  ;;  %vm1065_vm15 = vcmp.eq.s32.totalorder %v10068_v20, %v12235_v60 }
 0x197   : > { %8996 = vmatprep.subr.msk.mxu0 %vm1256_vm0, %v9793_v16  ;;  %9028 = vmatprep.subr.msk.mxu1 %vm1258_vm1, %v9793_v16  ;;  %v6843_v33 = vadd.f32 %v6779_v41, %v4029_v13  ;;  %v6845_v54 = vadd.f32 %v6781_v50, %v4118_v62  ;;  %v6780_v55 = vmul.f32 %v12381_v14, %v4037_v38 }
 0x198   : > { %8997 = vmatpush1.msk.msra.mxu0 %vm1255_vm2, %v9793_v16  ;;  %9029 = vmatpush1.msk.msra.mxu1 %vm1257_vm3, %v9793_v16  ;;  %v6782_v53 = vmul.f32 %v12391_v46, %v4126_v59  ;;  %vm1000_vm0 = vcmp.eq.s32.totalorder %v10083_v21, %v12209_v35  ;;  %vm1002_vm1 = vcmp.eq.s32.totalorder %v10083_v21, %v12213_v43 }
 0x199   : > { %8998 = vmatprep.subr.msk.mxu0 %vm1192_vm4, %v9793_v16  ;;  %9030 = vmatprep.subr.msk.mxu1 %vm1194_vm5, %v9793_v16  ;;  %v6907_v52 = vmul.f32 %v6843_v33, %v12347_v11  ;;  %v6909_v0 = vmul.f32 %v6845_v54, %v12351_v61  ;;  %v6844_v12 = vadd.f32 %v6780_v55, %v4031_v40 }
 0x19a   : > { %4923 = vmatprep.mubr.f32.mxu0 %v9792_v1  ;;  %5012 = vmatprep.mubr.f32.mxu1 %v9792_v1  ;;  %v6846_v13 = vadd.f32 %v6782_v53, %v4120_v58  ;;  %v12470_v58 = vld [vmem:[%s15521_s2 + $0x18] sm:$0xff]  ;;  %vm999_vm2 = vcmp.eq.s32.totalorder %v10083_v21, %v12231_v63  ;;  %vm1001_vm3 = vcmp.eq.s32.totalorder %v10083_v21, %v12235_v60 }
 0x19b   : > { %8999 = vmatpush1.msk.msra.mxu0 %vm1191_vm6, %v9793_v16  ;;  %9031 = vmatpush1.msk.msra.mxu1 %vm1193_vm7, %v9793_v16  ;;  %v6971_v62 = vadd.f32 %v6907_v52, %v12252_v56  ;;  %v6973_v40 = vadd.f32 %v6909_v0, %v12254_v57  ;;  %v6908_v45 = vmul.f32 %v6844_v12, %v12381_v14 }
 0x19c   : > { %4924 = vmatmul.mubr.f32.gmra.mxu0 %v12470_v58  ;;  %5013 = vmatmul.mubr.f32.gmra.mxu1 %v12470_v58  ;;  %v6910_v56 = vmul.f32 %v6846_v13, %v12391_v46  ;;  %vm936_vm4 = vcmp.eq.s32.totalorder %v10098_v22, %v12209_v35  ;;  %vm938_vm5 = vcmp.eq.s32.totalorder %v10098_v22, %v12213_v43 }
 0x19d   : > { %9000 = vmatprep.subr.msk.mxu0 %vm1128_vm8, %v9793_v16  ;;  %9032 = vmatprep.subr.msk.mxu1 %vm1130_vm9, %v9793_v16  ;;  %v7035_v57 = vmul.f32 %v6971_v62, %v12347_v11  ;;  %v7037_v37 = vmul.f32 %v6973_v40, %v12351_v61  ;;  %v6972_v41 = vadd.f32 %v6908_v45, %v12275_v44 }
 0x19e   : > { %9001 = vmatpush1.msk.msra.mxu0 %vm1127_vm10, %v9793_v16  ;;  %9033 = vmatpush1.msk.msra.mxu1 %vm1129_vm11, %v9793_v16  ;;  %v6974_v11 = vadd.f32 %v6910_v56, %v12277_v47  ;;  %vm935_vm6 = vcmp.eq.s32.totalorder %v10098_v22, %v12231_v63  ;;  %vm937_vm7 = vcmp.eq.s32.totalorder %v10098_v22, %v12235_v60 }
 0x19f   : > { %9002 = vmatprep.subr.msk.mxu0 %vm1064_vm12, %v9793_v16  ;;  %9034 = vmatprep.subr.msk.mxu1 %vm1066_vm13, %v9793_v16  ;;  %v7099_v44 = vadd.f32 %v7035_v57, %v12191_v48  ;;  %v7101_v61 = vadd.f32 %v7037_v37, %v12193_v42  ;;  %v7036_v50 = vmul.f32 %v6972_v41, %v12381_v14 }
 0x1a0   : > { %9003 = vmatpush1.msk.msra.mxu0 %vm1063_vm14, %v9793_v16  ;;  %9035 = vmatpush1.msk.msra.mxu1 %vm1065_vm15, %v9793_v16  ;;  %v7038_v48 = vmul.f32 %v6974_v11, %v12391_v46  ;;  %vm872_vm8 = vcmp.eq.s32.totalorder %v10113_v23, %v12209_v35  ;;  %vm874_vm9 = vcmp.eq.s32.totalorder %v10113_v23, %v12213_v43 }
 0x1a1   : > { %9004 = vmatprep.subr.msk.mxu0 %vm1000_vm0, %v9793_v16  ;;  %9036 = vmatprep.subr.msk.mxu1 %vm1002_vm1, %v9793_v16  ;;  %v7171_v42 = vmul.f32 1.442695, %v7099_v44  ;;  %v7175_v47 = vmul.f32 1.442695, %v7101_v61  ;;  %v7100_v14 = vadd.f32 %v7036_v50, %v12215_v49  ;;  %vm871_vm10 = vcmp.eq.s32.totalorder %v10113_v23, %v12231_v63 }
 0x1a2   : > { %9005 = vmatpush1.msk.msra.mxu0 %vm999_vm2, %v9793_v16  ;;  %9037 = vmatpush1.msk.msra.mxu1 %vm1001_vm3, %v9793_v16  ;;  %v7102_v46 = vadd.f32 %v7038_v48, %v12217_v39  ;;  %vm873_vm11 = vcmp.eq.s32.totalorder %v10113_v23, %v12235_v60  ;;  %vm808_vm12 = vcmp.eq.s32.totalorder %v10128_v24, %v12209_v35 }
 0x1a3   : > { %9006 = vmatprep.subr.msk.mxu0 %vm936_vm4, %v9793_v16  ;;  %9038 = vmatprep.subr.msk.mxu1 %vm938_vm5, %v9793_v16  ;;  %9566 = vpow2.f32 %v7171_v42  ;;  %v7173_v49 = vmul.f32 1.442695, %v7100_v14  ;;  %vm810_vm13 = vcmp.eq.s32.totalorder %v10128_v24, %v12213_v43  ;;  %vm807_vm14 = vcmp.eq.s32.totalorder %v10128_v24, %v12231_v63 }
 0x1a4   : > { %9007 = vmatpush1.msk.msra.mxu0 %vm935_vm6, %v9793_v16  ;;  %9039 = vmatpush1.msk.msra.mxu1 %vm937_vm7, %v9793_v16  ;;  %9568 = vpow2.f32 %v7175_v47  ;;  %v7177_v39 = vmul.f32 1.442695, %v7102_v46  ;;  %vm809_vm15 = vcmp.eq.s32.totalorder %v10128_v24, %v12235_v60  ;;  %vm744_vm0 = vcmp.eq.s32.totalorder %v10143_v25, %v12209_v35 }
 0x1a5   : > { %9008 = vmatprep.subr.msk.mxu0 %vm872_vm8, %v9793_v16  ;;  %9040 = vmatprep.subr.msk.mxu1 %vm874_vm9, %v9793_v16  ;;  %9570 = vpow2.f32 %v7173_v49  ;;  %vm746_vm1 = vcmp.eq.s32.totalorder %v10143_v25, %v12213_v43  ;;  %vm743_vm2 = vcmp.eq.s32.totalorder %v10143_v25, %v12231_v63  ;;  %vm745_vm3 = vcmp.eq.s32.totalorder %v10143_v25, %v12235_v60 }
 0x1a6   : > { %9009 = vmatpush1.msk.msra.mxu0 %vm871_vm10, %v9793_v16  ;;  %9041 = vmatpush1.msk.msra.mxu1 %vm873_vm11, %v9793_v16  ;;  %9572 = vpow2.f32 %v7177_v39  ;;  %vm680_vm4 = vcmp.eq.s32.totalorder %v10158_v26, %v12209_v35  ;;  %vm682_vm5 = vcmp.eq.s32.totalorder %v10158_v26, %v12213_v43  ;;  %vm679_vm6 = vcmp.eq.s32.totalorder %v10158_v26, %v12231_v63 }
 0x1a7   : > { %9010 = vmatprep.subr.msk.mxu0 %vm808_vm12, %v9793_v16  ;;  %9042 = vmatprep.subr.msk.mxu1 %vm810_vm13, %v9793_v16  ;;  %vm681_vm7 = vcmp.eq.s32.totalorder %v10158_v26, %v12235_v60  ;;  %vm616_vm8 = vcmp.eq.s32.totalorder %v10167_v27, %v12209_v35  ;;  %vm618_vm9 = vcmp.eq.s32.totalorder %v10167_v27, %v12213_v43 }
 0x1a8   : > { %9011 = vmatpush1.msk.msra.mxu0 %vm807_vm14, %v9793_v16  ;;  %9043 = vmatpush1.msk.msra.mxu1 %vm809_vm15, %v9793_v16  ;;  %vm615_vm10 = vcmp.eq.s32.totalorder %v10167_v27, %v12231_v63  ;;  %vm617_vm11 = vcmp.eq.s32.totalorder %v10167_v27, %v12235_v60  ;;  %vm552_vm12 = vcmp.eq.s32.totalorder %v9953_v2, %v12209_v35 }
 0x1a9   : > { %9012 = vmatprep.subr.msk.mxu0 %vm744_vm0, %v9793_v16  ;;  %9044 = vmatprep.subr.msk.mxu1 %vm746_vm1, %v9793_v16  ;;  %vm554_vm13 = vcmp.eq.s32.totalorder %v9953_v2, %v12213_v43  ;;  %v12626_v33 = vrot.slane %v12183_v34, %v10182_v28  ;;  %v12630_v54 = vrot.slane %v12183_v34, %v10185_v29 }
 0x1aa   : > { %9013 = vmatpush1.msk.msra.mxu0 %vm743_vm2, %v9793_v16  ;;  %9045 = vmatpush1.msk.msra.mxu1 %vm745_vm3, %v9793_v16  ;;  %v12608_v38 = vpop.f32.mrf.mxu0  ;;  %v12610_v59 = vpop.f32.mrf.mxu1  ;;  %vm551_vm14 = vcmp.eq.s32.totalorder %v9953_v2, %v12231_v63  ;;  %v12648_v52 = vrot.slane %v12183_v34, %v10194_v30  ;;  %v12652_v0 = vrot.slane %v12183_v34, %v10197_v31 }
 0x1ab   : > { %9014 = vmatprep.subr.msk.mxu0 %vm680_vm4, %v9793_v16  ;;  %9046 = vmatprep.subr.msk.mxu1 %vm682_vm5, %v9793_v16  ;;  %vm553_vm15 = vcmp.eq.s32.totalorder %v9953_v2, %v12235_v60  ;;  %vm1516_vm0 = vcmp.eq.s32.totalorder %v9968_v7, %v12626_v33  ;;  %vm1518_vm1 = vcmp.eq.s32.totalorder %v9968_v7, %v12630_v54 }
 0x1ac   : > { %9015 = vmatpush1.msk.msra.mxu0 %vm679_vm6, %v9793_v16  ;;  %9047 = vmatpush1.msk.msra.mxu1 %vm681_vm7, %v9793_v16  ;;  %v12632_v55 = vpop.f32.mrf.mxu0  ;;  %v12634_v53 = vpop.f32.mrf.mxu1  ;;  %vm1515_vm2 = vcmp.eq.s32.totalorder %v9968_v7, %v12648_v52  ;;  %vm1517_vm3 = vcmp.eq.s32.totalorder %v9968_v7, %v12652_v0  ;;  %vm1452_vm4 = vcmp.eq.s32.totalorder %v9974_v9, %v12626_v33 }
 0x1ad   : > { %9016 = vmatprep.subr.msk.mxu0 %vm616_vm8, %v9793_v16  ;;  %9048 = vmatprep.subr.msk.mxu1 %vm618_vm9, %v9793_v16  ;;  %vm1454_vm5 = vcmp.eq.s32.totalorder %v9974_v9, %v12630_v54  ;;  %vm1451_vm6 = vcmp.eq.s32.totalorder %v9974_v9, %v12648_v52  ;;  %vm1453_vm7 = vcmp.eq.s32.totalorder %v9974_v9, %v12652_v0 }
 0x1ae   : > { %9017 = vmatpush1.msk.msra.mxu0 %vm615_vm10, %v9793_v16  ;;  %9049 = vmatpush1.msk.msra.mxu1 %vm617_vm11, %v9793_v16  ;;  %vm1388_vm8 = vcmp.eq.s32.totalorder %v9977_v10, %v12626_v33  ;;  %vm1390_vm9 = vcmp.eq.s32.totalorder %v9977_v10, %v12630_v54  ;;  %vm1387_vm10 = vcmp.eq.s32.totalorder %v9977_v10, %v12648_v52 }
 0x1af   : > { %9018 = vmatprep.subr.msk.mxu0 %vm552_vm12, %v9793_v16  ;;  %9050 = vmatprep.subr.msk.mxu1 %vm554_vm13, %v9793_v16  ;;  %vm1389_vm11 = vcmp.eq.s32.totalorder %v9977_v10, %v12652_v0  ;;  %vm1324_vm12 = vcmp.eq.s32.totalorder %v9996_v15, %v12626_v33  ;;  %vm1326_vm13 = vcmp.eq.s32.totalorder %v9996_v15, %v12630_v54 }
 0x1b0   : > { %v9567_v43 = vpop.eup %9566  ;;  %9019 = vmatpush1.msk.msra.mxu0 %vm551_vm14, %v9793_v16  ;;  %5083 = vmatprep.mubr.f32.mxu0 %v9792_v1  ;;  %v12669_v34 = vpop.f32.mrf.mxu0  ;;  %vm1323_vm14 = vcmp.eq.s32.totalorder %v9996_v15, %v12648_v52  ;;  %v12745_v37 = vrot.slane %v12312_v8, %v10194_v30  ;;  %v12749_v41 = vrot.slane %v12312_v8, %v10197_v31 }
 0x1b1   : > { %v12671_v63 = vpop.f32.mrf.mxu1  ;;  %v9569_v35 = vpop.eup %9568  ;;  %9051 = vmatpush1.msk.msra.mxu1 %vm553_vm15, %v9793_v16  ;;  %5172 = vmatprep.mubr.f32.mxu1 %v9792_v1  ;;  %7291 = vst [vmem:[%s11853_s6 + $0x40] sm:$0xff] %v9567_v43  ;;  %vm1325_vm15 = vcmp.eq.s32.totalorder %v9996_v15, %v12652_v0  ;;  %v12779_v11 = vrot.slane %v12312_v8, %v10182_v28 }
 0x1b2   : > { %v9571_v60 = vpop.eup %9570  ;;  %5084 = vmatmul.mubr.f32.vlgmr.msra.gmra.mxu0 %v12266_v36  ;;  %5173 = vmatmul.mubr.f32.vlgmr.msra.gmra.mxu1 %v12266_v36  ;;  %7293 = vst [vmem:[%s11853_s6 + $0x50] sm:$0xff] %v9569_v35  ;;  %v12687_v12 = vpop.f32.mrf.mxu0  ;;  %v6514_v50 = vrot.slane %v12312_v8, %v10185_v29 }
 0x1b3   : > { %v12689_v13 = vpop.f32.mrf.mxu1  ;;  %v9573_v62 = vpop.eup %9572  ;;  %9052 = vmatprep.subr.msk.mxu0 %vm1516_vm0, %v9793_v16  ;;  %9084 = vmatprep.subr.msk.mxu1 %vm1518_vm1, %v9793_v16  ;;  %7292 = vst [vmem:[%s11853_s6 + $0x48] sm:$0xff] %v9571_v60  ;;  %vm1260_vm0 = vcmp.eq.s32.totalorder %v10023_v17, %v12626_v33  ;;  %vm1262_vm1 = vcmp.eq.s32.totalorder %v10023_v17, %v12630_v54 }
 0x1b4   : > { %9053 = vmatpush1.msk.msra.mxu0 %vm1515_vm2, %v9793_v16  ;;  %9085 = vmatpush1.msk.msra.mxu1 %vm1517_vm3, %v9793_v16  ;;  %7294 = vst [vmem:[%s11853_s6 + $0x58] sm:$0xff] %v9573_v62  ;;  %vm1259_vm2 = vcmp.eq.s32.totalorder %v10023_v17, %v12648_v52  ;;  %vm1261_vm3 = vcmp.eq.s32.totalorder %v10023_v17, %v12652_v0 }
 0x1b5   : > { %9054 = vmatprep.subr.msk.mxu0 %vm1452_vm4, %v9793_v16  ;;  %9086 = vmatprep.subr.msk.mxu1 %vm1454_vm5, %v9793_v16  ;;  %vm1196_vm4 = vcmp.eq.s32.totalorder %v10038_v18, %v12626_v33  ;;  %vm1198_vm5 = vcmp.eq.s32.totalorder %v10038_v18, %v12630_v54 }
 0x1b6   : > { %5089 = vmatprep.mubr.f32.mxu0 %v9792_v1  ;;  %5178 = vmatprep.mubr.f32.mxu1 %v9792_v1  ;;  %v4207_v40 = vpop.f32.mrf.mxu0  ;;  %v4296_v45 = vpop.f32.mrf.mxu1 }
 0x1b7   : > { %9055 = vmatpush1.msk.msra.mxu0 %vm1451_vm6, %v9793_v16  ;;  %9087 = vmatpush1.msk.msra.mxu1 %vm1453_vm7, %v9793_v16  ;;  %vm1195_vm6 = vcmp.eq.s32.totalorder %v10038_v18, %v12648_v52  ;;  %vm1197_vm7 = vcmp.eq.s32.totalorder %v10038_v18, %v12652_v0 }
 0x1b8   : > { %5090 = vmatmul.mubr.f32.gmra.mxu0 %v12325_v32  ;;  %5179 = vmatmul.mubr.f32.gmra.mxu1 %v12325_v32  ;;  %v4209_v56 = vpop.f32.mrf.mxu0  ;;  %v4298_v57 = vpop.f32.mrf.mxu1 }
 0x1b9   : > { %9056 = vmatprep.subr.msk.mxu0 %vm1388_vm8, %v9793_v16  ;;  %9088 = vmatprep.subr.msk.mxu1 %vm1390_vm9, %v9793_v16  ;;  %vm1132_vm8 = vcmp.eq.s32.totalorder %v10053_v19, %v12626_v33  ;;  %vm1134_vm9 = vcmp.eq.s32.totalorder %v10053_v19, %v12630_v54 }
 0x1ba   : > { %9057 = vmatpush1.msk.msra.mxu0 %vm1387_vm10, %v9793_v16  ;;  %9089 = vmatpush1.msk.msra.mxu1 %vm1389_vm11, %v9793_v16  ;;  %vm1131_vm10 = vcmp.eq.s32.totalorder %v10053_v19, %v12648_v52  ;;  %vm1133_vm11 = vcmp.eq.s32.totalorder %v10053_v19, %v12652_v0 }
 0x1bb   : > { %9058 = vmatprep.subr.msk.mxu0 %vm1324_vm12, %v9793_v16  ;;  %9090 = vmatprep.subr.msk.mxu1 %vm1326_vm13, %v9793_v16  ;;  %vm1068_vm12 = vcmp.eq.s32.totalorder %v10068_v20, %v12626_v33  ;;  %vm1070_vm13 = vcmp.eq.s32.totalorder %v10068_v20, %v12630_v54 }
 0x1bc   : > { %5095 = vmatprep.mubr.f32.mxu0 %v9792_v1  ;;  %5184 = vmatprep.mubr.f32.mxu1 %v9792_v1  ;;  %v4213_v44 = vpop.f32.mrf.mxu0  ;;  %v4302_v61 = vpop.f32.mrf.mxu1 }
 0x1bd   : > { %9059 = vmatpush1.msk.msra.mxu0 %vm1323_vm14, %v9793_v16  ;;  %9091 = vmatpush1.msk.msra.mxu1 %vm1325_vm15, %v9793_v16  ;;  %v6783_v48 = vmul.f32 %v12745_v37, %v4213_v44  ;;  %v6785_v42 = vmul.f32 %v12749_v41, %v4302_v61  ;;  %vm1067_vm14 = vcmp.eq.s32.totalorder %v10068_v20, %v12648_v52 }
 0x1be   : > { %5096 = vmatmul.mubr.f32.gmra.mxu0 %v12408_v51  ;;  %5185 = vmatmul.mubr.f32.gmra.mxu1 %v12408_v51  ;;  %v4215_v8 = vpop.f32.mrf.mxu0  ;;  %v4304_v47 = vpop.f32.mrf.mxu1  ;;  %vm1069_vm15 = vcmp.eq.s32.totalorder %v10068_v20, %v12652_v0 }
 0x1bf   : > { %9060 = vmatprep.subr.msk.mxu0 %vm1260_vm0, %v9793_v16  ;;  %9092 = vmatprep.subr.msk.mxu1 %vm1262_vm1, %v9793_v16  ;;  %v6847_v14 = vadd.f32 %v6783_v48, %v4207_v40  ;;  %v6849_v46 = vadd.f32 %v6785_v42, %v4296_v45  ;;  %v6784_v49 = vmul.f32 %v12779_v11, %v4215_v8  ;;  %v12986_v48 = vld [vmem:[%s9939_s28 + $0x28] sm:$0xff] }
 0x1c0   : > { %9061 = vmatpush1.msk.msra.mxu0 %vm1259_vm2, %v9793_v16  ;;  %9093 = vmatpush1.msk.msra.mxu1 %vm1261_vm3, %v9793_v16  ;;  %v6786_v39 = vmul.f32 %v6514_v50, %v4304_v47  ;;  %vm1004_vm0 = vcmp.eq.s32.totalorder %v10083_v21, %v12626_v33  ;;  %vm1006_vm1 = vcmp.eq.s32.totalorder %v10083_v21, %v12630_v54 }
 0x1c1   : > { %9062 = vmatprep.subr.msk.mxu0 %vm1196_vm4, %v9793_v16  ;;  %9094 = vmatprep.subr.msk.mxu1 %vm1198_vm5, %v9793_v16  ;;  %v6911_v43 = vmul.f32 %v6847_v14, %v12745_v37  ;;  %v6913_v35 = vmul.f32 %v6849_v46, %v12749_v41  ;;  %v6848_v60 = vadd.f32 %v6784_v49, %v4209_v56 }
 0x1c2   : > { %5101 = vmatprep.mubr.f32.mxu0 %v9792_v1  ;;  %5190 = vmatprep.mubr.f32.mxu1 %v9792_v1  ;;  %v6850_v62 = vadd.f32 %v6786_v39, %v4298_v57  ;;  %vm1003_vm2 = vcmp.eq.s32.totalorder %v10083_v21, %v12648_v52  ;;  %vm1005_vm3 = vcmp.eq.s32.totalorder %v10083_v21, %v12652_v0 }
 0x1c3   : > { %9063 = vmatpush1.msk.msra.mxu0 %vm1195_vm6, %v9793_v16  ;;  %9095 = vmatpush1.msk.msra.mxu1 %vm1197_vm7, %v9793_v16  ;;  %v6975_v40 = vadd.f32 %v6911_v43, %v12669_v34  ;;  %v6977_v45 = vadd.f32 %v6913_v35, %v12671_v63  ;;  %v6912_v56 = vmul.f32 %v6848_v60, %v12779_v11 }
 0x1c4   : > { %5102 = vmatmul.mubr.f32.gmra.mxu0 %v12470_v58  ;;  %5191 = vmatmul.mubr.f32.gmra.mxu1 %v12470_v58  ;;  %v6914_v57 = vmul.f32 %v6850_v62, %v6514_v50  ;;  %vm940_vm4 = vcmp.eq.s32.totalorder %v10098_v22, %v12626_v33  ;;  %vm942_vm5 = vcmp.eq.s32.totalorder %v10098_v22, %v12630_v54 }
 0x1c5   : > { %9064 = vmatprep.subr.msk.mxu0 %vm1132_vm8, %v9793_v16  ;;  %9096 = vmatprep.subr.msk.mxu1 %vm1134_vm9, %v9793_v16  ;;  %v7039_v34 = vmul.f32 %v6975_v40, %v12745_v37  ;;  %v7041_v63 = vmul.f32 %v6977_v45, %v12749_v41  ;;  %v6976_v44 = vadd.f32 %v6912_v56, %v12687_v12  ;;  %v13104_v56 = vld [vmem:[%s9945_s30 + $0x10] sm:$0xff] }
 0x1c6   : > { %9065 = vmatpush1.msk.msra.mxu0 %vm1131_vm10, %v9793_v16  ;;  %9097 = vmatpush1.msk.msra.mxu1 %vm1133_vm11, %v9793_v16  ;;  %v6978_v37 = vadd.f32 %v6914_v57, %v12689_v13  ;;  %vm939_vm6 = vcmp.eq.s32.totalorder %v10098_v22, %v12648_v52  ;;  %vm941_vm7 = vcmp.eq.s32.totalorder %v10098_v22, %v12652_v0 }
 0x1c7   : > { %9066 = vmatprep.subr.msk.mxu0 %vm1068_vm12, %v9793_v16  ;;  %9098 = vmatprep.subr.msk.mxu1 %vm1070_vm13, %v9793_v16  ;;  %v7103_v12 = vadd.f32 %v7039_v34, %v12608_v38  ;;  %v7105_v41 = vadd.f32 %v7041_v63, %v12610_v59  ;;  %v7040_v61 = vmul.f32 %v6976_v44, %v12779_v11 }
 0x1c8   : > { %9067 = vmatpush1.msk.msra.mxu0 %vm1067_vm14, %v9793_v16  ;;  %9099 = vmatpush1.msk.msra.mxu1 %vm1069_vm15, %v9793_v16  ;;  %v7042_v38 = vmul.f32 %v6978_v37, %v6514_v50  ;;  %vm876_vm8 = vcmp.eq.s32.totalorder %v10113_v23, %v12626_v33  ;;  %vm878_vm9 = vcmp.eq.s32.totalorder %v10113_v23, %v12630_v54 }
 0x1c9   : > { %9068 = vmatprep.subr.msk.mxu0 %vm1004_vm0, %v9793_v16  ;;  %9100 = vmatprep.subr.msk.mxu1 %vm1006_vm1, %v9793_v16  ;;  %v7179_v59 = vmul.f32 1.442695, %v7103_v12  ;;  %v7183_v13 = vmul.f32 1.442695, %v7105_v41  ;;  %v7104_v11 = vadd.f32 %v7040_v61, %v12632_v55  ;;  %vm875_vm10 = vcmp.eq.s32.totalorder %v10113_v23, %v12648_v52 }
 0x1ca   : > { %9069 = vmatpush1.msk.msra.mxu0 %vm1003_vm2, %v9793_v16  ;;  %9101 = vmatpush1.msk.msra.mxu1 %vm1005_vm3, %v9793_v16  ;;  %v7106_v50 = vadd.f32 %v7042_v38, %v12634_v53  ;;  %vm877_vm11 = vcmp.eq.s32.totalorder %v10113_v23, %v12652_v0  ;;  %vm812_vm12 = vcmp.eq.s32.totalorder %v10128_v24, %v12626_v33 }
 0x1cb   : > { %9070 = vmatprep.subr.msk.mxu0 %vm940_vm4, %v9793_v16  ;;  %9102 = vmatprep.subr.msk.mxu1 %vm942_vm5, %v9793_v16  ;;  %9574 = vpow2.f32 %v7179_v59  ;;  %v7181_v55 = vmul.f32 1.442695, %v7104_v11  ;;  %vm814_vm13 = vcmp.eq.s32.totalorder %v10128_v24, %v12630_v54  ;;  %vm811_vm14 = vcmp.eq.s32.totalorder %v10128_v24, %v12648_v52 }
 0x1cc   : > { %9071 = vmatpush1.msk.msra.mxu0 %vm939_vm6, %v9793_v16  ;;  %9103 = vmatpush1.msk.msra.mxu1 %vm941_vm7, %v9793_v16  ;;  %9576 = vpow2.f32 %v7183_v13  ;;  %v7185_v53 = vmul.f32 1.442695, %v7106_v50  ;;  %vm813_vm15 = vcmp.eq.s32.totalorder %v10128_v24, %v12652_v0  ;;  %vm748_vm0 = vcmp.eq.s32.totalorder %v10143_v25, %v12626_v33 }
 0x1cd   : > { %9072 = vmatprep.subr.msk.mxu0 %vm876_vm8, %v9793_v16  ;;  %9104 = vmatprep.subr.msk.mxu1 %vm878_vm9, %v9793_v16  ;;  %9578 = vpow2.f32 %v7181_v55  ;;  %vm750_vm1 = vcmp.eq.s32.totalorder %v10143_v25, %v12630_v54  ;;  %vm747_vm2 = vcmp.eq.s32.totalorder %v10143_v25, %v12648_v52  ;;  %vm749_vm3 = vcmp.eq.s32.totalorder %v10143_v25, %v12652_v0 }
 0x1ce   : > { %9073 = vmatpush1.msk.msra.mxu0 %vm875_vm10, %v9793_v16  ;;  %9105 = vmatpush1.msk.msra.mxu1 %vm877_vm11, %v9793_v16  ;;  %9580 = vpow2.f32 %v7185_v53  ;;  %vm684_vm4 = vcmp.eq.s32.totalorder %v10158_v26, %v12626_v33  ;;  %vm686_vm5 = vcmp.eq.s32.totalorder %v10158_v26, %v12630_v54  ;;  %vm683_vm6 = vcmp.eq.s32.totalorder %v10158_v26, %v12648_v52 }
 0x1cf   : > { %9074 = vmatprep.subr.msk.mxu0 %vm812_vm12, %v9793_v16  ;;  %9106 = vmatprep.subr.msk.mxu1 %vm814_vm13, %v9793_v16  ;;  %vm685_vm7 = vcmp.eq.s32.totalorder %v10158_v26, %v12652_v0  ;;  %vm620_vm8 = vcmp.eq.s32.totalorder %v10167_v27, %v12626_v33  ;;  %vm622_vm9 = vcmp.eq.s32.totalorder %v10167_v27, %v12630_v54 }
 0x1d0   : > { %9075 = vmatpush1.msk.msra.mxu0 %vm811_vm14, %v9793_v16  ;;  %9107 = vmatpush1.msk.msra.mxu1 %vm813_vm15, %v9793_v16  ;;  %vm619_vm10 = vcmp.eq.s32.totalorder %v10167_v27, %v12648_v52  ;;  %vm621_vm11 = vcmp.eq.s32.totalorder %v10167_v27, %v12652_v0  ;;  %vm556_vm12 = vcmp.eq.s32.totalorder %v9953_v2, %v12626_v33 }
 0x1d1   : > { %9076 = vmatprep.subr.msk.mxu0 %vm748_vm0, %v9793_v16  ;;  %9108 = vmatprep.subr.msk.mxu1 %vm750_vm1, %v9793_v16  ;;  %vm558_vm13 = vcmp.eq.s32.totalorder %v9953_v2, %v12630_v54  ;;  %v13012_v47 = vrot.slane %v12986_v48, %v9956_v3  ;;  %v13016_v14 = vrot.slane %v12986_v48, %v9959_v4 }
 0x1d2   : > { %9077 = vmatpush1.msk.msra.mxu0 %vm747_vm2, %v9793_v16  ;;  %9109 = vmatpush1.msk.msra.mxu1 %vm749_vm3, %v9793_v16  ;;  %v12994_v42 = vpop.f32.mrf.mxu0  ;;  %v12996_v8 = vpop.f32.mrf.mxu1  ;;  %vm555_vm14 = vcmp.eq.s32.totalorder %v9953_v2, %v12648_v52  ;;  %v13034_v39 = vrot.slane %v12986_v48, %v9962_v5  ;;  %v13038_v43 = vrot.slane %v12986_v48, %v9965_v6 }
 0x1d3   : > { %9078 = vmatprep.subr.msk.mxu0 %vm684_vm4, %v9793_v16  ;;  %9110 = vmatprep.subr.msk.mxu1 %vm686_vm5, %v9793_v16  ;;  %vm557_vm15 = vcmp.eq.s32.totalorder %v9953_v2, %v12652_v0  ;;  %vm1520_vm0 = vcmp.eq.s32.totalorder %v9968_v7, %v13012_v47  ;;  %vm1522_vm1 = vcmp.eq.s32.totalorder %v9968_v7, %v13016_v14 }
 0x1d4   : > { %9079 = vmatpush1.msk.msra.mxu0 %vm683_vm6, %v9793_v16  ;;  %9111 = vmatpush1.msk.msra.mxu1 %vm685_vm7, %v9793_v16  ;;  %v13018_v46 = vpop.f32.mrf.mxu0  ;;  %v13020_v49 = vpop.f32.mrf.mxu1  ;;  %vm1519_vm2 = vcmp.eq.s32.totalorder %v9968_v7, %v13034_v39  ;;  %vm1521_vm3 = vcmp.eq.s32.totalorder %v9968_v7, %v13038_v43  ;;  %vm1456_vm4 = vcmp.eq.s32.totalorder %v9974_v9, %v13012_v47 }
 0x1d5   : > { %9080 = vmatprep.subr.msk.mxu0 %vm620_vm8, %v9793_v16  ;;  %9112 = vmatprep.subr.msk.mxu1 %vm622_vm9, %v9793_v16  ;;  %vm1458_vm5 = vcmp.eq.s32.totalorder %v9974_v9, %v13016_v14  ;;  %vm1455_vm6 = vcmp.eq.s32.totalorder %v9974_v9, %v13034_v39  ;;  %vm1457_vm7 = vcmp.eq.s32.totalorder %v9974_v9, %v13038_v43 }
 0x1d6   : > { %9081 = vmatpush1.msk.msra.mxu0 %vm619_vm10, %v9793_v16  ;;  %9113 = vmatpush1.msk.msra.mxu1 %vm621_vm11, %v9793_v16  ;;  %vm1392_vm8 = vcmp.eq.s32.totalorder %v9977_v10, %v13012_v47  ;;  %vm1394_vm9 = vcmp.eq.s32.totalorder %v9977_v10, %v13016_v14  ;;  %vm1391_vm10 = vcmp.eq.s32.totalorder %v9977_v10, %v13034_v39 }
 0x1d7   : > { %9082 = vmatprep.subr.msk.mxu0 %vm556_vm12, %v9793_v16  ;;  %9114 = vmatprep.subr.msk.mxu1 %vm558_vm13, %v9793_v16  ;;  %vm1393_vm11 = vcmp.eq.s32.totalorder %v9977_v10, %v13038_v43  ;;  %vm1328_vm12 = vcmp.eq.s32.totalorder %v9996_v15, %v13012_v47  ;;  %vm1330_vm13 = vcmp.eq.s32.totalorder %v9996_v15, %v13016_v14 }
 0x1d8   : > { %v9575_v54 = vpop.eup %9574  ;;  %9083 = vmatpush1.msk.msra.mxu0 %vm555_vm14, %v9793_v16  ;;  %5261 = vmatprep.mubr.f32.mxu0 %v9792_v1  ;;  %v13055_v52 = vpop.f32.mrf.mxu0  ;;  %vm1327_vm14 = vcmp.eq.s32.totalorder %v9996_v15, %v13034_v39  ;;  %v13138_v63 = vrot.slane %v13104_v56, %v9965_v6  ;;  %v13168_v44 = vrot.slane %v13104_v56, %v9956_v3 }
 0x1d9   : > { %v13057_v0 = vpop.f32.mrf.mxu1  ;;  %v9577_v33 = vpop.eup %9576  ;;  %9115 = vmatpush1.msk.msra.mxu1 %vm557_vm15, %v9793_v16  ;;  %5350 = vmatprep.mubr.f32.mxu1 %v9792_v1  ;;  %7295 = vst [vmem:[%s11853_s6 + $0x60] sm:$0xff] %v9575_v54  ;;  %vm1329_vm15 = vcmp.eq.s32.totalorder %v9996_v15, %v13038_v43  ;;  %v6530_v41 = vrot.slane %v13104_v56, %v9959_v4 }
 0x1da   : > { %v9579_v35 = vpop.eup %9578  ;;  %5262 = vmatmul.mubr.f32.vlgmr.msra.gmra.mxu0 %v12266_v36  ;;  %5351 = vmatmul.mubr.f32.vlgmr.msra.gmra.mxu1 %v12266_v36  ;;  %7297 = vst [vmem:[%s11853_s6 + $0x70] sm:$0xff] %v9577_v33  ;;  %v13073_v60 = vpop.f32.mrf.mxu0 }
 0x1db   : > { %v13075_v62 = vpop.f32.mrf.mxu1  ;;  %v9581_v40 = vpop.eup %9580  ;;  %9116 = vmatprep.subr.msk.mxu0 %vm1520_vm0, %v9793_v16  ;;  %9148 = vmatprep.subr.msk.mxu1 %vm1522_vm1, %v9793_v16  ;;  %7296 = vst [vmem:[%s11853_s6 + $0x68] sm:$0xff] %v9579_v35  ;;  %vm1264_vm0 = vcmp.eq.s32.totalorder %v10023_v17, %v13012_v47  ;;  %vm1266_vm1 = vcmp.eq.s32.totalorder %v10023_v17, %v13016_v14 }
 0x1dc   : > { %9117 = vmatpush1.msk.msra.mxu0 %vm1519_vm2, %v9793_v16  ;;  %9149 = vmatpush1.msk.msra.mxu1 %vm1521_vm3, %v9793_v16  ;;  %7298 = vst [vmem:[%s11853_s6 + $0x78] sm:$0xff] %v9581_v40  ;;  %vm1263_vm2 = vcmp.eq.s32.totalorder %v10023_v17, %v13034_v39  ;;  %vm1265_vm3 = vcmp.eq.s32.totalorder %v10023_v17, %v13038_v43 }
 0x1dd   : > { %9118 = vmatprep.subr.msk.mxu0 %vm1456_vm4, %v9793_v16  ;;  %9150 = vmatprep.subr.msk.mxu1 %vm1458_vm5, %v9793_v16  ;;  %vm1200_vm4 = vcmp.eq.s32.totalorder %v10038_v18, %v13012_v47  ;;  %vm1202_vm5 = vcmp.eq.s32.totalorder %v10038_v18, %v13016_v14 }
 0x1de   : > { %5267 = vmatprep.mubr.f32.mxu0 %v9792_v1  ;;  %5356 = vmatprep.mubr.f32.mxu1 %v9792_v1  ;;  %v4385_v36 = vpop.f32.mrf.mxu0  ;;  %v4474_v45 = vpop.f32.mrf.mxu1 }
 0x1df   : > { %9119 = vmatpush1.msk.msra.mxu0 %vm1455_vm6, %v9793_v16  ;;  %9151 = vmatpush1.msk.msra.mxu1 %vm1457_vm7, %v9793_v16  ;;  %vm1199_vm6 = vcmp.eq.s32.totalorder %v10038_v18, %v13034_v39  ;;  %vm1201_vm7 = vcmp.eq.s32.totalorder %v10038_v18, %v13038_v43 }
 0x1e0   : > { %5268 = vmatmul.mubr.f32.gmra.mxu0 %v12325_v32  ;;  %5357 = vmatmul.mubr.f32.gmra.mxu1 %v12325_v32  ;;  %v4387_v57 = vpop.f32.mrf.mxu0  ;;  %v4476_v34 = vpop.f32.mrf.mxu1  ;;  %v13134_v32 = vrot.slane %v13104_v56, %v9962_v5 }
 0x1e1   : > { %9120 = vmatprep.subr.msk.mxu0 %vm1392_vm8, %v9793_v16  ;;  %9152 = vmatprep.subr.msk.mxu1 %vm1394_vm9, %v9793_v16  ;;  %vm1136_vm8 = vcmp.eq.s32.totalorder %v10053_v19, %v13012_v47  ;;  %vm1138_vm9 = vcmp.eq.s32.totalorder %v10053_v19, %v13016_v14 }
 0x1e2   : > { %9121 = vmatpush1.msk.msra.mxu0 %vm1391_vm10, %v9793_v16  ;;  %9153 = vmatpush1.msk.msra.mxu1 %vm1393_vm11, %v9793_v16  ;;  %vm1135_vm10 = vcmp.eq.s32.totalorder %v10053_v19, %v13034_v39  ;;  %vm1137_vm11 = vcmp.eq.s32.totalorder %v10053_v19, %v13038_v43 }
 0x1e3   : > { %9122 = vmatprep.subr.msk.mxu0 %vm1328_vm12, %v9793_v16  ;;  %9154 = vmatprep.subr.msk.mxu1 %vm1330_vm13, %v9793_v16  ;;  %vm1072_vm12 = vcmp.eq.s32.totalorder %v10068_v20, %v13012_v47  ;;  %vm1074_vm13 = vcmp.eq.s32.totalorder %v10068_v20, %v13016_v14 }
 0x1e4   : > { %5273 = vmatprep.mubr.f32.mxu0 %v9792_v1  ;;  %5362 = vmatprep.mubr.f32.mxu1 %v9792_v1  ;;  %v4391_v37 = vpop.f32.mrf.mxu0  ;;  %v4480_v12 = vpop.f32.mrf.mxu1 }
 0x1e5   : > { %9123 = vmatpush1.msk.msra.mxu0 %vm1327_vm14, %v9793_v16  ;;  %9155 = vmatpush1.msk.msra.mxu1 %vm1329_vm15, %v9793_v16  ;;  %v6787_v61 = vmul.f32 %v13134_v32, %v4391_v37  ;;  %v6789_v38 = vmul.f32 %v13138_v63, %v4480_v12  ;;  %vm1071_vm14 = vcmp.eq.s32.totalorder %v10068_v20, %v13034_v39 }
 0x1e6   : > { %5274 = vmatmul.mubr.f32.gmra.mxu0 %v12408_v51  ;;  %5363 = vmatmul.mubr.f32.gmra.mxu1 %v12408_v51  ;;  %v4393_v59 = vpop.f32.mrf.mxu0  ;;  %v4482_v13 = vpop.f32.mrf.mxu1  ;;  %vm1073_vm15 = vcmp.eq.s32.totalorder %v10068_v20, %v13038_v43 }
 0x1e7   : > { %9124 = vmatprep.subr.msk.mxu0 %vm1264_vm0, %v9793_v16  ;;  %9156 = vmatprep.subr.msk.mxu1 %vm1266_vm1, %v9793_v16  ;;  %v6851_v51 = vadd.f32 %v6787_v61, %v4385_v36  ;;  %v6853_v11 = vadd.f32 %v6789_v38, %v4474_v45  ;;  %v6788_v50 = vmul.f32 %v13168_v44, %v4393_v59 }
 0x1e8   : > { %9125 = vmatpush1.msk.msra.mxu0 %vm1263_vm2, %v9793_v16  ;;  %9157 = vmatpush1.msk.msra.mxu1 %vm1265_vm3, %v9793_v16  ;;  %v6790_v55 = vmul.f32 %v6530_v41, %v4482_v13  ;;  %vm1008_vm0 = vcmp.eq.s32.totalorder %v10083_v21, %v13012_v47  ;;  %vm1010_vm1 = vcmp.eq.s32.totalorder %v10083_v21, %v13016_v14 }
 0x1e9   : > { %9126 = vmatprep.subr.msk.mxu0 %vm1200_vm4, %v9793_v16  ;;  %9158 = vmatprep.subr.msk.mxu1 %vm1202_vm5, %v9793_v16  ;;  %v6915_v53 = vmul.f32 %v6851_v51, %v13134_v32  ;;  %v6917_v54 = vmul.f32 %v6853_v11, %v13138_v63  ;;  %v6852_v33 = vadd.f32 %v6788_v50, %v4387_v57  ;;  %v13455_v50 = vld [vmem:[%s15521_s2] sm:$0xff] }
 0x1ea   : > { %5279 = vmatprep.mubr.f32.mxu0 %v9792_v1  ;;  %5368 = vmatprep.mubr.f32.mxu1 %v9792_v1  ;;  %v6854_v35 = vadd.f32 %v6790_v55, %v4476_v34  ;;  %vm1007_vm2 = vcmp.eq.s32.totalorder %v10083_v21, %v13034_v39  ;;  %vm1009_vm3 = vcmp.eq.s32.totalorder %v10083_v21, %v13038_v43 }
 0x1eb   : > { %9127 = vmatpush1.msk.msra.mxu0 %vm1199_vm6, %v9793_v16  ;;  %9159 = vmatpush1.msk.msra.mxu1 %vm1201_vm7, %v9793_v16  ;;  %v6979_v40 = vadd.f32 %v6915_v53, %v13055_v52  ;;  %v6981_v36 = vadd.f32 %v6917_v54, %v13057_v0  ;;  %v6916_v45 = vmul.f32 %v6852_v33, %v13168_v44 }
 0x1ec   : > { %5280 = vmatmul.mubr.f32.gmra.mxu0 %v12470_v58  ;;  %5369 = vmatmul.mubr.f32.gmra.mxu1 %v12470_v58  ;;  %v6918_v57 = vmul.f32 %v6854_v35, %v6530_v41  ;;  %vm944_vm4 = vcmp.eq.s32.totalorder %v10098_v22, %v13012_v47  ;;  %vm946_vm5 = vcmp.eq.s32.totalorder %v10098_v22, %v13016_v14 }
 0x1ed   : > { %9128 = vmatprep.subr.msk.mxu0 %vm1136_vm8, %v9793_v16  ;;  %9160 = vmatprep.subr.msk.mxu1 %vm1138_vm9, %v9793_v16  ;;  %v7043_v52 = vmul.f32 %v6979_v40, %v13134_v32  ;;  %v7045_v58 = vmul.f32 %v6981_v36, %v13138_v63  ;;  %v6980_v0 = vadd.f32 %v6916_v45, %v13073_v60  ;;  %v13511_v40 = vld [vmem:[%s15521_s2 + $0x8] sm:$0xff] }
 0x1ee   : > { %9129 = vmatpush1.msk.msra.mxu0 %vm1135_vm10, %v9793_v16  ;;  %9161 = vmatpush1.msk.msra.mxu1 %vm1137_vm11, %v9793_v16  ;;  %v6982_v34 = vadd.f32 %v6918_v57, %v13075_v62  ;;  %vm943_vm6 = vcmp.eq.s32.totalorder %v10098_v22, %v13034_v39  ;;  %vm945_vm7 = vcmp.eq.s32.totalorder %v10098_v22, %v13038_v43 }
 0x1ef   : > { %9130 = vmatprep.subr.msk.mxu0 %vm1072_vm12, %v9793_v16  ;;  %9162 = vmatprep.subr.msk.mxu1 %vm1074_vm13, %v9793_v16  ;;  %v7107_v60 = vadd.f32 %v7043_v52, %v12994_v42  ;;  %v7109_v32 = vadd.f32 %v7045_v58, %v12996_v8  ;;  %v7044_v63 = vmul.f32 %v6980_v0, %v13168_v44 }
 0x1f0   : > { %9131 = vmatpush1.msk.msra.mxu0 %vm1071_vm14, %v9793_v16  ;;  %9163 = vmatpush1.msk.msra.mxu1 %vm1073_vm15, %v9793_v16  ;;  %v7046_v42 = vmul.f32 %v6982_v34, %v6530_v41  ;;  %vm880_vm8 = vcmp.eq.s32.totalorder %v10113_v23, %v13012_v47  ;;  %vm882_vm9 = vcmp.eq.s32.totalorder %v10113_v23, %v13016_v14 }
 0x1f1   : > { %9132 = vmatprep.subr.msk.mxu0 %vm1008_vm0, %v9793_v16  ;;  %9164 = vmatprep.subr.msk.mxu1 %vm1010_vm1, %v9793_v16  ;;  %v7187_v8 = vmul.f32 1.442695, %v7107_v60  ;;  %v7191_v62 = vmul.f32 1.442695, %v7109_v32  ;;  %v7108_v44 = vadd.f32 %v7044_v63, %v13018_v46  ;;  %vm879_vm10 = vcmp.eq.s32.totalorder %v10113_v23, %v13034_v39 }
 0x1f2   : > { %9133 = vmatpush1.msk.msra.mxu0 %vm1007_vm2, %v9793_v16  ;;  %9165 = vmatpush1.msk.msra.mxu1 %vm1009_vm3, %v9793_v16  ;;  %v7110_v37 = vadd.f32 %v7046_v42, %v13020_v49  ;;  %vm881_vm11 = vcmp.eq.s32.totalorder %v10113_v23, %v13038_v43  ;;  %vm816_vm12 = vcmp.eq.s32.totalorder %v10128_v24, %v13012_v47 }
 0x1f3   : > { %9134 = vmatprep.subr.msk.mxu0 %vm944_vm4, %v9793_v16  ;;  %9166 = vmatprep.subr.msk.mxu1 %vm946_vm5, %v9793_v16  ;;  %9582 = vpow2.f32 %v7187_v8  ;;  %v7189_v46 = vmul.f32 1.442695, %v7108_v44  ;;  %vm818_vm13 = vcmp.eq.s32.totalorder %v10128_v24, %v13016_v14  ;;  %vm815_vm14 = vcmp.eq.s32.totalorder %v10128_v24, %v13034_v39 }
 0x1f4   : > { %9135 = vmatpush1.msk.msra.mxu0 %vm943_vm6, %v9793_v16  ;;  %9167 = vmatpush1.msk.msra.mxu1 %vm945_vm7, %v9793_v16  ;;  %9584 = vpow2.f32 %v7191_v62  ;;  %v7193_v49 = vmul.f32 1.442695, %v7110_v37  ;;  %vm817_vm15 = vcmp.eq.s32.totalorder %v10128_v24, %v13038_v43  ;;  %vm752_vm0 = vcmp.eq.s32.totalorder %v10143_v25, %v13012_v47 }
 0x1f5   : > { %9136 = vmatprep.subr.msk.mxu0 %vm880_vm8, %v9793_v16  ;;  %9168 = vmatprep.subr.msk.mxu1 %vm882_vm9, %v9793_v16  ;;  %9586 = vpow2.f32 %v7189_v46  ;;  %vm754_vm1 = vcmp.eq.s32.totalorder %v10143_v25, %v13016_v14  ;;  %vm751_vm2 = vcmp.eq.s32.totalorder %v10143_v25, %v13034_v39  ;;  %vm753_vm3 = vcmp.eq.s32.totalorder %v10143_v25, %v13038_v43 }
 0x1f6   : > { %9137 = vmatpush1.msk.msra.mxu0 %vm879_vm10, %v9793_v16  ;;  %9169 = vmatpush1.msk.msra.mxu1 %vm881_vm11, %v9793_v16  ;;  %9588 = vpow2.f32 %v7193_v49  ;;  %vm688_vm4 = vcmp.eq.s32.totalorder %v10158_v26, %v13012_v47  ;;  %vm690_vm5 = vcmp.eq.s32.totalorder %v10158_v26, %v13016_v14  ;;  %vm687_vm6 = vcmp.eq.s32.totalorder %v10158_v26, %v13034_v39 }
 0x1f7   : > { %9138 = vmatprep.subr.msk.mxu0 %vm816_vm12, %v9793_v16  ;;  %9170 = vmatprep.subr.msk.mxu1 %vm818_vm13, %v9793_v16  ;;  %vm689_vm7 = vcmp.eq.s32.totalorder %v10158_v26, %v13038_v43  ;;  %vm624_vm8 = vcmp.eq.s32.totalorder %v10167_v27, %v13012_v47  ;;  %vm626_vm9 = vcmp.eq.s32.totalorder %v10167_v27, %v13016_v14 }
 0x1f8   : > { %9139 = vmatpush1.msk.msra.mxu0 %vm815_vm14, %v9793_v16  ;;  %9171 = vmatpush1.msk.msra.mxu1 %vm817_vm15, %v9793_v16  ;;  %vm623_vm10 = vcmp.eq.s32.totalorder %v10167_v27, %v13034_v39  ;;  %vm625_vm11 = vcmp.eq.s32.totalorder %v10167_v27, %v13038_v43  ;;  %vm560_vm12 = vcmp.eq.s32.totalorder %v9953_v2, %v13012_v47 }
 0x1f9   : > { %9140 = vmatprep.subr.msk.mxu0 %vm752_vm0, %v9793_v16  ;;  %9172 = vmatprep.subr.msk.mxu1 %vm754_vm1, %v9793_v16  ;;  %vm562_vm13 = vcmp.eq.s32.totalorder %v9953_v2, %v13016_v14  ;;  %v13398_v61 = vrot.slane %v12986_v48, %v10182_v28  ;;  %v13402_v38 = vrot.slane %v12986_v48, %v10185_v29 }
 0x1fa   : > { %9141 = vmatpush1.msk.msra.mxu0 %vm751_vm2, %v9793_v16  ;;  %9173 = vmatpush1.msk.msra.mxu1 %vm753_vm3, %v9793_v16  ;;  %v13380_v12 = vpop.f32.mrf.mxu0  ;;  %v13382_v41 = vpop.f32.mrf.mxu1  ;;  %vm559_vm14 = vcmp.eq.s32.totalorder %v9953_v2, %v13034_v39  ;;  %v13420_v51 = vrot.slane %v12986_v48, %v10194_v30  ;;  %v13424_v11 = vrot.slane %v12986_v48, %v10197_v31 }
 0x1fb   : > { %9142 = vmatprep.subr.msk.mxu0 %vm688_vm4, %v9793_v16  ;;  %9174 = vmatprep.subr.msk.mxu1 %vm690_vm5, %v9793_v16  ;;  %vm561_vm15 = vcmp.eq.s32.totalorder %v9953_v2, %v13038_v43  ;;  %vm1524_vm0 = vcmp.eq.s32.totalorder %v9968_v7, %v13398_v61  ;;  %vm1526_vm1 = vcmp.eq.s32.totalorder %v9968_v7, %v13402_v38 }
 0x1fc   : > { %9143 = vmatpush1.msk.msra.mxu0 %vm687_vm6, %v9793_v16  ;;  %9175 = vmatpush1.msk.msra.mxu1 %vm689_vm7, %v9793_v16  ;;  %v13404_v59 = vpop.f32.mrf.mxu0  ;;  %v13406_v13 = vpop.f32.mrf.mxu1  ;;  %vm1523_vm2 = vcmp.eq.s32.totalorder %v9968_v7, %v13420_v51  ;;  %vm1525_vm3 = vcmp.eq.s32.totalorder %v9968_v7, %v13424_v11  ;;  %vm1460_vm4 = vcmp.eq.s32.totalorder %v9974_v9, %v13398_v61 }
 0x1fd   : > { %9144 = vmatprep.subr.msk.mxu0 %vm624_vm8, %v9793_v16  ;;  %9176 = vmatprep.subr.msk.mxu1 %vm626_vm9, %v9793_v16  ;;  %vm1462_vm5 = vcmp.eq.s32.totalorder %v9974_v9, %v13402_v38  ;;  %vm1459_vm6 = vcmp.eq.s32.totalorder %v9974_v9, %v13420_v51  ;;  %vm1461_vm7 = vcmp.eq.s32.totalorder %v9974_v9, %v13424_v11 }
 0x1fe   : > { %9145 = vmatpush1.msk.msra.mxu0 %vm623_vm10, %v9793_v16  ;;  %9177 = vmatpush1.msk.msra.mxu1 %vm625_vm11, %v9793_v16  ;;  %vm1396_vm8 = vcmp.eq.s32.totalorder %v9977_v10, %v13398_v61  ;;  %vm1398_vm9 = vcmp.eq.s32.totalorder %v9977_v10, %v13402_v38  ;;  %vm1395_vm10 = vcmp.eq.s32.totalorder %v9977_v10, %v13420_v51 }
 0x1ff   : > { %9146 = vmatprep.subr.msk.mxu0 %vm560_vm12, %v9793_v16  ;;  %9178 = vmatprep.subr.msk.mxu1 %vm562_vm13, %v9793_v16  ;;  %vm1397_vm11 = vcmp.eq.s32.totalorder %v9977_v10, %v13424_v11  ;;  %vm1332_vm12 = vcmp.eq.s32.totalorder %v9996_v15, %v13398_v61  ;;  %vm1334_vm13 = vcmp.eq.s32.totalorder %v9996_v15, %v13402_v38 }
 0x200   : > { %v9583_v14 = vpop.eup %9582  ;;  %9147 = vmatpush1.msk.msra.mxu0 %vm559_vm14, %v9793_v16  ;;  %5439 = vmatprep.mubr.f32.mxu0 %v9792_v1  ;;  %v13441_v48 = vpop.f32.mrf.mxu0  ;;  %vm1331_vm14 = vcmp.eq.s32.totalorder %v9996_v15, %v13420_v51  ;;  %v13533_v57 = vrot.slane %v13104_v56, %v10194_v30  ;;  %v13537_v52 = vrot.slane %v13104_v56, %v10197_v31 }
 0x201   : > { %v13443_v39 = vpop.f32.mrf.mxu1  ;;  %v9585_v47 = vpop.eup %9584  ;;  %9179 = vmatpush1.msk.msra.mxu1 %vm561_vm15, %v9793_v16  ;;  %5528 = vmatprep.mubr.f32.mxu1 %v9792_v1  ;;  %7299 = vst [vmem:[%s11853_s6 + $0x80] sm:$0xff] %v9583_v14  ;;  %vm1333_vm15 = vcmp.eq.s32.totalorder %v9996_v15, %v13424_v11  ;;  %v13567_v58 = vrot.slane %v13104_v56, %v10182_v28 }
 0x202   : > { %v9587_v43 = vpop.eup %9586  ;;  %5440 = vmatmul.mubr.f32.vlgmr.msra.gmra.mxu0 %v13455_v50  ;;  %5529 = vmatmul.mubr.f32.vlgmr.msra.gmra.mxu1 %v13455_v50  ;;  %7301 = vst [vmem:[%s11853_s6 + $0x90] sm:$0xff] %v9585_v47  ;;  %v13464_v55 = vpop.f32.mrf.mxu0  ;;  %v13577_v60 = vrot.slane %v13104_v56, %v10185_v29  ;;  %v13594_v56 = vld [vmem:[%s15521_s2 + $0x10] sm:$0xff] }
 0x203   : > { %v13466_v53 = vpop.f32.mrf.mxu1  ;;  %v9589_v54 = vpop.eup %9588  ;;  %9180 = vmatprep.subr.msk.mxu0 %vm1524_vm0, %v9793_v16  ;;  %9212 = vmatprep.subr.msk.mxu1 %vm1526_vm1, %v9793_v16  ;;  %7300 = vst [vmem:[%s11853_s6 + $0x88] sm:$0xff] %v9587_v43  ;;  %vm1268_vm0 = vcmp.eq.s32.totalorder %v10023_v17, %v13398_v61  ;;  %vm1270_vm1 = vcmp.eq.s32.totalorder %v10023_v17, %v13402_v38 }
 0x204   : > { %9181 = vmatpush1.msk.msra.mxu0 %vm1523_vm2, %v9793_v16  ;;  %9213 = vmatpush1.msk.msra.mxu1 %vm1525_vm3, %v9793_v16  ;;  %7302 = vst [vmem:[%s11853_s6 + $0x98] sm:$0xff] %v9589_v54  ;;  %vm1267_vm2 = vcmp.eq.s32.totalorder %v10023_v17, %v13420_v51  ;;  %vm1269_vm3 = vcmp.eq.s32.totalorder %v10023_v17, %v13424_v11 }
 0x205   : > { %9182 = vmatprep.subr.msk.mxu0 %vm1460_vm4, %v9793_v16  ;;  %9214 = vmatprep.subr.msk.mxu1 %vm1462_vm5, %v9793_v16  ;;  %vm1204_vm4 = vcmp.eq.s32.totalorder %v10038_v18, %v13398_v61  ;;  %vm1206_vm5 = vcmp.eq.s32.totalorder %v10038_v18, %v13402_v38 }
 0x206   : > { %5445 = vmatprep.mubr.f32.mxu0 %v9792_v1  ;;  %5534 = vmatprep.mubr.f32.mxu1 %v9792_v1  ;;  %v4563_v33 = vpop.f32.mrf.mxu0  ;;  %v4652_v35 = vpop.f32.mrf.mxu1 }
 0x207   : > { %9183 = vmatpush1.msk.msra.mxu0 %vm1459_vm6, %v9793_v16  ;;  %9215 = vmatpush1.msk.msra.mxu1 %vm1461_vm7, %v9793_v16  ;;  %vm1203_vm6 = vcmp.eq.s32.totalorder %v10038_v18, %v13420_v51  ;;  %vm1205_vm7 = vcmp.eq.s32.totalorder %v10038_v18, %v13424_v11 }
 0x208   : > { %5446 = vmatmul.mubr.f32.gmra.mxu0 %v13511_v40  ;;  %5535 = vmatmul.mubr.f32.gmra.mxu1 %v13511_v40  ;;  %v4565_v36 = vpop.f32.mrf.mxu0  ;;  %v4654_v45 = vpop.f32.mrf.mxu1 }
 0x209   : > { %9184 = vmatprep.subr.msk.mxu0 %vm1396_vm8, %v9793_v16  ;;  %9216 = vmatprep.subr.msk.mxu1 %vm1398_vm9, %v9793_v16  ;;  %vm1140_vm8 = vcmp.eq.s32.totalorder %v10053_v19, %v13398_v61  ;;  %vm1142_vm9 = vcmp.eq.s32.totalorder %v10053_v19, %v13402_v38 }
 0x20a   : > { %9185 = vmatpush1.msk.msra.mxu0 %vm1395_vm10, %v9793_v16  ;;  %9217 = vmatpush1.msk.msra.mxu1 %vm1397_vm11, %v9793_v16  ;;  %vm1139_vm10 = vcmp.eq.s32.totalorder %v10053_v19, %v13420_v51  ;;  %vm1141_vm11 = vcmp.eq.s32.totalorder %v10053_v19, %v13424_v11 }
 0x20b   : > { %9186 = vmatprep.subr.msk.mxu0 %vm1332_vm12, %v9793_v16  ;;  %9218 = vmatprep.subr.msk.mxu1 %vm1334_vm13, %v9793_v16  ;;  %vm1076_vm12 = vcmp.eq.s32.totalorder %v10068_v20, %v13398_v61  ;;  %vm1078_vm13 = vcmp.eq.s32.totalorder %v10068_v20, %v13402_v38 }
 0x20c   : > { %5451 = vmatprep.mubr.f32.mxu0 %v9792_v1  ;;  %5540 = vmatprep.mubr.f32.mxu1 %v9792_v1  ;;  %v4569_v0 = vpop.f32.mrf.mxu0  ;;  %v4658_v34 = vpop.f32.mrf.mxu1 }
 0x20d   : > { %9187 = vmatpush1.msk.msra.mxu0 %vm1331_vm14, %v9793_v16  ;;  %9219 = vmatpush1.msk.msra.mxu1 %vm1333_vm15, %v9793_v16  ;;  %v6791_v32 = vmul.f32 %v13533_v57, %v4569_v0  ;;  %v6793_v63 = vmul.f32 %v13537_v52, %v4658_v34  ;;  %vm1075_vm14 = vcmp.eq.s32.totalorder %v10068_v20, %v13420_v51 }
 0x20e   : > { %5452 = vmatmul.mubr.f32.gmra.mxu0 %v13594_v56  ;;  %5541 = vmatmul.mubr.f32.gmra.mxu1 %v13594_v56  ;;  %v4571_v42 = vpop.f32.mrf.mxu0  ;;  %v4660_v8 = vpop.f32.mrf.mxu1  ;;  %vm1077_vm15 = vcmp.eq.s32.totalorder %v10068_v20, %v13424_v11 }
 0x20f   : > { %9188 = vmatprep.subr.msk.mxu0 %vm1268_vm0, %v9793_v16  ;;  %9220 = vmatprep.subr.msk.mxu1 %vm1270_vm1, %v9793_v16  ;;  %v6855_v62 = vadd.f32 %v6791_v32, %v4563_v33  ;;  %v6857_v44 = vadd.f32 %v6793_v63, %v4652_v35  ;;  %v6792_v37 = vmul.f32 %v13567_v58, %v4571_v42  ;;  %v13789_v32 = vld [vmem:[%s9939_s28 + $0x30] sm:$0xff] }
 0x210   : > { %9189 = vmatpush1.msk.msra.mxu0 %vm1267_vm2, %v9793_v16  ;;  %9221 = vmatpush1.msk.msra.mxu1 %vm1269_vm3, %v9793_v16  ;;  %v6794_v46 = vmul.f32 %v13577_v60, %v4660_v8  ;;  %vm1012_vm0 = vcmp.eq.s32.totalorder %v10083_v21, %v13398_v61  ;;  %vm1014_vm1 = vcmp.eq.s32.totalorder %v10083_v21, %v13402_v38 }
 0x211   : > { %9190 = vmatprep.subr.msk.mxu0 %vm1204_vm4, %v9793_v16  ;;  %9222 = vmatprep.subr.msk.mxu1 %vm1206_vm5, %v9793_v16  ;;  %v6919_v49 = vmul.f32 %v6855_v62, %v13533_v57  ;;  %v6921_v14 = vmul.f32 %v6857_v44, %v13537_v52  ;;  %v6856_v47 = vadd.f32 %v6792_v37, %v4565_v36  ;;  %v13656_v36 = vld [vmem:[%s15521_s2 + $0x18] sm:$0xff] }
 0x212   : > { %5457 = vmatprep.mubr.f32.mxu0 %v9792_v1  ;;  %5546 = vmatprep.mubr.f32.mxu1 %v9792_v1  ;;  %v6858_v43 = vadd.f32 %v6794_v46, %v4654_v45  ;;  %vm1011_vm2 = vcmp.eq.s32.totalorder %v10083_v21, %v13420_v51  ;;  %vm1013_vm3 = vcmp.eq.s32.totalorder %v10083_v21, %v13424_v11 }
 0x213   : > { %9191 = vmatpush1.msk.msra.mxu0 %vm1203_vm6, %v9793_v16  ;;  %9223 = vmatpush1.msk.msra.mxu1 %vm1205_vm7, %v9793_v16  ;;  %v6983_v54 = vadd.f32 %v6919_v49, %v13441_v48  ;;  %v6985_v33 = vadd.f32 %v6921_v14, %v13443_v39  ;;  %v6920_v35 = vmul.f32 %v6856_v47, %v13567_v58 }
 0x214   : > { %5458 = vmatmul.mubr.f32.gmra.mxu0 %v13656_v36  ;;  %5547 = vmatmul.mubr.f32.gmra.mxu1 %v13656_v36  ;;  %v6922_v48 = vmul.f32 %v6858_v43, %v13577_v60  ;;  %vm948_vm4 = vcmp.eq.s32.totalorder %v10098_v22, %v13398_v61  ;;  %vm950_vm5 = vcmp.eq.s32.totalorder %v10098_v22, %v13402_v38 }
 0x215   : > { %9192 = vmatprep.subr.msk.mxu0 %vm1140_vm8, %v9793_v16  ;;  %9224 = vmatprep.subr.msk.mxu1 %vm1142_vm9, %v9793_v16  ;;  %v7047_v39 = vmul.f32 %v6983_v54, %v13533_v57  ;;  %v7049_v45 = vmul.f32 %v6985_v33, %v13537_v52  ;;  %v6984_v0 = vadd.f32 %v6920_v35, %v13464_v55 }
 0x216   : > { %9193 = vmatpush1.msk.msra.mxu0 %vm1139_vm10, %v9793_v16  ;;  %9225 = vmatpush1.msk.msra.mxu1 %vm1141_vm11, %v9793_v16  ;;  %v6986_v57 = vadd.f32 %v6922_v48, %v13466_v53  ;;  %vm947_vm6 = vcmp.eq.s32.totalorder %v10098_v22, %v13420_v51  ;;  %vm949_vm7 = vcmp.eq.s32.totalorder %v10098_v22, %v13424_v11  ;;  %v13907_v48 = vld [vmem:[%s9945_s30 + $0x18] sm:$0xff] }
 0x217   : > { %9194 = vmatprep.subr.msk.mxu0 %vm1076_vm12, %v9793_v16  ;;  %9226 = vmatprep.subr.msk.mxu1 %vm1078_vm13, %v9793_v16  ;;  %v7111_v55 = vadd.f32 %v7047_v39, %v13380_v12  ;;  %v7113_v52 = vadd.f32 %v7049_v45, %v13382_v41  ;;  %v7048_v34 = vmul.f32 %v6984_v0, %v13567_v58 }
 0x218   : > { %9195 = vmatpush1.msk.msra.mxu0 %vm1075_vm14, %v9793_v16  ;;  %9227 = vmatpush1.msk.msra.mxu1 %vm1077_vm15, %v9793_v16  ;;  %v7050_v12 = vmul.f32 %v6986_v57, %v13577_v60  ;;  %vm884_vm8 = vcmp.eq.s32.totalorder %v10113_v23, %v13398_v61  ;;  %vm886_vm9 = vcmp.eq.s32.totalorder %v10113_v23, %v13402_v38 }
 0x219   : > { %9196 = vmatprep.subr.msk.mxu0 %vm1012_vm0, %v9793_v16  ;;  %9228 = vmatprep.subr.msk.mxu1 %vm1014_vm1, %v9793_v16  ;;  %v7195_v41 = vmul.f32 1.442695, %v7111_v55  ;;  %v7199_v53 = vmul.f32 1.442695, %v7113_v52  ;;  %v7112_v58 = vadd.f32 %v7048_v34, %v13404_v59  ;;  %vm883_vm10 = vcmp.eq.s32.totalorder %v10113_v23, %v13420_v51 }
 0x21a   : > { %9197 = vmatpush1.msk.msra.mxu0 %vm1011_vm2, %v9793_v16  ;;  %9229 = vmatpush1.msk.msra.mxu1 %vm1013_vm3, %v9793_v16  ;;  %v7114_v60 = vadd.f32 %v7050_v12, %v13406_v13  ;;  %vm885_vm11 = vcmp.eq.s32.totalorder %v10113_v23, %v13424_v11  ;;  %vm820_vm12 = vcmp.eq.s32.totalorder %v10128_v24, %v13398_v61 }
 0x21b   : > { %9198 = vmatprep.subr.msk.mxu0 %vm948_vm4, %v9793_v16  ;;  %9230 = vmatprep.subr.msk.mxu1 %vm950_vm5, %v9793_v16  ;;  %9590 = vpow2.f32 %v7195_v41  ;;  %v7197_v59 = vmul.f32 1.442695, %v7112_v58  ;;  %vm822_vm13 = vcmp.eq.s32.totalorder %v10128_v24, %v13402_v38  ;;  %vm819_vm14 = vcmp.eq.s32.totalorder %v10128_v24, %v13420_v51 }
 0x21c   : > { %9199 = vmatpush1.msk.msra.mxu0 %vm947_vm6, %v9793_v16  ;;  %9231 = vmatpush1.msk.msra.mxu1 %vm949_vm7, %v9793_v16  ;;  %9592 = vpow2.f32 %v7199_v53  ;;  %v7201_v13 = vmul.f32 1.442695, %v7114_v60  ;;  %vm821_vm15 = vcmp.eq.s32.totalorder %v10128_v24, %v13424_v11  ;;  %vm756_vm0 = vcmp.eq.s32.totalorder %v10143_v25, %v13398_v61 }
 0x21d   : > { %9200 = vmatprep.subr.msk.mxu0 %vm884_vm8, %v9793_v16  ;;  %9232 = vmatprep.subr.msk.mxu1 %vm886_vm9, %v9793_v16  ;;  %9594 = vpow2.f32 %v7197_v59  ;;  %vm758_vm1 = vcmp.eq.s32.totalorder %v10143_v25, %v13402_v38  ;;  %vm755_vm2 = vcmp.eq.s32.totalorder %v10143_v25, %v13420_v51  ;;  %vm757_vm3 = vcmp.eq.s32.totalorder %v10143_v25, %v13424_v11 }
 0x21e   : > { %9201 = vmatpush1.msk.msra.mxu0 %vm883_vm10, %v9793_v16  ;;  %9233 = vmatpush1.msk.msra.mxu1 %vm885_vm11, %v9793_v16  ;;  %9596 = vpow2.f32 %v7201_v13  ;;  %vm692_vm4 = vcmp.eq.s32.totalorder %v10158_v26, %v13398_v61  ;;  %vm694_vm5 = vcmp.eq.s32.totalorder %v10158_v26, %v13402_v38  ;;  %vm691_vm6 = vcmp.eq.s32.totalorder %v10158_v26, %v13420_v51 }
 0x21f   : > { %9202 = vmatprep.subr.msk.mxu0 %vm820_vm12, %v9793_v16  ;;  %9234 = vmatprep.subr.msk.mxu1 %vm822_vm13, %v9793_v16  ;;  %vm693_vm7 = vcmp.eq.s32.totalorder %v10158_v26, %v13424_v11  ;;  %vm628_vm8 = vcmp.eq.s32.totalorder %v10167_v27, %v13398_v61  ;;  %vm630_vm9 = vcmp.eq.s32.totalorder %v10167_v27, %v13402_v38 }
 0x220   : > { %9203 = vmatpush1.msk.msra.mxu0 %vm819_vm14, %v9793_v16  ;;  %9235 = vmatpush1.msk.msra.mxu1 %vm821_vm15, %v9793_v16  ;;  %vm627_vm10 = vcmp.eq.s32.totalorder %v10167_v27, %v13420_v51  ;;  %vm629_vm11 = vcmp.eq.s32.totalorder %v10167_v27, %v13424_v11  ;;  %vm564_vm12 = vcmp.eq.s32.totalorder %v9953_v2, %v13398_v61 }
 0x221   : > { %9204 = vmatprep.subr.msk.mxu0 %vm756_vm0, %v9793_v16  ;;  %9236 = vmatprep.subr.msk.mxu1 %vm758_vm1, %v9793_v16  ;;  %vm566_vm13 = vcmp.eq.s32.totalorder %v9953_v2, %v13402_v38  ;;  %v13815_v8 = vrot.slane %v13789_v32, %v9956_v3  ;;  %v13819_v62 = vrot.slane %v13789_v32, %v9959_v4 }
 0x222   : > { %9205 = vmatpush1.msk.msra.mxu0 %vm755_vm2, %v9793_v16  ;;  %9237 = vmatpush1.msk.msra.mxu1 %vm757_vm3, %v9793_v16  ;;  %v13797_v63 = vpop.f32.mrf.mxu0  ;;  %v13799_v42 = vpop.f32.mrf.mxu1  ;;  %vm563_vm14 = vcmp.eq.s32.totalorder %v9953_v2, %v13420_v51  ;;  %v13837_v46 = vrot.slane %v13789_v32, %v9962_v5  ;;  %v13841_v49 = vrot.slane %v13789_v32, %v9965_v6 }
 0x223   : > { %9206 = vmatprep.subr.msk.mxu0 %vm692_vm4, %v9793_v16  ;;  %9238 = vmatprep.subr.msk.mxu1 %vm694_vm5, %v9793_v16  ;;  %vm565_vm15 = vcmp.eq.s32.totalorder %v9953_v2, %v13424_v11  ;;  %vm1528_vm0 = vcmp.eq.s32.totalorder %v9968_v7, %v13815_v8  ;;  %vm1530_vm1 = vcmp.eq.s32.totalorder %v9968_v7, %v13819_v62 }
 0x224   : > { %9207 = vmatpush1.msk.msra.mxu0 %vm691_vm6, %v9793_v16  ;;  %9239 = vmatpush1.msk.msra.mxu1 %vm693_vm7, %v9793_v16  ;;  %v13821_v44 = vpop.f32.mrf.mxu0  ;;  %v13823_v37 = vpop.f32.mrf.mxu1  ;;  %vm1527_vm2 = vcmp.eq.s32.totalorder %v9968_v7, %v13837_v46  ;;  %vm1529_vm3 = vcmp.eq.s32.totalorder %v9968_v7, %v13841_v49  ;;  %vm1464_vm4 = vcmp.eq.s32.totalorder %v9974_v9, %v13815_v8 }
 0x225   : > { %9208 = vmatprep.subr.msk.mxu0 %vm628_vm8, %v9793_v16  ;;  %9240 = vmatprep.subr.msk.mxu1 %vm630_vm9, %v9793_v16  ;;  %vm1466_vm5 = vcmp.eq.s32.totalorder %v9974_v9, %v13819_v62  ;;  %vm1463_vm6 = vcmp.eq.s32.totalorder %v9974_v9, %v13837_v46  ;;  %vm1465_vm7 = vcmp.eq.s32.totalorder %v9974_v9, %v13841_v49 }
 0x226   : > { %9209 = vmatpush1.msk.msra.mxu0 %vm627_vm10, %v9793_v16  ;;  %9241 = vmatpush1.msk.msra.mxu1 %vm629_vm11, %v9793_v16  ;;  %vm1400_vm8 = vcmp.eq.s32.totalorder %v9977_v10, %v13815_v8  ;;  %vm1402_vm9 = vcmp.eq.s32.totalorder %v9977_v10, %v13819_v62  ;;  %vm1399_vm10 = vcmp.eq.s32.totalorder %v9977_v10, %v13837_v46 }
 0x227   : > { %9210 = vmatprep.subr.msk.mxu0 %vm564_vm12, %v9793_v16  ;;  %9242 = vmatprep.subr.msk.mxu1 %vm566_vm13, %v9793_v16  ;;  %vm1401_vm11 = vcmp.eq.s32.totalorder %v9977_v10, %v13841_v49  ;;  %vm1336_vm12 = vcmp.eq.s32.totalorder %v9996_v15, %v13815_v8  ;;  %vm1338_vm13 = vcmp.eq.s32.totalorder %v9996_v15, %v13819_v62 }
 0x228   : > { %v9591_v38 = vpop.eup %9590  ;;  %9211 = vmatpush1.msk.msra.mxu0 %vm563_vm14, %v9793_v16  ;;  %5617 = vmatprep.mubr.f32.mxu0 %v9792_v1  ;;  %v13858_v51 = vpop.f32.mrf.mxu0  ;;  %vm1335_vm14 = vcmp.eq.s32.totalorder %v9996_v15, %v13837_v46  ;;  %v13937_v0 = vrot.slane %v13907_v48, %v9962_v5  ;;  %v13941_v57 = vrot.slane %v13907_v48, %v9965_v6 }
 0x229   : > { %v13860_v11 = vpop.f32.mrf.mxu1  ;;  %v9593_v61 = vpop.eup %9592  ;;  %9243 = vmatpush1.msk.msra.mxu1 %vm565_vm15, %v9793_v16  ;;  %5706 = vmatprep.mubr.f32.mxu1 %v9792_v1  ;;  %7303 = vst [vmem:[%s11853_s6 + $0xa0] sm:$0xff] %v9591_v38  ;;  %vm1337_vm15 = vcmp.eq.s32.totalorder %v9996_v15, %v13841_v49  ;;  %v13971_v55 = vrot.slane %v13907_v48, %v9956_v3 }
 0x22a   : > { %v9595_v14 = vpop.eup %9594  ;;  %5618 = vmatmul.mubr.f32.vlgmr.msra.gmra.mxu0 %v13455_v50  ;;  %5707 = vmatmul.mubr.f32.vlgmr.msra.gmra.mxu1 %v13455_v50  ;;  %7305 = vst [vmem:[%s11853_s6 + $0xb0] sm:$0xff] %v9593_v61  ;;  %v13876_v47 = vpop.f32.mrf.mxu0  ;;  %v6562_v12 = vrot.slane %v13907_v48, %v9959_v4 }
 0x22b   : > { %v13878_v43 = vpop.f32.mrf.mxu1  ;;  %v9597_v54 = vpop.eup %9596  ;;  %9244 = vmatprep.subr.msk.mxu0 %vm1528_vm0, %v9793_v16  ;;  %9276 = vmatprep.subr.msk.mxu1 %vm1530_vm1, %v9793_v16  ;;  %7304 = vst [vmem:[%s11853_s6 + $0xa8] sm:$0xff] %v9595_v14  ;;  %vm1272_vm0 = vcmp.eq.s32.totalorder %v10023_v17, %v13815_v8  ;;  %vm1274_vm1 = vcmp.eq.s32.totalorder %v10023_v17, %v13819_v62 }
 0x22c   : > { %9245 = vmatpush1.msk.msra.mxu0 %vm1527_vm2, %v9793_v16  ;;  %9277 = vmatpush1.msk.msra.mxu1 %vm1529_vm3, %v9793_v16  ;;  %7306 = vst [vmem:[%s11853_s6 + $0xb8] sm:$0xff] %v9597_v54  ;;  %vm1271_vm2 = vcmp.eq.s32.totalorder %v10023_v17, %v13837_v46  ;;  %vm1273_vm3 = vcmp.eq.s32.totalorder %v10023_v17, %v13841_v49 }
 0x22d   : > { %9246 = vmatprep.subr.msk.mxu0 %vm1464_vm4, %v9793_v16  ;;  %9278 = vmatprep.subr.msk.mxu1 %vm1466_vm5, %v9793_v16  ;;  %vm1208_vm4 = vcmp.eq.s32.totalorder %v10038_v18, %v13815_v8  ;;  %vm1210_vm5 = vcmp.eq.s32.totalorder %v10038_v18, %v13819_v62 }
 0x22e   : > { %5623 = vmatprep.mubr.f32.mxu0 %v9792_v1  ;;  %5712 = vmatprep.mubr.f32.mxu1 %v9792_v1  ;;  %v4741_v33 = vpop.f32.mrf.mxu0  ;;  %v4830_v35 = vpop.f32.mrf.mxu1 }
 0x22f   : > { %9247 = vmatpush1.msk.msra.mxu0 %vm1463_vm6, %v9793_v16  ;;  %9279 = vmatpush1.msk.msra.mxu1 %vm1465_vm7, %v9793_v16  ;;  %vm1207_vm6 = vcmp.eq.s32.totalorder %v10038_v18, %v13837_v46  ;;  %vm1209_vm7 = vcmp.eq.s32.totalorder %v10038_v18, %v13841_v49 }
 0x230   : > { %5624 = vmatmul.mubr.f32.gmra.mxu0 %v13511_v40  ;;  %5713 = vmatmul.mubr.f32.gmra.mxu1 %v13511_v40  ;;  %v4743_v39 = vpop.f32.mrf.mxu0  ;;  %v4832_v45 = vpop.f32.mrf.mxu1 }
 0x231   : > { %9248 = vmatprep.subr.msk.mxu0 %vm1400_vm8, %v9793_v16  ;;  %9280 = vmatprep.subr.msk.mxu1 %vm1402_vm9, %v9793_v16  ;;  %vm1144_vm8 = vcmp.eq.s32.totalorder %v10053_v19, %v13815_v8  ;;  %vm1146_vm9 = vcmp.eq.s32.totalorder %v10053_v19, %v13819_v62 }
 0x232   : > { %9249 = vmatpush1.msk.msra.mxu0 %vm1399_vm10, %v9793_v16  ;;  %9281 = vmatpush1.msk.msra.mxu1 %vm1401_vm11, %v9793_v16  ;;  %vm1143_vm10 = vcmp.eq.s32.totalorder %v10053_v19, %v13837_v46  ;;  %vm1145_vm11 = vcmp.eq.s32.totalorder %v10053_v19, %v13841_v49 }
 0x233   : > { %9250 = vmatprep.subr.msk.mxu0 %vm1336_vm12, %v9793_v16  ;;  %9282 = vmatprep.subr.msk.mxu1 %vm1338_vm13, %v9793_v16  ;;  %vm1080_vm12 = vcmp.eq.s32.totalorder %v10068_v20, %v13815_v8  ;;  %vm1082_vm13 = vcmp.eq.s32.totalorder %v10068_v20, %v13819_v62 }
 0x234   : > { %5629 = vmatprep.mubr.f32.mxu0 %v9792_v1  ;;  %5718 = vmatprep.mubr.f32.mxu1 %v9792_v1  ;;  %v4747_v52 = vpop.f32.mrf.mxu0  ;;  %v4836_v34 = vpop.f32.mrf.mxu1 }
 0x235   : > { %9251 = vmatpush1.msk.msra.mxu0 %vm1335_vm14, %v9793_v16  ;;  %9283 = vmatpush1.msk.msra.mxu1 %vm1337_vm15, %v9793_v16  ;;  %v6795_v41 = vmul.f32 %v13937_v0, %v4747_v52  ;;  %v6797_v53 = vmul.f32 %v13941_v57, %v4836_v34  ;;  %vm1079_vm14 = vcmp.eq.s32.totalorder %v10068_v20, %v13837_v46 }
 0x236   : > { %5630 = vmatmul.mubr.f32.gmra.mxu0 %v13594_v56  ;;  %5719 = vmatmul.mubr.f32.gmra.mxu1 %v13594_v56  ;;  %v4749_v58 = vpop.f32.mrf.mxu0  ;;  %v4838_v60 = vpop.f32.mrf.mxu1  ;;  %vm1081_vm15 = vcmp.eq.s32.totalorder %v10068_v20, %v13841_v49 }
 0x237   : > { %9252 = vmatprep.subr.msk.mxu0 %vm1272_vm0, %v9793_v16  ;;  %9284 = vmatprep.subr.msk.mxu1 %vm1274_vm1, %v9793_v16  ;;  %v6859_v59 = vadd.f32 %v6795_v41, %v4741_v33  ;;  %v6861_v13 = vadd.f32 %v6797_v53, %v4830_v35  ;;  %v6796_v38 = vmul.f32 %v13971_v55, %v4749_v58 }
 0x238   : > { %9253 = vmatpush1.msk.msra.mxu0 %vm1271_vm2, %v9793_v16  ;;  %9285 = vmatpush1.msk.msra.mxu1 %vm1273_vm3, %v9793_v16  ;;  %v6798_v61 = vmul.f32 %v6562_v12, %v4838_v60  ;;  %vm1016_vm0 = vcmp.eq.s32.totalorder %v10083_v21, %v13815_v8  ;;  %vm1018_vm1 = vcmp.eq.s32.totalorder %v10083_v21, %v13819_v62 }
 0x239   : > { %9254 = vmatprep.subr.msk.mxu0 %vm1208_vm4, %v9793_v16  ;;  %9286 = vmatprep.subr.msk.mxu1 %vm1210_vm5, %v9793_v16  ;;  %v6923_v14 = vmul.f32 %v6859_v59, %v13937_v0  ;;  %v6925_v54 = vmul.f32 %v6861_v13, %v13941_v57  ;;  %v6860_v33 = vadd.f32 %v6796_v38, %v4743_v39 }
 0x23a   : > { %5635 = vmatprep.mubr.f32.mxu0 %v9792_v1  ;;  %5724 = vmatprep.mubr.f32.mxu1 %v9792_v1  ;;  %v6862_v35 = vadd.f32 %v6798_v61, %v4832_v45  ;;  %vm1015_vm2 = vcmp.eq.s32.totalorder %v10083_v21, %v13837_v46  ;;  %vm1017_vm3 = vcmp.eq.s32.totalorder %v10083_v21, %v13841_v49 }
 0x23b   : > { %9255 = vmatpush1.msk.msra.mxu0 %vm1207_vm6, %v9793_v16  ;;  %9287 = vmatpush1.msk.msra.mxu1 %vm1209_vm7, %v9793_v16  ;;  %v6987_v39 = vadd.f32 %v6923_v14, %v13858_v51  ;;  %v6989_v52 = vadd.f32 %v6925_v54, %v13860_v11  ;;  %v6924_v34 = vmul.f32 %v6860_v33, %v13971_v55 }
 0x23c   : > { %5636 = vmatmul.mubr.f32.gmra.mxu0 %v13656_v36  ;;  %5725 = vmatmul.mubr.f32.gmra.mxu1 %v13656_v36  ;;  %v6926_v45 = vmul.f32 %v6862_v35, %v6562_v12  ;;  %vm952_vm4 = vcmp.eq.s32.totalorder %v10098_v22, %v13815_v8  ;;  %vm954_vm5 = vcmp.eq.s32.totalorder %v10098_v22, %v13819_v62 }
 0x23d   : > { %9256 = vmatprep.subr.msk.mxu0 %vm1144_vm8, %v9793_v16  ;;  %9288 = vmatprep.subr.msk.mxu1 %vm1146_vm9, %v9793_v16  ;;  %v7051_v51 = vmul.f32 %v6987_v39, %v13937_v0  ;;  %v7053_v11 = vmul.f32 %v6989_v52, %v13941_v57  ;;  %v6988_v41 = vadd.f32 %v6924_v34, %v13876_v47 }
 0x23e   : > { %9257 = vmatpush1.msk.msra.mxu0 %vm1143_vm10, %v9793_v16  ;;  %9289 = vmatpush1.msk.msra.mxu1 %vm1145_vm11, %v9793_v16  ;;  %v6990_v0 = vadd.f32 %v6926_v45, %v13878_v43  ;;  %vm951_vm6 = vcmp.eq.s32.totalorder %v10098_v22, %v13837_v46  ;;  %vm953_vm7 = vcmp.eq.s32.totalorder %v10098_v22, %v13841_v49 }
 0x23f   : > { %9258 = vmatprep.subr.msk.mxu0 %vm1080_vm12, %v9793_v16  ;;  %9290 = vmatprep.subr.msk.mxu1 %vm1082_vm13, %v9793_v16  ;;  %v7115_v47 = vadd.f32 %v7051_v51, %v13797_v63  ;;  %v7117_v57 = vadd.f32 %v7053_v11, %v13799_v42  ;;  %v7052_v53 = vmul.f32 %v6988_v41, %v13971_v55 }
 0x240   : > { %9259 = vmatpush1.msk.msra.mxu0 %vm1079_vm14, %v9793_v16  ;;  %9291 = vmatpush1.msk.msra.mxu1 %vm1081_vm15, %v9793_v16  ;;  %v7054_v63 = vmul.f32 %v6990_v0, %v6562_v12  ;;  %vm888_vm8 = vcmp.eq.s32.totalorder %v10113_v23, %v13815_v8  ;;  %vm890_vm9 = vcmp.eq.s32.totalorder %v10113_v23, %v13819_v62 }
 0x241   : > { %9260 = vmatprep.subr.msk.mxu0 %vm1016_vm0, %v9793_v16  ;;  %9292 = vmatprep.subr.msk.mxu1 %vm1018_vm1, %v9793_v16  ;;  %v7203_v42 = vmul.f32 1.442695, %v7115_v47  ;;  %v7207_v43 = vmul.f32 1.442695, %v7117_v57  ;;  %v7116_v55 = vadd.f32 %v7052_v53, %v13821_v44  ;;  %vm887_vm10 = vcmp.eq.s32.totalorder %v10113_v23, %v13837_v46 }
 0x242   : > { %9261 = vmatpush1.msk.msra.mxu0 %vm1015_vm2, %v9793_v16  ;;  %9293 = vmatpush1.msk.msra.mxu1 %vm1017_vm3, %v9793_v16  ;;  %v7118_v12 = vadd.f32 %v7054_v63, %v13823_v37  ;;  %vm889_vm11 = vcmp.eq.s32.totalorder %v10113_v23, %v13841_v49  ;;  %vm824_vm12 = vcmp.eq.s32.totalorder %v10128_v24, %v13815_v8 }
 0x243   : > { %9262 = vmatprep.subr.msk.mxu0 %vm952_vm4, %v9793_v16  ;;  %9294 = vmatprep.subr.msk.mxu1 %vm954_vm5, %v9793_v16  ;;  %9598 = vpow2.f32 %v7203_v42  ;;  %v7205_v44 = vmul.f32 1.442695, %v7116_v55  ;;  %vm826_vm13 = vcmp.eq.s32.totalorder %v10128_v24, %v13819_v62  ;;  %vm823_vm14 = vcmp.eq.s32.totalorder %v10128_v24, %v13837_v46 }
 0x244   : > { %9263 = vmatpush1.msk.msra.mxu0 %vm951_vm6, %v9793_v16  ;;  %9295 = vmatpush1.msk.msra.mxu1 %vm953_vm7, %v9793_v16  ;;  %9600 = vpow2.f32 %v7207_v43  ;;  %v7209_v37 = vmul.f32 1.442695, %v7118_v12  ;;  %vm825_vm15 = vcmp.eq.s32.totalorder %v10128_v24, %v13841_v49  ;;  %vm760_vm0 = vcmp.eq.s32.totalorder %v10143_v25, %v13815_v8 }
 0x245   : > { %9264 = vmatprep.subr.msk.mxu0 %vm888_vm8, %v9793_v16  ;;  %9296 = vmatprep.subr.msk.mxu1 %vm890_vm9, %v9793_v16  ;;  %9602 = vpow2.f32 %v7205_v44  ;;  %vm762_vm1 = vcmp.eq.s32.totalorder %v10143_v25, %v13819_v62  ;;  %vm759_vm2 = vcmp.eq.s32.totalorder %v10143_v25, %v13837_v46  ;;  %vm761_vm3 = vcmp.eq.s32.totalorder %v10143_v25, %v13841_v49 }
 0x246   : > { %9265 = vmatpush1.msk.msra.mxu0 %vm887_vm10, %v9793_v16  ;;  %9297 = vmatpush1.msk.msra.mxu1 %vm889_vm11, %v9793_v16  ;;  %9604 = vpow2.f32 %v7209_v37  ;;  %vm696_vm4 = vcmp.eq.s32.totalorder %v10158_v26, %v13815_v8  ;;  %vm698_vm5 = vcmp.eq.s32.totalorder %v10158_v26, %v13819_v62  ;;  %vm695_vm6 = vcmp.eq.s32.totalorder %v10158_v26, %v13837_v46 }
 0x247   : > { %9266 = vmatprep.subr.msk.mxu0 %vm824_vm12, %v9793_v16  ;;  %9298 = vmatprep.subr.msk.mxu1 %vm826_vm13, %v9793_v16  ;;  %vm697_vm7 = vcmp.eq.s32.totalorder %v10158_v26, %v13841_v49  ;;  %vm632_vm8 = vcmp.eq.s32.totalorder %v10167_v27, %v13815_v8  ;;  %vm634_vm9 = vcmp.eq.s32.totalorder %v10167_v27, %v13819_v62 }
 0x248   : > { %9267 = vmatpush1.msk.msra.mxu0 %vm823_vm14, %v9793_v16  ;;  %9299 = vmatpush1.msk.msra.mxu1 %vm825_vm15, %v9793_v16  ;;  %vm631_vm10 = vcmp.eq.s32.totalorder %v10167_v27, %v13837_v46  ;;  %vm633_vm11 = vcmp.eq.s32.totalorder %v10167_v27, %v13841_v49  ;;  %vm568_vm12 = vcmp.eq.s32.totalorder %v9953_v2, %v13815_v8 }
 0x249   : > { %9268 = vmatprep.subr.msk.mxu0 %vm760_vm0, %v9793_v16  ;;  %9300 = vmatprep.subr.msk.mxu1 %vm762_vm1, %v9793_v16  ;;  %vm570_vm13 = vcmp.eq.s32.totalorder %v9953_v2, %v13819_v62  ;;  %v14201_v59 = vrot.slane %v13789_v32, %v10182_v28  ;;  %v14205_v13 = vrot.slane %v13789_v32, %v10185_v29 }
 0x24a   : > { %9269 = vmatpush1.msk.msra.mxu0 %vm759_vm2, %v9793_v16  ;;  %9301 = vmatpush1.msk.msra.mxu1 %vm761_vm3, %v9793_v16  ;;  %v14183_v58 = vpop.f32.mrf.mxu0  ;;  %v14185_v60 = vpop.f32.mrf.mxu1  ;;  %vm567_vm14 = vcmp.eq.s32.totalorder %v9953_v2, %v13837_v46  ;;  %v14223_v14 = vrot.slane %v13789_v32, %v10194_v30  ;;  %v14227_v54 = vrot.slane %v13789_v32, %v10197_v31 }
 0x24b   : > { %9270 = vmatprep.subr.msk.mxu0 %vm696_vm4, %v9793_v16  ;;  %9302 = vmatprep.subr.msk.mxu1 %vm698_vm5, %v9793_v16  ;;  %vm569_vm15 = vcmp.eq.s32.totalorder %v9953_v2, %v13841_v49  ;;  %vm1532_vm0 = vcmp.eq.s32.totalorder %v9968_v7, %v14201_v59  ;;  %vm1534_vm1 = vcmp.eq.s32.totalorder %v9968_v7, %v14205_v13 }
 0x24c   : > { %9271 = vmatpush1.msk.msra.mxu0 %vm695_vm6, %v9793_v16  ;;  %9303 = vmatpush1.msk.msra.mxu1 %vm697_vm7, %v9793_v16  ;;  %v14207_v38 = vpop.f32.mrf.mxu0  ;;  %v14209_v61 = vpop.f32.mrf.mxu1  ;;  %vm1531_vm2 = vcmp.eq.s32.totalorder %v9968_v7, %v14223_v14  ;;  %vm1533_vm3 = vcmp.eq.s32.totalorder %v9968_v7, %v14227_v54  ;;  %vm1468_vm4 = vcmp.eq.s32.totalorder %v9974_v9, %v14201_v59 }
 0x24d   : > { %9272 = vmatprep.subr.msk.mxu0 %vm632_vm8, %v9793_v16  ;;  %9304 = vmatprep.subr.msk.mxu1 %vm634_vm9, %v9793_v16  ;;  %vm1470_vm5 = vcmp.eq.s32.totalorder %v9974_v9, %v14205_v13  ;;  %vm1467_vm6 = vcmp.eq.s32.totalorder %v9974_v9, %v14223_v14  ;;  %vm1469_vm7 = vcmp.eq.s32.totalorder %v9974_v9, %v14227_v54 }
 0x24e   : > { %9273 = vmatpush1.msk.msra.mxu0 %vm631_vm10, %v9793_v16  ;;  %9305 = vmatpush1.msk.msra.mxu1 %vm633_vm11, %v9793_v16  ;;  %vm1404_vm8 = vcmp.eq.s32.totalorder %v9977_v10, %v14201_v59  ;;  %vm1406_vm9 = vcmp.eq.s32.totalorder %v9977_v10, %v14205_v13  ;;  %vm1403_vm10 = vcmp.eq.s32.totalorder %v9977_v10, %v14223_v14 }
 0x24f   : > { %9274 = vmatprep.subr.msk.mxu0 %vm568_vm12, %v9793_v16  ;;  %9306 = vmatprep.subr.msk.mxu1 %vm570_vm13, %v9793_v16  ;;  %vm1405_vm11 = vcmp.eq.s32.totalorder %v9977_v10, %v14227_v54  ;;  %vm1340_vm12 = vcmp.eq.s32.totalorder %v9996_v15, %v14201_v59  ;;  %vm1342_vm13 = vcmp.eq.s32.totalorder %v9996_v15, %v14205_v13 }
 0x250   : > { %v9599_v62 = vpop.eup %9598  ;;  %9275 = vmatpush1.msk.msra.mxu0 %vm567_vm14, %v9793_v16  ;;  %5795 = vmatprep.mubr.f32.mxu0 %v9792_v1  ;;  %v14244_v32 = vpop.f32.mrf.mxu0  ;;  %vm1339_vm14 = vcmp.eq.s32.totalorder %v9996_v15, %v14223_v14  ;;  %v14324_v51 = vrot.slane %v13907_v48, %v10197_v31  ;;  %v14354_v11 = vrot.slane %v13907_v48, %v10182_v28 }
 0x251   : > { %v14246_v46 = vpop.f32.mrf.mxu1  ;;  %v9601_v8 = vpop.eup %9600  ;;  %9307 = vmatpush1.msk.msra.mxu1 %vm569_vm15, %v9793_v16  ;;  %5884 = vmatprep.mubr.f32.mxu1 %v9792_v1  ;;  %7307 = vst [vmem:[%s11853_s6 + $0xc0] sm:$0xff] %v9599_v62  ;;  %vm1341_vm15 = vcmp.eq.s32.totalorder %v9996_v15, %v14227_v54  ;;  %v6578_v47 = vrot.slane %v13907_v48, %v10185_v29 }
 0x252   : > { %v9603_v49 = vpop.eup %9602  ;;  %5796 = vmatmul.mubr.f32.vlgmr.msra.gmra.mxu0 %v13455_v50  ;;  %5885 = vmatmul.mubr.f32.vlgmr.msra.gmra.mxu1 %v13455_v50  ;;  %7309 = vst [vmem:[%s11853_s6 + $0xd0] sm:$0xff] %v9601_v8  ;;  %v14262_v33 = vpop.f32.mrf.mxu0 }
 0x253   : > { %v14264_v35 = vpop.f32.mrf.mxu1  ;;  %v9605_v39 = vpop.eup %9604  ;;  %9308 = vmatprep.subr.msk.mxu0 %vm1532_vm0, %v9793_v16  ;;  %9340 = vmatprep.subr.msk.mxu1 %vm1534_vm1, %v9793_v16  ;;  %7308 = vst [vmem:[%s11853_s6 + $0xc8] sm:$0xff] %v9603_v49  ;;  %vm1276_vm0 = vcmp.eq.s32.totalorder %v10023_v17, %v14201_v59  ;;  %vm1278_vm1 = vcmp.eq.s32.totalorder %v10023_v17, %v14205_v13 }
 0x254   : > { %9309 = vmatpush1.msk.msra.mxu0 %vm1531_vm2, %v9793_v16  ;;  %9341 = vmatpush1.msk.msra.mxu1 %vm1533_vm3, %v9793_v16  ;;  %7310 = vst [vmem:[%s11853_s6 + $0xd8] sm:$0xff] %v9605_v39  ;;  %vm1275_vm2 = vcmp.eq.s32.totalorder %v10023_v17, %v14223_v14  ;;  %vm1277_vm3 = vcmp.eq.s32.totalorder %v10023_v17, %v14227_v54 }
 0x255   : > { %9310 = vmatprep.subr.msk.mxu0 %vm1468_vm4, %v9793_v16  ;;  %9342 = vmatprep.subr.msk.mxu1 %vm1470_vm5, %v9793_v16  ;;  %vm1212_vm4 = vcmp.eq.s32.totalorder %v10038_v18, %v14201_v59  ;;  %vm1214_vm5 = vcmp.eq.s32.totalorder %v10038_v18, %v14205_v13 }
 0x256   : > { %5801 = vmatprep.mubr.f32.mxu0 %v9792_v1  ;;  %5890 = vmatprep.mubr.f32.mxu1 %v9792_v1  ;;  %v4919_v50 = vpop.f32.mrf.mxu0  ;;  %v5008_v52 = vpop.f32.mrf.mxu1 }
 0x257   : > { %9311 = vmatpush1.msk.msra.mxu0 %vm1467_vm6, %v9793_v16  ;;  %9343 = vmatpush1.msk.msra.mxu1 %vm1469_vm7, %v9793_v16  ;;  %vm1211_vm6 = vcmp.eq.s32.totalorder %v10038_v18, %v14223_v14  ;;  %vm1213_vm7 = vcmp.eq.s32.totalorder %v10038_v18, %v14227_v54 }
 0x258   : > { %5802 = vmatmul.mubr.f32.gmra.mxu0 %v13511_v40  ;;  %5891 = vmatmul.mubr.f32.gmra.mxu1 %v13511_v40  ;;  %v4921_v34 = vpop.f32.mrf.mxu0  ;;  %v5010_v45 = vpop.f32.mrf.mxu1  ;;  %v14320_v40 = vrot.slane %v13907_v48, %v10194_v30 }
 0x259   : > { %9312 = vmatprep.subr.msk.mxu0 %vm1404_vm8, %v9793_v16  ;;  %9344 = vmatprep.subr.msk.mxu1 %vm1406_vm9, %v9793_v16  ;;  %vm1148_vm8 = vcmp.eq.s32.totalorder %v10053_v19, %v14201_v59  ;;  %vm1150_vm9 = vcmp.eq.s32.totalorder %v10053_v19, %v14205_v13 }
 0x25a   : > { %9313 = vmatpush1.msk.msra.mxu0 %vm1403_vm10, %v9793_v16  ;;  %9345 = vmatpush1.msk.msra.mxu1 %vm1405_vm11, %v9793_v16  ;;  %vm1147_vm10 = vcmp.eq.s32.totalorder %v10053_v19, %v14223_v14  ;;  %vm1149_vm11 = vcmp.eq.s32.totalorder %v10053_v19, %v14227_v54 }
 0x25b   : > { %9314 = vmatprep.subr.msk.mxu0 %vm1340_vm12, %v9793_v16  ;;  %9346 = vmatprep.subr.msk.mxu1 %vm1342_vm13, %v9793_v16  ;;  %vm1084_vm12 = vcmp.eq.s32.totalorder %v10068_v20, %v14201_v59  ;;  %vm1086_vm13 = vcmp.eq.s32.totalorder %v10068_v20, %v14205_v13 }
 0x25c   : > { %5807 = vmatprep.mubr.f32.mxu0 %v9792_v1  ;;  %5896 = vmatprep.mubr.f32.mxu1 %v9792_v1  ;;  %v4925_v41 = vpop.f32.mrf.mxu0  ;;  %v5014_v0 = vpop.f32.mrf.mxu1 }
 0x25d   : > { %9315 = vmatpush1.msk.msra.mxu0 %vm1339_vm14, %v9793_v16  ;;  %9347 = vmatpush1.msk.msra.mxu1 %vm1341_vm15, %v9793_v16  ;;  %v6799_v57 = vmul.f32 %v14320_v40, %v4925_v41  ;;  %v6801_v53 = vmul.f32 %v14324_v51, %v5014_v0  ;;  %vm1083_vm14 = vcmp.eq.s32.totalorder %v10068_v20, %v14223_v14 }
 0x25e   : > { %5808 = vmatmul.mubr.f32.gmra.mxu0 %v13594_v56  ;;  %5897 = vmatmul.mubr.f32.gmra.mxu1 %v13594_v56  ;;  %v4927_v48 = vpop.f32.mrf.mxu0  ;;  %v5016_v63 = vpop.f32.mrf.mxu1  ;;  %vm1085_vm15 = vcmp.eq.s32.totalorder %v10068_v20, %v14227_v54 }
 0x25f   : > { %9316 = vmatprep.subr.msk.mxu0 %vm1276_vm0, %v9793_v16  ;;  %9348 = vmatprep.subr.msk.mxu1 %vm1278_vm1, %v9793_v16  ;;  %v6863_v56 = vadd.f32 %v6799_v57, %v4919_v50  ;;  %v6865_v42 = vadd.f32 %v6801_v53, %v5008_v52  ;;  %v6800_v43 = vmul.f32 %v14354_v11, %v4927_v48 }
 0x260   : > { %9317 = vmatpush1.msk.msra.mxu0 %vm1275_vm2, %v9793_v16  ;;  %9349 = vmatpush1.msk.msra.mxu1 %vm1277_vm3, %v9793_v16  ;;  %v6802_v55 = vmul.f32 %v6578_v47, %v5016_v63  ;;  %vm1020_vm0 = vcmp.eq.s32.totalorder %v10083_v21, %v14201_v59  ;;  %vm1022_vm1 = vcmp.eq.s32.totalorder %v10083_v21, %v14205_v13 }
 0x261   : > { %9318 = vmatprep.subr.msk.mxu0 %vm1212_vm4, %v9793_v16  ;;  %9350 = vmatprep.subr.msk.mxu1 %vm1214_vm5, %v9793_v16  ;;  %v6927_v12 = vmul.f32 %v6863_v56, %v14320_v40  ;;  %v6929_v44 = vmul.f32 %v6865_v42, %v14324_v51  ;;  %v6864_v37 = vadd.f32 %v6800_v43, %v4921_v34  ;;  %v14644_v43 = vld [vmem:[%s15521_s2] sm:$0xff] }
 0x262   : > { %5813 = vmatprep.mubr.f32.mxu0 %v9792_v1  ;;  %5902 = vmatprep.mubr.f32.mxu1 %v9792_v1  ;;  %v6866_v62 = vadd.f32 %v6802_v55, %v5010_v45  ;;  %vm1019_vm2 = vcmp.eq.s32.totalorder %v10083_v21, %v14223_v14  ;;  %vm1021_vm3 = vcmp.eq.s32.totalorder %v10083_v21, %v14227_v54 }
 0x263   : > { %9319 = vmatpush1.msk.msra.mxu0 %vm1211_vm6, %v9793_v16  ;;  %9351 = vmatpush1.msk.msra.mxu1 %vm1213_vm7, %v9793_v16  ;;  %v6991_v8 = vadd.f32 %v6927_v12, %v14244_v32  ;;  %v6993_v49 = vadd.f32 %v6929_v44, %v14246_v46  ;;  %v6928_v39 = vmul.f32 %v6864_v37, %v14354_v11 }
 0x264   : > { %5814 = vmatmul.mubr.f32.gmra.mxu0 %v13656_v36  ;;  %5903 = vmatmul.mubr.f32.gmra.mxu1 %v13656_v36  ;;  %v6930_v50 = vmul.f32 %v6866_v62, %v6578_v47  ;;  %vm956_vm4 = vcmp.eq.s32.totalorder %v10098_v22, %v14201_v59  ;;  %vm958_vm5 = vcmp.eq.s32.totalorder %v10098_v22, %v14205_v13 }
 0x265   : > { %9320 = vmatprep.subr.msk.mxu0 %vm1148_vm8, %v9793_v16  ;;  %9352 = vmatprep.subr.msk.mxu1 %vm1150_vm9, %v9793_v16  ;;  %v7055_v32 = vmul.f32 %v6991_v8, %v14320_v40  ;;  %v7057_v36 = vmul.f32 %v6993_v49, %v14324_v51  ;;  %v6992_v46 = vadd.f32 %v6928_v39, %v14262_v33  ;;  %v14690_v8 = vld [vmem:[%s9945_s30 + $0x20] sm:$0xff]  ;;  %v14703_v49 = vld [vmem:[%s15521_s2 + $0x8] sm:$0xff] }
 0x266   : > { %9321 = vmatpush1.msk.msra.mxu0 %vm1147_vm10, %v9793_v16  ;;  %9353 = vmatpush1.msk.msra.mxu1 %vm1149_vm11, %v9793_v16  ;;  %v6994_v52 = vadd.f32 %v6930_v50, %v14264_v35  ;;  %vm955_vm6 = vcmp.eq.s32.totalorder %v10098_v22, %v14223_v14  ;;  %vm957_vm7 = vcmp.eq.s32.totalorder %v10098_v22, %v14227_v54 }
 0x267   : > { %9322 = vmatprep.subr.msk.mxu0 %vm1084_vm12, %v9793_v16  ;;  %9354 = vmatprep.subr.msk.mxu1 %vm1086_vm13, %v9793_v16  ;;  %v7119_v33 = vadd.f32 %v7055_v32, %v14183_v58  ;;  %v7121_v34 = vadd.f32 %v7057_v36, %v14185_v60  ;;  %v7056_v45 = vmul.f32 %v6992_v46, %v14354_v11  ;;  %v14561_v11 = vld [vmem:[%s9939_s28 + $0x38] sm:$0xff] }
 0x268   : > { %9323 = vmatpush1.msk.msra.mxu0 %vm1083_vm14, %v9793_v16  ;;  %9355 = vmatpush1.msk.msra.mxu1 %vm1085_vm15, %v9793_v16  ;;  %v7058_v58 = vmul.f32 %v6994_v52, %v6578_v47  ;;  %vm892_vm8 = vcmp.eq.s32.totalorder %v10113_v23, %v14201_v59  ;;  %vm894_vm9 = vcmp.eq.s32.totalorder %v10113_v23, %v14205_v13 }
 0x269   : > { %9324 = vmatprep.subr.msk.mxu0 %vm1020_vm0, %v9793_v16  ;;  %9356 = vmatprep.subr.msk.mxu1 %vm1022_vm1, %v9793_v16  ;;  %v7211_v60 = vmul.f32 1.442695, %v7119_v33  ;;  %v7215_v35 = vmul.f32 1.442695, %v7121_v34  ;;  %v7120_v40 = vadd.f32 %v7056_v45, %v14207_v38  ;;  %vm891_vm10 = vcmp.eq.s32.totalorder %v10113_v23, %v14223_v14 }
 0x26a   : > { %9325 = vmatpush1.msk.msra.mxu0 %vm1019_vm2, %v9793_v16  ;;  %9357 = vmatpush1.msk.msra.mxu1 %vm1021_vm3, %v9793_v16  ;;  %v7122_v51 = vadd.f32 %v7058_v58, %v14209_v61  ;;  %vm893_vm11 = vcmp.eq.s32.totalorder %v10113_v23, %v14227_v54  ;;  %vm828_vm12 = vcmp.eq.s32.totalorder %v10128_v24, %v14201_v59 }
 0x26b   : > { %9326 = vmatprep.subr.msk.mxu0 %vm956_vm4, %v9793_v16  ;;  %9358 = vmatprep.subr.msk.mxu1 %vm958_vm5, %v9793_v16  ;;  %9606 = vpow2.f32 %v7211_v60  ;;  %v7213_v38 = vmul.f32 1.442695, %v7120_v40  ;;  %vm830_vm13 = vcmp.eq.s32.totalorder %v10128_v24, %v14205_v13  ;;  %vm827_vm14 = vcmp.eq.s32.totalorder %v10128_v24, %v14223_v14  ;;  %v14786_v60 = vld [vmem:[%s15521_s2 + $0x10] sm:$0xff] }
 0x26c   : > { %9327 = vmatpush1.msk.msra.mxu0 %vm955_vm6, %v9793_v16  ;;  %9359 = vmatpush1.msk.msra.mxu1 %vm957_vm7, %v9793_v16  ;;  %9608 = vpow2.f32 %v7215_v35  ;;  %v7217_v61 = vmul.f32 1.442695, %v7122_v51  ;;  %vm829_vm15 = vcmp.eq.s32.totalorder %v10128_v24, %v14227_v54  ;;  %vm764_vm0 = vcmp.eq.s32.totalorder %v10143_v25, %v14201_v59 }
 0x26d   : > { %9328 = vmatprep.subr.msk.mxu0 %vm892_vm8, %v9793_v16  ;;  %9360 = vmatprep.subr.msk.mxu1 %vm894_vm9, %v9793_v16  ;;  %9610 = vpow2.f32 %v7213_v38  ;;  %vm766_vm1 = vcmp.eq.s32.totalorder %v10143_v25, %v14205_v13  ;;  %vm763_vm2 = vcmp.eq.s32.totalorder %v10143_v25, %v14223_v14  ;;  %vm765_vm3 = vcmp.eq.s32.totalorder %v10143_v25, %v14227_v54 }
 0x26e   : > { %9329 = vmatpush1.msk.msra.mxu0 %vm891_vm10, %v9793_v16  ;;  %9361 = vmatpush1.msk.msra.mxu1 %vm893_vm11, %v9793_v16  ;;  %9612 = vpow2.f32 %v7217_v61  ;;  %vm700_vm4 = vcmp.eq.s32.totalorder %v10158_v26, %v14201_v59  ;;  %vm702_vm5 = vcmp.eq.s32.totalorder %v10158_v26, %v14205_v13  ;;  %vm699_vm6 = vcmp.eq.s32.totalorder %v10158_v26, %v14223_v14 }
 0x26f   : > { %9330 = vmatprep.subr.msk.mxu0 %vm828_vm12, %v9793_v16  ;;  %9362 = vmatprep.subr.msk.mxu1 %vm830_vm13, %v9793_v16  ;;  %vm701_vm7 = vcmp.eq.s32.totalorder %v10158_v26, %v14227_v54  ;;  %vm636_vm8 = vcmp.eq.s32.totalorder %v10167_v27, %v14201_v59  ;;  %vm638_vm9 = vcmp.eq.s32.totalorder %v10167_v27, %v14205_v13 }
 0x270   : > { %9331 = vmatpush1.msk.msra.mxu0 %vm827_vm14, %v9793_v16  ;;  %9363 = vmatpush1.msk.msra.mxu1 %vm829_vm15, %v9793_v16  ;;  %vm635_vm10 = vcmp.eq.s32.totalorder %v10167_v27, %v14223_v14  ;;  %vm637_vm11 = vcmp.eq.s32.totalorder %v10167_v27, %v14227_v54  ;;  %vm572_vm12 = vcmp.eq.s32.totalorder %v9953_v2, %v14201_v59 }
 0x271   : > { %9332 = vmatprep.subr.msk.mxu0 %vm764_vm0, %v9793_v16  ;;  %9364 = vmatprep.subr.msk.mxu1 %vm766_vm1, %v9793_v16  ;;  %vm574_vm13 = vcmp.eq.s32.totalorder %v9953_v2, %v14205_v13  ;;  %v14587_v47 = vrot.slane %v14561_v11, %v9956_v3  ;;  %v14591_v57 = vrot.slane %v14561_v11, %v9959_v4 }
 0x272   : > { %9333 = vmatpush1.msk.msra.mxu0 %vm763_vm2, %v9793_v16  ;;  %9365 = vmatpush1.msk.msra.mxu1 %vm765_vm3, %v9793_v16  ;;  %v14569_v41 = vpop.f32.mrf.mxu0  ;;  %v14571_v0 = vpop.f32.mrf.mxu1  ;;  %vm571_vm14 = vcmp.eq.s32.totalorder %v9953_v2, %v14223_v14  ;;  %v14609_v63 = vrot.slane %v14561_v11, %v9962_v5  ;;  %v14613_v56 = vrot.slane %v14561_v11, %v9965_v6 }
 0x273   : > { %9334 = vmatprep.subr.msk.mxu0 %vm700_vm4, %v9793_v16  ;;  %9366 = vmatprep.subr.msk.mxu1 %vm702_vm5, %v9793_v16  ;;  %vm573_vm15 = vcmp.eq.s32.totalorder %v9953_v2, %v14227_v54  ;;  %vm1536_vm0 = vcmp.eq.s32.totalorder %v9968_v7, %v14587_v47  ;;  %vm1538_vm1 = vcmp.eq.s32.totalorder %v9968_v7, %v14591_v57 }
 0x274   : > { %9335 = vmatpush1.msk.msra.mxu0 %vm699_vm6, %v9793_v16  ;;  %9367 = vmatpush1.msk.msra.mxu1 %vm701_vm7, %v9793_v16  ;;  %v14593_v53 = vpop.f32.mrf.mxu0  ;;  %v14595_v48 = vpop.f32.mrf.mxu1  ;;  %vm1535_vm2 = vcmp.eq.s32.totalorder %v9968_v7, %v14609_v63  ;;  %vm1537_vm3 = vcmp.eq.s32.totalorder %v9968_v7, %v14613_v56  ;;  %vm1472_vm4 = vcmp.eq.s32.totalorder %v9974_v9, %v14587_v47 }
 0x275   : > { %9336 = vmatprep.subr.msk.mxu0 %vm636_vm8, %v9793_v16  ;;  %9368 = vmatprep.subr.msk.mxu1 %vm638_vm9, %v9793_v16  ;;  %vm1474_vm5 = vcmp.eq.s32.totalorder %v9974_v9, %v14591_v57  ;;  %vm1471_vm6 = vcmp.eq.s32.totalorder %v9974_v9, %v14609_v63  ;;  %vm1473_vm7 = vcmp.eq.s32.totalorder %v9974_v9, %v14613_v56 }
 0x276   : > { %9337 = vmatpush1.msk.msra.mxu0 %vm635_vm10, %v9793_v16  ;;  %9369 = vmatpush1.msk.msra.mxu1 %vm637_vm11, %v9793_v16  ;;  %vm1408_vm8 = vcmp.eq.s32.totalorder %v9977_v10, %v14587_v47  ;;  %vm1410_vm9 = vcmp.eq.s32.totalorder %v9977_v10, %v14591_v57  ;;  %vm1407_vm10 = vcmp.eq.s32.totalorder %v9977_v10, %v14609_v63 }
 0x277   : > { %9338 = vmatprep.subr.msk.mxu0 %vm572_vm12, %v9793_v16  ;;  %9370 = vmatprep.subr.msk.mxu1 %vm574_vm13, %v9793_v16  ;;  %vm1409_vm11 = vcmp.eq.s32.totalorder %v9977_v10, %v14613_v56  ;;  %vm1344_vm12 = vcmp.eq.s32.totalorder %v9996_v15, %v14587_v47  ;;  %vm1346_vm13 = vcmp.eq.s32.totalorder %v9996_v15, %v14591_v57 }
 0x278   : > { %v9607_v13 = vpop.eup %9606  ;;  %9339 = vmatpush1.msk.msra.mxu0 %vm571_vm14, %v9793_v16  ;;  %5973 = vmatprep.mubr.f32.mxu0 %v9792_v1  ;;  %v14630_v14 = vpop.f32.mrf.mxu0  ;;  %vm1343_vm14 = vcmp.eq.s32.totalorder %v9996_v15, %v14609_v63  ;;  %v14725_v32 = vrot.slane %v14690_v8, %v9962_v5  ;;  %v14729_v36 = vrot.slane %v14690_v8, %v9965_v6 }
 0x279   : > { %v14632_v54 = vpop.f32.mrf.mxu1  ;;  %v9609_v59 = vpop.eup %9608  ;;  %9371 = vmatpush1.msk.msra.mxu1 %vm573_vm15, %v9793_v16  ;;  %6062 = vmatprep.mubr.f32.mxu1 %v9792_v1  ;;  %7311 = vst [vmem:[%s11853_s6 + $0xe0] sm:$0xff] %v9607_v13  ;;  %vm1345_vm15 = vcmp.eq.s32.totalorder %v9996_v15, %v14613_v56  ;;  %v14759_v46 = vrot.slane %v14690_v8, %v9956_v3 }
 0x27a   : > { %v9611_v42 = vpop.eup %9610  ;;  %5974 = vmatmul.mubr.f32.vlgmr.msra.gmra.mxu0 %v14644_v43  ;;  %6063 = vmatmul.mubr.f32.vlgmr.msra.gmra.mxu1 %v14644_v43  ;;  %7313 = vst [vmem:[%s11853_s6 + $0xf0] sm:$0xff] %v9609_v59  ;;  %v14653_v55 = vpop.f32.mrf.mxu0  ;;  %v14769_v34 = vrot.slane %v14690_v8, %v9959_v4 }
 0x27b   : > { %v14655_v12 = vpop.f32.mrf.mxu1  ;;  %v9613_v44 = vpop.eup %9612  ;;  %9372 = vmatprep.subr.msk.mxu0 %vm1536_vm0, %v9793_v16  ;;  %9404 = vmatprep.subr.msk.mxu1 %vm1538_vm1, %v9793_v16  ;;  %7312 = vst [vmem:[%s11853_s6 + $0xe8] sm:$0xff] %v9611_v42  ;;  %vm1280_vm0 = vcmp.eq.s32.totalorder %v10023_v17, %v14587_v47  ;;  %vm1282_vm1 = vcmp.eq.s32.totalorder %v10023_v17, %v14591_v57 }
 0x27c   : > { %9373 = vmatpush1.msk.msra.mxu0 %vm1535_vm2, %v9793_v16  ;;  %9405 = vmatpush1.msk.msra.mxu1 %vm1537_vm3, %v9793_v16  ;;  %7314 = vst [vmem:[%s11853_s6 + $0xf8] sm:$0xff] %v9613_v44  ;;  %vm1279_vm2 = vcmp.eq.s32.totalorder %v10023_v17, %v14609_v63  ;;  %vm1281_vm3 = vcmp.eq.s32.totalorder %v10023_v17, %v14613_v56 }
 0x27d   : > { %9374 = vmatprep.subr.msk.mxu0 %vm1472_vm4, %v9793_v16  ;;  %9406 = vmatprep.subr.msk.mxu1 %vm1474_vm5, %v9793_v16  ;;  %vm1216_vm4 = vcmp.eq.s32.totalorder %v10038_v18, %v14587_v47  ;;  %vm1218_vm5 = vcmp.eq.s32.totalorder %v10038_v18, %v14591_v57 }
 0x27e   : > { %5979 = vmatprep.mubr.f32.mxu0 %v9792_v1  ;;  %6068 = vmatprep.mubr.f32.mxu1 %v9792_v1  ;;  %v5097_v37 = vpop.f32.mrf.mxu0  ;;  %v5186_v62 = vpop.f32.mrf.mxu1 }
 0x27f   : > { %9375 = vmatpush1.msk.msra.mxu0 %vm1471_vm6, %v9793_v16  ;;  %9407 = vmatpush1.msk.msra.mxu1 %vm1473_vm7, %v9793_v16  ;;  %vm1215_vm6 = vcmp.eq.s32.totalorder %v10038_v18, %v14609_v63  ;;  %vm1217_vm7 = vcmp.eq.s32.totalorder %v10038_v18, %v14613_v56 }
 0x280   : > { %5980 = vmatmul.mubr.f32.gmra.mxu0 %v14703_v49  ;;  %6069 = vmatmul.mubr.f32.gmra.mxu1 %v14703_v49  ;;  %v5099_v39 = vpop.f32.mrf.mxu0  ;;  %v5188_v50 = vpop.f32.mrf.mxu1 }
 0x281   : > { %9376 = vmatprep.subr.msk.mxu0 %vm1408_vm8, %v9793_v16  ;;  %9408 = vmatprep.subr.msk.mxu1 %vm1410_vm9, %v9793_v16  ;;  %vm1152_vm8 = vcmp.eq.s32.totalorder %v10053_v19, %v14587_v47  ;;  %vm1154_vm9 = vcmp.eq.s32.totalorder %v10053_v19, %v14591_v57 }
 0x282   : > { %9377 = vmatpush1.msk.msra.mxu0 %vm1407_vm10, %v9793_v16  ;;  %9409 = vmatpush1.msk.msra.mxu1 %vm1409_vm11, %v9793_v16  ;;  %vm1151_vm10 = vcmp.eq.s32.totalorder %v10053_v19, %v14609_v63  ;;  %vm1153_vm11 = vcmp.eq.s32.totalorder %v10053_v19, %v14613_v56 }
 0x283   : > { %9378 = vmatprep.subr.msk.mxu0 %vm1344_vm12, %v9793_v16  ;;  %9410 = vmatprep.subr.msk.mxu1 %vm1346_vm13, %v9793_v16  ;;  %vm1088_vm12 = vcmp.eq.s32.totalorder %v10068_v20, %v14587_v47  ;;  %vm1090_vm13 = vcmp.eq.s32.totalorder %v10068_v20, %v14591_v57 }
 0x284   : > { %5985 = vmatprep.mubr.f32.mxu0 %v9792_v1  ;;  %6074 = vmatprep.mubr.f32.mxu1 %v9792_v1  ;;  %v5103_v52 = vpop.f32.mrf.mxu0  ;;  %v5192_v33 = vpop.f32.mrf.mxu1 }
 0x285   : > { %9379 = vmatpush1.msk.msra.mxu0 %vm1343_vm14, %v9793_v16  ;;  %9411 = vmatpush1.msk.msra.mxu1 %vm1345_vm15, %v9793_v16  ;;  %v6803_v45 = vmul.f32 %v14725_v32, %v5103_v52  ;;  %v6805_v58 = vmul.f32 %v14729_v36, %v5192_v33  ;;  %vm1087_vm14 = vcmp.eq.s32.totalorder %v10068_v20, %v14609_v63 }
 0x286   : > { %5986 = vmatmul.mubr.f32.gmra.mxu0 %v14786_v60  ;;  %6075 = vmatmul.mubr.f32.gmra.mxu1 %v14786_v60  ;;  %v5105_v35 = vpop.f32.mrf.mxu0  ;;  %v5194_v40 = vpop.f32.mrf.mxu1  ;;  %vm1089_vm15 = vcmp.eq.s32.totalorder %v10068_v20, %v14613_v56 }
 0x287   : > { %9380 = vmatprep.subr.msk.mxu0 %vm1280_vm0, %v9793_v16  ;;  %9412 = vmatprep.subr.msk.mxu1 %vm1282_vm1, %v9793_v16  ;;  %v6867_v51 = vadd.f32 %v6803_v45, %v5097_v37  ;;  %v6869_v38 = vadd.f32 %v6805_v58, %v5186_v62  ;;  %v6804_v61 = vmul.f32 %v14759_v46, %v5105_v35 }
 0x288   : > { %9381 = vmatpush1.msk.msra.mxu0 %vm1279_vm2, %v9793_v16  ;;  %9413 = vmatpush1.msk.msra.mxu1 %vm1281_vm3, %v9793_v16  ;;  %v6806_v13 = vmul.f32 %v14769_v34, %v5194_v40  ;;  %vm1024_vm0 = vcmp.eq.s32.totalorder %v10083_v21, %v14587_v47  ;;  %vm1026_vm1 = vcmp.eq.s32.totalorder %v10083_v21, %v14591_v57 }
 0x289   : > { %9382 = vmatprep.subr.msk.mxu0 %vm1216_vm4, %v9793_v16  ;;  %9414 = vmatprep.subr.msk.mxu1 %vm1218_vm5, %v9793_v16  ;;  %v6931_v59 = vmul.f32 %v6867_v51, %v14725_v32  ;;  %v6933_v42 = vmul.f32 %v6869_v38, %v14729_v36  ;;  %v6868_v44 = vadd.f32 %v6804_v61, %v5099_v39 }
 0x28a   : > { %5991 = vmatprep.mubr.f32.mxu0 %v9792_v1  ;;  %6080 = vmatprep.mubr.f32.mxu1 %v9792_v1  ;;  %v6870_v37 = vadd.f32 %v6806_v13, %v5188_v50  ;;  %v14848_v50 = vld [vmem:[%s15521_s2 + $0x18] sm:$0xff]  ;;  %vm1023_vm2 = vcmp.eq.s32.totalorder %v10083_v21, %v14609_v63  ;;  %vm1025_vm3 = vcmp.eq.s32.totalorder %v10083_v21, %v14613_v56 }
 0x28b   : > { %9383 = vmatpush1.msk.msra.mxu0 %vm1215_vm6, %v9793_v16  ;;  %9415 = vmatpush1.msk.msra.mxu1 %vm1217_vm7, %v9793_v16  ;;  %v6995_v62 = vadd.f32 %v6931_v59, %v14630_v14  ;;  %v6997_v39 = vadd.f32 %v6933_v42, %v14632_v54  ;;  %v6932_v52 = vmul.f32 %v6868_v44, %v14759_v46 }
 0x28c   : > { %5992 = vmatmul.mubr.f32.gmra.mxu0 %v14848_v50  ;;  %6081 = vmatmul.mubr.f32.gmra.mxu1 %v14848_v50  ;;  %v6934_v14 = vmul.f32 %v6870_v37, %v14769_v34  ;;  %vm960_vm4 = vcmp.eq.s32.totalorder %v10098_v22, %v14587_v47  ;;  %vm962_vm5 = vcmp.eq.s32.totalorder %v10098_v22, %v14591_v57 }
 0x28d   : > { %9384 = vmatprep.subr.msk.mxu0 %vm1152_vm8, %v9793_v16  ;;  %9416 = vmatprep.subr.msk.mxu1 %vm1154_vm9, %v9793_v16  ;;  %v7059_v54 = vmul.f32 %v6995_v62, %v14725_v32  ;;  %v7061_v33 = vmul.f32 %v6997_v39, %v14729_v36  ;;  %v6996_v45 = vadd.f32 %v6932_v52, %v14653_v55 }
 0x28e   : > { %9385 = vmatpush1.msk.msra.mxu0 %vm1151_vm10, %v9793_v16  ;;  %9417 = vmatpush1.msk.msra.mxu1 %vm1153_vm11, %v9793_v16  ;;  %v6998_v32 = vadd.f32 %v6934_v14, %v14655_v12  ;;  %vm959_vm6 = vcmp.eq.s32.totalorder %v10098_v22, %v14609_v63  ;;  %vm961_vm7 = vcmp.eq.s32.totalorder %v10098_v22, %v14613_v56 }
 0x28f   : > { %9386 = vmatprep.subr.msk.mxu0 %vm1088_vm12, %v9793_v16  ;;  %9418 = vmatprep.subr.msk.mxu1 %vm1090_vm13, %v9793_v16  ;;  %v7123_v55 = vadd.f32 %v7059_v54, %v14569_v41  ;;  %v7125_v36 = vadd.f32 %v7061_v33, %v14571_v0  ;;  %v7060_v58 = vmul.f32 %v6996_v45, %v14759_v46 }
 0x290   : > { %9387 = vmatpush1.msk.msra.mxu0 %vm1087_vm14, %v9793_v16  ;;  %9419 = vmatpush1.msk.msra.mxu1 %vm1089_vm15, %v9793_v16  ;;  %v7062_v41 = vmul.f32 %v6998_v32, %v14769_v34  ;;  %vm896_vm8 = vcmp.eq.s32.totalorder %v10113_v23, %v14587_v47  ;;  %vm898_vm9 = vcmp.eq.s32.totalorder %v10113_v23, %v14591_v57 }
 0x291   : > { %9388 = vmatprep.subr.msk.mxu0 %vm1024_vm0, %v9793_v16  ;;  %9420 = vmatprep.subr.msk.mxu1 %vm1026_vm1, %v9793_v16  ;;  %v7219_v0 = vmul.f32 1.442695, %v7123_v55  ;;  %v7223_v12 = vmul.f32 1.442695, %v7125_v36  ;;  %v7124_v46 = vadd.f32 %v7060_v58, %v14593_v53  ;;  %vm895_vm10 = vcmp.eq.s32.totalorder %v10113_v23, %v14609_v63 }
 0x292   : > { %9389 = vmatpush1.msk.msra.mxu0 %vm1023_vm2, %v9793_v16  ;;  %9421 = vmatpush1.msk.msra.mxu1 %vm1025_vm3, %v9793_v16  ;;  %v7126_v34 = vadd.f32 %v7062_v41, %v14595_v48  ;;  %vm897_vm11 = vcmp.eq.s32.totalorder %v10113_v23, %v14613_v56  ;;  %vm832_vm12 = vcmp.eq.s32.totalorder %v10128_v24, %v14587_v47 }
 0x293   : > { %9390 = vmatprep.subr.msk.mxu0 %vm960_vm4, %v9793_v16  ;;  %9422 = vmatprep.subr.msk.mxu1 %vm962_vm5, %v9793_v16  ;;  %9614 = vpow2.f32 %v7219_v0  ;;  %v7221_v53 = vmul.f32 1.442695, %v7124_v46  ;;  %vm834_vm13 = vcmp.eq.s32.totalorder %v10128_v24, %v14591_v57  ;;  %vm831_vm14 = vcmp.eq.s32.totalorder %v10128_v24, %v14609_v63 }
 0x294   : > { %9391 = vmatpush1.msk.msra.mxu0 %vm959_vm6, %v9793_v16  ;;  %9423 = vmatpush1.msk.msra.mxu1 %vm961_vm7, %v9793_v16  ;;  %9616 = vpow2.f32 %v7223_v12  ;;  %v7225_v48 = vmul.f32 1.442695, %v7126_v34  ;;  %vm833_vm15 = vcmp.eq.s32.totalorder %v10128_v24, %v14613_v56  ;;  %vm768_vm0 = vcmp.eq.s32.totalorder %v10143_v25, %v14587_v47 }
 0x295   : > { %9392 = vmatprep.subr.msk.mxu0 %vm896_vm8, %v9793_v16  ;;  %9424 = vmatprep.subr.msk.mxu1 %vm898_vm9, %v9793_v16  ;;  %9618 = vpow2.f32 %v7221_v53  ;;  %vm770_vm1 = vcmp.eq.s32.totalorder %v10143_v25, %v14591_v57  ;;  %vm767_vm2 = vcmp.eq.s32.totalorder %v10143_v25, %v14609_v63  ;;  %vm769_vm3 = vcmp.eq.s32.totalorder %v10143_v25, %v14613_v56 }
 0x296   : > { %9393 = vmatpush1.msk.msra.mxu0 %vm895_vm10, %v9793_v16  ;;  %9425 = vmatpush1.msk.msra.mxu1 %vm897_vm11, %v9793_v16  ;;  %9620 = vpow2.f32 %v7225_v48  ;;  %vm704_vm4 = vcmp.eq.s32.totalorder %v10158_v26, %v14587_v47  ;;  %vm706_vm5 = vcmp.eq.s32.totalorder %v10158_v26, %v14591_v57  ;;  %vm703_vm6 = vcmp.eq.s32.totalorder %v10158_v26, %v14609_v63 }
 0x297   : > { %9394 = vmatprep.subr.msk.mxu0 %vm832_vm12, %v9793_v16  ;;  %9426 = vmatprep.subr.msk.mxu1 %vm834_vm13, %v9793_v16  ;;  %vm705_vm7 = vcmp.eq.s32.totalorder %v10158_v26, %v14613_v56  ;;  %vm640_vm8 = vcmp.eq.s32.totalorder %v10167_v27, %v14587_v47  ;;  %vm642_vm9 = vcmp.eq.s32.totalorder %v10167_v27, %v14591_v57 }
 0x298   : > { %9395 = vmatpush1.msk.msra.mxu0 %vm831_vm14, %v9793_v16  ;;  %9427 = vmatpush1.msk.msra.mxu1 %vm833_vm15, %v9793_v16  ;;  %vm639_vm10 = vcmp.eq.s32.totalorder %v10167_v27, %v14609_v63  ;;  %vm641_vm11 = vcmp.eq.s32.totalorder %v10167_v27, %v14613_v56  ;;  %vm576_vm12 = vcmp.eq.s32.totalorder %v9953_v2, %v14587_v47 }
 0x299   : > { %9396 = vmatprep.subr.msk.mxu0 %vm768_vm0, %v9793_v16  ;;  %9428 = vmatprep.subr.msk.mxu1 %vm770_vm1, %v9793_v16  ;;  %vm578_vm13 = vcmp.eq.s32.totalorder %v9953_v2, %v14591_v57  ;;  %v15004_v51 = vrot.slane %v14561_v11, %v10182_v28  ;;  %v15008_v38 = vrot.slane %v14561_v11, %v10185_v29 }
 0x29a   : > { %9397 = vmatpush1.msk.msra.mxu0 %vm767_vm2, %v9793_v16  ;;  %9429 = vmatpush1.msk.msra.mxu1 %vm769_vm3, %v9793_v16  ;;  %v14986_v35 = vpop.f32.mrf.mxu0  ;;  %v14988_v40 = vpop.f32.mrf.mxu1  ;;  %vm575_vm14 = vcmp.eq.s32.totalorder %v9953_v2, %v14609_v63  ;;  %v15026_v59 = vrot.slane %v14561_v11, %v10194_v30  ;;  %v15030_v42 = vrot.slane %v14561_v11, %v10197_v31 }
 0x29b   : > { %9398 = vmatprep.subr.msk.mxu0 %vm704_vm4, %v9793_v16  ;;  %9430 = vmatprep.subr.msk.mxu1 %vm706_vm5, %v9793_v16  ;;  %vm577_vm15 = vcmp.eq.s32.totalorder %v9953_v2, %v14613_v56  ;;  %vm1540_vm0 = vcmp.eq.s32.totalorder %v9968_v7, %v15004_v51  ;;  %vm1542_vm1 = vcmp.eq.s32.totalorder %v9968_v7, %v15008_v38 }
 0x29c   : > { %9399 = vmatpush1.msk.msra.mxu0 %vm703_vm6, %v9793_v16  ;;  %9431 = vmatpush1.msk.msra.mxu1 %vm705_vm7, %v9793_v16  ;;  %v15010_v61 = vpop.f32.mrf.mxu0  ;;  %v15012_v13 = vpop.f32.mrf.mxu1  ;;  %vm1539_vm2 = vcmp.eq.s32.totalorder %v9968_v7, %v15026_v59  ;;  %vm1541_vm3 = vcmp.eq.s32.totalorder %v9968_v7, %v15030_v42  ;;  %vm1476_vm4 = vcmp.eq.s32.totalorder %v9974_v9, %v15004_v51 }
 0x29d   : > { %9400 = vmatprep.subr.msk.mxu0 %vm640_vm8, %v9793_v16  ;;  %9432 = vmatprep.subr.msk.mxu1 %vm642_vm9, %v9793_v16  ;;  %vm1478_vm5 = vcmp.eq.s32.totalorder %v9974_v9, %v15008_v38  ;;  %vm1475_vm6 = vcmp.eq.s32.totalorder %v9974_v9, %v15026_v59  ;;  %vm1477_vm7 = vcmp.eq.s32.totalorder %v9974_v9, %v15030_v42 }
 0x29e   : > { %9401 = vmatpush1.msk.msra.mxu0 %vm639_vm10, %v9793_v16  ;;  %9433 = vmatpush1.msk.msra.mxu1 %vm641_vm11, %v9793_v16  ;;  %vm1412_vm8 = vcmp.eq.s32.totalorder %v9977_v10, %v15004_v51  ;;  %vm1414_vm9 = vcmp.eq.s32.totalorder %v9977_v10, %v15008_v38  ;;  %vm1411_vm10 = vcmp.eq.s32.totalorder %v9977_v10, %v15026_v59 }
 0x29f   : > { %9402 = vmatprep.subr.msk.mxu0 %vm576_vm12, %v9793_v16  ;;  %9434 = vmatprep.subr.msk.mxu1 %vm578_vm13, %v9793_v16  ;;  %vm1413_vm11 = vcmp.eq.s32.totalorder %v9977_v10, %v15030_v42  ;;  %vm1348_vm12 = vcmp.eq.s32.totalorder %v9996_v15, %v15004_v51  ;;  %vm1350_vm13 = vcmp.eq.s32.totalorder %v9996_v15, %v15008_v38 }
 0x2a0   : > { %v9615_v57 = vpop.eup %9614  ;;  %9403 = vmatpush1.msk.msra.mxu0 %vm575_vm14, %v9793_v16  ;;  %6151 = vmatprep.mubr.f32.mxu0 %v9792_v1  ;;  %v15047_v11 = vpop.f32.mrf.mxu0  ;;  %vm1347_vm14 = vcmp.eq.s32.totalorder %v9996_v15, %v15026_v59  ;;  %v15123_v14 = vrot.slane %v14690_v8, %v10194_v30  ;;  %v15127_v54 = vrot.slane %v14690_v8, %v10197_v31 }
 0x2a1   : > { %v15049_v63 = vpop.f32.mrf.mxu1  ;;  %v9617_v47 = vpop.eup %9616  ;;  %9435 = vmatpush1.msk.msra.mxu1 %vm577_vm15, %v9793_v16  ;;  %6240 = vmatprep.mubr.f32.mxu1 %v9792_v1  ;;  %7315 = vst [vmem:[%s11853_s6 + $0x100] sm:$0xff] %v9615_v57  ;;  %vm1349_vm15 = vcmp.eq.s32.totalorder %v9996_v15, %v15030_v42  ;;  %v15157_v10 = vrot.slane %v14690_v8, %v10182_v28 }
 0x2a2   : > { %v9619_v56 = vpop.eup %9618  ;;  %6152 = vmatmul.mubr.f32.vlgmr.msra.gmra.mxu0 %v14644_v43  ;;  %6241 = vmatmul.mubr.f32.vlgmr.msra.gmra.mxu1 %v14644_v43  ;;  %7317 = vst [vmem:[%s11853_s6 + $0x110] sm:$0xff] %v9617_v47  ;;  %v15065_v44 = vpop.f32.mrf.mxu0  ;;  %v6610_v32 = vrot.slane %v14690_v8, %v10185_v29 }
 0x2a3   : > { %v15067_v37 = vpop.f32.mrf.mxu1  ;;  %v9621_v62 = vpop.eup %9620  ;;  %9436 = vmatprep.subr.msk.mxu0 %vm1540_vm0, %v9793_v16  ;;  %9468 = vmatprep.subr.msk.mxu1 %vm1542_vm1, %v9793_v16  ;;  %7316 = vst [vmem:[%s11853_s6 + $0x108] sm:$0xff] %v9619_v56  ;;  %vm1284_vm0 = vcmp.eq.s32.totalorder %v10023_v17, %v15004_v51  ;;  %vm1286_vm1 = vcmp.eq.s32.totalorder %v10023_v17, %v15008_v38 }
 0x2a4   : > { %9437 = vmatpush1.msk.msra.mxu0 %vm1539_vm2, %v9793_v16  ;;  %9469 = vmatpush1.msk.msra.mxu1 %vm1541_vm3, %v9793_v16  ;;  %7318 = vst [vmem:[%s11853_s6 + $0x118] sm:$0xff] %v9621_v62  ;;  %vm1283_vm2 = vcmp.eq.s32.totalorder %v10023_v17, %v15026_v59  ;;  %vm1285_vm3 = vcmp.eq.s32.totalorder %v10023_v17, %v15030_v42 }
 0x2a5   : > { %9438 = vmatprep.subr.msk.mxu0 %vm1476_vm4, %v9793_v16  ;;  %9470 = vmatprep.subr.msk.mxu1 %vm1478_vm5, %v9793_v16  ;;  %vm1220_vm4 = vcmp.eq.s32.totalorder %v10038_v18, %v15004_v51  ;;  %vm1222_vm5 = vcmp.eq.s32.totalorder %v10038_v18, %v15008_v38 }
 0x2a6   : > { %6157 = vmatprep.mubr.f32.mxu0 %v9792_v1  ;;  %6246 = vmatprep.mubr.f32.mxu1 %v9792_v1  ;;  %v5275_v7 = vpop.f32.mrf.mxu0  ;;  %v5364_v9 = vpop.f32.mrf.mxu1 }
 0x2a7   : > { %9439 = vmatpush1.msk.msra.mxu0 %vm1475_vm6, %v9793_v16  ;;  %9471 = vmatpush1.msk.msra.mxu1 %vm1477_vm7, %v9793_v16  ;;  %vm1219_vm6 = vcmp.eq.s32.totalorder %v10038_v18, %v15026_v59  ;;  %vm1221_vm7 = vcmp.eq.s32.totalorder %v10038_v18, %v15030_v42 }
 0x2a8   : > { %6158 = vmatmul.mubr.f32.gmra.mxu0 %v14703_v49  ;;  %6247 = vmatmul.mubr.f32.gmra.mxu1 %v14703_v49  ;;  %v5277_v39 = vpop.f32.mrf.mxu0  ;;  %v5366_v52 = vpop.f32.mrf.mxu1 }
 0x2a9   : > { %9440 = vmatprep.subr.msk.mxu0 %vm1412_vm8, %v9793_v16  ;;  %9472 = vmatprep.subr.msk.mxu1 %vm1414_vm9, %v9793_v16  ;;  %vm1156_vm8 = vcmp.eq.s32.totalorder %v10053_v19, %v15004_v51  ;;  %vm1158_vm9 = vcmp.eq.s32.totalorder %v10053_v19, %v15008_v38 }
 0x2aa   : > { %9441 = vmatpush1.msk.msra.mxu0 %vm1411_vm10, %v9793_v16  ;;  %9473 = vmatpush1.msk.msra.mxu1 %vm1413_vm11, %v9793_v16  ;;  %vm1155_vm10 = vcmp.eq.s32.totalorder %v10053_v19, %v15026_v59  ;;  %vm1157_vm11 = vcmp.eq.s32.totalorder %v10053_v19, %v15030_v42 }
 0x2ab   : > { %9442 = vmatprep.subr.msk.mxu0 %vm1348_vm12, %v9793_v16  ;;  %9474 = vmatprep.subr.msk.mxu1 %vm1350_vm13, %v9793_v16  ;;  %vm1092_vm12 = vcmp.eq.s32.totalorder %v10068_v20, %v15004_v51  ;;  %vm1094_vm13 = vcmp.eq.s32.totalorder %v10068_v20, %v15008_v38 }
 0x2ac   : > { %6163 = vmatprep.mubr.f32.mxu0 %v9792_v1  ;;  %6252 = vmatprep.mubr.f32.mxu1 %v9792_v1  ;;  %v5281_v33 = vpop.f32.mrf.mxu0  ;;  %v5370_v45 = vpop.f32.mrf.mxu1 }
 0x2ad   : > { %9443 = vmatpush1.msk.msra.mxu0 %vm1347_vm14, %v9793_v16  ;;  %9475 = vmatpush1.msk.msra.mxu1 %vm1349_vm15, %v9793_v16  ;;  %v6807_v55 = vmul.f32 %v15123_v14, %v5281_v33  ;;  %v6809_v36 = vmul.f32 %v15127_v54, %v5370_v45  ;;  %vm1091_vm14 = vcmp.eq.s32.totalorder %v10068_v20, %v15026_v59 }
 0x2ae   : > { %6164 = vmatmul.mubr.f32.gmra.mxu0 %v14786_v60  ;;  %6253 = vmatmul.mubr.f32.gmra.mxu1 %v14786_v60  ;;  %v5283_v15 = vpop.f32.mrf.mxu0  ;;  %v5372_v8 = vpop.f32.mrf.mxu1  ;;  %vm1093_vm15 = vcmp.eq.s32.totalorder %v10068_v20, %v15030_v42 }
 0x2af   : > { %9444 = vmatprep.subr.msk.mxu0 %vm1284_vm0, %v9793_v16  ;;  %9476 = vmatprep.subr.msk.mxu1 %vm1286_vm1, %v9793_v16  ;;  %v6871_v58 = vadd.f32 %v6807_v55, %v5275_v7  ;;  %v6873_v41 = vadd.f32 %v6809_v36, %v5364_v9  ;;  %v6808_v0 = vmul.f32 %v15157_v10, %v5283_v15 }
 0x2b0   : > { %9445 = vmatpush1.msk.msra.mxu0 %vm1283_vm2, %v9793_v16  ;;  %9477 = vmatpush1.msk.msra.mxu1 %vm1285_vm3, %v9793_v16  ;;  %v6810_v12 = vmul.f32 %v6610_v32, %v5372_v8  ;;  %vm1028_vm0 = vcmp.eq.s32.totalorder %v10083_v21, %v15004_v51  ;;  %vm1030_vm1 = vcmp.eq.s32.totalorder %v10083_v21, %v15008_v38 }
 0x2b1   : > { %9446 = vmatprep.subr.msk.mxu0 %vm1220_vm4, %v9793_v16  ;;  %9478 = vmatprep.subr.msk.mxu1 %vm1222_vm5, %v9793_v16  ;;  %v6935_v17 = vmul.f32 %v6871_v58, %v15123_v14  ;;  %v6937_v46 = vmul.f32 %v6873_v41, %v15127_v54  ;;  %v6872_v34 = vadd.f32 %v6808_v0, %v5277_v39 }
 0x2b2   : > { %6169 = vmatprep.mubr.f32.mxu0 %v9792_v1  ;;  %6258 = vmatprep.mubr.f32.mxu1 %v9792_v1  ;;  %v6874_v53 = vadd.f32 %v6810_v12, %v5366_v52  ;;  %vm1027_vm2 = vcmp.eq.s32.totalorder %v10083_v21, %v15026_v59  ;;  %vm1029_vm3 = vcmp.eq.s32.totalorder %v10083_v21, %v15030_v42  ;;  %v15414_v52 = vld [vmem:[%s9945_s30 + $0x28] sm:$0xff] }
 0x2b3   : > { %9447 = vmatpush1.msk.msra.mxu0 %vm1219_vm6, %v9793_v16  ;;  %9479 = vmatpush1.msk.msra.mxu1 %vm1221_vm7, %v9793_v16  ;;  %v6999_v48 = vadd.f32 %v6935_v17, %v15047_v11  ;;  %v7001_v57 = vadd.f32 %v6937_v46, %v15049_v63  ;;  %v6936_v47 = vmul.f32 %v6872_v34, %v15157_v10 }
 0x2b4   : > { %6170 = vmatmul.mubr.f32.gmra.mxu0 %v14848_v50  ;;  %6259 = vmatmul.mubr.f32.gmra.mxu1 %v14848_v50  ;;  %v6938_v56 = vmul.f32 %v6874_v53, %v6610_v32  ;;  %vm964_vm4 = vcmp.eq.s32.totalorder %v10098_v22, %v15004_v51  ;;  %vm966_vm5 = vcmp.eq.s32.totalorder %v10098_v22, %v15008_v38 }
 0x2b5   : > { %9448 = vmatprep.subr.msk.mxu0 %vm1156_vm8, %v9793_v16  ;;  %9480 = vmatprep.subr.msk.mxu1 %vm1158_vm9, %v9793_v16  ;;  %v7063_v18 = vmul.f32 %v6999_v48, %v15123_v14  ;;  %v7065_v11 = vmul.f32 %v7001_v57, %v15127_v54  ;;  %v7000_v63 = vadd.f32 %v6936_v47, %v15065_v44 }
 0x2b6   : > { %9449 = vmatpush1.msk.msra.mxu0 %vm1155_vm10, %v9793_v16  ;;  %9481 = vmatpush1.msk.msra.mxu1 %vm1157_vm11, %v9793_v16  ;;  %v7002_v62 = vadd.f32 %v6938_v56, %v15067_v37  ;;  %vm963_vm6 = vcmp.eq.s32.totalorder %v10098_v22, %v15026_v59  ;;  %vm965_vm7 = vcmp.eq.s32.totalorder %v10098_v22, %v15030_v42 }
 0x2b7   : > { %9450 = vmatprep.subr.msk.mxu0 %vm1092_vm12, %v9793_v16  ;;  %9482 = vmatprep.subr.msk.mxu1 %vm1094_vm13, %v9793_v16  ;;  %v7127_v19 = vadd.f32 %v7063_v18, %v14986_v35  ;;  %v7129_v44 = vadd.f32 %v7065_v11, %v14988_v40  ;;  %v7064_v7 = vmul.f32 %v7000_v63, %v15157_v10 }
 0x2b8   : > { %9451 = vmatpush1.msk.msra.mxu0 %vm1091_vm14, %v9793_v16  ;;  %9483 = vmatpush1.msk.msra.mxu1 %vm1093_vm15, %v9793_v16  ;;  %v7066_v35 = vmul.f32 %v7002_v62, %v6610_v32  ;;  %vm900_vm8 = vcmp.eq.s32.totalorder %v10113_v23, %v15004_v51  ;;  %vm902_vm9 = vcmp.eq.s32.totalorder %v10113_v23, %v15008_v38 }
 0x2b9   : > { %9452 = vmatprep.subr.msk.mxu0 %vm1028_vm0, %v9793_v16  ;;  %9484 = vmatprep.subr.msk.mxu1 %vm1030_vm1, %v9793_v16  ;;  %v7227_v20 = vmul.f32 1.442695, %v7127_v19  ;;  %v7231_v40 = vmul.f32 1.442695, %v7129_v44  ;;  %v7128_v37 = vadd.f32 %v7064_v7, %v15010_v61  ;;  %vm899_vm10 = vcmp.eq.s32.totalorder %v10113_v23, %v15026_v59 }
 0x2ba   : > { %9453 = vmatpush1.msk.msra.mxu0 %vm1027_vm2, %v9793_v16  ;;  %9485 = vmatpush1.msk.msra.mxu1 %vm1029_vm3, %v9793_v16  ;;  %v7130_v9 = vadd.f32 %v7066_v35, %v15012_v13  ;;  %vm901_vm11 = vcmp.eq.s32.totalorder %v10113_v23, %v15030_v42  ;;  %vm836_vm12 = vcmp.eq.s32.totalorder %v10128_v24, %v15004_v51 }
 0x2bb   : > { %9454 = vmatprep.subr.msk.mxu0 %vm964_vm4, %v9793_v16  ;;  %9486 = vmatprep.subr.msk.mxu1 %vm966_vm5, %v9793_v16  ;;  %9622 = vpow2.f32 %v7227_v20  ;;  %v7229_v21 = vmul.f32 1.442695, %v7128_v37  ;;  %vm838_vm13 = vcmp.eq.s32.totalorder %v10128_v24, %v15008_v38  ;;  %vm835_vm14 = vcmp.eq.s32.totalorder %v10128_v24, %v15026_v59 }
 0x2bc   : > { %9455 = vmatpush1.msk.msra.mxu0 %vm963_vm6, %v9793_v16  ;;  %9487 = vmatpush1.msk.msra.mxu1 %vm965_vm7, %v9793_v16  ;;  %9624 = vpow2.f32 %v7231_v40  ;;  %v7233_v23 = vmul.f32 1.442695, %v7130_v9  ;;  %vm837_vm15 = vcmp.eq.s32.totalorder %v10128_v24, %v15030_v42  ;;  %vm772_vm0 = vcmp.eq.s32.totalorder %v10143_v25, %v15004_v51 }
 0x2bd   : > { %9456 = vmatprep.subr.msk.mxu0 %vm900_vm8, %v9793_v16  ;;  %9488 = vmatprep.subr.msk.mxu1 %vm902_vm9, %v9793_v16  ;;  %9626 = vpow2.f32 %v7229_v21  ;;  %vm774_vm1 = vcmp.eq.s32.totalorder %v10143_v25, %v15008_v38  ;;  %vm771_vm2 = vcmp.eq.s32.totalorder %v10143_v25, %v15026_v59  ;;  %vm773_vm3 = vcmp.eq.s32.totalorder %v10143_v25, %v15030_v42 }
 0x2be   : > { %9457 = vmatpush1.msk.msra.mxu0 %vm899_vm10, %v9793_v16  ;;  %9489 = vmatpush1.msk.msra.mxu1 %vm901_vm11, %v9793_v16  ;;  %9628 = vpow2.f32 %v7233_v23  ;;  %vm708_vm4 = vcmp.eq.s32.totalorder %v10158_v26, %v15004_v51  ;;  %vm710_vm5 = vcmp.eq.s32.totalorder %v10158_v26, %v15008_v38  ;;  %vm707_vm6 = vcmp.eq.s32.totalorder %v10158_v26, %v15026_v59 }
 0x2bf   : > { %9458 = vmatprep.subr.msk.mxu0 %vm836_vm12, %v9793_v16  ;;  %9490 = vmatprep.subr.msk.mxu1 %vm838_vm13, %v9793_v16  ;;  %vm709_vm7 = vcmp.eq.s32.totalorder %v10158_v26, %v15030_v42  ;;  %vm644_vm8 = vcmp.eq.s32.totalorder %v10167_v27, %v15004_v51  ;;  %vm646_vm9 = vcmp.eq.s32.totalorder %v10167_v27, %v15008_v38 }
 0x2c0   : > { %9459 = vmatpush1.msk.msra.mxu0 %vm835_vm14, %v9793_v16  ;;  %9491 = vmatpush1.msk.msra.mxu1 %vm837_vm15, %v9793_v16  ;;  %vm643_vm10 = vcmp.eq.s32.totalorder %v10167_v27, %v15026_v59  ;;  %vm645_vm11 = vcmp.eq.s32.totalorder %v10167_v27, %v15030_v42  ;;  %vm580_vm12 = vcmp.eq.s32.totalorder %v9953_v2, %v15004_v51 }
 0x2c1   : > { %9460 = vmatprep.subr.msk.mxu0 %vm772_vm0, %v9793_v16  ;;  %9492 = vmatprep.subr.msk.mxu1 %vm774_vm1, %v9793_v16  ;;  %vm582_vm13 = vcmp.eq.s32.totalorder %v9953_v2, %v15008_v38  ;;  %vm579_vm14 = vcmp.eq.s32.totalorder %v9953_v2, %v15026_v59  ;;  %vm581_vm15 = vcmp.eq.s32.totalorder %v9953_v2, %v15030_v42 }
 0x2c2   : > { %9461 = vmatpush1.msk.msra.mxu0 %vm771_vm2, %v9793_v16  ;;  %9493 = vmatpush1.msk.msra.mxu1 %vm773_vm3, %v9793_v16  ;;  %v15369_v22 = vpop.f32.mrf.mxu0  ;;  %v15371_v24 = vpop.f32.mrf.mxu1  ;;  %v6614_v54 = vrot.slane %v15414_v52, %v9962_v5  ;;  %v6622_v10 = vrot.slane %v15414_v52, %v9965_v6  ;;  %v6626_v33 = vrot.slane %v15414_v52, %v9959_v4 }
 0x2c3   : > { %9462 = vmatprep.subr.msk.mxu0 %vm708_vm4, %v9793_v16  ;;  %9494 = vmatprep.subr.msk.mxu1 %vm710_vm5, %v9793_v16 }
 0x2c4   : > { %9463 = vmatpush1.msk.msra.mxu0 %vm707_vm6, %v9793_v16  ;;  %9495 = vmatpush1.msk.msra.mxu1 %vm709_vm7, %v9793_v16  ;;  %v15385_v25 = vpop.f32.mrf.mxu0  ;;  %v15387_v26 = vpop.f32.mrf.mxu1 }
 0x2c5   : > { %9464 = vmatprep.subr.msk.mxu0 %vm644_vm8, %v9793_v16  ;;  %9496 = vmatprep.subr.msk.mxu1 %vm646_vm9, %v9793_v16 }
 0x2c6   : > { %9465 = vmatpush1.msk.msra.mxu0 %vm643_vm10, %v9793_v16  ;;  %9497 = vmatpush1.msk.msra.mxu1 %vm645_vm11, %v9793_v16 }
 0x2c7   : > { %9466 = vmatprep.subr.msk.mxu0 %vm580_vm12, %v9793_v16  ;;  %9498 = vmatprep.subr.msk.mxu1 %vm582_vm13, %v9793_v16 }
 0x2c8   : > { %v9623_v27 = vpop.eup %9622  ;;  %9467 = vmatpush1.msk.msra.mxu0 %vm579_vm14, %v9793_v16  ;;  %6329 = vmatprep.mubr.f32.mxu0 %v9792_v1  ;;  %v5447_v51 = vpop.f32.mrf.mxu0 }
 0x2c9   : > { %v5536_v38 = vpop.f32.mrf.mxu1  ;;  %v9625_v61 = vpop.eup %9624  ;;  %9499 = vmatpush1.msk.msra.mxu1 %vm581_vm15, %v9793_v16  ;;  %6418 = vmatprep.mubr.f32.mxu1 %v9792_v1  ;;  %7319 = vst [vmem:[%s11853_s6 + $0x120] sm:$0xff] %v9623_v27 }
 0x2ca   : > { %v9627_v2 = vpop.eup %9626  ;;  %6330 = vmatmul.mubr.f32.vlgmr.msra.gmra.mxu0 %v14644_v43  ;;  %6419 = vmatmul.mubr.f32.vlgmr.msra.gmra.mxu1 %v14644_v43  ;;  %7321 = vst [vmem:[%s11853_s6 + $0x130] sm:$0xff] %v9625_v61  ;;  %v5449_v13 = vpop.f32.mrf.mxu0 }
 0x2cb   : > { %v5538_v59 = vpop.f32.mrf.mxu1  ;;  %v9629_v42 = vpop.eup %9628  ;;  %6335 = vmatprep.mubr.f32.mxu0 %v9792_v1  ;;  %6424 = vmatprep.mubr.f32.mxu1 %v9792_v1  ;;  %7320 = vst [vmem:[%s11853_s6 + $0x128] sm:$0xff] %v9627_v2 }
 0x2cc   : > { %7322 = vst [vmem:[%s11853_s6 + $0x138] sm:$0xff] %v9629_v42 }
 0x2ce   : > { %6336 = vmatmul.mubr.f32.gmra.mxu0 %v14703_v49  ;;  %6425 = vmatmul.mubr.f32.gmra.mxu1 %v14703_v49  ;;  %v5453_v16 = vpop.f32.mrf.mxu0  ;;  %v5542_v39 = vpop.f32.mrf.mxu1  ;;  %v6618_v49 = vrot.slane %v15414_v52, %v9956_v3 }
 0x2cf   : > { %6341 = vmatprep.mubr.f32.mxu0 %v9792_v1  ;;  %6430 = vmatprep.mubr.f32.mxu1 %v9792_v1 }
 0x2d0   : > { %v5455_v43 = vpop.f32.mrf.mxu0  ;;  %v5544_v14 = vpop.f32.mrf.mxu1 }
 0x2d2   : > { %6342 = vmatmul.mubr.f32.gmra.mxu0 %v14786_v60  ;;  %6431 = vmatmul.mubr.f32.gmra.mxu1 %v14786_v60 }
 0x2d3   : > { %6347 = vmatprep.mubr.f32.mxu0 %v9792_v1  ;;  %6436 = vmatprep.mubr.f32.mxu1 %v9792_v1 }
 0x2d4   : > { %v5459_v45 = vpop.f32.mrf.mxu0  ;;  %v5548_v32 = vpop.f32.mrf.mxu1 }
 0x2d5   : > { %v6811_v55 = vmul.f32 %v6614_v54, %v5459_v45  ;;  %v6813_v36 = vmul.f32 %v6622_v10, %v5548_v32 }
 0x2d6   : > { %6348 = vmatmul.mubr.f32.gmra.mxu0 %v14848_v50  ;;  %6437 = vmatmul.mubr.f32.gmra.mxu1 %v14848_v50  ;;  %v5461_v15 = vpop.f32.mrf.mxu0  ;;  %v5550_v60 = vpop.f32.mrf.mxu1 }
 0x2d7   : > { %v6875_v8 = vadd.f32 %v6811_v55, %v5453_v16  ;;  %v6877_v58 = vadd.f32 %v6813_v36, %v5542_v39  ;;  %v6812_v41 = vmul.f32 %v6618_v49, %v5461_v15  ;;  %v6814_v1 = vmul.f32 %v6626_v33, %v5550_v60 }
 0x2d8   : > { %v6630_v39 = vrot.slane %v15414_v52, %v10194_v30 }
 0x2d9   : > { %v6939_v0 = vmul.f32 %v6875_v8, %v6614_v54  ;;  %v6941_v12 = vmul.f32 %v6877_v58, %v6622_v10  ;;  %v6876_v17 = vadd.f32 %v6812_v41, %v5455_v43  ;;  %v6878_v46 = vadd.f32 %v6814_v1, %v5544_v14 }
 0x2da   : > { %v6638_v43 = vrot.slane %v15414_v52, %v10197_v31  ;;  %v6634_v14 = vrot.slane %v15414_v52, %v10182_v28 }
 0x2db   : > { %v7003_v34 = vadd.f32 %v6939_v0, %v5447_v51  ;;  %v7005_v53 = vadd.f32 %v6941_v12, %v5536_v38  ;;  %v6940_v48 = vmul.f32 %v6876_v17, %v6618_v49  ;;  %v6942_v57 = vmul.f32 %v6878_v46, %v6626_v33 }
 0x2dd   : > { %v7067_v47 = vmul.f32 %v7003_v34, %v6614_v54  ;;  %v7069_v56 = vmul.f32 %v7005_v53, %v6622_v10  ;;  %v7004_v18 = vadd.f32 %v6940_v48, %v5449_v13  ;;  %v7006_v11 = vadd.f32 %v6942_v57, %v5538_v59 }
 0x2de   : > { %v6642_v54 = vrot.slane %v15414_v52, %v10185_v29 }
 0x2df   : > { %v7131_v50 = vadd.f32 %v7067_v47, %v15369_v22  ;;  %v7133_v63 = vadd.f32 %v7069_v56, %v15371_v24  ;;  %v7068_v62 = vmul.f32 %v7004_v18, %v6618_v49  ;;  %v7070_v19 = vmul.f32 %v7006_v11, %v6626_v33 }
 0x2e1   : > { %v7235_v44 = vmul.f32 1.442695, %v7131_v50  ;;  %v7239_v7 = vmul.f32 1.442695, %v7133_v63  ;;  %v7132_v35 = vadd.f32 %v7068_v62, %v15385_v25  ;;  %v7134_v20 = vadd.f32 %v7070_v19, %v15387_v26 }
 0x2e3   : > { %9630 = vpow2.f32 %v7235_v44  ;;  %v7237_v40 = vmul.f32 1.442695, %v7132_v35  ;;  %v7241_v37 = vmul.f32 1.442695, %v7134_v20 }
 0x2e4   : > { %9632 = vpow2.f32 %v7239_v7 }
 0x2e5   : > { %9634 = vpow2.f32 %v7237_v40 }
 0x2e6   : > { %9636 = vpow2.f32 %v7241_v37 }
 0x2ea   : > { %v5619_v9 = vpop.f32.mrf.mxu0  ;;  %v5708_v21 = vpop.f32.mrf.mxu1 }
 0x2ec   : > { %v5621_v23 = vpop.f32.mrf.mxu0  ;;  %v5710_v22 = vpop.f32.mrf.mxu1 }
 0x2f0   : > { %v9631_v24 = vpop.eup %9630  ;;  %v5625_v27 = vpop.f32.mrf.mxu0 }
 0x2f1   : > { %v5714_v51 = vpop.f32.mrf.mxu1  ;;  %v9633_v25 = vpop.eup %9632  ;;  %7323 = vst [vmem:[%s11853_s6 + $0x140] sm:$0xff] %v9631_v24 }
 0x2f2   : > { %v9635_v38 = vpop.eup %9634  ;;  %7325 = vst [vmem:[%s11853_s6 + $0x150] sm:$0xff] %v9633_v25  ;;  %v5627_v26 = vpop.f32.mrf.mxu0 }
 0x2f3   : > { %v5716_v61 = vpop.f32.mrf.mxu1  ;;  %v9637_v2 = vpop.eup %9636  ;;  %7324 = vst [vmem:[%s11853_s6 + $0x148] sm:$0xff] %v9635_v38 }
 0x2f4   : > { %7326 = vst [vmem:[%s11853_s6 + $0x158] sm:$0xff] %v9637_v2 }
 0x2f6   : > { %v5631_v13 = vpop.f32.mrf.mxu0  ;;  %v5720_v59 = vpop.f32.mrf.mxu1 }
 0x2f8   : > { %v5633_v42 = vpop.f32.mrf.mxu0  ;;  %v5722_v16 = vpop.f32.mrf.mxu1 }
 0x2fc   : > { %v5637_v10 = vpop.f32.mrf.mxu0  ;;  %v5726_v49 = vpop.f32.mrf.mxu1 }
 0x2fd   : > { %v6815_v33 = vmul.f32 %v6630_v39, %v5637_v10  ;;  %v6817_v45 = vmul.f32 %v6638_v43, %v5726_v49 }
 0x2fe   : > { %v5639_v32 = vpop.f32.mrf.mxu0  ;;  %v5728_v55 = vpop.f32.mrf.mxu1 }
 0x2ff   : > { %v6879_v36 = vadd.f32 %v6815_v33, %v5631_v13  ;;  %v6881_v15 = vadd.f32 %v6817_v45, %v5720_v59  ;;  %v6816_v60 = vmul.f32 %v6634_v14, %v5639_v32  ;;  %v6818_v8 = vmul.f32 %v6642_v54, %v5728_v55 }
 0x301   : > { %v6943_v58 = vmul.f32 %v6879_v36, %v6630_v39  ;;  %v6945_v41 = vmul.f32 %v6881_v15, %v6638_v43  ;;  %v6880_v1 = vadd.f32 %v6816_v60, %v5633_v42  ;;  %v6882_v0 = vadd.f32 %v6818_v8, %v5722_v16 }
 0x303   : > { %v7007_v12 = vadd.f32 %v6943_v58, %v5625_v27  ;;  %v7009_v17 = vadd.f32 %v6945_v41, %v5714_v51  ;;  %v6944_v46 = vmul.f32 %v6880_v1, %v6634_v14  ;;  %v6946_v34 = vmul.f32 %v6882_v0, %v6642_v54 }
 0x305   : > { %v7071_v53 = vmul.f32 %v7007_v12, %v6630_v39  ;;  %v7073_v52 = vmul.f32 %v7009_v17, %v6638_v43  ;;  %v7008_v48 = vadd.f32 %v6944_v46, %v5627_v26  ;;  %v7010_v57 = vadd.f32 %v6946_v34, %v5716_v61  ;;  %v15453_v61 = vld [vmem:[%s9945_s30 + $0x30] sm:$0xff] }
 0x306   : > { %v6646_v59 = vrot.slane %v15453_v61, %v9962_v5  ;;  %v6654_v42 = vrot.slane %v15453_v61, %v9965_v6  ;;  %v6650_v16 = vrot.slane %v15453_v61, %v9956_v3  ;;  %v6658_v39 = vrot.slane %v15453_v61, %v9959_v4 }
 0x307   : > { %v7135_v47 = vadd.f32 %v7071_v53, %v5619_v9  ;;  %v7137_v56 = vadd.f32 %v7073_v52, %v5708_v21  ;;  %v7072_v18 = vmul.f32 %v7008_v48, %v6634_v14  ;;  %v7074_v11 = vmul.f32 %v7010_v57, %v6642_v54 }
 0x309   : > { %v7243_v50 = vmul.f32 1.442695, %v7135_v47  ;;  %v7247_v63 = vmul.f32 1.442695, %v7137_v56  ;;  %v7136_v62 = vadd.f32 %v7072_v18, %v5621_v23  ;;  %v7138_v19 = vadd.f32 %v7074_v11, %v5710_v22 }
 0x30b   : > { %9638 = vpow2.f32 %v7243_v50  ;;  %v7245_v44 = vmul.f32 1.442695, %v7136_v62  ;;  %v7249_v7 = vmul.f32 1.442695, %v7138_v19 }
 0x30c   : > { %9640 = vpow2.f32 %v7247_v63 }
 0x30d   : > { %9642 = vpow2.f32 %v7245_v44 }
 0x30e   : > { %9644 = vpow2.f32 %v7249_v7 }
 0x312   : > { %v5797_v35 = vpop.f32.mrf.mxu0  ;;  %v5886_v20 = vpop.f32.mrf.mxu1 }
 0x314   : > { %v5799_v40 = vpop.f32.mrf.mxu0  ;;  %v5888_v37 = vpop.f32.mrf.mxu1 }
 0x318   : > { %v9639_v9 = vpop.eup %9638  ;;  %v5803_v21 = vpop.f32.mrf.mxu0 }
 0x319   : > { %v5892_v24 = vpop.f32.mrf.mxu1  ;;  %v9641_v23 = vpop.eup %9640  ;;  %7327 = vst [vmem:[%s11853_s6 + $0x160] sm:$0xff] %v9639_v9 }
 0x31a   : > { %v9643_v22 = vpop.eup %9642  ;;  %7329 = vst [vmem:[%s11853_s6 + $0x170] sm:$0xff] %v9641_v23  ;;  %v5805_v27 = vpop.f32.mrf.mxu0 }
 0x31b   : > { %v5894_v51 = vpop.f32.mrf.mxu1  ;;  %v9645_v25 = vpop.eup %9644  ;;  %7328 = vst [vmem:[%s11853_s6 + $0x168] sm:$0xff] %v9643_v22 }
 0x31c   : > { %7330 = vst [vmem:[%s11853_s6 + $0x178] sm:$0xff] %v9645_v25 }
 0x31e   : > { %v5809_v38 = vpop.f32.mrf.mxu0  ;;  %v5898_v26 = vpop.f32.mrf.mxu1 }
 0x320   : > { %v5811_v2 = vpop.f32.mrf.mxu0  ;;  %v5900_v13 = vpop.f32.mrf.mxu1 }
 0x324   : > { %v5815_v43 = vpop.f32.mrf.mxu0  ;;  %v5904_v14 = vpop.f32.mrf.mxu1 }
 0x325   : > { %v6819_v54 = vmul.f32 %v6646_v59, %v5815_v43  ;;  %v6821_v10 = vmul.f32 %v6654_v42, %v5904_v14 }
 0x326   : > { %v5817_v49 = vpop.f32.mrf.mxu0  ;;  %v5906_v33 = vpop.f32.mrf.mxu1 }
 0x327   : > { %v6883_v45 = vadd.f32 %v6819_v54, %v5809_v38  ;;  %v6885_v32 = vadd.f32 %v6821_v10, %v5898_v26  ;;  %v6820_v55 = vmul.f32 %v6650_v16, %v5817_v49  ;;  %v6822_v36 = vmul.f32 %v6658_v39, %v5906_v33 }
 0x328   : > { %v6662_v26 = vrot.slane %v15453_v61, %v10194_v30 }
 0x329   : > { %v6947_v15 = vmul.f32 %v6883_v45, %v6646_v59  ;;  %v6949_v60 = vmul.f32 %v6885_v32, %v6654_v42  ;;  %v6884_v8 = vadd.f32 %v6820_v55, %v5811_v2  ;;  %v6886_v58 = vadd.f32 %v6822_v36, %v5900_v13 }
 0x32a   : > { %v6670_v2 = vrot.slane %v15453_v61, %v10197_v31  ;;  %v6666_v13 = vrot.slane %v15453_v61, %v10182_v28 }
 0x32b   : > { %v7011_v41 = vadd.f32 %v6947_v15, %v5803_v21  ;;  %v7013_v1 = vadd.f32 %v6949_v60, %v5892_v24  ;;  %v6948_v0 = vmul.f32 %v6884_v8, %v6650_v16  ;;  %v6950_v12 = vmul.f32 %v6886_v58, %v6658_v39 }
 0x32d   : > { %v7075_v17 = vmul.f32 %v7011_v41, %v6646_v59  ;;  %v7077_v46 = vmul.f32 %v7013_v1, %v6654_v42  ;;  %v7012_v34 = vadd.f32 %v6948_v0, %v5805_v27  ;;  %v7014_v53 = vadd.f32 %v6950_v12, %v5894_v51 }
 0x32e   : > { %v6674_v59 = vrot.slane %v15453_v61, %v10185_v29 }
 0x32f   : > { %v7139_v52 = vadd.f32 %v7075_v17, %v5797_v35  ;;  %v7141_v48 = vadd.f32 %v7077_v46, %v5886_v20  ;;  %v7076_v57 = vmul.f32 %v7012_v34, %v6650_v16  ;;  %v7078_v47 = vmul.f32 %v7014_v53, %v6658_v39 }
 0x331   : > { %v7251_v56 = vmul.f32 1.442695, %v7139_v52  ;;  %v7255_v18 = vmul.f32 1.442695, %v7141_v48  ;;  %v7140_v11 = vadd.f32 %v7076_v57, %v5799_v40  ;;  %v7142_v50 = vadd.f32 %v7078_v47, %v5888_v37 }
 0x333   : > { %9646 = vpow2.f32 %v7251_v56  ;;  %v7253_v63 = vmul.f32 1.442695, %v7140_v11  ;;  %v7257_v62 = vmul.f32 1.442695, %v7142_v50 }
 0x334   : > { %9648 = vpow2.f32 %v7255_v18 }
 0x335   : > { %9650 = vpow2.f32 %v7253_v63 }
 0x336   : > { %9652 = vpow2.f32 %v7257_v62 }
 0x33a   : > { %v5975_v19 = vpop.f32.mrf.mxu0  ;;  %v6064_v44 = vpop.f32.mrf.mxu1 }
 0x33c   : > { %v5977_v7 = vpop.f32.mrf.mxu0  ;;  %v6066_v35 = vpop.f32.mrf.mxu1 }
 0x340   : > { %v9647_v20 = vpop.eup %9646  ;;  %v5981_v9 = vpop.f32.mrf.mxu0 }
 0x341   : > { %v6070_v21 = vpop.f32.mrf.mxu1  ;;  %v9649_v24 = vpop.eup %9648  ;;  %7331 = vst [vmem:[%s11853_s6 + $0x180] sm:$0xff] %v9647_v20 }
 0x342   : > { %v9651_v40 = vpop.eup %9650  ;;  %7333 = vst [vmem:[%s11853_s6 + $0x190] sm:$0xff] %v9649_v24  ;;  %v5983_v37 = vpop.f32.mrf.mxu0 }
 0x343   : > { %v6072_v23 = vpop.f32.mrf.mxu1  ;;  %v9653_v22 = vpop.eup %9652  ;;  %7332 = vst [vmem:[%s11853_s6 + $0x188] sm:$0xff] %v9651_v40 }
 0x344   : > { %7334 = vst [vmem:[%s11853_s6 + $0x198] sm:$0xff] %v9653_v22 }
 0x346   : > { %v5987_v27 = vpop.f32.mrf.mxu0  ;;  %v6076_v51 = vpop.f32.mrf.mxu1 }
 0x348   : > { %v5989_v25 = vpop.f32.mrf.mxu0  ;;  %v6078_v38 = vpop.f32.mrf.mxu1 }
 0x34c   : > { %v5993_v42 = vpop.f32.mrf.mxu0  ;;  %v6082_v16 = vpop.f32.mrf.mxu1 }
 0x34d   : > { %v6823_v39 = vmul.f32 %v6662_v26, %v5993_v42  ;;  %v6825_v43 = vmul.f32 %v6670_v2, %v6082_v16 }
 0x34e   : > { %v5995_v14 = vpop.f32.mrf.mxu0  ;;  %v6084_v54 = vpop.f32.mrf.mxu1 }
 0x34f   : > { %v6887_v10 = vadd.f32 %v6823_v39, %v5987_v27  ;;  %v6889_v49 = vadd.f32 %v6825_v43, %v6076_v51  ;;  %v6824_v33 = vmul.f32 %v6666_v13, %v5995_v14  ;;  %v6826_v45 = vmul.f32 %v6674_v59, %v6084_v54 }
 0x351   : > { %v6951_v32 = vmul.f32 %v6887_v10, %v6662_v26  ;;  %v6953_v55 = vmul.f32 %v6889_v49, %v6670_v2  ;;  %v6888_v36 = vadd.f32 %v6824_v33, %v5989_v25  ;;  %v6890_v15 = vadd.f32 %v6826_v45, %v6078_v38 }
 0x353   : > { %v7015_v60 = vadd.f32 %v6951_v32, %v5981_v9  ;;  %v7017_v8 = vadd.f32 %v6953_v55, %v6070_v21  ;;  %v6952_v58 = vmul.f32 %v6888_v36, %v6666_v13  ;;  %v6954_v41 = vmul.f32 %v6890_v15, %v6674_v59 }
 0x355   : > { %v7079_v1 = vmul.f32 %v7015_v60, %v6662_v26  ;;  %v7081_v61 = vmul.f32 %v7017_v8, %v6670_v2  ;;  %v7016_v0 = vadd.f32 %v6952_v58, %v5983_v37  ;;  %v7018_v12 = vadd.f32 %v6954_v41, %v6072_v23  ;;  %v15480_v23 = vld [vmem:[%s9945_s30 + $0x38] sm:$0xff] }
 0x356   : > { %v6678_v51 = vrot.slane %v15480_v23, %v9962_v5  ;;  %v6686_v25 = vrot.slane %v15480_v23, %v9965_v6  ;;  %v6682_v38 = vrot.slane %v15480_v23, %v9956_v3  ;;  %v6690_v26 = vrot.slane %v15480_v23, %v9959_v4 }
 0x357   : > { %v7143_v17 = vadd.f32 %v7079_v1, %v5975_v19  ;;  %v7145_v46 = vadd.f32 %v7081_v61, %v6064_v44  ;;  %v7080_v34 = vmul.f32 %v7016_v0, %v6666_v13  ;;  %v7082_v53 = vmul.f32 %v7018_v12, %v6674_v59 }
 0x359   : > { %v7259_v52 = vmul.f32 1.442695, %v7143_v17  ;;  %v7263_v48 = vmul.f32 1.442695, %v7145_v46  ;;  %v7144_v57 = vadd.f32 %v7080_v34, %v5977_v7  ;;  %v7146_v47 = vadd.f32 %v7082_v53, %v6066_v35 }
 0x35b   : > { %9654 = vpow2.f32 %v7259_v52  ;;  %v7261_v56 = vmul.f32 1.442695, %v7144_v57  ;;  %v7265_v18 = vmul.f32 1.442695, %v7146_v47 }
 0x35c   : > { %9656 = vpow2.f32 %v7263_v48 }
 0x35d   : > { %9658 = vpow2.f32 %v7261_v56 }
 0x35e   : > { %9660 = vpow2.f32 %v7265_v18 }
 0x362   : > { %v6153_v11 = vpop.f32.mrf.mxu0  ;;  %v6242_v50 = vpop.f32.mrf.mxu1 }
 0x364   : > { %v6155_v63 = vpop.f32.mrf.mxu0  ;;  %v6244_v62 = vpop.f32.mrf.mxu1 }
 0x368   : > { %v9655_v19 = vpop.eup %9654  ;;  %v6159_v44 = vpop.f32.mrf.mxu0 }
 0x369   : > { %v6248_v20 = vpop.f32.mrf.mxu1  ;;  %v9657_v7 = vpop.eup %9656  ;;  %7335 = vst [vmem:[%s11853_s6 + $0x1a0] sm:$0xff] %v9655_v19 }
 0x36a   : > { %v9659_v35 = vpop.eup %9658  ;;  %7337 = vst [vmem:[%s11853_s6 + $0x1b0] sm:$0xff] %v9657_v7  ;;  %v6161_v9 = vpop.f32.mrf.mxu0  ;;  %v6694_v7 = vrot.slane %v15480_v23, %v10194_v30 }
 0x36b   : > { %v6250_v21 = vpop.f32.mrf.mxu1  ;;  %v9661_v24 = vpop.eup %9660  ;;  %7336 = vst [vmem:[%s11853_s6 + $0x1a8] sm:$0xff] %v9659_v35  ;;  %v6702_v35 = vrot.slane %v15480_v23, %v10197_v31 }
 0x36c   : > { %7338 = vst [vmem:[%s11853_s6 + $0x1b8] sm:$0xff] %v9661_v24  ;;  %v6698_v24 = vrot.slane %v15480_v23, %v10182_v28 }
 0x36e   : > { %v6165_v40 = vpop.f32.mrf.mxu0  ;;  %v6254_v37 = vpop.f32.mrf.mxu1 }
 0x370   : > { %v6167_v22 = vpop.f32.mrf.mxu0  ;;  %v6256_v27 = vpop.f32.mrf.mxu1 }
 0x374   : > { %v6171_v2 = vpop.f32.mrf.mxu0  ;;  %v6260_v13 = vpop.f32.mrf.mxu1 }
 0x375   : > { %v6827_v59 = vmul.f32 %v6678_v51, %v6171_v2  ;;  %v6829_v42 = vmul.f32 %v6686_v25, %v6260_v13 }
 0x376   : > { %v6173_v16 = vpop.f32.mrf.mxu0  ;;  %v6262_v39 = vpop.f32.mrf.mxu1 }
 0x377   : > { %v6891_v43 = vadd.f32 %v6827_v59, %v6165_v40  ;;  %v6893_v14 = vadd.f32 %v6829_v42, %v6254_v37  ;;  %v6828_v54 = vmul.f32 %v6682_v38, %v6173_v16  ;;  %v6830_v10 = vmul.f32 %v6690_v26, %v6262_v39 }
 0x378   : > { %v6706_v40 = vrot.slane %v15480_v23, %v10185_v29 }
 0x379   : > { %v6955_v5 = vmul.f32 %v6891_v43, %v6678_v51  ;;  %v6957_v49 = vmul.f32 %v6893_v14, %v6686_v25  ;;  %v6892_v33 = vadd.f32 %v6828_v54, %v6167_v22  ;;  %v6894_v6 = vadd.f32 %v6830_v10, %v6256_v27 }
 0x37b   : > { %v7019_v45 = vadd.f32 %v6955_v5, %v6159_v44  ;;  %v7021_v32 = vadd.f32 %v6957_v49, %v6248_v20  ;;  %v6956_v3 = vmul.f32 %v6892_v33, %v6682_v38  ;;  %v6958_v55 = vmul.f32 %v6894_v6, %v6690_v26 }
 0x37d   : > { %v7083_v36 = vmul.f32 %v7019_v45, %v6678_v51  ;;  %v7085_v4 = vmul.f32 %v7021_v32, %v6686_v25  ;;  %v7020_v15 = vadd.f32 %v6956_v3, %v6161_v9  ;;  %v7022_v60 = vadd.f32 %v6958_v55, %v6250_v21 }
 0x37f   : > { %v7147_v8 = vadd.f32 %v7083_v36, %v6153_v11  ;;  %v7149_v58 = vadd.f32 %v7085_v4, %v6242_v50  ;;  %v7084_v41 = vmul.f32 %v7020_v15, %v6682_v38  ;;  %v7086_v1 = vmul.f32 %v7022_v60, %v6690_v26 }
 0x381   : > { %v7267_v61 = vmul.f32 1.442695, %v7147_v8  ;;  %v7271_v0 = vmul.f32 1.442695, %v7149_v58  ;;  %v7148_v12 = vadd.f32 %v7084_v41, %v6155_v63  ;;  %v7150_v17 = vadd.f32 %v7086_v1, %v6244_v62 }
 0x383   : > { %9662 = vpow2.f32 %v7267_v61  ;;  %v7269_v46 = vmul.f32 1.442695, %v7148_v12  ;;  %v7273_v34 = vmul.f32 1.442695, %v7150_v17 }
 0x384   : > { %9664 = vpow2.f32 %v7271_v0 }
 0x385   : > { %9666 = vpow2.f32 %v7269_v46 }
 0x386   : > { %9668 = vpow2.f32 %v7273_v34 }
 0x38a   : > { %v6331_v53 = vpop.f32.mrf.mxu0  ;;  %v6420_v52 = vpop.f32.mrf.mxu1 }
 0x38c   : > { %v6333_v48 = vpop.f32.mrf.mxu0  ;;  %v6422_v57 = vpop.f32.mrf.mxu1 }
 0x38e   : > { %v6337_v47 = vpop.f32.mrf.mxu0  ;;  %v6426_v56 = vpop.f32.mrf.mxu1 }
 0x390   : > { %v9663_v18 = vpop.eup %9662  ;;  %v6339_v11 = vpop.f32.mrf.mxu0 }
 0x391   : > { %v6428_v50 = vpop.f32.mrf.mxu1  ;;  %v9665_v63 = vpop.eup %9664  ;;  %7339 = vst [vmem:[%s11853_s6 + $0x1c0] sm:$0xff] %v9663_v18 }
 0x392   : > { %v9667_v62 = vpop.eup %9666  ;;  %7341 = vst [vmem:[%s11853_s6 + $0x1d0] sm:$0xff] %v9665_v63  ;;  %v6343_v19 = vpop.f32.mrf.mxu0 }
 0x393   : > { %v6432_v44 = vpop.f32.mrf.mxu1  ;;  %v9669_v20 = vpop.eup %9668  ;;  %7340 = vst [vmem:[%s11853_s6 + $0x1c8] sm:$0xff] %v9667_v62 }
 0x394   : > { %7342 = vst [vmem:[%s11853_s6 + $0x1d8] sm:$0xff] %v9669_v20  ;;  %v6345_v9 = vpop.f32.mrf.mxu0 }
 0x395   : > { %v6434_v21 = vpop.f32.mrf.mxu1 }
 0x396   : > { %v6349_v37 = vpop.f32.mrf.mxu0 }
 0x397   : > { %v6438_v22 = vpop.f32.mrf.mxu1  ;;  %v6831_v27 = vmul.f32 %v6694_v7, %v6349_v37 }
 0x398   : > { %v6833_v51 = vmul.f32 %v6702_v35, %v6438_v22  ;;  %v6351_v25 = vpop.f32.mrf.mxu0 }
 0x399   : > { %v6440_v38 = vpop.f32.mrf.mxu1  ;;  %v6895_v26 = vadd.f32 %v6831_v27, %v6343_v19  ;;  %v6832_v2 = vmul.f32 %v6698_v24, %v6351_v25 }
 0x39a   : > { %v6897_v30 = vadd.f32 %v6833_v51, %v6432_v44  ;;  %v6834_v13 = vmul.f32 %v6706_v40, %v6440_v38 }
 0x39b   : > { %v6959_v31 = vmul.f32 %v6895_v26, %v6694_v7  ;;  %v6896_v42 = vadd.f32 %v6832_v2, %v6345_v9 }
 0x39c   : > { %v6961_v59 = vmul.f32 %v6897_v30, %v6702_v35  ;;  %v6898_v16 = vadd.f32 %v6834_v13, %v6434_v21 }
 0x39d   : > { %v7023_v39 = vadd.f32 %v6959_v31, %v6337_v47  ;;  %v6960_v28 = vmul.f32 %v6896_v42, %v6698_v24 }
 0x39e   : > { %v7025_v43 = vadd.f32 %v6961_v59, %v6426_v56  ;;  %v6962_v14 = vmul.f32 %v6898_v16, %v6706_v40 }
 0x39f   : > { %v7087_v54 = vmul.f32 %v7023_v39, %v6694_v7  ;;  %v7024_v23 = vadd.f32 %v6960_v28, %v6339_v11 }
 0x3a0   : > { %v7089_v29 = vmul.f32 %v7025_v43, %v6702_v35  ;;  %v7026_v10 = vadd.f32 %v6962_v14, %v6428_v50 }
 0x3a1   : > { %v7151_v5 = vadd.f32 %v7087_v54, %v6331_v53  ;;  %v7088_v33 = vmul.f32 %v7024_v23, %v6698_v24 }
 0x3a2   : > { %v7153_v49 = vadd.f32 %v7089_v29, %v6420_v52  ;;  %v7090_v6 = vmul.f32 %v7026_v10, %v6706_v40 }
 0x3a3   : > { %v7275_v45 = vmul.f32 1.442695, %v7151_v5  ;;  %v7152_v3 = vadd.f32 %v7088_v33, %v6333_v48 }
 0x3a4   : > { %v7279_v32 = vmul.f32 1.442695, %v7153_v49  ;;  %v7154_v55 = vadd.f32 %v7090_v6, %v6422_v57 }
 0x3a5   : > { %9670 = vpow2.f32 %v7275_v45  ;;  %v7277_v36 = vmul.f32 1.442695, %v7152_v3 }
 0x3a6   : > { %v7281_v4 = vmul.f32 1.442695, %v7154_v55  ;;  %9672 = vpow2.f32 %v7279_v32 }
 0x3a7   : > { %9674 = vpow2.f32 %v7277_v36 }
 0x3a8   : > { %9676 = vpow2.f32 %v7281_v4 }
 0x3b2   : > { %v9671_v15 = vpop.eup %9670 }
 0x3b3   : > { %v9673_v60 = vpop.eup %9672  ;;  %7343 = vst [vmem:[%s11853_s6 + $0x1e0] sm:$0xff] %v9671_v15 }
 0x3b4   : > { %v9675_v8 = vpop.eup %9674  ;;  %7345 = vst [vmem:[%s11853_s6 + $0x1f0] sm:$0xff] %v9673_v60 }
 0x3b5   : > { %v9677_v58 = vpop.eup %9676  ;;  %7344 = vst [vmem:[%s11853_s6 + $0x1e8] sm:$0xff] %v9675_v8 }
 0x3b6   : > { %7346 = vst [vmem:[%s11853_s6 + $0x1f8] sm:$0xff] %v9677_v58 }
 0x3b7 PF: > { %p16_p8 = scmp.ge.s32.totalorder %s9834_s17, 10   ;;  %s15531_s12 = smov %s9780_s13 }
 0x3b8   : > { %s15532_s13 = smov %s9784_s14  ;;  %s15533_s14 = smov %s9844_s20 }
 0x3b9   : > { %s15534_s15 = smov %s9834_s17  ;;  %18 = sbr.rel (!%p16_p8) target bundleno = 5 (0x5), region = 85 }
 0x3be   :  { %7369 = vsyncpa [#allocation3], 1 }
 0x3bf   :  { %7371 = vsyncpa [#allocation3 + $0x1], 1 }
 0x3c0   :  { %7372 = vsyncpa [#allocation5], 1 }
 0x3c1   :  { %7374 = vsyncpa [#allocation5 + $0x1], 1 }

</bundles_post_ra>
